<compile_context>
chip_gen: v6e
topology: v6e:2x2x1
jax: 0.10.0
libtpu: 0.0.40
codegen_flags: <defaults>
</compile_context>

<pallas_src>
import math

import numpy as np

import jax
import jax.numpy as jnp
from jax import lax
from jax.experimental import pallas as pl
from jax.experimental.pallas import tpu as pltpu


CONV_CFG = [  # (cin, cout, kernel, stride)
    (1, 2, 3, 2), (2, 4, 3, 2), (4, 8, 3, 2),
    (8, 8, 3, 2), (8, 8, 3, 2), (8, 8, 2, 2),
]
FC_CFG = [(32, 8), (8, 8), (8, 2)]
BN_EPS = 1e-5
IMG = 160       # smallest square input that flattens to 8*2*2 = 32 features
BATCH = 2


def _round_up(x, m):
    return (x + m - 1) // m * m


def _spatial_sizes(h0):
    hs = [h0]
    for (_ci, _co, k, s) in CONV_CFG:
        hs.append((hs[-1] - k) // s + 1)
    return hs      # [160, 79, 39, 19, 9, 4, 2]


# ----------------------------------------------------------------------------
# Parameters (mirrors nn.Module.__init__) and one-time packing for the kernel
# ----------------------------------------------------------------------------
def init_params(key):
    params = {"conv": [], "fc": []}
    for (cin, cout, k, _s) in CONV_CFG:
        key, sub = jax.random.split(key)
        fan_in = cin * k * k
        bound = math.sqrt(6.0 / fan_in)              # kaiming_uniform_ (a=0)
        w = jax.random.uniform(sub, (cout, cin, k, k), jnp.float32,
                               -bound, bound)
        gamma = jnp.ones((cout,), jnp.float32)       # BatchNorm2d defaults
        beta = jnp.zeros((cout,), jnp.float32)
        rmean = jnp.zeros((cout,), jnp.float32)
        rvar = jnp.ones((cout,), jnp.float32)
        scale = gamma / jnp.sqrt(rvar + BN_EPS)      # eval-mode folded affine
        bias = beta - rmean * scale
        params["conv"].append((w, scale, bias))
    for (fin, fout) in FC_CFG:
        key, sub = jax.random.split(key)
        std = math.sqrt(2.0 / (fin + fout))          # xavier_normal_
        w = jax.random.normal(sub, (fout, fin), jnp.float32) * std
        b = jnp.zeros((fout,), jnp.float32)
        params["fc"].append((w, b))
    return params


def pack_params(params, img=IMG, bt=BATCH):
    """One-time prep: rewrite every conv layer as constant matrices so the whole
    forward runs as a chain of 2-D MXU matmuls with the batch tile in the lane
    dimension.  BatchNorm (eval mode) is folded into U_all / bias."""
    hs = _spatial_sizes(img)
    # flatten(c, h, w) handling below hard-requires the final 2x2 feature map.
    assert hs[-1] == 2 and CONV_CFG[-1][1] * hs[-1] * hs[-1] == FC_CFG[0][0], hs

    packed = {"conv": [], "meta": [], "bt": bt, "img": img}
    for li, ((w, scale, bias), (ci, co, k, s)) in enumerate(
            zip(params["conv"], CONV_CFG)):
        H, Ho = hs[li], hs[li + 1]                   # square maps: W=H, Wo=Ho
        w_np = np.asarray(w, np.float32)
        sc_np = np.asarray(scale, np.float32)
        bi_np = np.asarray(bias, np.float32)
        rpad = _round_up(ci * H, 16)                 # 16-row (packed bf16) tap blocks

        # Block-diagonal column tap-selection + stride matrices, one per kw:
        #   B[kw][n*W + w', n*Wo + j] = 1  iff  w' == s*j + kw
        B = np.zeros((k, bt * H, bt * Ho), np.float32)
        j = np.arange(Ho)
        for kw in range(k):
            for n in range(bt):
                B[kw, n * H + s * j + kw, n * Ho + j] = 1.0

        # U_all[co*Ho+i, kw*rpad + ci*H + h'] = bn_scale[co] * w[co, ci, h'-s*i, kw]
        U5 = np.zeros((k, co, Ho, ci, H), np.float32)
        for kw in range(k):
            for i in range(Ho):
                for kh in range(k):
                    U5[kw, :, i, :, s * i + kh] = w_np[:, :, kh, kw] * sc_np[:, None]
        Upad = np.zeros((k, co, Ho, rpad), np.float32)
        Upad[..., :ci * H] = U5.reshape(k, co, Ho, ci * H)
        U_all = Upad.transpose(1, 2, 0, 3).reshape(co * Ho, k * rpad)

        bias_vec = np.repeat(bi_np, Ho).reshape(co * Ho, 1).astype(np.float32)

        packed["conv"].append((jnp.asarray(B, jnp.bfloat16),      # exact 0/1
                               jnp.asarray(U_all, jnp.bfloat16),
                               jnp.asarray(bias_vec)))            # f32 epilogue
        packed["meta"].append((ci, co, k, H, Ho, rpad))

    # MLP head: torch.flatten on (N, 8, 2, 2) orders features (c, h, w); the
    # last activation slab has rows (c*2 + h) and columns (n*2 + w), so W1 is
    # split by w parity at pack time and two 0/1 matrices gather each sample's
    # w-columns -> the whole head runs batched over (*, bt) tiles in f32.
    (w1, b1), (w2, b2), (w3, b3) = params["fc"]
    w1 = np.asarray(w1, np.float32)
    sel0 = np.zeros((bt * 2, bt), np.float32)
    sel1 = np.zeros((bt * 2, bt), np.float32)
    for n in range(bt):
        sel0[2 * n + 0, n] = 1.0
        sel1[2 * n + 1, n] = 1.0
    packed["head"] = tuple(jnp.asarray(a, jnp.float32) for a in (
        sel0, sel1, w1[:, 0::2], w1[:, 1::2],
        np.asarray(b1).reshape(-1, 1),
        np.asarray(w2), np.asarray(b2).reshape(-1, 1),
        np.asarray(w3), np.asarray(b3).reshape(-1, 1)))
    return packed


# ----------------------------------------------------------------------------
# Fused Pallas kernel: 6x (conv+BN+ReLU) + MLP head, all activations in VMEM.
# ----------------------------------------------------------------------------
def _make_kernel(metas, bt):
    n_layers = len(metas)

    def kernel(*refs):
        idx = 0
        x_ref = refs[idx]; idx += 1
        conv_refs = [refs[idx + 3 * i: idx + 3 * i + 3] for i in range(n_layers)]
        idx += 3 * n_layers
        sel0, sel1, w1a, w1b, b1, w2, b2, w3, b3 = refs[idx:idx + 9]; idx += 9
        out_ref = refs[idx]; idx += 1
        t_ref = refs[idx]; idx += 1
        act = refs[idx:idx + n_layers]

        # Zero-padded rows of each tap block meet all-zero U_all columns, but
        # they must be finite; one cheap memset covers step-0 garbage VMEM.
        t_ref[...] = jnp.zeros_like(t_ref)

        src = x_ref                                   # (Ci*H, bt*W) bf16 slab
        o = None
        for li in range(n_layers):
            b_ref, u_ref, bias_ref = conv_refs[li]
            ci, co, k, H, Ho, rpad = metas[li]
            cols = bt * Ho
            x_val = src[...]                          # bf16
            # k column-tap selections -> row blocks of the shared T scratch.
            for kw in range(k):
                tap = jnp.dot(x_val, b_ref[kw],
                              preferred_element_type=jnp.float32)  # (Ci*H, cols)
                t_ref[pl.ds(kw * rpad, ci * H), pl.ds(0, cols)] = (
                    tap.astype(jnp.bfloat16))
            # One merged large-K contraction: taps + row taps + channels + BN.
            t_val = t_ref[pl.ds(0, k * rpad), pl.ds(0, cols)]       # bf16
            o = jnp.dot(u_ref[...], t_val,
                        preferred_element_type=jnp.float32)         # (Co*Ho, cols)
            o = jnp.maximum(o + bias_ref[...], 0.0)                  # f32 epilogue
            act[li][...] = o.astype(jnp.bfloat16)                    # bf16 store
            src = act[li]

        # Batched MLP head (32 -> 8 -> 8 -> 2), all samples at once, in f32.
        a5 = o                                                       # (16, bt*2) f32
        e0 = jnp.dot(a5, sel0[...], preferred_element_type=jnp.float32)  # (16, bt)
        e1 = jnp.dot(a5, sel1[...], preferred_element_type=jnp.float32)
        h = (jnp.dot(w1a[...], e0, preferred_element_type=jnp.float32)
             + jnp.dot(w1b[...], e1, preferred_element_type=jnp.float32)
             + b1[...])
        h = jnp.maximum(h, 0.0)                                      # (8, bt)
        h = jnp.maximum(jnp.dot(w2[...], h,
                                preferred_element_type=jnp.float32) + b2[...], 0.0)
        out_ref[...] = (jnp.dot(w3[...], h,
                                preferred_element_type=jnp.float32) + b3[...])

    return kernel


def _const_spec(shape):
    nd = len(shape)
    return pl.BlockSpec(shape, lambda t, _nd=nd: (0,) * _nd)


def forward_pallas(x_nchw, packed):
    n, c, h, w = x_nchw.shape
    bt, img = packed["bt"], packed["img"]
    metas = packed["meta"]
    assert c == 1 and h == img and w == img, (c, h, w)

    num_tiles = (n + bt - 1) // bt
    n_pad = num_tiles * bt
    if n_pad != n:
        x_nchw = jnp.pad(x_nchw, ((0, n_pad - n), (0, 0), (0, 0), (0, 0)))

    # (N,C,H,W) -> (tiles, C*H, bt*W): each batch tile's samples in the lanes.
    x_lanes = (x_nchw.reshape(num_tiles, bt, c * h, w)
                     .transpose(0, 2, 1, 3)
                     .reshape(num_tiles, c * h, bt * w)
                     .astype(jnp.bfloat16))

    consts = []
    for (B, U_all, bias_vec) in packed["conv"]:
        consts += [B, U_all, bias_vec]
    consts += list(packed["head"])

    in_specs = [pl.BlockSpec((None, c * h, bt * w), lambda t: (t, 0, 0))]
    in_specs += [_const_spec(a.shape) for a in consts]   # block 0 every step
    out_spec = pl.BlockSpec((None, 2, bt), lambda t: (t, 0, 0))

    t_rows = max(k * rpad for (_ci, _co, k, _H, _Ho, rpad) in metas)
    t_cols = max(bt * Ho for (_ci, _co, _k, _H, Ho, _r) in metas)
    scratch = [pltpu.VMEM((t_rows, t_cols), jnp.bfloat16)]
    scratch += [pltpu.VMEM((co * Ho, bt * Ho), jnp.bfloat16)
                for (_ci, co, _k, _H, Ho, _r) in metas]

    out = pl.pallas_call(
        _make_kernel(metas, bt),
        out_shape=jax.ShapeDtypeStruct((num_tiles, 2, bt), jnp.float32),
        grid_spec=pltpu.PrefetchScalarGridSpec(
            num_scalar_prefetch=0,
            grid=(num_tiles,),
            in_specs=in_specs,
            out_specs=out_spec,
            scratch_shapes=scratch),
        compiler_params=pltpu.CompilerParams(
            dimension_semantics=(("parallel",) if num_tiles > 1
                                 else ("arbitrary",))),
    )(x_lanes, *consts)

    # (tiles, 2, bt) -> (n, 2), matching the torch module's output layout.
    return out.transpose(0, 2, 1).reshape(n_pad, 2)[:n]


# ----------------------------------------------------------------------------
# Plain-JAX reference (eval-mode BN), for verification
# ----------------------------------------------------------------------------
def forward_reference(x_nchw, params):
    h = x_nchw
    for (w, scale, bias), (_cin, _cout, _k, s) in zip(params["conv"], CONV_CFG):
        h = lax.conv_general_dilated(
            h, w, window_strides=(s, s), padding="VALID",
            dimension_numbers=("NCHW", "OIHW", "NCHW"))
        h = h * scale.reshape(1, -1, 1, 1) + bias.reshape(1, -1, 1, 1)
        h = jnp.maximum(h, 0.0)
    flat = h.reshape(h.shape[0], -1)
    (w1, b1), (w2, b2), (w3, b3) = params["fc"]
    h = jnp.maximum(flat @ w1.T + b1, 0.0)
    h = jnp.maximum(h @ w2.T + b2, 0.0)
    return h @ w3.T + b3


# ----------------------------------------------------------------------------
if __name__ == "__main__":
    key = jax.random.PRNGKey(0)
    key, pkey, xkey = jax.random.split(key, 3)
    params = init_params(pkey)
    packed = pack_params(params, img=IMG, bt=BATCH)

    # Smallest square input that yields 8*2*2 = 32 flattened features.
    x = jax.random.normal(xkey, (BATCH, 1, IMG, IMG), jnp.float32)  # NCHW

    out = jax.block_until_ready(forward_pallas(x, packed))
    assert out.shape == (BATCH, 2), out.shape

    ref = jax.block_until_ready(forward_reference(x, params))
    # bf16 matmul operands (f32 accumulation) across 6 conv + 3 fc layers.
    assert jnp.allclose(out, ref, rtol=5e-2, atol=2e-2), (out, ref)

    print("KERNEL_OK")
</pallas_src>

<mosaic_0001>
module attributes {stable_mosaic.version = 11 : i64} {
  func.func @kernel(%arg0: i32, %arg1: memref<1x160x320xbf16, #tpu.memory_space<vmem>>, %arg2: memref<3x320x158xbf16, #tpu.memory_space<vmem>>, %arg3: memref<158x480xbf16, #tpu.memory_space<vmem>>, %arg4: memref<158x1xf32, #tpu.memory_space<vmem>>, %arg5: memref<3x158x78xbf16, #tpu.memory_space<vmem>>, %arg6: memref<156x480xbf16, #tpu.memory_space<vmem>>, %arg7: memref<156x1xf32, #tpu.memory_space<vmem>>, %arg8: memref<3x78x38xbf16, #tpu.memory_space<vmem>>, %arg9: memref<152x480xbf16, #tpu.memory_space<vmem>>, %arg10: memref<152x1xf32, #tpu.memory_space<vmem>>, %arg11: memref<3x38x18xbf16, #tpu.memory_space<vmem>>, %arg12: memref<72x480xbf16, #tpu.memory_space<vmem>>, %arg13: memref<72x1xf32, #tpu.memory_space<vmem>>, %arg14: memref<3x18x8xbf16, #tpu.memory_space<vmem>>, %arg15: memref<32x240xbf16, #tpu.memory_space<vmem>>, %arg16: memref<32x1xf32, #tpu.memory_space<vmem>>, %arg17: memref<2x8x4xbf16, #tpu.memory_space<vmem>>, %arg18: memref<16x64xbf16, #tpu.memory_space<vmem>>, %arg19: memref<16x1xf32, #tpu.memory_space<vmem>>, %arg20: memref<4x2xf32, #tpu.memory_space<vmem>>, %arg21: memref<4x2xf32, #tpu.memory_space<vmem>>, %arg22: memref<8x16xf32, #tpu.memory_space<vmem>>, %arg23: memref<8x16xf32, #tpu.memory_space<vmem>>, %arg24: memref<8x1xf32, #tpu.memory_space<vmem>>, %arg25: memref<8x8xf32, #tpu.memory_space<vmem>>, %arg26: memref<8x1xf32, #tpu.memory_space<vmem>>, %arg27: memref<2x8xf32, #tpu.memory_space<vmem>>, %arg28: memref<2x1xf32, #tpu.memory_space<vmem>>, %arg29: memref<1x2x2xf32, #tpu.memory_space<vmem>>, %arg30: memref<480x158xbf16, #tpu.memory_space<vmem>>, %arg31: memref<158x158xbf16, #tpu.memory_space<vmem>>, %arg32: memref<156x78xbf16, #tpu.memory_space<vmem>>, %arg33: memref<152x38xbf16, #tpu.memory_space<vmem>>, %arg34: memref<72x18xbf16, #tpu.memory_space<vmem>>, %arg35: memref<32x8xbf16, #tpu.memory_space<vmem>>, %arg36: memref<16x4xbf16, #tpu.memory_space<vmem>>) attributes {dimension_semantics = [#tpu.dimension_semantics<arbitrary>], iteration_bounds = array<i64: 1>, scalar_prefetch = 0 : i64, scratch_operands = 7 : i64, tpu.core_type = #tpu.core_type<tc>, window_params = [{transform_indices = @transform_0, window_bounds = array<i64: 1, 160, 320>}, {pipeline_mode = #tpu.pipeline_mode<synchronous>, transform_indices = @transform_1, window_bounds = array<i64: 3, 320, 158>}, {pipeline_mode = #tpu.pipeline_mode<synchronous>, transform_indices = @transform_2, window_bounds = array<i64: 158, 480>}, {pipeline_mode = #tpu.pipeline_mode<synchronous>, transform_indices = @transform_3, window_bounds = array<i64: 158, 1>}, {pipeline_mode = #tpu.pipeline_mode<synchronous>, transform_indices = @transform_4, window_bounds = array<i64: 3, 158, 78>}, {pipeline_mode = #tpu.pipeline_mode<synchronous>, transform_indices = @transform_5, window_bounds = array<i64: 156, 480>}, {pipeline_mode = #tpu.pipeline_mode<synchronous>, transform_indices = @transform_6, window_bounds = array<i64: 156, 1>}, {pipeline_mode = #tpu.pipeline_mode<synchronous>, transform_indices = @transform_7, window_bounds = array<i64: 3, 78, 38>}, {pipeline_mode = #tpu.pipeline_mode<synchronous>, transform_indices = @transform_8, window_bounds = array<i64: 152, 480>}, {pipeline_mode = #tpu.pipeline_mode<synchronous>, transform_indices = @transform_9, window_bounds = array<i64: 152, 1>}, {pipeline_mode = #tpu.pipeline_mode<synchronous>, transform_indices = @transform_10, window_bounds = array<i64: 3, 38, 18>}, {pipeline_mode = #tpu.pipeline_mode<synchronous>, transform_indices = @transform_11, window_bounds = array<i64: 72, 480>}, {pipeline_mode = #tpu.pipeline_mode<synchronous>, transform_indices = @transform_12, window_bounds = array<i64: 72, 1>}, {pipeline_mode = #tpu.pipeline_mode<synchronous>, transform_indices = @transform_13, window_bounds = array<i64: 3, 18, 8>}, {pipeline_mode = #tpu.pipeline_mode<synchronous>, transform_indices = @transform_14, window_bounds = array<i64: 32, 240>}, {pipeline_mode = #tpu.pipeline_mode<synchronous>, transform_indices = @transform_15, window_bounds = array<i64: 32, 1>}, {pipeline_mode = #tpu.pipeline_mode<synchronous>, transform_indices = @transform_16, window_bounds = array<i64: 2, 8, 4>}, {pipeline_mode = #tpu.pipeline_mode<synchronous>, transform_indices = @transform_17, window_bounds = array<i64: 16, 64>}, {pipeline_mode = #tpu.pipeline_mode<synchronous>, transform_indices = @transform_18, window_bounds = array<i64: 16, 1>}, {pipeline_mode = #tpu.pipeline_mode<synchronous>, transform_indices = @transform_19, window_bounds = array<i64: 4, 2>}, {pipeline_mode = #tpu.pipeline_mode<synchronous>, transform_indices = @transform_20, window_bounds = array<i64: 4, 2>}, {pipeline_mode = #tpu.pipeline_mode<synchronous>, transform_indices = @transform_21, window_bounds = array<i64: 8, 16>}, {pipeline_mode = #tpu.pipeline_mode<synchronous>, transform_indices = @transform_22, window_bounds = array<i64: 8, 16>}, {pipeline_mode = #tpu.pipeline_mode<synchronous>, transform_indices = @transform_23, window_bounds = array<i64: 8, 1>}, {pipeline_mode = #tpu.pipeline_mode<synchronous>, transform_indices = @transform_24, window_bounds = array<i64: 8, 8>}, {pipeline_mode = #tpu.pipeline_mode<synchronous>, transform_indices = @transform_25, window_bounds = array<i64: 8, 1>}, {pipeline_mode = #tpu.pipeline_mode<synchronous>, transform_indices = @transform_26, window_bounds = array<i64: 2, 8>}, {pipeline_mode = #tpu.pipeline_mode<synchronous>, transform_indices = @transform_27, window_bounds = array<i64: 2, 1>}, {transform_indices = @transform_28, window_bounds = array<i64: 1, 2, 2>}]} {
    %cst = arith.constant 0.000000e+00 : bf16
    %0 = vector.broadcast %cst : bf16 to vector<480x158xbf16>
    %c0 = arith.constant 0 : index
    %c0_0 = arith.constant 0 : index
    %1 = vector.load %arg30[%c0, %c0_0] : memref<480x158xbf16, #tpu.memory_space<vmem>>, vector<480x158xbf16>
    tpu.vector_store %arg30[%c0, %c0_0], %0 {strides = array<i32>} : memref<480x158xbf16, #tpu.memory_space<vmem>>, vector<480x158xbf16>,
    %c0_1 = arith.constant 0 : index
    %c0_2 = arith.constant 0 : index
    %c0_3 = arith.constant 0 : index
    %2 = vector.load %arg1[%c0_1, %c0_2, %c0_3] : memref<1x160x320xbf16, #tpu.memory_space<vmem>>, vector<1x160x320xbf16>
    %3 = vector.shape_cast %2 : vector<1x160x320xbf16> to vector<160x320xbf16>
    %c0_4 = arith.constant 0 : index
    %c0_5 = arith.constant 0 : index
    %c0_6 = arith.constant 0 : index
    %4 = vector.load %arg2[%c0_4, %c0_5, %c0_6] : memref<3x320x158xbf16, #tpu.memory_space<vmem>>, vector<1x320x158xbf16>
    %5 = vector.shape_cast %4 : vector<1x320x158xbf16> to vector<320x158xbf16>
    %cst_7 = arith.constant dense<0.000000e+00> : vector<160x158xf32>
    %6 = tpu.matmul %3, %5, %cst_7 {dimension_numbers = #tpu.dot_dimension_numbers<[1], [0], [0], [1], [0, 0, 1, 1], [], []>} : vector<160x320xbf16>, vector<320x158xbf16>, vector<160x158xf32> -> vector<160x158xf32>
    %7 = arith.truncf %6 : vector<160x158xf32> to vector<160x158xbf16>
    %c0_8 = arith.constant 0 : index
    %c0_9 = arith.constant 0 : index
    %8 = vector.load %arg30[%c0_8, %c0_9] : memref<480x158xbf16, #tpu.memory_space<vmem>>, vector<160x158xbf16>
    tpu.vector_store %arg30[%c0_8, %c0_9], %7 {strides = array<i32>} : memref<480x158xbf16, #tpu.memory_space<vmem>>, vector<160x158xbf16>,
    %c1 = arith.constant 1 : index
    %c0_10 = arith.constant 0 : index
    %c0_11 = arith.constant 0 : index
    %9 = vector.load %arg2[%c1, %c0_10, %c0_11] : memref<3x320x158xbf16, #tpu.memory_space<vmem>>, vector<1x320x158xbf16>
    %10 = vector.shape_cast %9 : vector<1x320x158xbf16> to vector<320x158xbf16>
    %cst_12 = arith.constant dense<0.000000e+00> : vector<160x158xf32>
    %11 = tpu.matmul %3, %10, %cst_12 {dimension_numbers = #tpu.dot_dimension_numbers<[1], [0], [0], [1], [0, 0, 1, 1], [], []>} : vector<160x320xbf16>, vector<320x158xbf16>, vector<160x158xf32> -> vector<160x158xf32>
    %12 = arith.truncf %11 : vector<160x158xf32> to vector<160x158xbf16>
    %c160 = arith.constant 160 : index
    %c0_13 = arith.constant 0 : index
    %13 = vector.load %arg30[%c160, %c0_13] : memref<480x158xbf16, #tpu.memory_space<vmem>>, vector<160x158xbf16>
    tpu.vector_store %arg30[%c160, %c0_13], %12 {strides = array<i32>} : memref<480x158xbf16, #tpu.memory_space<vmem>>, vector<160x158xbf16>,
    %c2 = arith.constant 2 : index
    %c0_14 = arith.constant 0 : index
    %c0_15 = arith.constant 0 : index
    %14 = vector.load %arg2[%c2, %c0_14, %c0_15] : memref<3x320x158xbf16, #tpu.memory_space<vmem>>, vector<1x320x158xbf16>
    %15 = vector.shape_cast %14 : vector<1x320x158xbf16> to vector<320x158xbf16>
    %cst_16 = arith.constant dense<0.000000e+00> : vector<160x158xf32>
    %16 = tpu.matmul %3, %15, %cst_16 {dimension_numbers = #tpu.dot_dimension_numbers<[1], [0], [0], [1], [0, 0, 1, 1], [], []>} : vector<160x320xbf16>, vector<320x158xbf16>, vector<160x158xf32> -> vector<160x158xf32>
    %17 = arith.truncf %16 : vector<160x158xf32> to vector<160x158xbf16>
    %c320 = arith.constant 320 : index
    %c0_17 = arith.constant 0 : index
    %18 = vector.load %arg30[%c320, %c0_17] : memref<480x158xbf16, #tpu.memory_space<vmem>>, vector<160x158xbf16>
    tpu.vector_store %arg30[%c320, %c0_17], %17 {strides = array<i32>} : memref<480x158xbf16, #tpu.memory_space<vmem>>, vector<160x158xbf16>,
    %c0_18 = arith.constant 0 : index
    %c0_19 = arith.constant 0 : index
    %19 = vector.load %arg30[%c0_18, %c0_19] : memref<480x158xbf16, #tpu.memory_space<vmem>>, vector<480x158xbf16>
    %c0_20 = arith.constant 0 : index
    %c0_21 = arith.constant 0 : index
    %20 = vector.load %arg3[%c0_20, %c0_21] : memref<158x480xbf16, #tpu.memory_space<vmem>>, vector<158x480xbf16>
    %cst_22 = arith.constant dense<0.000000e+00> : vector<158x158xf32>
    %21 = tpu.matmul %20, %19, %cst_22 {dimension_numbers = #tpu.dot_dimension_numbers<[1], [0], [0], [1], [0, 0, 1, 1], [], []>} : vector<158x480xbf16>, vector<480x158xbf16>, vector<158x158xf32> -> vector<158x158xf32>
    %c0_23 = arith.constant 0 : index
    %c0_24 = arith.constant 0 : index
    %22 = vector.load %arg4[%c0_23, %c0_24] : memref<158x1xf32, #tpu.memory_space<vmem>>, vector<158x1xf32>
    %23 = vector.broadcast %22 : vector<158x1xf32> to vector<158x158xf32>
    %24 = arith.addf %21, %23 : vector<158x158xf32>
    %cst_25 = arith.constant 0.000000e+00 : f32
    %25 = vector.broadcast %cst_25 : f32 to vector<158x158xf32>
    %26 = arith.maximumf %24, %25 : vector<158x158xf32>
    %27 = arith.truncf %26 : vector<158x158xf32> to vector<158x158xbf16>
    %c0_26 = arith.constant 0 : index
    %c0_27 = arith.constant 0 : index
    %28 = vector.load %arg31[%c0_26, %c0_27] : memref<158x158xbf16, #tpu.memory_space<vmem>>, vector<158x158xbf16>
    tpu.vector_store %arg31[%c0_26, %c0_27], %27 {strides = array<i32>} : memref<158x158xbf16, #tpu.memory_space<vmem>>, vector<158x158xbf16>,
    %c0_28 = arith.constant 0 : index
    %c0_29 = arith.constant 0 : index
    %29 = vector.load %arg31[%c0_28, %c0_29] : memref<158x158xbf16, #tpu.memory_space<vmem>>, vector<158x158xbf16>
    %c0_30 = arith.constant 0 : index
    %c0_31 = arith.constant 0 : index
    %c0_32 = arith.constant 0 : index
    %30 = vector.load %arg5[%c0_30, %c0_31, %c0_32] : memref<3x158x78xbf16, #tpu.memory_space<vmem>>, vector<1x158x78xbf16>
    %31 = vector.shape_cast %30 : vector<1x158x78xbf16> to vector<158x78xbf16>
    %cst_33 = arith.constant dense<0.000000e+00> : vector<158x78xf32>
    %32 = tpu.matmul %29, %31, %cst_33 {dimension_numbers = #tpu.dot_dimension_numbers<[1], [0], [0], [1], [0, 0, 1, 1], [], []>} : vector<158x158xbf16>, vector<158x78xbf16>, vector<158x78xf32> -> vector<158x78xf32>
    %33 = arith.truncf %32 : vector<158x78xf32> to vector<158x78xbf16>
    %c0_34 = arith.constant 0 : index
    %c0_35 = arith.constant 0 : index
    %34 = vector.load %arg30[%c0_34, %c0_35] : memref<480x158xbf16, #tpu.memory_space<vmem>>, vector<158x78xbf16>
    tpu.vector_store %arg30[%c0_34, %c0_35], %33 {strides = array<i32>} : memref<480x158xbf16, #tpu.memory_space<vmem>>, vector<158x78xbf16>,
    %c1_36 = arith.constant 1 : index
    %c0_37 = arith.constant 0 : index
    %c0_38 = arith.constant 0 : index
    %35 = vector.load %arg5[%c1_36, %c0_37, %c0_38] : memref<3x158x78xbf16, #tpu.memory_space<vmem>>, vector<1x158x78xbf16>
    %36 = vector.shape_cast %35 : vector<1x158x78xbf16> to vector<158x78xbf16>
    %cst_39 = arith.constant dense<0.000000e+00> : vector<158x78xf32>
    %37 = tpu.matmul %29, %36, %cst_39 {dimension_numbers = #tpu.dot_dimension_numbers<[1], [0], [0], [1], [0, 0, 1, 1], [], []>} : vector<158x158xbf16>, vector<158x78xbf16>, vector<158x78xf32> -> vector<158x78xf32>
    %38 = arith.truncf %37 : vector<158x78xf32> to vector<158x78xbf16>
    %c160_40 = arith.constant 160 : index
    %c0_41 = arith.constant 0 : index
    %39 = vector.load %arg30[%c160_40, %c0_41] : memref<480x158xbf16, #tpu.memory_space<vmem>>, vector<158x78xbf16>
    tpu.vector_store %arg30[%c160_40, %c0_41], %38 {strides = array<i32>} : memref<480x158xbf16, #tpu.memory_space<vmem>>, vector<158x78xbf16>,
    %c2_42 = arith.constant 2 : index
    %c0_43 = arith.constant 0 : index
    %c0_44 = arith.constant 0 : index
    %40 = vector.load %arg5[%c2_42, %c0_43, %c0_44] : memref<3x158x78xbf16, #tpu.memory_space<vmem>>, vector<1x158x78xbf16>
    %41 = vector.shape_cast %40 : vector<1x158x78xbf16> to vector<158x78xbf16>
    %cst_45 = arith.constant dense<0.000000e+00> : vector<158x78xf32>
    %42 = tpu.matmul %29, %41, %cst_45 {dimension_numbers = #tpu.dot_dimension_numbers<[1], [0], [0], [1], [0, 0, 1, 1], [], []>} : vector<158x158xbf16>, vector<158x78xbf16>, vector<158x78xf32> -> vector<158x78xf32>
    %43 = arith.truncf %42 : vector<158x78xf32> to vector<158x78xbf16>
    %c320_46 = arith.constant 320 : index
    %c0_47 = arith.constant 0 : index
    %44 = vector.load %arg30[%c320_46, %c0_47] : memref<480x158xbf16, #tpu.memory_space<vmem>>, vector<158x78xbf16>
    tpu.vector_store %arg30[%c320_46, %c0_47], %43 {strides = array<i32>} : memref<480x158xbf16, #tpu.memory_space<vmem>>, vector<158x78xbf16>,
    %c0_48 = arith.constant 0 : index
    %c0_49 = arith.constant 0 : index
    %45 = vector.load %arg30[%c0_48, %c0_49] : memref<480x158xbf16, #tpu.memory_space<vmem>>, vector<480x78xbf16>
    %c0_50 = arith.constant 0 : index
    %c0_51 = arith.constant 0 : index
    %46 = vector.load %arg6[%c0_50, %c0_51] : memref<156x480xbf16, #tpu.memory_space<vmem>>, vector<156x480xbf16>
    %cst_52 = arith.constant dense<0.000000e+00> : vector<156x78xf32>
    %47 = tpu.matmul %46, %45, %cst_52 {dimension_numbers = #tpu.dot_dimension_numbers<[1], [0], [0], [1], [0, 0, 1, 1], [], []>} : vector<156x480xbf16>, vector<480x78xbf16>, vector<156x78xf32> -> vector<156x78xf32>
    %c0_53 = arith.constant 0 : index
    %c0_54 = arith.constant 0 : index
    %48 = vector.load %arg7[%c0_53, %c0_54] : memref<156x1xf32, #tpu.memory_space<vmem>>, vector<156x1xf32>
    %49 = vector.broadcast %48 : vector<156x1xf32> to vector<156x78xf32>
    %50 = arith.addf %47, %49 : vector<156x78xf32>
    %cst_55 = arith.constant 0.000000e+00 : f32
    %51 = vector.broadcast %cst_55 : f32 to vector<156x78xf32>
    %52 = arith.maximumf %50, %51 : vector<156x78xf32>
    %53 = arith.truncf %52 : vector<156x78xf32> to vector<156x78xbf16>
    %c0_56 = arith.constant 0 : index
    %c0_57 = arith.constant 0 : index
    %54 = vector.load %arg32[%c0_56, %c0_57] : memref<156x78xbf16, #tpu.memory_space<vmem>>, vector<156x78xbf16>
    tpu.vector_store %arg32[%c0_56, %c0_57], %53 {strides = array<i32>} : memref<156x78xbf16, #tpu.memory_space<vmem>>, vector<156x78xbf16>,
    %c0_58 = arith.constant 0 : index
    %c0_59 = arith.constant 0 : index
    %55 = vector.load %arg32[%c0_58, %c0_59] : memref<156x78xbf16, #tpu.memory_space<vmem>>, vector<156x78xbf16>
    %c0_60 = arith.constant 0 : index
    %c0_61 = arith.constant 0 : index
    %c0_62 = arith.constant 0 : index
    %56 = vector.load %arg8[%c0_60, %c0_61, %c0_62] : memref<3x78x38xbf16, #tpu.memory_space<vmem>>, vector<1x78x38xbf16>
    %57 = vector.shape_cast %56 : vector<1x78x38xbf16> to vector<78x38xbf16>
    %cst_63 = arith.constant dense<0.000000e+00> : vector<156x38xf32>
    %58 = tpu.matmul %55, %57, %cst_63 {dimension_numbers = #tpu.dot_dimension_numbers<[1], [0], [0], [1], [0, 0, 1, 1], [], []>} : vector<156x78xbf16>, vector<78x38xbf16>, vector<156x38xf32> -> vector<156x38xf32>
    %59 = arith.truncf %58 : vector<156x38xf32> to vector<156x38xbf16>
    %c0_64 = arith.constant 0 : index
    %c0_65 = arith.constant 0 : index
    %60 = vector.load %arg30[%c0_64, %c0_65] : memref<480x158xbf16, #tpu.memory_space<vmem>>, vector<156x38xbf16>
    tpu.vector_store %arg30[%c0_64, %c0_65], %59 {strides = array<i32>} : memref<480x158xbf16, #tpu.memory_space<vmem>>, vector<156x38xbf16>,
    %c1_66 = arith.constant 1 : index
    %c0_67 = arith.constant 0 : index
    %c0_68 = arith.constant 0 : index
    %61 = vector.load %arg8[%c1_66, %c0_67, %c0_68] : memref<3x78x38xbf16, #tpu.memory_space<vmem>>, vector<1x78x38xbf16>
    %62 = vector.shape_cast %61 : vector<1x78x38xbf16> to vector<78x38xbf16>
    %cst_69 = arith.constant dense<0.000000e+00> : vector<156x38xf32>
    %63 = tpu.matmul %55, %62, %cst_69 {dimension_numbers = #tpu.dot_dimension_numbers<[1], [0], [0], [1], [0, 0, 1, 1], [], []>} : vector<156x78xbf16>, vector<78x38xbf16>, vector<156x38xf32> -> vector<156x38xf32>
    %64 = arith.truncf %63 : vector<156x38xf32> to vector<156x38xbf16>
    %c160_70 = arith.constant 160 : index
    %c0_71 = arith.constant 0 : index
    %65 = vector.load %arg30[%c160_70, %c0_71] : memref<480x158xbf16, #tpu.memory_space<vmem>>, vector<156x38xbf16>
    tpu.vector_store %arg30[%c160_70, %c0_71], %64 {strides = array<i32>} : memref<480x158xbf16, #tpu.memory_space<vmem>>, vector<156x38xbf16>,
    %c2_72 = arith.constant 2 : index
    %c0_73 = arith.constant 0 : index
    %c0_74 = arith.constant 0 : index
    %66 = vector.load %arg8[%c2_72, %c0_73, %c0_74] : memref<3x78x38xbf16, #tpu.memory_space<vmem>>, vector<1x78x38xbf16>
    %67 = vector.shape_cast %66 : vector<1x78x38xbf16> to vector<78x38xbf16>
    %cst_75 = arith.constant dense<0.000000e+00> : vector<156x38xf32>
    %68 = tpu.matmul %55, %67, %cst_75 {dimension_numbers = #tpu.dot_dimension_numbers<[1], [0], [0], [1], [0, 0, 1, 1], [], []>} : vector<156x78xbf16>, vector<78x38xbf16>, vector<156x38xf32> -> vector<156x38xf32>
    %69 = arith.truncf %68 : vector<156x38xf32> to vector<156x38xbf16>
    %c320_76 = arith.constant 320 : index
    %c0_77 = arith.constant 0 : index
    %70 = vector.load %arg30[%c320_76, %c0_77] : memref<480x158xbf16, #tpu.memory_space<vmem>>, vector<156x38xbf16>
    tpu.vector_store %arg30[%c320_76, %c0_77], %69 {strides = array<i32>} : memref<480x158xbf16, #tpu.memory_space<vmem>>, vector<156x38xbf16>,
    %c0_78 = arith.constant 0 : index
    %c0_79 = arith.constant 0 : index
    %71 = vector.load %arg30[%c0_78, %c0_79] : memref<480x158xbf16, #tpu.memory_space<vmem>>, vector<480x38xbf16>
    %c0_80 = arith.constant 0 : index
    %c0_81 = arith.constant 0 : index
    %72 = vector.load %arg9[%c0_80, %c0_81] : memref<152x480xbf16, #tpu.memory_space<vmem>>, vector<152x480xbf16>
    %cst_82 = arith.constant dense<0.000000e+00> : vector<152x38xf32>
    %73 = tpu.matmul %72, %71, %cst_82 {dimension_numbers = #tpu.dot_dimension_numbers<[1], [0], [0], [1], [0, 0, 1, 1], [], []>} : vector<152x480xbf16>, vector<480x38xbf16>, vector<152x38xf32> -> vector<152x38xf32>
    %c0_83 = arith.constant 0 : index
    %c0_84 = arith.constant 0 : index
    %74 = vector.load %arg10[%c0_83, %c0_84] : memref<152x1xf32, #tpu.memory_space<vmem>>, vector<152x1xf32>
    %75 = vector.broadcast %74 : vector<152x1xf32> to vector<152x38xf32>
    %76 = arith.addf %73, %75 : vector<152x38xf32>
    %cst_85 = arith.constant 0.000000e+00 : f32
    %77 = vector.broadcast %cst_85 : f32 to vector<152x38xf32>
    %78 = arith.maximumf %76, %77 : vector<152x38xf32>
    %79 = arith.truncf %78 : vector<152x38xf32> to vector<152x38xbf16>
    %c0_86 = arith.constant 0 : index
    %c0_87 = arith.constant 0 : index
    %80 = vector.load %arg33[%c0_86, %c0_87] : memref<152x38xbf16, #tpu.memory_space<vmem>>, vector<152x38xbf16>
    tpu.vector_store %arg33[%c0_86, %c0_87], %79 {strides = array<i32>} : memref<152x38xbf16, #tpu.memory_space<vmem>>, vector<152x38xbf16>,
    %c0_88 = arith.constant 0 : index
    %c0_89 = arith.constant 0 : index
    %81 = vector.load %arg33[%c0_88, %c0_89] : memref<152x38xbf16, #tpu.memory_space<vmem>>, vector<152x38xbf16>
    %c0_90 = arith.constant 0 : index
    %c0_91 = arith.constant 0 : index
    %c0_92 = arith.constant 0 : index
    %82 = vector.load %arg11[%c0_90, %c0_91, %c0_92] : memref<3x38x18xbf16, #tpu.memory_space<vmem>>, vector<1x38x18xbf16>
    %83 = vector.shape_cast %82 : vector<1x38x18xbf16> to vector<38x18xbf16>
    %cst_93 = arith.constant dense<0.000000e+00> : vector<152x18xf32>
    %84 = tpu.matmul %81, %83, %cst_93 {dimension_numbers = #tpu.dot_dimension_numbers<[1], [0], [0], [1], [0, 0, 1, 1], [], []>} : vector<152x38xbf16>, vector<38x18xbf16>, vector<152x18xf32> -> vector<152x18xf32>
    %85 = arith.truncf %84 : vector<152x18xf32> to vector<152x18xbf16>
    %c0_94 = arith.constant 0 : index
    %c0_95 = arith.constant 0 : index
    %86 = vector.load %arg30[%c0_94, %c0_95] : memref<480x158xbf16, #tpu.memory_space<vmem>>, vector<152x18xbf16>
    tpu.vector_store %arg30[%c0_94, %c0_95], %85 {strides = array<i32>} : memref<480x158xbf16, #tpu.memory_space<vmem>>, vector<152x18xbf16>,
    %c1_96 = arith.constant 1 : index
    %c0_97 = arith.constant 0 : index
    %c0_98 = arith.constant 0 : index
    %87 = vector.load %arg11[%c1_96, %c0_97, %c0_98] : memref<3x38x18xbf16, #tpu.memory_space<vmem>>, vector<1x38x18xbf16>
    %88 = vector.shape_cast %87 : vector<1x38x18xbf16> to vector<38x18xbf16>
    %cst_99 = arith.constant dense<0.000000e+00> : vector<152x18xf32>
    %89 = tpu.matmul %81, %88, %cst_99 {dimension_numbers = #tpu.dot_dimension_numbers<[1], [0], [0], [1], [0, 0, 1, 1], [], []>} : vector<152x38xbf16>, vector<38x18xbf16>, vector<152x18xf32> -> vector<152x18xf32>
    %90 = arith.truncf %89 : vector<152x18xf32> to vector<152x18xbf16>
    %c160_100 = arith.constant 160 : index
    %c0_101 = arith.constant 0 : index
    %91 = vector.load %arg30[%c160_100, %c0_101] : memref<480x158xbf16, #tpu.memory_space<vmem>>, vector<152x18xbf16>
    tpu.vector_store %arg30[%c160_100, %c0_101], %90 {strides = array<i32>} : memref<480x158xbf16, #tpu.memory_space<vmem>>, vector<152x18xbf16>,
    %c2_102 = arith.constant 2 : index
    %c0_103 = arith.constant 0 : index
    %c0_104 = arith.constant 0 : index
    %92 = vector.load %arg11[%c2_102, %c0_103, %c0_104] : memref<3x38x18xbf16, #tpu.memory_space<vmem>>, vector<1x38x18xbf16>
    %93 = vector.shape_cast %92 : vector<1x38x18xbf16> to vector<38x18xbf16>
    %cst_105 = arith.constant dense<0.000000e+00> : vector<152x18xf32>
    %94 = tpu.matmul %81, %93, %cst_105 {dimension_numbers = #tpu.dot_dimension_numbers<[1], [0], [0], [1], [0, 0, 1, 1], [], []>} : vector<152x38xbf16>, vector<38x18xbf16>, vector<152x18xf32> -> vector<152x18xf32>
    %95 = arith.truncf %94 : vector<152x18xf32> to vector<152x18xbf16>
    %c320_106 = arith.constant 320 : index
    %c0_107 = arith.constant 0 : index
    %96 = vector.load %arg30[%c320_106, %c0_107] : memref<480x158xbf16, #tpu.memory_space<vmem>>, vector<152x18xbf16>
    tpu.vector_store %arg30[%c320_106, %c0_107], %95 {strides = array<i32>} : memref<480x158xbf16, #tpu.memory_space<vmem>>, vector<152x18xbf16>,
    %c0_108 = arith.constant 0 : index
    %c0_109 = arith.constant 0 : index
    %97 = vector.load %arg30[%c0_108, %c0_109] : memref<480x158xbf16, #tpu.memory_space<vmem>>, vector<480x18xbf16>
    %c0_110 = arith.constant 0 : index
    %c0_111 = arith.constant 0 : index
    %98 = vector.load %arg12[%c0_110, %c0_111] : memref<72x480xbf16, #tpu.memory_space<vmem>>, vector<72x480xbf16>
    %cst_112 = arith.constant dense<0.000000e+00> : vector<72x18xf32>
    %99 = tpu.matmul %98, %97, %cst_112 {dimension_numbers = #tpu.dot_dimension_numbers<[1], [0], [0], [1], [0, 0, 1, 1], [], []>} : vector<72x480xbf16>, vector<480x18xbf16>, vector<72x18xf32> -> vector<72x18xf32>
    %c0_113 = arith.constant 0 : index
    %c0_114 = arith.constant 0 : index
    %100 = vector.load %arg13[%c0_113, %c0_114] : memref<72x1xf32, #tpu.memory_space<vmem>>, vector<72x1xf32>
    %101 = vector.broadcast %100 : vector<72x1xf32> to vector<72x18xf32>
    %102 = arith.addf %99, %101 : vector<72x18xf32>
    %cst_115 = arith.constant 0.000000e+00 : f32
    %103 = vector.broadcast %cst_115 : f32 to vector<72x18xf32>
    %104 = arith.maximumf %102, %103 : vector<72x18xf32>
    %105 = arith.truncf %104 : vector<72x18xf32> to vector<72x18xbf16>
    %c0_116 = arith.constant 0 : index
    %c0_117 = arith.constant 0 : index
    %106 = vector.load %arg34[%c0_116, %c0_117] : memref<72x18xbf16, #tpu.memory_space<vmem>>, vector<72x18xbf16>
    tpu.vector_store %arg34[%c0_116, %c0_117], %105 {strides = array<i32>} : memref<72x18xbf16, #tpu.memory_space<vmem>>, vector<72x18xbf16>,
    %c0_118 = arith.constant 0 : index
    %c0_119 = arith.constant 0 : index
    %107 = vector.load %arg34[%c0_118, %c0_119] : memref<72x18xbf16, #tpu.memory_space<vmem>>, vector<72x18xbf16>
    %c0_120 = arith.constant 0 : index
    %c0_121 = arith.constant 0 : index
    %c0_122 = arith.constant 0 : index
    %108 = vector.load %arg14[%c0_120, %c0_121, %c0_122] : memref<3x18x8xbf16, #tpu.memory_space<vmem>>, vector<1x18x8xbf16>
    %109 = vector.shape_cast %108 : vector<1x18x8xbf16> to vector<18x8xbf16>
    %cst_123 = arith.constant dense<0.000000e+00> : vector<72x8xf32>
    %110 = tpu.matmul %107, %109, %cst_123 {dimension_numbers = #tpu.dot_dimension_numbers<[1], [0], [0], [1], [0, 0, 1, 1], [], []>} : vector<72x18xbf16>, vector<18x8xbf16>, vector<72x8xf32> -> vector<72x8xf32>
    %111 = arith.truncf %110 : vector<72x8xf32> to vector<72x8xbf16>
    %c0_124 = arith.constant 0 : index
    %c0_125 = arith.constant 0 : index
    %112 = vector.load %arg30[%c0_124, %c0_125] : memref<480x158xbf16, #tpu.memory_space<vmem>>, vector<72x8xbf16>
    tpu.vector_store %arg30[%c0_124, %c0_125], %111 {strides = array<i32>} : memref<480x158xbf16, #tpu.memory_space<vmem>>, vector<72x8xbf16>,
    %c1_126 = arith.constant 1 : index
    %c0_127 = arith.constant 0 : index
    %c0_128 = arith.constant 0 : index
    %113 = vector.load %arg14[%c1_126, %c0_127, %c0_128] : memref<3x18x8xbf16, #tpu.memory_space<vmem>>, vector<1x18x8xbf16>
    %114 = vector.shape_cast %113 : vector<1x18x8xbf16> to vector<18x8xbf16>
    %cst_129 = arith.constant dense<0.000000e+00> : vector<72x8xf32>
    %115 = tpu.matmul %107, %114, %cst_129 {dimension_numbers = #tpu.dot_dimension_numbers<[1], [0], [0], [1], [0, 0, 1, 1], [], []>} : vector<72x18xbf16>, vector<18x8xbf16>, vector<72x8xf32> -> vector<72x8xf32>
    %116 = arith.truncf %115 : vector<72x8xf32> to vector<72x8xbf16>
    %c80 = arith.constant 80 : index
    %c0_130 = arith.constant 0 : index
    %117 = vector.load %arg30[%c80, %c0_130] : memref<480x158xbf16, #tpu.memory_space<vmem>>, vector<72x8xbf16>
    tpu.vector_store %arg30[%c80, %c0_130], %116 {strides = array<i32>} : memref<480x158xbf16, #tpu.memory_space<vmem>>, vector<72x8xbf16>,
    %c2_131 = arith.constant 2 : index
    %c0_132 = arith.constant 0 : index
    %c0_133 = arith.constant 0 : index
    %118 = vector.load %arg14[%c2_131, %c0_132, %c0_133] : memref<3x18x8xbf16, #tpu.memory_space<vmem>>, vector<1x18x8xbf16>
    %119 = vector.shape_cast %118 : vector<1x18x8xbf16> to vector<18x8xbf16>
    %cst_134 = arith.constant dense<0.000000e+00> : vector<72x8xf32>
    %120 = tpu.matmul %107, %119, %cst_134 {dimension_numbers = #tpu.dot_dimension_numbers<[1], [0], [0], [1], [0, 0, 1, 1], [], []>} : vector<72x18xbf16>, vector<18x8xbf16>, vector<72x8xf32> -> vector<72x8xf32>
    %121 = arith.truncf %120 : vector<72x8xf32> to vector<72x8xbf16>
    %c160_135 = arith.constant 160 : index
    %c0_136 = arith.constant 0 : index
    %122 = vector.load %arg30[%c160_135, %c0_136] : memref<480x158xbf16, #tpu.memory_space<vmem>>, vector<72x8xbf16>
    tpu.vector_store %arg30[%c160_135, %c0_136], %121 {strides = array<i32>} : memref<480x158xbf16, #tpu.memory_space<vmem>>, vector<72x8xbf16>,
    %c0_137 = arith.constant 0 : index
    %c0_138 = arith.constant 0 : index
    %123 = vector.load %arg30[%c0_137, %c0_138] : memref<480x158xbf16, #tpu.memory_space<vmem>>, vector<240x8xbf16>
    %c0_139 = arith.constant 0 : index
    %c0_140 = arith.constant 0 : index
    %124 = vector.load %arg15[%c0_139, %c0_140] : memref<32x240xbf16, #tpu.memory_space<vmem>>, vector<32x240xbf16>
    %cst_141 = arith.constant dense<0.000000e+00> : vector<32x8xf32>
    %125 = tpu.matmul %124, %123, %cst_141 {dimension_numbers = #tpu.dot_dimension_numbers<[1], [0], [0], [1], [0, 0, 1, 1], [], []>} : vector<32x240xbf16>, vector<240x8xbf16>, vector<32x8xf32> -> vector<32x8xf32>
    %c0_142 = arith.constant 0 : index
    %c0_143 = arith.constant 0 : index
    %126 = vector.load %arg16[%c0_142, %c0_143] : memref<32x1xf32, #tpu.memory_space<vmem>>, vector<32x1xf32>
    %127 = vector.broadcast %126 : vector<32x1xf32> to vector<32x8xf32>
    %128 = arith.addf %125, %127 : vector<32x8xf32>
    %cst_144 = arith.constant 0.000000e+00 : f32
    %129 = vector.broadcast %cst_144 : f32 to vector<32x8xf32>
    %130 = arith.maximumf %128, %129 : vector<32x8xf32>
    %131 = arith.truncf %130 : vector<32x8xf32> to vector<32x8xbf16>
    %c0_145 = arith.constant 0 : index
    %c0_146 = arith.constant 0 : index
    %132 = vector.load %arg35[%c0_145, %c0_146] : memref<32x8xbf16, #tpu.memory_space<vmem>>, vector<32x8xbf16>
    tpu.vector_store %arg35[%c0_145, %c0_146], %131 {strides = array<i32>} : memref<32x8xbf16, #tpu.memory_space<vmem>>, vector<32x8xbf16>,
    %c0_147 = arith.constant 0 : index
    %c0_148 = arith.constant 0 : index
    %133 = vector.load %arg35[%c0_147, %c0_148] : memref<32x8xbf16, #tpu.memory_space<vmem>>, vector<32x8xbf16>
    %c0_149 = arith.constant 0 : index
    %c0_150 = arith.constant 0 : index
    %c0_151 = arith.constant 0 : index
    %134 = vector.load %arg17[%c0_149, %c0_150, %c0_151] : memref<2x8x4xbf16, #tpu.memory_space<vmem>>, vector<1x8x4xbf16>
    %135 = vector.shape_cast %134 : vector<1x8x4xbf16> to vector<8x4xbf16>
    %cst_152 = arith.constant dense<0.000000e+00> : vector<32x4xf32>
    %136 = tpu.matmul %133, %135, %cst_152 {dimension_numbers = #tpu.dot_dimension_numbers<[1], [0], [0], [1], [0, 0, 1, 1], [], []>} : vector<32x8xbf16>, vector<8x4xbf16>, vector<32x4xf32> -> vector<32x4xf32>
    %137 = arith.truncf %136 : vector<32x4xf32> to vector<32x4xbf16>
    %c0_153 = arith.constant 0 : index
    %c0_154 = arith.constant 0 : index
    %138 = vector.load %arg30[%c0_153, %c0_154] : memref<480x158xbf16, #tpu.memory_space<vmem>>, vector<32x4xbf16>
    tpu.vector_store %arg30[%c0_153, %c0_154], %137 {strides = array<i32>} : memref<480x158xbf16, #tpu.memory_space<vmem>>, vector<32x4xbf16>,
    %c1_155 = arith.constant 1 : index
    %c0_156 = arith.constant 0 : index
    %c0_157 = arith.constant 0 : index
    %139 = vector.load %arg17[%c1_155, %c0_156, %c0_157] : memref<2x8x4xbf16, #tpu.memory_space<vmem>>, vector<1x8x4xbf16>
    %140 = vector.shape_cast %139 : vector<1x8x4xbf16> to vector<8x4xbf16>
    %cst_158 = arith.constant dense<0.000000e+00> : vector<32x4xf32>
    %141 = tpu.matmul %133, %140, %cst_158 {dimension_numbers = #tpu.dot_dimension_numbers<[1], [0], [0], [1], [0, 0, 1, 1], [], []>} : vector<32x8xbf16>, vector<8x4xbf16>, vector<32x4xf32> -> vector<32x4xf32>
    %142 = arith.truncf %141 : vector<32x4xf32> to vector<32x4xbf16>
    %c32 = arith.constant 32 : index
    %c0_159 = arith.constant 0 : index
    %143 = vector.load %arg30[%c32, %c0_159] : memref<480x158xbf16, #tpu.memory_space<vmem>>, vector<32x4xbf16>
    tpu.vector_store %arg30[%c32, %c0_159], %142 {strides = array<i32>} : memref<480x158xbf16, #tpu.memory_space<vmem>>, vector<32x4xbf16>,
    %c0_160 = arith.constant 0 : index
    %c0_161 = arith.constant 0 : index
    %144 = vector.load %arg30[%c0_160, %c0_161] : memref<480x158xbf16, #tpu.memory_space<vmem>>, vector<64x4xbf16>
    %c0_162 = arith.constant 0 : index
    %c0_163 = arith.constant 0 : index
    %145 = vector.load %arg18[%c0_162, %c0_163] : memref<16x64xbf16, #tpu.memory_space<vmem>>, vector<16x64xbf16>
    %cst_164 = arith.constant dense<0.000000e+00> : vector<16x4xf32>
    %146 = tpu.matmul %145, %144, %cst_164 {dimension_numbers = #tpu.dot_dimension_numbers<[1], [0], [0], [1], [0, 0, 1, 1], [], []>} : vector<16x64xbf16>, vector<64x4xbf16>, vector<16x4xf32> -> vector<16x4xf32>
    %c0_165 = arith.constant 0 : index
    %c0_166 = arith.constant 0 : index
    %147 = vector.load %arg19[%c0_165, %c0_166] : memref<16x1xf32, #tpu.memory_space<vmem>>, vector<16x1xf32>
    %148 = vector.broadcast %147 : vector<16x1xf32> to vector<16x4xf32>
    %149 = arith.addf %146, %148 : vector<16x4xf32>
    %cst_167 = arith.constant 0.000000e+00 : f32
    %150 = vector.broadcast %cst_167 : f32 to vector<16x4xf32>
    %151 = arith.maximumf %149, %150 : vector<16x4xf32>
    %152 = arith.truncf %151 : vector<16x4xf32> to vector<16x4xbf16>
    %c0_168 = arith.constant 0 : index
    %c0_169 = arith.constant 0 : index
    %153 = vector.load %arg36[%c0_168, %c0_169] : memref<16x4xbf16, #tpu.memory_space<vmem>>, vector<16x4xbf16>
    tpu.vector_store %arg36[%c0_168, %c0_169], %152 {strides = array<i32>} : memref<16x4xbf16, #tpu.memory_space<vmem>>, vector<16x4xbf16>,
    %c0_170 = arith.constant 0 : index
    %c0_171 = arith.constant 0 : index
    %154 = vector.load %arg20[%c0_170, %c0_171] : memref<4x2xf32, #tpu.memory_space<vmem>>, vector<4x2xf32>
    %cst_172 = arith.constant dense<0.000000e+00> : vector<16x2xf32>
    %155 = tpu.matmul %151, %154, %cst_172 {dimension_numbers = #tpu.dot_dimension_numbers<[1], [0], [0], [1], [0, 0, 1, 1], [], []>} : vector<16x4xf32>, vector<4x2xf32>, vector<16x2xf32> -> vector<16x2xf32>
    %c0_173 = arith.constant 0 : index
    %c0_174 = arith.constant 0 : index
    %156 = vector.load %arg21[%c0_173, %c0_174] : memref<4x2xf32, #tpu.memory_space<vmem>>, vector<4x2xf32>
    %cst_175 = arith.constant dense<0.000000e+00> : vector<16x2xf32>
    %157 = tpu.matmul %151, %156, %cst_175 {dimension_numbers = #tpu.dot_dimension_numbers<[1], [0], [0], [1], [0, 0, 1, 1], [], []>} : vector<16x4xf32>, vector<4x2xf32>, vector<16x2xf32> -> vector<16x2xf32>
    %c0_176 = arith.constant 0 : index
    %c0_177 = arith.constant 0 : index
    %158 = vector.load %arg22[%c0_176, %c0_177] : memref<8x16xf32, #tpu.memory_space<vmem>>, vector<8x16xf32>
    %cst_178 = arith.constant dense<0.000000e+00> : vector<8x2xf32>
    %159 = tpu.matmul %158, %155, %cst_178 {dimension_numbers = #tpu.dot_dimension_numbers<[1], [0], [0], [1], [0, 0, 1, 1], [], []>} : vector<8x16xf32>, vector<16x2xf32>, vector<8x2xf32> -> vector<8x2xf32>
    %c0_179 = arith.constant 0 : index
    %c0_180 = arith.constant 0 : index
    %160 = vector.load %arg23[%c0_179, %c0_180] : memref<8x16xf32, #tpu.memory_space<vmem>>, vector<8x16xf32>
    %cst_181 = arith.constant dense<0.000000e+00> : vector<8x2xf32>
    %161 = tpu.matmul %160, %157, %cst_181 {dimension_numbers = #tpu.dot_dimension_numbers<[1], [0], [0], [1], [0, 0, 1, 1], [], []>} : vector<8x16xf32>, vector<16x2xf32>, vector<8x2xf32> -> vector<8x2xf32>
    %162 = arith.addf %159, %161 : vector<8x2xf32>
    %c0_182 = arith.constant 0 : index
    %c0_183 = arith.constant 0 : index
    %163 = vector.load %arg24[%c0_182, %c0_183] : memref<8x1xf32, #tpu.memory_space<vmem>>, vector<8x1xf32>
    %164 = vector.broadcast %163 : vector<8x1xf32> to vector<8x2xf32>
    %165 = arith.addf %162, %164 : vector<8x2xf32>
    %cst_184 = arith.constant 0.000000e+00 : f32
    %166 = vector.broadcast %cst_184 : f32 to vector<8x2xf32>
    %167 = arith.maximumf %165, %166 : vector<8x2xf32>
    %c0_185 = arith.constant 0 : index
    %c0_186 = arith.constant 0 : index
    %168 = vector.load %arg25[%c0_185, %c0_186] : memref<8x8xf32, #tpu.memory_space<vmem>>, vector<8x8xf32>
    %cst_187 = arith.constant dense<0.000000e+00> : vector<8x2xf32>
    %169 = tpu.matmul %168, %167, %cst_187 {dimension_numbers = #tpu.dot_dimension_numbers<[1], [0], [0], [1], [0, 0, 1, 1], [], []>} : vector<8x8xf32>, vector<8x2xf32>, vector<8x2xf32> -> vector<8x2xf32>
    %c0_188 = arith.constant 0 : index
    %c0_189 = arith.constant 0 : index
    %170 = vector.load %arg26[%c0_188, %c0_189] : memref<8x1xf32, #tpu.memory_space<vmem>>, vector<8x1xf32>
    %171 = vector.broadcast %170 : vector<8x1xf32> to vector<8x2xf32>
    %172 = arith.addf %169, %171 : vector<8x2xf32>
    %cst_190 = arith.constant 0.000000e+00 : f32
    %173 = vector.broadcast %cst_190 : f32 to vector<8x2xf32>
    %174 = arith.maximumf %172, %173 : vector<8x2xf32>
    %c0_191 = arith.constant 0 : index
    %c0_192 = arith.constant 0 : index
    %175 = vector.load %arg27[%c0_191, %c0_192] : memref<2x8xf32, #tpu.memory_space<vmem>>, vector<2x8xf32>
    %cst_193 = arith.constant dense<0.000000e+00> : vector<2x2xf32>
    %176 = tpu.matmul %175, %174, %cst_193 {dimension_numbers = #tpu.dot_dimension_numbers<[1], [0], [0], [1], [0, 0, 1, 1], [], []>} : vector<2x8xf32>, vector<8x2xf32>, vector<2x2xf32> -> vector<2x2xf32>
    %c0_194 = arith.constant 0 : index
    %c0_195 = arith.constant 0 : index
    %177 = vector.load %arg28[%c0_194, %c0_195] : memref<2x1xf32, #tpu.memory_space<vmem>>, vector<2x1xf32>
    %178 = vector.broadcast %177 : vector<2x1xf32> to vector<2x2xf32>
    %179 = arith.addf %176, %178 : vector<2x2xf32>
    %c0_196 = arith.constant 0 : index
    %c0_197 = arith.constant 0 : index
    %c0_198 = arith.constant 0 : index
    %180 = vector.load %arg29[%c0_196, %c0_197, %c0_198] : memref<1x2x2xf32, #tpu.memory_space<vmem>>, vector<1x2x2xf32>
    %181 = vector.shape_cast %180 : vector<1x2x2xf32> to vector<2x2xf32>
    %182 = vector.shape_cast %179 : vector<2x2xf32> to vector<1x2x2xf32>
    tpu.vector_store %arg29[%c0_196, %c0_197, %c0_198], %182 {strides = array<i32>} : memref<1x2x2xf32, #tpu.memory_space<vmem>>, vector<1x2x2xf32>,
    return
  }
  func.func @transform_0(%arg0: i32) -> (i32, i32, i32) {
    %c0_i32 = arith.constant 0 : i32
    %c0_i32_0 = arith.constant 0 : i32
    %c0_i32_1 = arith.constant 0 : i32
    return %arg0, %c0_i32, %c0_i32_0 : i32, i32, i32
  }
  func.func @transform_1(%arg0: i32) -> (i32, i32, i32) {
    %c0_i32 = arith.constant 0 : i32
    %c0_i32_0 = arith.constant 0 : i32
    %c0_i32_1 = arith.constant 0 : i32
    %c0_i32_2 = arith.constant 0 : i32
    return %c0_i32, %c0_i32_0, %c0_i32_1 : i32, i32, i32
  }
  func.func @transform_2(%arg0: i32) -> (i32, i32) {
    %c0_i32 = arith.constant 0 : i32
    %c0_i32_0 = arith.constant 0 : i32
    %c0_i32_1 = arith.constant 0 : i32
    return %c0_i32, %c0_i32_0 : i32, i32
  }
  func.func @transform_3(%arg0: i32) -> (i32, i32) {
    %c0_i32 = arith.constant 0 : i32
    %c0_i32_0 = arith.constant 0 : i32
    %c0_i32_1 = arith.constant 0 : i32
    return %c0_i32, %c0_i32_0 : i32, i32
  }
  func.func @transform_4(%arg0: i32) -> (i32, i32, i32) {
    %c0_i32 = arith.constant 0 : i32
    %c0_i32_0 = arith.constant 0 : i32
    %c0_i32_1 = arith.constant 0 : i32
    %c0_i32_2 = arith.constant 0 : i32
    return %c0_i32, %c0_i32_0, %c0_i32_1 : i32, i32, i32
  }
  func.func @transform_5(%arg0: i32) -> (i32, i32) {
    %c0_i32 = arith.constant 0 : i32
    %c0_i32_0 = arith.constant 0 : i32
    %c0_i32_1 = arith.constant 0 : i32
    return %c0_i32, %c0_i32_0 : i32, i32
  }
  func.func @transform_6(%arg0: i32) -> (i32, i32) {
    %c0_i32 = arith.constant 0 : i32
    %c0_i32_0 = arith.constant 0 : i32
    %c0_i32_1 = arith.constant 0 : i32
    return %c0_i32, %c0_i32_0 : i32, i32
  }
  func.func @transform_7(%arg0: i32) -> (i32, i32, i32) {
    %c0_i32 = arith.constant 0 : i32
    %c0_i32_0 = arith.constant 0 : i32
    %c0_i32_1 = arith.constant 0 : i32
    %c0_i32_2 = arith.constant 0 : i32
    return %c0_i32, %c0_i32_0, %c0_i32_1 : i32, i32, i32
  }
  func.func @transform_8(%arg0: i32) -> (i32, i32) {
    %c0_i32 = arith.constant 0 : i32
    %c0_i32_0 = arith.constant 0 : i32
    %c0_i32_1 = arith.constant 0 : i32
    return %c0_i32, %c0_i32_0 : i32, i32
  }
  func.func @transform_9(%arg0: i32) -> (i32, i32) {
    %c0_i32 = arith.constant 0 : i32
    %c0_i32_0 = arith.constant 0 : i32
    %c0_i32_1 = arith.constant 0 : i32
    return %c0_i32, %c0_i32_0 : i32, i32
  }
  func.func @transform_10(%arg0: i32) -> (i32, i32, i32) {
    %c0_i32 = arith.constant 0 : i32
    %c0_i32_0 = arith.constant 0 : i32
    %c0_i32_1 = arith.constant 0 : i32
    %c0_i32_2 = arith.constant 0 : i32
    return %c0_i32, %c0_i32_0, %c0_i32_1 : i32, i32, i32
  }
  func.func @transform_11(%arg0: i32) -> (i32, i32) {
    %c0_i32 = arith.constant 0 : i32
    %c0_i32_0 = arith.constant 0 : i32
    %c0_i32_1 = arith.constant 0 : i32
    return %c0_i32, %c0_i32_0 : i32, i32
  }
  func.func @transform_12(%arg0: i32) -> (i32, i32) {
    %c0_i32 = arith.constant 0 : i32
    %c0_i32_0 = arith.constant 0 : i32
    %c0_i32_1 = arith.constant 0 : i32
    return %c0_i32, %c0_i32_0 : i32, i32
  }
  func.func @transform_13(%arg0: i32) -> (i32, i32, i32) {
    %c0_i32 = arith.constant 0 : i32
    %c0_i32_0 = arith.constant 0 : i32
    %c0_i32_1 = arith.constant 0 : i32
    %c0_i32_2 = arith.constant 0 : i32
    return %c0_i32, %c0_i32_0, %c0_i32_1 : i32, i32, i32
  }
  func.func @transform_14(%arg0: i32) -> (i32, i32) {
    %c0_i32 = arith.constant 0 : i32
    %c0_i32_0 = arith.constant 0 : i32
    %c0_i32_1 = arith.constant 0 : i32
    return %c0_i32, %c0_i32_0 : i32, i32
  }
  func.func @transform_15(%arg0: i32) -> (i32, i32) {
    %c0_i32 = arith.constant 0 : i32
    %c0_i32_0 = arith.constant 0 : i32
    %c0_i32_1 = arith.constant 0 : i32
    return %c0_i32, %c0_i32_0 : i32, i32
  }
  func.func @transform_16(%arg0: i32) -> (i32, i32, i32) {
    %c0_i32 = arith.constant 0 : i32
    %c0_i32_0 = arith.constant 0 : i32
    %c0_i32_1 = arith.constant 0 : i32
    %c0_i32_2 = arith.constant 0 : i32
    return %c0_i32, %c0_i32_0, %c0_i32_1 : i32, i32, i32
  }
  func.func @transform_17(%arg0: i32) -> (i32, i32) {
    %c0_i32 = arith.constant 0 : i32
    %c0_i32_0 = arith.constant 0 : i32
    %c0_i32_1 = arith.constant 0 : i32
    return %c0_i32, %c0_i32_0 : i32, i32
  }
  func.func @transform_18(%arg0: i32) -> (i32, i32) {
    %c0_i32 = arith.constant 0 : i32
    %c0_i32_0 = arith.constant 0 : i32
    %c0_i32_1 = arith.constant 0 : i32
    return %c0_i32, %c0_i32_0 : i32, i32
  }
  func.func @transform_19(%arg0: i32) -> (i32, i32) {
    %c0_i32 = arith.constant 0 : i32
    %c0_i32_0 = arith.constant 0 : i32
    %c0_i32_1 = arith.constant 0 : i32
    return %c0_i32, %c0_i32_0 : i32, i32
  }
  func.func @transform_20(%arg0: i32) -> (i32, i32) {
    %c0_i32 = arith.constant 0 : i32
    %c0_i32_0 = arith.constant 0 : i32
    %c0_i32_1 = arith.constant 0 : i32
    return %c0_i32, %c0_i32_0 : i32, i32
  }
  func.func @transform_21(%arg0: i32) -> (i32, i32) {
    %c0_i32 = arith.constant 0 : i32
    %c0_i32_0 = arith.constant 0 : i32
    %c0_i32_1 = arith.constant 0 : i32
    return %c0_i32, %c0_i32_0 : i32, i32
  }
  func.func @transform_22(%arg0: i32) -> (i32, i32) {
    %c0_i32 = arith.constant 0 : i32
    %c0_i32_0 = arith.constant 0 : i32
    %c0_i32_1 = arith.constant 0 : i32
    return %c0_i32, %c0_i32_0 : i32, i32
  }
  func.func @transform_23(%arg0: i32) -> (i32, i32) {
    %c0_i32 = arith.constant 0 : i32
    %c0_i32_0 = arith.constant 0 : i32
    %c0_i32_1 = arith.constant 0 : i32
    return %c0_i32, %c0_i32_0 : i32, i32
  }
  func.func @transform_24(%arg0: i32) -> (i32, i32) {
    %c0_i32 = arith.constant 0 : i32
    %c0_i32_0 = arith.constant 0 : i32
    %c0_i32_1 = arith.constant 0 : i32
    return %c0_i32, %c0_i32_0 : i32, i32
  }
  func.func @transform_25(%arg0: i32) -> (i32, i32) {
    %c0_i32 = arith.constant 0 : i32
    %c0_i32_0 = arith.constant 0 : i32
    %c0_i32_1 = arith.constant 0 : i32
    return %c0_i32, %c0_i32_0 : i32, i32
  }
  func.func @transform_26(%arg0: i32) -> (i32, i32) {
    %c0_i32 = arith.constant 0 : i32
    %c0_i32_0 = arith.constant 0 : i32
    %c0_i32_1 = arith.constant 0 : i32
    return %c0_i32, %c0_i32_0 : i32, i32
  }
  func.func @transform_27(%arg0: i32) -> (i32, i32) {
    %c0_i32 = arith.constant 0 : i32
    %c0_i32_0 = arith.constant 0 : i32
    %c0_i32_1 = arith.constant 0 : i32
    return %c0_i32, %c0_i32_0 : i32, i32
  }
  func.func @transform_28(%arg0: i32) -> (i32, i32, i32) {
    %c0_i32 = arith.constant 0 : i32
    %c0_i32_0 = arith.constant 0 : i32
    %c0_i32_1 = arith.constant 0 : i32
    return %arg0, %c0_i32, %c0_i32_0 : i32, i32, i32
  }
}

</mosaic_0001>

<bundles_post_ra>
// kernel: tpu_custom_call.1
= control target key start
LH: loop header
LB: loop body
LE: loop exit
PB: predicated region body
PF: predicated region fallthrough
CT: control target
= control target key end

     0   :  { %s16513_s0 = inlined_call_operand.vmem [shape: bf16[1,160,320], index: 0, kind: input, shape index: {}]   ;;  %s16514_s1 = inlined_call_operand.vmem [shape: bf16[3,320,158], index: 1, kind: input, shape index: {}]   ;;  %s16515_s2 = inlined_call_operand.vmem [shape: bf16[158,480], index: 2, kind: input, shape index: {}]   ;;  %s16516_s3 = inlined_call_operand.vmem [shape: f32[158,1], index: 3, kind: input, shape index: {}]   ;;  %s16517_s4 = inlined_call_operand.vmem [shape: bf16[3,158,78], index: 4, kind: input, shape index: {}]   ;;  %s16518_s5 = inlined_call_operand.vmem [shape: bf16[156,480], index: 5, kind: input, shape index: {}]   ;;  %s16519_s6 = inlined_call_operand.vmem [shape: f32[156,1], index: 6, kind: input, shape index: {}]   ;;  %s16520_s7 = inlined_call_operand.vmem [shape: bf16[3,78,38], index: 7, kind: input, shape index: {}]   ;;  %s16521_s8 = inlined_call_operand.vmem [shape: bf16[152,480], index: 8, kind: input, shape index: {}]   ;;  %s16522_s9 = inlined_call_operand.vmem [shape: f32[152,1], index: 9, kind: input, shape index: {}]   ;;  %s16523_s10 = inlined_call_operand.vmem [shape: bf16[3,38,18], index: 10, kind: input, shape index: {}]   ;;  %s16524_s11 = inlined_call_operand.vmem [shape: bf16[72,480], index: 11, kind: input, shape index: {}]   ;;  %s16525_s12 = inlined_call_operand.vmem [shape: f32[72,1], index: 12, kind: input, shape index: {}]   ;;  %s16526_s13 = inlined_call_operand.vmem [shape: bf16[3,18,8], index: 13, kind: input, shape index: {}]   ;;  %s16527_s14 = inlined_call_operand.vmem [shape: bf16[32,240], index: 14, kind: input, shape index: {}]   ;;  %s16528_s15 = inlined_call_operand.vmem [shape: f32[32,1], index: 15, kind: input, shape index: {}]   ;;  %s16529_s16 = inlined_call_operand.vmem [shape: bf16[2,8,4], index: 16, kind: input, shape index: {}]   ;;  %s16530_s17 = inlined_call_operand.vmem [shape: bf16[16,64], index: 17, kind: input, shape index: {}]   ;;  %s16531_s18 = inlined_call_operand.vmem [shape: f32[16,1], index: 18, kind: input, shape index: {}]   ;;  %s16532_s19 = inlined_call_operand.vmem [shape: f32[4,2], index: 19, kind: input, shape index: {}]   ;;  %s16533_s20 = inlined_call_operand.vmem [shape: f32[4,2], index: 20, kind: input, shape index: {}]   ;;  %s16534_s21 = inlined_call_operand.vmem [shape: f32[8,16], index: 21, kind: input, shape index: {}]   ;;  %s16535_s22 = inlined_call_operand.vmem [shape: f32[8,16], index: 22, kind: input, shape index: {}]   ;;  %s16536_s23 = inlined_call_operand.vmem [shape: f32[8,1], index: 23, kind: input, shape index: {}]   ;;  %s16537_s24 = inlined_call_operand.vmem [shape: f32[8,8], index: 24, kind: input, shape index: {}]   ;;  %s16538_s25 = inlined_call_operand.vmem [shape: f32[8,1], index: 25, kind: input, shape index: {}]   ;;  %s16539_s26 = inlined_call_operand.vmem [shape: f32[2,8], index: 26, kind: input, shape index: {}]   ;;  %s16540_s27 = inlined_call_operand.vmem [shape: f32[2,1], index: 27, kind: input, shape index: {}]   ;;  %s16541_s28 = inlined_call_operand.hbm [shape: f32[1,2,2], index: 28, kind: output, shape index: {}]  }
   0x1   :  { %16555 = sst [smem:[#allocation12_spill]] %s16513_s0 }
   0x2   :  { %16556 = sst [smem:[#allocation13_spill]] %s16514_s1 }
   0x3   :  { %16557 = sst [smem:[#allocation14_spill]] %s16515_s2 }
   0x4   :  { %16558 = sst [smem:[#allocation15_spill]] %s16516_s3 }
   0x5   :  { %16559 = sst [smem:[#allocation16_spill]] %s16517_s4 }
   0x6   :  { %16560 = sst [smem:[#allocation17_spill]] %s16518_s5 }
   0x7   :  { %16561 = sst [smem:[#allocation18_spill]] %s16519_s6 }
   0x8   :  { %16562 = sst [smem:[#allocation19_spill]] %s16520_s7 }
   0x9   :  { %16563 = sst [smem:[#allocation20_spill]] %s16521_s8 }
   0xa   :  { %16564 = sst [smem:[#allocation21_spill]] %s16522_s9 }
   0xb   :  { %16565 = sst [smem:[#allocation22_spill]] %s16523_s10 }
   0xc   :  { %16566 = sst [smem:[#allocation23_spill]] %s16524_s11 }
   0xd   :  { %16567 = sst [smem:[#allocation24_spill]] %s16525_s12 }
   0xe   :  { %s16568_s9 = sld [smem:[#allocation13_spill]]  ;;  %v13212_v2 = vmov 0   ;;  %vm584_vm0 = vcmask 523264   ;;  %vm91_vm1 = vcmask 1043456   ;;  %vm92_vm2 = vcmask 244740  }
   0xf   :  { %780 = vmatprep.mubr.bf16.mxu1 %v13212_v2  ;;  %12446 = vset.pattern.permute.xlu0 %v13212_v2  ;;  %s16569_s7 = sld [smem:[#allocation12_spill]]  ;;  %vm13835_vm3 = vmor %vm92_vm2, %vm91_vm1 }
  0x10   :  { %12447 = vset.pattern.permute.xlu1 %v13212_v2  ;;  %94 = vst.msk [vmem:[#allocation2] sm:$0xff] %vm13835_vm3, %v13212_v2  ;;  %95 = vst.msk [vmem:[#allocation2 + $0x8] sm:$0xff] %vm13835_vm3, %v13212_v2 }
  0x11   :  { %96 = vst.msk [vmem:[#allocation2 + $0x10] sm:$0xff] %vm13835_vm3, %v13212_v2  ;;  %97 = vst.msk [vmem:[#allocation2 + $0x18] sm:$0xff] %vm13835_vm3, %v13212_v2 }
  0x12   :  { %98 = vst.msk [vmem:[#allocation2 + $0x20] sm:$0xff] %vm13835_vm3, %v13212_v2  ;;  %99 = vst.msk [vmem:[#allocation2 + $0x28] sm:$0xff] %vm13835_vm3, %v13212_v2 }
  0x13   :  { %100 = vst.msk [vmem:[#allocation2 + $0x30] sm:$0xff] %vm13835_vm3, %v13212_v2  ;;  %101 = vst.msk [vmem:[#allocation2 + $0x38] sm:$0xff] %vm13835_vm3, %v13212_v2 }
  0x14   :  { %v12448_v0 = vld [vmem:[%s16568_s9 + $0x74] ss:$8 sps:$4 sm:$0xff]   ;;  %v12450_v1 = vld [vmem:[%s16568_s9 + $0x70] ss:$8 sps:$4 sm:$0xff]   ;;  %v12451_v3 = vld [vmem:[%s16568_s9 + $0x64] ss:$8 sps:$4 sm:$0xff]  }
  0x15   :  { %615 = vmatprep.subr.bf16.mxu0 %v12448_v0  ;;  %v12453_v4 = vld [vmem:[%s16568_s9 + $0x60] ss:$8 sps:$4 sm:$0xff]   ;;  %v12454_v5 = vld [vmem:[%s16568_s9 + $0x54] ss:$8 sps:$4 sm:$0xff]   ;;  %v12456_v6 = vld [vmem:[%s16568_s9 + $0x50] ss:$8 sps:$4 sm:$0xff]  }
  0x16   :  { %616 = vmatpush1.bf16.msra.mxu0 %v12450_v1  ;;  %v12457_v7 = vld [vmem:[%s16568_s9 + $0x44] ss:$8 sps:$4 sm:$0xff]   ;;  %v12459_v8 = vld [vmem:[%s16568_s9 + $0x40] ss:$8 sps:$4 sm:$0xff]   ;;  %v12460_v9 = vld [vmem:[%s16568_s9 + $0x34] ss:$8 sps:$4 sm:$0xff]  }
  0x17   :  { %617 = vmatprep.subr.bf16.mxu0 %v12451_v3  ;;  %v12462_v10 = vld [vmem:[%s16568_s9 + $0x30] ss:$8 sps:$4 sm:$0xff]   ;;  %v12481_v11 = vld [vmem:[%s16568_s9 + $0x134] ss:$8 sps:$4 sm:$0xff]   ;;  %v12463_v13 = vld [vmem:[%s16568_s9 + $0x24] ss:$8 sps:$4 sm:$0xff]  }
  0x18   :  { %v12483_v12 = vld [vmem:[%s16568_s9 + $0x130] ss:$8 sps:$4 sm:$0xff]   ;;  %756 = vmatprep.subr.bf16.mxu1 %v12481_v11  ;;  %v12487_v14 = vld [vmem:[%s16568_s9 + $0x124] ss:$8 sps:$4 sm:$0xff]   ;;  %v12489_v15 = vld [vmem:[%s16568_s9 + $0x120] ss:$8 sps:$4 sm:$0xff]  }
  0x19   :  { %757 = vmatpush1.bf16.msra.mxu1 %v12483_v12  ;;  %v12465_v16 = vld [vmem:[%s16568_s9 + $0x20] ss:$8 sps:$4 sm:$0xff]   ;;  %v12466_v17 = vld [vmem:[%s16568_s9 + $0x14] ss:$8 sps:$4 sm:$0xff]   ;;  %v12495_v19 = vld [vmem:[%s16568_s9 + $0x110] ss:$8 sps:$4 sm:$0xff]  }
  0x1a   :  { %618 = vmatpush1.bf16.msra.mxu0 %v12453_v4  ;;  %758 = vmatprep.subr.bf16.mxu1 %v12487_v14  ;;  %v12493_v18 = vld [vmem:[%s16568_s9 + $0x114] ss:$8 sps:$4 sm:$0xff]   ;;  %v12468_v20 = vld [vmem:[%s16568_s9 + $0x10] ss:$8 sps:$4 sm:$0xff]   ;;  %v12499_v21 = vld [vmem:[%s16568_s9 + $0x104] ss:$8 sps:$4 sm:$0xff]  }
  0x1b   :  { %619 = vmatprep.subr.bf16.mxu0 %v12454_v5  ;;  %v12469_v22 = vld [vmem:[%s16568_s9 + $0x4] ss:$8 sps:$4 sm:$0xff]   ;;  %v12501_v23 = vld [vmem:[%s16568_s9 + $0x100] ss:$8 sps:$4 sm:$0xff]   ;;  %v12472_v25 = vld [vmem:[%s16568_s9 + $0xf4] ss:$8 sps:$4 sm:$0xff]  }
  0x1c   :  { %v12471_v24 = vld [vmem:[%s16568_s9] ss:$8 sps:$4 sm:$0xff]   ;;  %v13442_v26 = vld [vmem:[%s16569_s7 + $0x4] ss:$12 sps:$4 sm:$0xff]   ;;  %v12519_v31 = vld [vmem:[%s16568_s9 + $0x1b4] ss:$8 sps:$4 sm:$0xff]  }
  0x1d   :  { %759 = vmatpush1.bf16.msra.mxu1 %v12489_v15  ;;  %v12505_v27 = vld [vmem:[%s16569_s7 + $0x8] ss:$12 sps:$4 sm:$0xff]   ;;  %647 = vmatprep.mubr.bf16.mxu0 %v13442_v26  ;;  %v12474_v28 = vld [vmem:[%s16568_s9 + $0xf0] ss:$8 sps:$4 sm:$0xff]   ;;  %v12475_v29 = vld [vmem:[%s16568_s9 + $0xe4] ss:$8 sps:$4 sm:$0xff]  }
  0x1e   :  { %620 = vmatpush1.bf16.msra.mxu0 %v12456_v6  ;;  %760 = vmatprep.subr.bf16.mxu1 %v12493_v18  ;;  %v12517_v30 = vld [vmem:[%s16568_s9 + $0x1b0] ss:$8 sps:$4 sm:$0xff]   ;;  %v12477_v32 = vld [vmem:[%s16568_s9 + $0xe0] ss:$8 sps:$4 sm:$0xff]   ;;  %v12478_v33 = vld [vmem:[%s16568_s9 + $0xd4] ss:$8 sps:$4 sm:$0xff]  }
  0x1f   :  { %621 = vmatprep.subr.bf16.mxu0 %v12457_v7  ;;  %v12523_v34 = vld [vmem:[%s16568_s9 + $0x1a0] ss:$8 sps:$4 sm:$0xff]   ;;  %v12525_v35 = vld [vmem:[%s16568_s9 + $0x1a4] ss:$8 sps:$4 sm:$0xff]   ;;  %v12480_v37 = vld [vmem:[%s16568_s9 + $0xd0] ss:$8 sps:$4 sm:$0xff]  }
  0x20   :  { %v12512_v36 = vld [vmem:[%s16569_s7 + $0x20] ss:$12 sps:$4 sm:$0xff]   ;;  %v12532_v39 = vld [vmem:[%s16568_s9 + $0x194] ss:$8 sps:$4 sm:$0xff]   ;;  %v12530_v40 = vld [vmem:[%s16568_s9 + $0x190] ss:$8 sps:$4 sm:$0xff]  }
  0x21   :  { %761 = vmatpush1.bf16.msra.mxu1 %v12495_v19  ;;  %v12484_v38 = vld [vmem:[%s16568_s9 + $0xc4] ss:$8 sps:$4 sm:$0xff]   ;;  %v12486_v42 = vld [vmem:[%s16568_s9 + $0xc0] ss:$8 sps:$4 sm:$0xff]   ;;  %v12490_v43 = vld [vmem:[%s16568_s9 + $0xb4] ss:$8 sps:$4 sm:$0xff]  }
  0x22   :  { %622 = vmatpush1.bf16.msra.mxu0 %v12459_v8  ;;  %762 = vmatprep.subr.bf16.mxu1 %v12499_v21  ;;  %v12535_v41 = vld [vmem:[%s16568_s9 + $0x184] ss:$8 sps:$4 sm:$0xff]   ;;  %v12533_v45 = vld [vmem:[%s16568_s9 + $0x180] ss:$8 sps:$4 sm:$0xff]   ;;  %v12542_v46 = vld [vmem:[%s16568_s9 + $0x174] ss:$8 sps:$4 sm:$0xff]  }
  0x23   :  { %623 = vmatprep.subr.bf16.mxu0 %v12460_v9  ;;  %v12516_v44 = vld [vmem:[%s16569_s7 + $0x38] ss:$12 sps:$4 sm:$0xff]   ;;  %v12498_v51 = vld [vmem:[%s16568_s9 + $0xa0] ss:$8 sps:$4 sm:$0xff]   ;;  %v12502_v52 = vld [vmem:[%s16568_s9 + $0x94] ss:$8 sps:$4 sm:$0xff]  }
  0x24   :  { %v12492_v47 = vld [vmem:[%s16568_s9 + $0xb0] ss:$8 sps:$4 sm:$0xff]   ;;  %v12496_v48 = vld [vmem:[%s16568_s9 + $0xa4] ss:$8 sps:$4 sm:$0xff]   ;;  %v12543_v53 = vld [vmem:[%s16568_s9 + $0x160] ss:$8 sps:$4 sm:$0xff]  }
  0x25   :  { %763 = vmatpush1.bf16.msra.mxu1 %v12501_v23  ;;  %v12540_v49 = vld [vmem:[%s16568_s9 + $0x170] ss:$8 sps:$4 sm:$0xff]   ;;  %v12545_v50 = vld [vmem:[%s16568_s9 + $0x164] ss:$8 sps:$4 sm:$0xff]   ;;  %v12555_v55 = vld [vmem:[%s16568_s9 + $0x154] ss:$8 sps:$4 sm:$0xff]  }
  0x26   :  { %624 = vmatpush1.bf16.msra.mxu0 %v12462_v10  ;;  %1262 = vmatprep.subr.bf16.mxu1 %v12519_v31  ;;  %v12529_v54 = vld [vmem:[%s16569_s7 + $0x50] ss:$12 sps:$4 sm:$0xff]   ;;  %v12506_v57 = vld [vmem:[%s16568_s9 + $0x84] ss:$8 sps:$4 sm:$0xff]   ;;  %v12508_v60 = vld [vmem:[%s16568_s9 + $0x80] ss:$8 sps:$4 sm:$0xff]  }
  0x27   :  { %625 = vmatprep.subr.bf16.mxu0 %v12463_v13  ;;  %v12504_v56 = vld [vmem:[%s16568_s9 + $0x90] ss:$8 sps:$4 sm:$0xff]   ;;  %v12558_v59 = vld [vmem:[%s16568_s9 + $0x144] ss:$8 sps:$4 sm:$0xff]   ;;  %v12522_v61 = vld [vmem:[%s16568_s9 + $0x274] ss:$8 sps:$4 sm:$0xff]  }
  0x28   :  { %10269 = vmatmul.mubr.msk.bf16.vlgmr.msra.gmra.mxu1 %vm584_vm0, %v12505_v27  ;;  %v12553_v58 = vld [vmem:[%s16568_s9 + $0x150] ss:$8 sps:$4 sm:$0xff]   ;;  %v12539_v62 = vld [vmem:[%s16569_s7 + $0x68] ss:$12 sps:$4 sm:$0xff]   ;;  %v13570_v1 = vld [vmem:[%s16569_s7] ss:$12 sps:$4 sm:$0xff]  }
  0x29   :  { %790 = vmatprep.mubr.bf16.mxu1 %v13212_v2  ;;  %1263 = vmatpush1.bf16.msra.mxu1 %v12517_v30  ;;  %v12556_v63 = vld [vmem:[%s16568_s9 + $0x140] ss:$8 sps:$4 sm:$0xff]   ;;  %v12565_v0 = vld [vmem:[%s16568_s9 + $0x234] ss:$8 sps:$4 sm:$0xff]   ;;  %v12520_v4 = vld [vmem:[%s16568_s9 + $0x270] ss:$8 sps:$4 sm:$0xff]  }
  0x2a   :  { %626 = vmatpush1.bf16.msra.mxu0 %v12465_v16  ;;  %1264 = vmatprep.subr.bf16.mxu1 %v12525_v35  ;;  %v13575_v3 = vld [vmem:[%s16569_s7 + $0x1c] ss:$12 sps:$4 sm:$0xff]   ;;  %v12548_v5 = vld [vmem:[%s16568_s9 + $0x264] ss:$8 sps:$4 sm:$0xff]   ;;  %v12563_v6 = vld [vmem:[%s16568_s9 + $0x230] ss:$8 sps:$4 sm:$0xff]  }
  0x2b   :  { %627 = vmatprep.subr.bf16.mxu0 %v12466_v17  ;;  %v12568_v7 = vld [vmem:[%s16568_s9 + $0x224] ss:$8 sps:$4 sm:$0xff]   ;;  %v12546_v8 = vld [vmem:[%s16568_s9 + $0x260] ss:$8 sps:$4 sm:$0xff]   ;;  %v12578_v12 = vld [vmem:[%s16568_s9 + $0x254] ss:$8 sps:$4 sm:$0xff]  }
  0x2c   :  { %v12552_v9 = vld [vmem:[%s16569_s7 + $0x80] ss:$12 sps:$4 sm:$0xff]   ;;  %v13602_v10 = vld [vmem:[%s16569_s7 + $0x18] ss:$12 sps:$4 sm:$0xff]   ;;  %v12575_v13 = vld [vmem:[%s16568_s9 + $0x214] ss:$8 sps:$4 sm:$0xff]  }
  0x2d   :  { %1265 = vmatpush1.bf16.msra.mxu1 %v12523_v34  ;;  %v12566_v11 = vld [vmem:[%s16568_s9 + $0x220] ss:$8 sps:$4 sm:$0xff]   ;;  %v12576_v15 = vld [vmem:[%s16568_s9 + $0x250] ss:$8 sps:$4 sm:$0xff]   ;;  %v12581_v17 = vld [vmem:[%s16568_s9 + $0x204] ss:$8 sps:$4 sm:$0xff]  }
  0x2e   :  { %628 = vmatpush1.bf16.msra.mxu0 %v12468_v20  ;;  %1266 = vmatprep.subr.bf16.mxu1 %v12532_v39  ;;  %v13616_v14 = vld [vmem:[%s16569_s7 + $0x34] ss:$12 sps:$4 sm:$0xff]   ;;  %v12573_v16 = vld [vmem:[%s16568_s9 + $0x210] ss:$8 sps:$4 sm:$0xff]   ;;  %v12604_v19 = vld [vmem:[%s16568_s9 + $0x244] ss:$8 sps:$4 sm:$0xff]  }
  0x2f   :  { %629 = vmatprep.subr.bf16.mxu0 %v12469_v22  ;;  %v12602_v18 = vld [vmem:[%s16568_s9 + $0x240] ss:$8 sps:$4 sm:$0xff]   ;;  %v13640_v20 = vld [vmem:[%s16569_s7 + $0x30] ss:$12 sps:$4 sm:$0xff]   ;;  %v12562_v22 = vld [vmem:[%s16569_s7 + $0x98] ss:$12 sps:$4 sm:$0xff]  }
  0x30   :  { %10270 = vmatmul.mubr.msk.bf16.gmra.mxu1 %vm584_vm0, %v12512_v36  ;;  %v12579_v21 = vld [vmem:[%s16568_s9 + $0x200] ss:$8 sps:$4 sm:$0xff]   ;;  %v12588_v23 = vld [vmem:[%s16568_s9 + $0x1f4] ss:$8 sps:$4 sm:$0xff]   ;;  %v12586_v27 = vld [vmem:[%s16568_s9 + $0x1f0] ss:$8 sps:$4 sm:$0xff]  }
  0x31   :  { %800 = vmatprep.mubr.bf16.mxu1 %v13212_v2  ;;  %1267 = vmatpush1.bf16.msra.mxu1 %v12530_v40  ;;  %v13675_v30 = vld [vmem:[%s16569_s7 + $0xb0] ss:$12 sps:$4 sm:$0xff]   ;;  %v12601_v35 = vld [vmem:[%s16568_s9 + $0x1c4] ss:$8 sps:$4 sm:$0xff]   ;;  %v12599_v36 = vld [vmem:[%s16568_s9 + $0x1c0] ss:$8 sps:$4 sm:$0xff]  }
  0x32   :  { %630 = vmatpush1.bf16.msra.mxu0 %v12471_v24  ;;  %1268 = vmatprep.subr.bf16.mxu1 %v12535_v41  ;;  %v13654_v24 = vld [vmem:[%s16569_s7 + $0x4c] ss:$12 sps:$4 sm:$0xff]   ;;  %v12598_v31 = vld [vmem:[%s16568_s9 + $0x1d4] ss:$8 sps:$4 sm:$0xff]   ;;  %102 = vst.msk [vmem:[#allocation2 + $0x40] sm:$0xff] %vm13835_vm3, %v13212_v2  ;;  %103 = vst.msk [vmem:[#allocation2 + $0x48] sm:$0xff] %vm13835_vm3, %v13212_v2 }
  0x33   :  { %631 = vmatprep.subr.bf16.mxu0 %v12472_v25  ;;  %v12613_v25 = vld [vmem:[%s16568_s9 + $0x3b4] ss:$8 sps:$4 sm:$0xff]   ;;  %v12596_v34 = vld [vmem:[%s16568_s9 + $0x1d0] ss:$8 sps:$4 sm:$0xff]   ;;  %v13715_v39 = vld [vmem:[%s16569_s7 + $0x60] ss:$12 sps:$4 sm:$0xff]  }
  0x34   :  { %v13720_v40 = vld [vmem:[%s16569_s7 + $0x7c] ss:$12 sps:$4 sm:$0xff]   ;;  %v13730_v41 = vld [vmem:[%s16569_s7 + $0xe0] ss:$12 sps:$4 sm:$0xff]   ;;  %104 = vst.msk [vmem:[#allocation2 + $0x50] sm:$0xff] %vm13835_vm3, %v13212_v2  ;;  %105 = vst.msk [vmem:[#allocation2 + $0x58] sm:$0xff] %vm13835_vm3, %v13212_v2 }
  0x35   :  { %1269 = vmatpush1.bf16.msra.mxu1 %v12533_v45  ;;  %v13755_v45 = vld [vmem:[%s16569_s7 + $0xac] ss:$12 sps:$4 sm:$0xff]   ;;  %106 = vst.msk [vmem:[#allocation2 + $0x60] sm:$0xff] %vm13835_vm3, %v13212_v2  ;;  %107 = vst.msk [vmem:[#allocation2 + $0x68] sm:$0xff] %vm13835_vm3, %v13212_v2 }
  0x36   :  { %632 = vmatpush2.bf16.msra.mxu0 %v12474_v28  ;;  %1270 = vmatprep.subr.bf16.mxu1 %v12542_v46  ;;  %v12591_v28 = vld [vmem:[%s16568_s9 + $0x1e4] ss:$8 sps:$4 sm:$0xff]   ;;  %v12608_v46 = vld [vmem:[%s16568_s9 + $0x2f0] ss:$8 sps:$4 sm:$0xff]   ;;  %108 = vst.msk [vmem:[#allocation2 + $0x70] sm:$0xff] %vm13835_vm3, %v13212_v2  ;;  %109 = vst.msk [vmem:[#allocation2 + $0x78] sm:$0xff] %vm13835_vm3, %v13212_v2 }
  0x37   :  { %633 = vmatprep.subr.bf16.mxu0 %v12475_v29  ;;  %v12589_v29 = vld [vmem:[%s16568_s9 + $0x1e0] ss:$8 sps:$4 sm:$0xff]   ;;  %110 = vst.msk [vmem:[#allocation2 + $0x80] sm:$0xff] %vm13835_vm3, %v13212_v2  ;;  %111 = vst.msk [vmem:[#allocation2 + $0x88] sm:$0xff] %vm13835_vm3, %v13212_v2 }
  0x38   :  { %10271 = vmatmul.mubr.msk.bf16.gmra.mxu1 %vm584_vm0, %v12516_v44  ;;  %v13750_v44 = vld [vmem:[%s16569_s7 + $0x90] ss:$12 sps:$4 sm:$0xff]   ;;  %112 = vst.msk [vmem:[#allocation2 + $0x90] sm:$0xff] %vm13835_vm3, %v13212_v2  ;;  %113 = vst.msk [vmem:[#allocation2 + $0x98] sm:$0xff] %vm13835_vm3, %v13212_v2 }
  0x39   :  { %810 = vmatprep.mubr.bf16.mxu1 %v13212_v2  ;;  %1271 = vmatpush1.bf16.msra.mxu1 %v12540_v49  ;;  %v13776_v49 = vld [vmem:[%s16569_s7 + $0xa8] ss:$12 sps:$4 sm:$0xff]   ;;  %114 = vst.msk [vmem:[#allocation2 + $0xa0] sm:$0xff] %vm13835_vm3, %v13212_v2  ;;  %115 = vst.msk [vmem:[#allocation2 + $0xa8] sm:$0xff] %vm13835_vm3, %v13212_v2 }
  0x3a   :  { %634 = vmatpush2.bf16.msra.mxu0 %v12477_v32  ;;  %1272 = vmatprep.subr.bf16.mxu1 %v12545_v50  ;;  %v13683_v32 = vld [vmem:[%s16569_s7 + $0x48] ss:$12 sps:$4 sm:$0xff]   ;;  %v13781_v50 = vld [vmem:[%s16569_s7 + $0xc4] ss:$12 sps:$4 sm:$0xff]   ;;  %116 = vst.msk [vmem:[#allocation2 + $0xb0] sm:$0xff] %vm13835_vm3, %v13212_v2  ;;  %117 = vst.msk [vmem:[#allocation2 + $0xb8] sm:$0xff] %vm13835_vm3, %v13212_v2 }
  0x3b   :  { %635 = vmatprep.subr.bf16.mxu0 %v12478_v33  ;;  %v13688_v33 = vld [vmem:[%s16569_s7 + $0x64] ss:$12 sps:$4 sm:$0xff]   ;;  %118 = vst.msk [vmem:[#allocation2 + $0xc0] sm:$0xff] %vm13835_vm3, %v13212_v2  ;;  %119 = vst.msk [vmem:[#allocation2 + $0xc8] sm:$0xff] %vm13835_vm3, %v13212_v2 }
  0x3c   :  { %120 = vst.msk [vmem:[#allocation2 + $0xd0] sm:$0xff] %vm13835_vm3, %v13212_v2  ;;  %121 = vst.msk [vmem:[#allocation2 + $0xd8] sm:$0xff] %vm13835_vm3, %v13212_v2 }
  0x3d   :  { %1273 = vmatpush1.bf16.msra.mxu1 %v12543_v53  ;;  %v12620_v53 = vld [vmem:[%s16568_s9 + $0x2c0] ss:$8 sps:$4 sm:$0xff]   ;;  %122 = vst.msk [vmem:[#allocation2 + $0xe0] sm:$0xff] %vm13835_vm3, %v13212_v2  ;;  %123 = vst.msk [vmem:[#allocation2 + $0xe8] sm:$0xff] %vm13835_vm3, %v13212_v2 }
  0x3e   :  { %636 = vmatpush2.bf16.msra.mxu0 %v12480_v37  ;;  %1274 = vmatprep.subr.bf16.mxu1 %v12555_v55  ;;  %v13707_v37 = vld [vmem:[%s16569_s7 + $0xc8] ss:$12 sps:$4 sm:$0xff]   ;;  %v13802_v55 = vld [vmem:[%s16569_s7 + $0xc0] ss:$12 sps:$4 sm:$0xff]   ;;  %124 = vst.msk [vmem:[#allocation2 + $0xf0] sm:$0xff] %vm13835_vm3, %v13212_v2  ;;  %125 = vst.msk [vmem:[#allocation2 + $0xf8] sm:$0xff] %vm13835_vm3, %v13212_v2 }
  0x3f   :  { %637 = vmatprep.subr.bf16.mxu0 %v12484_v38  ;;  %v12610_v38 = vld [vmem:[%s16568_s9 + $0x2f4] ss:$8 sps:$4 sm:$0xff]   ;;  %126 = vst.msk [vmem:[#allocation2 + $0x100] sm:$0xff] %vm13835_vm3, %v13212_v2  ;;  %127 = vst.msk [vmem:[#allocation2 + $0x108] sm:$0xff] %vm13835_vm3, %v13212_v2 }
  0x40   :  { %10272 = vmatmul.mubr.msk.bf16.gmra.mxu1 %vm584_vm0, %v12529_v54  ;;  %v12625_v54 = vld [vmem:[%s16568_s9 + $0x2b4] ss:$8 sps:$4 sm:$0xff]   ;;  %128 = vst.msk [vmem:[#allocation2 + $0x110] sm:$0xff] %vm13835_vm3, %v13212_v2  ;;  %129 = vst.msk [vmem:[#allocation2 + $0x118] sm:$0xff] %vm13835_vm3, %v13212_v2 }
  0x41   :  { %820 = vmatprep.mubr.bf16.mxu1 %v13212_v2  ;;  %1275 = vmatpush1.bf16.msra.mxu1 %v12553_v58  ;;  %v12628_v58 = vld [vmem:[%s16568_s9 + $0x2a4] ss:$8 sps:$4 sm:$0xff]   ;;  %130 = vst.msk [vmem:[#allocation2 + $0x120] sm:$0xff] %vm13835_vm3, %v13212_v2  ;;  %131 = vst.msk [vmem:[#allocation2 + $0x128] sm:$0xff] %vm13835_vm3, %v13212_v2 }
  0x42   :  { %638 = vmatpush2.bf16.msra.mxu0 %v12486_v42  ;;  %1276 = vmatprep.subr.bf16.mxu1 %v12558_v59  ;;  %v13735_v42 = vld [vmem:[%s16569_s7 + $0x78] ss:$12 sps:$4 sm:$0xff]   ;;  %v13819_v59 = vld [vmem:[%s16568_s9 + $0x2a0] ss:$8 sps:$4 sm:$0xff]   ;;  %132 = vst.msk [vmem:[#allocation2 + $0x130] sm:$0xff] %vm13835_vm3, %v13212_v2  ;;  %133 = vst.msk [vmem:[#allocation2 + $0x138] sm:$0xff] %vm13835_vm3, %v13212_v2 }
  0x43   :  { %639 = vmatprep.subr.bf16.mxu0 %v12490_v43  ;;  %v13740_v43 = vld [vmem:[%s16569_s7 + $0x94] ss:$12 sps:$4 sm:$0xff]   ;;  %134 = vst.msk [vmem:[#allocation2 + $0x140] sm:$0xff] %vm13835_vm3, %v13212_v2  ;;  %135 = vst.msk [vmem:[#allocation2 + $0x148] sm:$0xff] %vm13835_vm3, %v13212_v2 }
  0x44   :  { %136 = vst.msk [vmem:[#allocation2 + $0x150] sm:$0xff] %vm13835_vm3, %v13212_v2  ;;  %137 = vst.msk [vmem:[#allocation2 + $0x158] sm:$0xff] %vm13835_vm3, %v13212_v2 }
  0x45   :  { %1277 = vmatpush1.bf16.msra.mxu1 %v12556_v63  ;;  %v13842_v63 = vld [vmem:[%s16568_s9 + $0x290] ss:$8 sps:$4 sm:$0xff]   ;;  %138 = vst.msk [vmem:[#allocation2 + $0x160] sm:$0xff] %vm13835_vm3, %v13212_v2  ;;  %139 = vst.msk [vmem:[#allocation2 + $0x168] sm:$0xff] %vm13835_vm3, %v13212_v2 }
  0x46   :  { %640 = vmatpush2.bf16.msra.mxu0 %v12492_v47  ;;  %1278 = vmatprep.subr.bf16.mxu1 %v12565_v0  ;;  %v12614_v47 = vld [vmem:[%s16568_s9 + $0x2e0] ss:$8 sps:$4 sm:$0xff]   ;;  %140 = vst.msk [vmem:[#allocation2 + $0x170] sm:$0xff] %vm13835_vm3, %v13212_v2  ;;  %141 = vst.msk [vmem:[#allocation2 + $0x178] sm:$0xff] %vm13835_vm3, %v13212_v2  ;;  %v12637_v0 = vld [vmem:[%s16568_s9 + $0x284] ss:$8 sps:$4 sm:$0xff]  }
  0x47   :  { %641 = vmatprep.subr.bf16.mxu0 %v12496_v48  ;;  %v12619_v48 = vld [vmem:[%s16568_s9 + $0x2d4] ss:$8 sps:$4 sm:$0xff]   ;;  %142 = vst.msk [vmem:[#allocation2 + $0x180] sm:$0xff] %vm13835_vm3, %v13212_v2  ;;  %143 = vst.msk [vmem:[#allocation2 + $0x188] sm:$0xff] %vm13835_vm3, %v13212_v2 }
  0x48   :  { %10273 = vmatmul.mubr.msk.bf16.gmra.mxu1 %vm584_vm0, %v12539_v62  ;;  %144 = vst.msk [vmem:[#allocation2 + $0x190] sm:$0xff] %vm13835_vm3, %v13212_v2  ;;  %145 = vst.msk [vmem:[#allocation2 + $0x198] sm:$0xff] %vm13835_vm3, %v13212_v2 }
  0x49   :  { %830 = vmatprep.mubr.bf16.mxu1 %v13212_v2  ;;  %1279 = vmatpush2.bf16.msra.mxu1 %v12563_v6  ;;  %146 = vst.msk [vmem:[#allocation2 + $0x1a0] sm:$0xff] %vm13835_vm3, %v13212_v2  ;;  %147 = vst.msk [vmem:[#allocation2 + $0x1a8] sm:$0xff] %vm13835_vm3, %v13212_v2  ;;  %v12638_v6 = vld [vmem:[%s16568_s9 + $0x370] ss:$8 sps:$4 sm:$0xff]  }
  0x4a   :  { %642 = vmatpush2.bf16.msra.mxu0 %v12498_v51  ;;  %1280 = vmatprep.subr.bf16.mxu1 %v12568_v7  ;;  %v12617_v51 = vld [vmem:[%s16568_s9 + $0x2d0] ss:$8 sps:$4 sm:$0xff]   ;;  %148 = vst.msk [vmem:[#allocation2 + $0x1b0] sm:$0xff] %vm13835_vm3, %v13212_v2  ;;  %149 = vst.msk [vmem:[#allocation2 + $0x1b8] sm:$0xff] %vm13835_vm3, %v13212_v2  ;;  %v12643_v7 = vld [vmem:[%s16568_s9 + $0x364] ss:$8 sps:$4 sm:$0xff]  }
  0x4b   :  { %643 = vmatprep.subr.bf16.mxu0 %v12502_v52  ;;  %v12622_v52 = vld [vmem:[%s16568_s9 + $0x2c4] ss:$8 sps:$4 sm:$0xff]   ;;  %150 = vst.msk [vmem:[#allocation2 + $0x1c0] sm:$0xff] %vm13835_vm3, %v13212_v2  ;;  %151 = vst.msk [vmem:[#allocation2 + $0x1c8] sm:$0xff] %vm13835_vm3, %v13212_v2 }
  0x4c   :  { %152 = vst.msk [vmem:[#allocation2 + $0x1d0] sm:$0xff] %vm13835_vm3, %v13212_v2  ;;  %153 = vst.msk [vmem:[#allocation2 + $0x1d8] sm:$0xff] %vm13835_vm3, %v13212_v2 }
  0x4d   :  { %1281 = vmatpush2.bf16.msra.mxu1 %v12566_v11  ;;  %v12649_v11 = vld [vmem:[%s16568_s9 + $0x394] ss:$8 sps:$4 sm:$0xff]  }
  0x4e   :  { %644 = vmatpush2.bf16.msra.mxu0 %v12504_v56  ;;  %1282 = vmatprep.subr.bf16.mxu1 %v12575_v13  ;;  %v13807_v56 = vld [vmem:[%s16569_s7 + $0xdc] ss:$12 sps:$4 sm:$0xff]   ;;  %v12647_v13 = vld [vmem:[%s16568_s9 + $0x390] ss:$8 sps:$4 sm:$0xff]  }
  0x4f   :  { %645 = vmatprep.subr.bf16.mxu0 %v12506_v57  ;;  %v12623_v57 = vld [vmem:[%s16568_s9 + $0x2b0] ss:$8 sps:$4 sm:$0xff]  }
  0x50   :  { %10274 = vmatmul.mubr.msk.bf16.gmra.mxu1 %vm584_vm0, %v12552_v9  ;;  %v14059_v9 = vld [vmem:[%s16569_s7 + $0x8] ss:$12 sps:$4 sm:$0xff]  }
  0x51   :  { %840 = vmatprep.mubr.bf16.mxu1 %v13212_v2  ;;  %1283 = vmatpush2.bf16.msra.mxu1 %v12573_v16  ;;  %v12652_v16 = vld [vmem:[%s16568_s9 + $0x344] ss:$8 sps:$4 sm:$0xff]  }
  0x52   :  { %646 = vmatpush2.bf16.msra.mxu0 %v12508_v60  ;;  %1284 = vmatprep.subr.bf16.mxu1 %v12581_v17  ;;  %v13826_v60 = vld [vmem:[%s16568_s9 + $0x294] ss:$8 sps:$4 sm:$0xff]   ;;  %v12665_v17 = vld [vmem:[%s16568_s9 + $0x380] ss:$8 sps:$4 sm:$0xff]  }
  0x53   :  { %1403 = vmatprep.subr.bf16.mxu0 %v12522_v61  ;;  %v13832_v61 = vld [vmem:[%s16569_s7 + $0xd8] ss:$12 sps:$4 sm:$0xff]  }
  0x55   :  { %648 = vmatmul.mubr.bf16.vlgmr.msra.gmra.mxu0 %v13570_v1  ;;  %1285 = vmatpush2.bf16.msra.mxu1 %v12579_v21  ;;  %v12653_v21 = vld [vmem:[%s16568_s9 + $0x330] ss:$8 sps:$4 sm:$0xff]  }
  0x56   :  { %657 = vmatprep.mubr.bf16.mxu0 %v13575_v3  ;;  %1404 = vmatpush1.bf16.msra.mxu0 %v12520_v4  ;;  %v12611_v4 = vld [vmem:[%s16568_s9 + $0x3b0] ss:$8 sps:$4 sm:$0xff]  }
  0x57   :  { %1405 = vmatprep.subr.bf16.mxu0 %v12548_v5  ;;  %1286 = vmatprep.subr.bf16.mxu1 %v12588_v23  ;;  %v12631_v5 = vld [vmem:[%s16568_s9 + $0x3a4] ss:$8 sps:$4 sm:$0xff]  }
  0x58   :  { %10275 = vmatmul.mubr.msk.bf16.gmra.mxu1 %vm584_vm0, %v12562_v22  ;;  %v12658_v22 = vld [vmem:[%s16568_s9 + $0x324] ss:$8 sps:$4 sm:$0xff]  }
  0x59   :  { %850 = vmatprep.mubr.bf16.mxu1 %v13212_v2  ;;  %1287 = vmatpush2.bf16.msra.mxu1 %v12586_v27  ;;  %v14115_v23 = vld [vmem:[%s16569_s7 + $0x38] ss:$12 sps:$4 sm:$0xff]  }
  0x5a   :  { %1406 = vmatpush1.bf16.msra.mxu0 %v12546_v8  ;;  %1288 = vmatprep.subr.bf16.mxu1 %v12591_v28  ;;  %v12629_v8 = vld [vmem:[%s16568_s9 + $0x3a0] ss:$8 sps:$4 sm:$0xff]   ;;  %v12659_v27 = vld [vmem:[%s16568_s9 + $0x310] ss:$8 sps:$4 sm:$0xff]   ;;  %v12664_v28 = vld [vmem:[%s16568_s9 + $0x304] ss:$8 sps:$4 sm:$0xff]  }
  0x5b   :  { %1407 = vmatprep.subr.bf16.mxu0 %v12578_v12  ;;  %v12646_v12 = vld [vmem:[%s16568_s9 + $0x354] ss:$8 sps:$4 sm:$0xff]  }
  0x5d   :  { %658 = vmatmul.mubr.bf16.gmra.mxu0 %v13602_v10  ;;  %1289 = vmatpush2.bf16.msra.mxu1 %v12589_v29  ;;  %v14137_v29 = vld [vmem:[%s16569_s7 + $0x50] ss:$12 sps:$4 sm:$0xff]  }
  0x5e   :  { %667 = vmatprep.mubr.bf16.mxu0 %v13616_v14  ;;  %1408 = vmatpush1.bf16.msra.mxu0 %v12576_v15  ;;  %v12667_v15 = vld [vmem:[%s16568_s9 + $0x384] ss:$8 sps:$4 sm:$0xff]  }
  0x5f   :  { %1409 = vmatprep.subr.bf16.mxu0 %v12604_v19  ;;  %1290 = vmatprep.subr.bf16.mxu1 %v12598_v31  ;;  %v12650_v19 = vld [vmem:[%s16568_s9 + $0x340] ss:$8 sps:$4 sm:$0xff]  }
  0x60   :  { %10276 = vmatmul.mubr.msk.bf16.gmra.mxu1 %vm584_vm0, %v13675_v30  ;;  %v12662_v31 = vld [vmem:[%s16568_s9 + $0x300] ss:$8 sps:$4 sm:$0xff]  }
  0x61   :  { %860 = vmatprep.mubr.bf16.mxu1 %v13212_v2  ;;  %1291 = vmatpush2.bf16.msra.mxu1 %v12596_v34  ;;  %v14150_v34 = vld [vmem:[%s16569_s7 + $0x68] ss:$12 sps:$4 sm:$0xff]  }
  0x62   :  { %1410 = vmatpush1.bf16.msra.mxu0 %v12602_v18  ;;  %1292 = vmatprep.subr.bf16.mxu1 %v12601_v35  ;;  %v14093_v18 = vld [vmem:[%s16569_s7 + $0x20] ss:$12 sps:$4 sm:$0xff]  }
  0x63   :  { %2050 = vmatprep.subr.bf16.mxu0 %v12613_v25  ;;  %v12661_v25 = vld [vmem:[%s16568_s9 + $0x314] ss:$8 sps:$4 sm:$0xff]   ;;  %v14160_v35 = vld [vmem:[%s16569_s7 + $0x80] ss:$12 sps:$4 sm:$0xff]  }
  0x65   :  { %668 = vmatmul.mubr.bf16.gmra.mxu0 %v13640_v20  ;;  %1293 = vmatpush2.bf16.msra.mxu1 %v12599_v36  ;;  %v13179_v36 = vld [vmem:[%s16569_s7 + $0x4] ss:$12 sps:$4 sm:$0xff]  }
  0x66   :  { %677 = vmatprep.mubr.bf16.mxu0 %v13654_v24  ;;  %1909 = vmatprep.subr.bf16.mxu1 %v12610_v38 }
  0x68   :  { %10277 = vmatmul.mubr.msk.bf16.gmra.mxu1 %vm584_vm0, %v13707_v37 }
  0x69   :  { %870 = vmatprep.mubr.bf16.mxu1 %v13212_v2 }
  0x6d   :  { %678 = vmatmul.mubr.bf16.gmra.mxu0 %v13683_v32 }
  0x6e   :  { %687 = vmatprep.mubr.bf16.mxu0 %v13688_v33 }
  0x70   :  { %10278 = vmatmul.mubr.msk.bf16.gmra.mxu1 %vm584_vm0, %v13730_v41 }
  0x71   :  { %1294 = vmatprep.mubr.bf16.mxu1 %v13442_v26  ;;  %v12616_v26 = vld [vmem:[%s16568_s9 + $0x2e4] ss:$8 sps:$4 sm:$0xff]  }
  0x75   :  { %688 = vmatmul.mubr.bf16.gmra.mxu0 %v13715_v39 }
  0x76   :  { %697 = vmatprep.mubr.bf16.mxu0 %v13720_v40 }
  0x78   :  { %1295 = vmatmul.mubr.bf16.vlgmr.msra.gmra.mxu1 %v13570_v1  ;;  %v12635_v1 = vld [vmem:[%s16568_s9 + $0x280] ss:$8 sps:$4 sm:$0xff]  }
  0x79   :  { %1304 = vmatprep.mubr.bf16.mxu1 %v13575_v3  ;;  %1910 = vmatpush1.bf16.msra.mxu1 %v12608_v46  ;;  %v12640_v3 = vld [vmem:[%s16568_s9 + $0x374] ss:$8 sps:$4 sm:$0xff]  }
  0x7a   :  { %1911 = vmatprep.subr.bf16.mxu1 %v12616_v26 }
  0x7d   :  { %698 = vmatmul.mubr.bf16.gmra.mxu0 %v13735_v42  ;;  %1912 = vmatpush1.bf16.msra.mxu1 %v12614_v47 }
  0x7e   :  { %707 = vmatprep.mubr.bf16.mxu0 %v13740_v43  ;;  %1913 = vmatprep.subr.bf16.mxu1 %v12619_v48 }
  0x80   :  { %1305 = vmatmul.mubr.bf16.gmra.mxu1 %v13602_v10  ;;  %v12641_v10 = vld [vmem:[%s16568_s9 + $0x360] ss:$8 sps:$4 sm:$0xff]  }
  0x81   :  { %1314 = vmatprep.mubr.bf16.mxu1 %v13616_v14  ;;  %1914 = vmatpush1.bf16.msra.mxu1 %v12617_v51  ;;  %v12644_v14 = vld [vmem:[%s16568_s9 + $0x350] ss:$8 sps:$4 sm:$0xff]  }
  0x82   :  { %1915 = vmatprep.subr.bf16.mxu1 %v12622_v52 }
  0x85   :  { %708 = vmatmul.mubr.bf16.gmra.mxu0 %v13750_v44  ;;  %1916 = vmatpush1.bf16.msra.mxu1 %v12620_v53 }
  0x86   :  { %717 = vmatprep.mubr.bf16.mxu0 %v13755_v45  ;;  %1917 = vmatprep.subr.bf16.mxu1 %v12625_v54 }
  0x88   :  { %1315 = vmatmul.mubr.bf16.gmra.mxu1 %v13640_v20  ;;  %v12655_v20 = vld [vmem:[%s16568_s9 + $0x334] ss:$8 sps:$4 sm:$0xff]  }
  0x89   :  { %1324 = vmatprep.mubr.bf16.mxu1 %v13654_v24  ;;  %1918 = vmatpush1.bf16.msra.mxu1 %v12623_v57  ;;  %v12656_v24 = vld [vmem:[%s16568_s9 + $0x320] ss:$8 sps:$4 sm:$0xff]  }
  0x8a   :  { %1919 = vmatprep.subr.bf16.mxu1 %v12628_v58 }
  0x8d   :  { %718 = vmatmul.mubr.bf16.gmra.mxu0 %v13776_v49  ;;  %1920 = vmatpush1.bf16.msra.mxu1 %v13819_v59 }
  0x8e   :  { %727 = vmatprep.mubr.bf16.mxu0 %v13781_v50  ;;  %1921 = vmatprep.subr.bf16.mxu1 %v13826_v60 }
  0x90   :  { %1325 = vmatmul.mubr.bf16.gmra.mxu1 %v13683_v32 }
  0x91   :  { %1334 = vmatprep.mubr.bf16.mxu1 %v13688_v33  ;;  %1922 = vmatpush1.bf16.msra.mxu1 %v13842_v63 }
  0x92   :  { %1923 = vmatprep.subr.bf16.mxu1 %v12637_v0 }
  0x95   :  { %728 = vmatmul.mubr.bf16.gmra.mxu0 %v13802_v55  ;;  %1924 = vmatpush1.bf16.msra.mxu1 %v12635_v1 }
  0x96   :  { %737 = vmatprep.mubr.bf16.mxu0 %v13807_v56  ;;  %1925 = vmatprep.subr.bf16.mxu1 %v12640_v3 }
  0x98   :  { %1335 = vmatmul.mubr.bf16.gmra.mxu1 %v13715_v39 }
  0x99   :  { %1344 = vmatprep.mubr.bf16.mxu1 %v13720_v40  ;;  %1926 = vmatpush2.bf16.msra.mxu1 %v12638_v6 }
  0x9a   :  { %1927 = vmatprep.subr.bf16.mxu1 %v12643_v7 }
  0x9d   :  { %738 = vmatmul.mubr.bf16.gmra.mxu0 %v13832_v61  ;;  %1928 = vmatpush2.bf16.msra.mxu1 %v12641_v10 }
  0x9e   :  { %1427 = vmatprep.mubr.bf16.mxu0 %v13212_v2  ;;  %1929 = vmatprep.subr.bf16.mxu1 %v12646_v12 }
  0xa0   :  { %1345 = vmatmul.mubr.bf16.gmra.mxu1 %v13735_v42 }
  0xa1   :  { %1354 = vmatprep.mubr.bf16.mxu1 %v13740_v43  ;;  %1930 = vmatpush2.bf16.msra.mxu1 %v12644_v14 }
  0xa2   :  { %1931 = vmatprep.subr.bf16.mxu1 %v12652_v16 }
  0xa5   :  { %10379 = vmatmul.mubr.msk.bf16.vlgmr.msra.gmra.mxu0 %vm584_vm0, %v14059_v9  ;;  %1932 = vmatpush2.bf16.msra.mxu1 %v12650_v19 }
  0xa6   :  { %1437 = vmatprep.mubr.bf16.mxu0 %v13212_v2  ;;  %2051 = vmatpush1.bf16.msra.mxu0 %v12611_v4 }
  0xa7   :  { %2052 = vmatprep.subr.bf16.mxu0 %v12631_v5  ;;  %1933 = vmatprep.subr.bf16.mxu1 %v12655_v20 }
  0xa8   :  { %1355 = vmatmul.mubr.bf16.gmra.mxu1 %v13750_v44 }
  0xa9   :  { %1364 = vmatprep.mubr.bf16.mxu1 %v13755_v45  ;;  %1934 = vmatpush2.bf16.msra.mxu1 %v12653_v21 }
  0xaa   :  { %2053 = vmatpush1.bf16.msra.mxu0 %v12629_v8  ;;  %1935 = vmatprep.subr.bf16.mxu1 %v12658_v22 }
  0xab   :  { %2054 = vmatprep.subr.bf16.mxu0 %v12649_v11 }
  0xad   :  { %10380 = vmatmul.mubr.msk.bf16.gmra.mxu0 %vm584_vm0, %v14093_v18  ;;  %1936 = vmatpush2.bf16.msra.mxu1 %v12656_v24 }
  0xae   :  { %1447 = vmatprep.mubr.bf16.mxu0 %v13212_v2  ;;  %2055 = vmatpush1.bf16.msra.mxu0 %v12647_v13 }
  0xaf   :  { %2056 = vmatprep.subr.bf16.mxu0 %v12667_v15  ;;  %1937 = vmatprep.subr.bf16.mxu1 %v12661_v25 }
  0xb0   :  { %1365 = vmatmul.mubr.bf16.gmra.mxu1 %v13776_v49 }
  0xb1   :  { %1374 = vmatprep.mubr.bf16.mxu1 %v13781_v50  ;;  %1938 = vmatpush2.bf16.msra.mxu1 %v12659_v27 }
  0xb2   :  { %2057 = vmatpush1.bf16.msra.mxu0 %v12665_v17  ;;  %1939 = vmatprep.subr.bf16.mxu1 %v12664_v28 }
  0xb5   :  { %10381 = vmatmul.mubr.msk.bf16.gmra.mxu0 %vm584_vm0, %v14115_v23  ;;  %1940 = vmatpush2.bf16.msra.mxu1 %v12662_v31 }
  0xb6   :  { %1457 = vmatprep.mubr.bf16.mxu0 %v13212_v2 }
  0xb8   :  { %1375 = vmatmul.mubr.bf16.gmra.mxu1 %v13802_v55 }
  0xb9   :  { %1384 = vmatprep.mubr.bf16.mxu1 %v13807_v56 }
  0xbd   :  { %10382 = vmatmul.mubr.msk.bf16.gmra.mxu0 %vm584_vm0, %v14137_v29 }
  0xbe   :  { %1467 = vmatprep.mubr.bf16.mxu0 %v13212_v2 }
  0xc0   :  { %1385 = vmatmul.mubr.bf16.gmra.mxu1 %v13832_v61 }
  0xc1   :  { %1941 = vmatprep.mubr.bf16.mxu1 %v13179_v36 }
  0xc5   :  { %10383 = vmatmul.mubr.msk.bf16.gmra.mxu0 %vm584_vm0, %v14150_v34 }
  0xc6   :  { %1477 = vmatprep.mubr.bf16.mxu0 %v13212_v2 }
  0xcd   :  { %10384 = vmatmul.mubr.msk.bf16.gmra.mxu0 %vm584_vm0, %v14160_v35 }
  0xce   :  { %1487 = vmatprep.mubr.bf16.mxu0 %v13212_v2 }
  0xcf   :  { %33 = vsyncpa [#allocation10], 0  ;;  %v13180_v38 = vld [vmem:[%s16569_s7] ss:$12 sps:$4 sm:$0xff]   ;;  %v14174_v46 = vld [vmem:[%s16569_s7 + $0x98] ss:$12 sps:$4 sm:$0xff]  }
  0xd0   :  { %1942 = vmatmul.mubr.bf16.vlgmr.msra.gmra.mxu1 %v13180_v38  ;;  %v13182_v26 = vld [vmem:[%s16569_s7 + $0x1c] ss:$12 sps:$4 sm:$0xff]   ;;  %v13183_v47 = vld [vmem:[%s16569_s7 + $0x18] ss:$12 sps:$4 sm:$0xff]   ;;  %v13184_v48 = vld [vmem:[%s16569_s7 + $0x34] ss:$12 sps:$4 sm:$0xff]  }
  0xd1   :  { %1951 = vmatprep.mubr.bf16.mxu1 %v13182_v26  ;;  %v13185_v51 = vld [vmem:[%s16569_s7 + $0x30] ss:$12 sps:$4 sm:$0xff]   ;;  %v13186_v52 = vld [vmem:[%s16569_s7 + $0x4c] ss:$12 sps:$4 sm:$0xff]   ;;  %s16572_s10 = sld [smem:[#allocation15_spill]]  ;;  %vm3025_vm4 = vcmask 785408  }
  0xd2   :  { %s16573_s2 = sld [smem:[#allocation14_spill]]  ;;  %vm3725_vm5 = vcmask 1046528   ;;  %vm3694_vm6 = vcmask 244736   ;;  %vm3501_vm7 = vcmask 1042432   ;;  %vm3502_vm8 = vcmask 243716  }
  0xd3   :  { %s16574_s6 = sld [smem:[#allocation18_spill]]  ;;  %vm3503_vm9 = vmor %vm3502_vm8, %vm3501_vm7  ;;  %vm3922_vm10 = vcmask 633856   ;;  %vm3942_vm11 = vcmask 632832   ;;  %vm5612_vm12 = vcmask 637952   ;;  %vm5501_vm13 = vcmask 631808  }
  0xd4   :  { %s16575_s11 = sld [smem:[#allocation21_spill]]  ;;  %vm5839_vm14 = vcmask 306176   ;;  %vm5859_vm15 = vcmask 304128   ;;  %vm7405_vm2 = vcmask 310272   ;;  %vm8900_vm8 = vcmask 60416  }
  0xd5   :  { %10385 = vmatmul.mubr.msk.bf16.gmra.mxu0 %vm584_vm0, %v14174_v46  ;;  %s16577_s5 = sld [smem:[#allocation16_spill]] }
  0xd6   :  { %1497 = vmatprep.mubr.bf16.mxu0 %v13212_v2  ;;  %s16581_s1 = sld [smem:[#allocation22_spill]] }
  0xd7   :  { %s16582_s30 = sld [smem:[#allocation23_spill]] }
  0xd8   :  { %1952 = vmatmul.mubr.bf16.gmra.mxu1 %v13183_v47 }
  0xd9   :  { %1961 = vmatprep.mubr.bf16.mxu1 %v13184_v48  ;;  %v13187_v48 = vld [vmem:[%s16569_s7 + $0xb0] ss:$12 sps:$4 sm:$0xff]  }
  0xdd   :  { %10386 = vmatmul.mubr.msk.bf16.gmra.mxu0 %vm584_vm0, %v13675_v30 }
  0xde   :  { %1507 = vmatprep.mubr.bf16.mxu0 %v13212_v2 }
  0xe0   :  { %1962 = vmatmul.mubr.bf16.gmra.mxu1 %v13185_v51 }
  0xe1   :  { %1971 = vmatprep.mubr.bf16.mxu1 %v13186_v52 }
  0xe5   :  { %10387 = vmatmul.mubr.msk.bf16.gmra.mxu0 %vm584_vm0, %v13707_v37 }
  0xe6   :  { %1517 = vmatprep.mubr.bf16.mxu0 %v13212_v2 }
  0xe8   :  { %1972 = vmatmul.mubr.bf16.gmra.mxu1 %v13683_v32  ;;  %v782_v30 = vpop.f32.mrf.mxu1 }
  0xe9   :  { %1981 = vmatprep.mubr.bf16.mxu1 %v13688_v33 }
  0xea   :  { %v784_v37 = vpop.f32.mrf.mxu1 }
  0xec   :  { %v786_v53 = vpop.f32.mrf.mxu1 }
  0xed   :  { %10388 = vmatmul.mubr.msk.bf16.gmra.mxu0 %vm584_vm0, %v13730_v41 }
  0xee   :  { %2074 = vmatprep.mubr.bf16.mxu0 %v13212_v2  ;;  %v788_v32 = vpop.f32.mrf.mxu1 }
  0xf0   :  { %1982 = vmatmul.mubr.bf16.gmra.mxu1 %v13715_v39  ;;  %v792_v54 = vpop.f32.mrf.mxu1 }
  0xf1   :  { %1991 = vmatprep.mubr.bf16.mxu1 %v13720_v40 }
  0xf2   :  { %v794_v33 = vpop.f32.mrf.mxu1 }
  0xf4   :  { %v796_v39 = vpop.f32.mrf.mxu1 }
  0xf5   :  { %10489 = vmatmul.mubr.msk.bf16.vlgmr.msra.gmra.mxu0 %vm584_vm0, %v14059_v9 }
  0xf6   :  { %2084 = vmatprep.mubr.bf16.mxu0 %v13212_v2  ;;  %v798_v41 = vpop.f32.mrf.mxu1 }
  0xf8   :  { %1992 = vmatmul.mubr.bf16.gmra.mxu1 %v13735_v42  ;;  %v802_v57 = vpop.f32.mrf.mxu1 }
  0xf9   :  { %2001 = vmatprep.mubr.bf16.mxu1 %v13740_v43 }
  0xfa   :  { %v804_v40 = vpop.f32.mrf.mxu1 }
  0xfc   :  { %v14220_v42 = vpop.f32.mrf.mxu1 }
  0xfd   :  { %10490 = vmatmul.mubr.msk.bf16.gmra.mxu0 %vm584_vm0, %v14093_v18 }
  0xfe   :  { %2094 = vmatprep.mubr.bf16.mxu0 %v13212_v2  ;;  %v14222_v58 = vpop.f32.mrf.mxu1 }
 0x100   :  { %2002 = vmatmul.mubr.bf16.gmra.mxu1 %v13750_v44  ;;  %v14224_v43 = vpop.f32.mrf.mxu1 }
 0x101   :  { %2011 = vmatprep.mubr.bf16.mxu1 %v13755_v45 }
 0x102   :  { %v14231_v44 = vpop.f32.mrf.mxu1 }
 0x104   :  { %v14233_v45 = vpop.f32.mrf.mxu1 }
 0x105   :  { %10491 = vmatmul.mubr.msk.bf16.gmra.mxu0 %vm584_vm0, %v14115_v23 }
 0x106   :  { %2104 = vmatprep.mubr.bf16.mxu0 %v13212_v2  ;;  %v14235_v59 = vpop.f32.mrf.mxu1 }
 0x108   :  { %2012 = vmatmul.mubr.bf16.gmra.mxu1 %v13776_v49  ;;  %v14237_v60 = vpop.f32.mrf.mxu1 }
 0x109   :  { %2021 = vmatprep.mubr.bf16.mxu1 %v13781_v50 }
 0x10a   :  { %v14244_v49 = vpop.f32.mrf.mxu1 }
 0x10c   :  { %v14246_v3 = vpop.f32.mrf.mxu1 }
 0x10d   :  { %10492 = vmatmul.mubr.msk.bf16.gmra.mxu0 %vm584_vm0, %v14137_v29 }
 0x10e   :  { %2114 = vmatprep.mubr.bf16.mxu0 %v13212_v2  ;;  %v14248_v6 = vpop.f32.mrf.mxu1 }
 0x110   :  { %2022 = vmatmul.mubr.bf16.gmra.mxu1 %v13802_v55 }
 0x111   :  { %2031 = vmatprep.mubr.bf16.mxu1 %v13807_v56  ;;  %v14252_v56 = vpop.f32.mrf.mxu1 }
 0x113   :  { %v14258_v11 = vpop.f32.mrf.mxu1 }
 0x115   :  { %v649_v63 = vpop.f32.mrf.mxu0  ;;  %10493 = vmatmul.mubr.msk.bf16.gmra.mxu0 %vm584_vm0, %v14150_v34  ;;  %v14262_v15 = vpop.f32.mrf.mxu1 }
 0x116   :  { %2124 = vmatprep.mubr.bf16.mxu0 %v13212_v2  ;;  %v783_v0 = vadd.f32 %v782_v30, %v649_v63 }
 0x117   :  { %v651_v50 = vpop.f32.mrf.mxu0 }
 0x118   :  { %v785_v1 = vadd.f32 %v784_v37, %v651_v50  ;;  %2032 = vmatmul.mubr.bf16.gmra.mxu1 %v13832_v61  ;;  %v14264_v61 = vpop.f32.mrf.mxu1 }
 0x119   :  { %v653_v4 = vpop.f32.mrf.mxu0 }
 0x11a   :  { %v11460_v5 = vpack.c.bf16 %v785_v1, %v783_v0  ;;  %v787_v7 = vadd.f32 %v786_v53, %v653_v4  ;;  %v14268_v21 = vpop.f32.mrf.mxu1 }
 0x11b   :  { %v655_v55 = vpop.f32.mrf.mxu0 }
 0x11c   :  { %1001 = vst.msk [vmem:[#allocation2] sm:$0xff] %vm13835_vm3, %v11460_v5  ;;  %v789_v8 = vadd.f32 %v788_v32, %v655_v55  ;;  %v14273_v24 = vpop.f32.mrf.mxu1 }
 0x11d   :  { %v659_v9 = vpop.f32.mrf.mxu0  ;;  %10494 = vmatmul.mubr.msk.bf16.gmra.mxu0 %vm584_vm0, %v14160_v35 }
 0x11e   :  { %v11461_v10 = vpack.c.bf16 %v789_v8, %v787_v7  ;;  %2134 = vmatprep.mubr.bf16.mxu0 %v13212_v2  ;;  %v793_v13 = vadd.f32 %v792_v54, %v659_v9  ;;  %v14277_v29 = vpop.f32.mrf.mxu1 }
 0x11f   :  { %v661_v12 = vpop.f32.mrf.mxu0 }
 0x120   :  { %1002 = vst.msk [vmem:[#allocation2 + $0x8] sm:$0xff] %vm13835_vm3, %v11461_v10  ;;  %v795_v14 = vadd.f32 %v794_v33, %v661_v12  ;;  %v14279_v35 = vpop.f32.mrf.mxu1 }
 0x121   :  { %v663_v16 = vpop.f32.mrf.mxu0 }
 0x122   :  { %v11462_v17 = vpack.c.bf16 %v795_v14, %v793_v13  ;;  %v797_v19 = vadd.f32 %v796_v39, %v663_v16  ;;  %v14285_v26 = vpop.f32.mrf.mxu1 }
 0x123   :  { %v665_v18 = vpop.f32.mrf.mxu0 }
 0x124   :  { %1003 = vst.msk [vmem:[#allocation2 + $0x10] sm:$0xff] %vm13835_vm3, %v11462_v17  ;;  %v799_v20 = vadd.f32 %v798_v41, %v665_v18  ;;  %v14292_v52 = vpop.f32.mrf.mxu1 }
 0x125   :  { %v669_v22 = vpop.f32.mrf.mxu0  ;;  %10495 = vmatmul.mubr.msk.bf16.gmra.mxu0 %vm584_vm0, %v14174_v46 }
 0x126   :  { %v11463_v23 = vpack.c.bf16 %v799_v20, %v797_v19  ;;  %2144 = vmatprep.mubr.bf16.mxu0 %v13212_v2  ;;  %v803_v27 = vadd.f32 %v802_v57, %v669_v22  ;;  %v14298_v32 = vpop.f32.mrf.mxu1 }
 0x127   :  { %v671_v25 = vpop.f32.mrf.mxu0 }
 0x128   :  { %1004 = vst.msk [vmem:[#allocation2 + $0x18] sm:$0xff] %vm13835_vm3, %v11463_v23  ;;  %v805_v28 = vadd.f32 %v804_v40, %v671_v25  ;;  %v14300_v39 = vpop.f32.mrf.mxu1 }
 0x129   :  { %v673_v31 = vpop.f32.mrf.mxu0 }
 0x12a   :  { %v11464_v34 = vpack.c.bf16 %v805_v28, %v803_v27  ;;  %v807_v38 = vadd.f32 %v14220_v42, %v673_v31  ;;  %v14306_v42 = vpop.f32.mrf.mxu1 }
 0x12b   :  { %v675_v36 = vpop.f32.mrf.mxu0 }
 0x12c   :  { %1005 = vst.msk [vmem:[#allocation2 + $0x20] sm:$0xff] %vm13835_vm3, %v11464_v34  ;;  %v809_v46 = vadd.f32 %v14222_v58, %v675_v36  ;;  %v14313_v63 = vpop.f32.mrf.mxu1 }
 0x12d   :  { %v679_v47 = vpop.f32.mrf.mxu0  ;;  %10496 = vmatmul.mubr.msk.bf16.gmra.mxu0 %vm584_vm0, %v13187_v48 }
 0x12e   :  { %v11465_v51 = vpack.c.bf16 %v809_v46, %v807_v38  ;;  %2154 = vmatprep.mubr.bf16.mxu0 %v13212_v2  ;;  %v813_v37 = vadd.f32 %v14224_v43, %v679_v47  ;;  %v13188_v43 = vld [vmem:[%s16569_s7 + $0xc8] ss:$12 sps:$4 sm:$0xff]   ;;  %v14319_v0 = vpop.f32.mrf.mxu1 }
 0x12f   :  { %v681_v30 = vpop.f32.mrf.mxu0 }
 0x130   :  { %1006 = vst.msk [vmem:[#allocation2 + $0x28] sm:$0xff] %vm13835_vm3, %v11465_v51  ;;  %v815_v53 = vadd.f32 %v14231_v44, %v681_v30  ;;  %v14321_v5 = vpop.f32.mrf.mxu1 }
 0x131   :  { %v683_v54 = vpop.f32.mrf.mxu0 }
 0x132   :  { %v11466_v33 = vpack.c.bf16 %v815_v53, %v813_v37  ;;  %v817_v57 = vadd.f32 %v14233_v45, %v683_v54  ;;  %v14327_v9 = vpop.f32.mrf.mxu1 }
 0x133   :  { %v685_v41 = vpop.f32.mrf.mxu0 }
 0x134   :  { %1007 = vst.msk [vmem:[#allocation2 + $0x30] sm:$0xff] %vm13835_vm3, %v11466_v33  ;;  %v819_v40 = vadd.f32 %v14235_v59, %v685_v41  ;;  %v14333_v12 = vpop.f32.mrf.mxu1 }
 0x135   :  { %v689_v58 = vpop.f32.mrf.mxu0  ;;  %10497 = vmatmul.mubr.msk.bf16.gmra.mxu0 %vm584_vm0, %v13188_v43 }
 0x136   :  { %v11467_v44 = vpack.c.bf16 %v819_v40, %v817_v57  ;;  %2164 = vmatprep.mubr.bf16.mxu0 %v13212_v2  ;;  %v823_v45 = vadd.f32 %v14237_v60, %v689_v58  ;;  %v13189_v60 = vld [vmem:[%s16569_s7 + $0xe0] ss:$12 sps:$4 sm:$0xff]   ;;  %v14339_v14 = vpop.f32.mrf.mxu1  ;;  %s16576_s7 = sld [smem:[#allocation24_spill]] }
 0x137   :  { %v691_v50 = vpop.f32.mrf.mxu0 }
 0x138   :  { %1008 = vst.msk [vmem:[#allocation2 + $0x38] sm:$0xff] %vm13835_vm3, %v11467_v44  ;;  %v825_v59 = vadd.f32 %v14244_v49, %v691_v50  ;;  %v14341_v18 = vpop.f32.mrf.mxu1 }
 0x139   :  { %v693_v1 = vpop.f32.mrf.mxu0 }
 0x13a   :  { %v11468_v4 = vpack.c.bf16 %v825_v59, %v823_v45  ;;  %v827_v7 = vadd.f32 %v14246_v3, %v693_v1  ;;  %v14347_v23 = vpop.f32.mrf.mxu1  ;;  %v2416_v1 = vld [vmem:[%s16572_s10 + $0x8] sm:$0xff] }
 0x13b   :  { %v695_v55 = vpop.f32.mrf.mxu0 }
 0x13c   :  { %1009 = vst.msk [vmem:[#allocation2 + $0x40] sm:$0xff] %vm13835_vm3, %v11468_v4  ;;  %v829_v8 = vadd.f32 %v14248_v6, %v695_v55  ;;  %v14349_v27 = vpop.f32.mrf.mxu1 }
 0x13d   :  { %v699_v10 = vpop.f32.mrf.mxu0  ;;  %10498 = vmatmul.mubr.msk.bf16.gmra.mxu0 %vm584_vm0, %v13189_v60 }
 0x13e   :  { %v11469_v49 = vpack.c.bf16 %v829_v8, %v827_v7  ;;  %v833_v3 = vadd.f32 %v14252_v56, %v699_v10  ;;  %v14355_v34 = vpop.f32.mrf.mxu1  ;;  %v12702_v10 = vld [vmem:[%s16573_s2 + $0x4] ss:$16 sps:$4 sm:$0xff]  }
 0x13f   :  { %v701_v13 = vpop.f32.mrf.mxu0  ;;  %3088 = vmatprep.mubr.bf16.mxu1 %v12702_v10  ;;  %v2322_v10 = vld [vmem:[#allocation2 + $0x38] sm:$0xff] }
 0x140   :  { %1010 = vst.msk [vmem:[#allocation2 + $0x48] sm:$0xff] %vm13835_vm3, %v11469_v49  ;;  %v835_v6 = vadd.f32 %v14258_v11, %v701_v13  ;;  %v14357_v38 = vpop.f32.mrf.mxu1  ;;  %v2419_v49 = vld [vmem:[%s16572_s10 + $0x20] sm:$0xff] }
 0x141   :  { %v703_v16 = vpop.f32.mrf.mxu0 }
 0x142   :  { %v11470_v17 = vpack.c.bf16 %v835_v6, %v833_v3  ;;  %v837_v20 = vadd.f32 %v14262_v15, %v703_v16  ;;  %v14363_v48 = vpop.f32.mrf.mxu1 }
 0x143   :  { %v705_v19 = vpop.f32.mrf.mxu0 }
 0x144   :  { %1011 = vst.msk [vmem:[#allocation2 + $0x50] sm:$0xff] %vm13835_vm3, %v11470_v17  ;;  %v839_v22 = vadd.f32 %v14264_v61, %v705_v19  ;;  %v14365_v30 = vpop.f32.mrf.mxu1 }
 0x145   :  { %v709_v25 = vpop.f32.mrf.mxu0 }
 0x146   :  { %v11471_v56 = vpack.c.bf16 %v839_v22, %v837_v20  ;;  %v843_v28 = vadd.f32 %v14268_v21, %v709_v25  ;;  %v14371_v54 = vpop.f32.mrf.mxu1 }
 0x147   :  { %v711_v11 = vpop.f32.mrf.mxu0 }
 0x148   :  { %1012 = vst.msk [vmem:[#allocation2 + $0x58] sm:$0xff] %vm13835_vm3, %v11471_v56  ;;  %v845_v31 = vadd.f32 %v14273_v24, %v711_v11  ;;  %v14373_v41 = vpop.f32.mrf.mxu1 }
 0x149   :  { %v713_v36 = vpop.f32.mrf.mxu0 }
 0x14a   :  { %v11472_v15 = vpack.c.bf16 %v845_v31, %v843_v28  ;;  %v847_v46 = vadd.f32 %v14277_v29, %v713_v36  ;;  %v14379_v58 = vpop.f32.mrf.mxu1  ;;  %v2417_v28 = vld [vmem:[%s16572_s10 + $0x10] sm:$0xff] }
 0x14b   :  { %v715_v61 = vpop.f32.mrf.mxu0  ;;  %v2421_v31 = vld [vmem:[%s16572_s10 + $0x30] sm:$0xff]  ;;  %2447 = vperm.xlu1 %12447, %v2417_v28   ;;  %v12678_v28 = vld [vmem:[#allocation2 + $0x24] ss:$8 sps:$4 sm:$0xff]  }
 0x14c   :  { %1013 = vst.msk [vmem:[#allocation2 + $0x60] sm:$0xff] %vm13835_vm3, %v11472_v15  ;;  %v849_v47 = vadd.f32 %v14279_v35, %v715_v61  ;;  %v14384_v44 = vpop.f32.mrf.mxu1 }
 0x14d   :  { %v719_v51 = vpop.f32.mrf.mxu0 }
 0x14e   :  { %v11473_v21 = vpack.c.bf16 %v849_v47, %v847_v46  ;;  %v853_v37 = vadd.f32 %v14285_v26, %v719_v51  ;;  %v2415_v26 = vld [vmem:[%s16572_s10] sm:$0xff] }
 0x14f   :  { %v721_v24 = vpop.f32.mrf.mxu0  ;;  %2437 = vperm.xlu0 %12446, %v2415_v26   ;;  %v2326_v51 = vld [vmem:[#allocation2 + $0x58] sm:$0xff]  ;;  %v2324_v26 = vld [vmem:[#allocation2 + $0x48] sm:$0xff] }
 0x150   :  { %1014 = vst.msk [vmem:[#allocation2 + $0x68] sm:$0xff] %vm13835_vm3, %v11473_v21  ;;  %v855_v53 = vadd.f32 %v14292_v52, %v721_v24 }
 0x151   :  { %v723_v33 = vpop.f32.mrf.mxu0 }
 0x152   :  { %v11474_v29 = vpack.c.bf16 %v855_v53, %v853_v37  ;;  %v857_v57 = vadd.f32 %v14298_v32, %v723_v33  ;;  %v12672_v37 = vld [vmem:[#allocation2 + $0x54] ss:$8 sps:$4 sm:$0xff]   ;;  %v2423_v33 = vld [vmem:[%s16572_s10 + $0x40] sm:$0xff] }
 0x153   :  { %v725_v35 = vpop.f32.mrf.mxu0  ;;  %2442 = vperm.xlu0 %12446, %v2416_v1   ;;  %v2327_v15 = vld [vmem:[#allocation2 + $0x60] sm:$0xff]  ;;  %v2418_v53 = vld [vmem:[%s16572_s10 + $0x18] sm:$0xff] }
 0x154   :  { %1015 = vst.msk [vmem:[#allocation2 + $0x70] sm:$0xff] %vm13835_vm3, %v11474_v29  ;;  %v859_v40 = vadd.f32 %v14300_v39, %v725_v35  ;;  %v14390_v39 = vpop.f32.mrf.mxu1  ;;  %2452 = vperm.xlu1 %12447, %v2418_v53   ;;  %v12680_v53 = vld [vmem:[#allocation2 + $0x14] ss:$8 sps:$4 sm:$0xff]  }
 0x155   :  { %v729_v43 = vpop.f32.mrf.mxu0 }
 0x156   :  { %v11475_v52 = vpack.c.bf16 %v859_v40, %v857_v57  ;;  %v863_v45 = vadd.f32 %v14306_v42, %v729_v43  ;;  %v14395_v55 = vpop.f32.mrf.mxu1 }
 0x157   :  { %v731_v50 = vpop.f32.mrf.mxu0  ;;  %2457 = vperm.xlu0 %12446, %v2419_v49   ;;  %v2328_v22 = vld [vmem:[#allocation2 + $0x68] sm:$0xff] }
 0x158   :  { %1016 = vst.msk [vmem:[#allocation2 + $0x78] sm:$0xff] %vm13835_vm3, %v11475_v52  ;;  %v865_v32 = vadd.f32 %v14313_v63, %v731_v50  ;;  %v14401_v63 = vpop.f32.mrf.mxu1  ;;  %v12670_v11 = vld [vmem:[#allocation2 + $0x64] ss:$8 sps:$4 sm:$0xff]   ;;  %v10571_v47 = vcombine.low %v2327_v15, %v2328_v22 }
 0x159   :  { %v733_v59 = vpop.f32.mrf.mxu0  ;;  %v2320_v22 = vld [vmem:[#allocation2 + $0x28] sm:$0xff] }
 0x15a   :  { %v11476_v4 = vpack.c.bf16 %v865_v32, %v863_v45  ;;  %v867_v8 = vadd.f32 %v14319_v0, %v733_v59  ;;  %v14409_v3 = vpop.f32.mrf.mxu1  ;;  %v12674_v45 = vld [vmem:[#allocation2 + $0x44] ss:$8 sps:$4 sm:$0xff]   ;;  %v2425_v59 = vld [vmem:[%s16572_s10 + $0x50] sm:$0xff] }
 0x15b   :  { %v735_v7 = vpop.f32.mrf.mxu0  ;;  %v2329_v0 = vld [vmem:[#allocation2 + $0x70] sm:$0xff]  ;;  %2467 = vperm.xlu0 %12446, %v2421_v31   ;;  %v2420_v32 = vld [vmem:[%s16572_s10 + $0x28] sm:$0xff] }
 0x15c   :  { %1017 = vst.msk [vmem:[#allocation2 + $0x80] sm:$0xff] %vm13835_vm3, %v11476_v4  ;;  %v869_v42 = vadd.f32 %v14321_v5, %v735_v7  ;;  %v14415_v25 = vpop.f32.mrf.mxu1  ;;  %2462 = vperm.xlu1 %12447, %v2420_v32   ;;  %v2424_v31 = vld [vmem:[%s16572_s10 + $0x48] sm:$0xff] }
 0x15d   :  { %v739_v60 = vpop.f32.mrf.mxu0  ;;  %v12682_v32 = vld [vmem:[#allocation2 + $0x4] ss:$8 sps:$4 sm:$0xff]  }
 0x15e   :  { %v11477_v13 = vpack.c.bf16 %v869_v42, %v867_v8  ;;  %v873_v17 = vadd.f32 %v14327_v9, %v739_v60  ;;  %v14423_v9 = vpop.f32.mrf.mxu1 }
 0x15f   :  { %v741_v6 = vpop.f32.mrf.mxu0  ;;  %v2330_v16 = vld [vmem:[#allocation2 + $0x78] sm:$0xff]  ;;  %2477 = vperm.xlu0 %12446, %v2423_v33  }
 0x160   :  { %v12668_v5 = vld [vmem:[#allocation2 + $0x74] ss:$8 sps:$4 sm:$0xff]   ;;  %1018 = vst.msk [vmem:[#allocation2 + $0x88] sm:$0xff] %vm13835_vm3, %v11477_v13  ;;  %v875_v19 = vadd.f32 %v14333_v12, %v741_v6  ;;  %v10573_v20 = vcombine.low %v2329_v0, %v2330_v16  ;;  %v14429_v21 = vpop.f32.mrf.mxu1  ;;  %v2427_v0 = vld [vmem:[%s16572_s10 + $0x60] sm:$0xff] }
 0x161   :  { %v743_v56 = vpop.f32.mrf.mxu0  ;;  %3056 = vmatprep.subr.bf16.mxu1 %v12668_v5  ;;  %v12676_v13 = vld [vmem:[#allocation2 + $0x34] ss:$8 sps:$4 sm:$0xff]  }
 0x162   :  { %v11478_v36 = vpack.c.bf16 %v875_v19, %v873_v17  ;;  %3057 = vmatpush1.bf16.msra.mxu1 %v10573_v20  ;;  %v877_v61 = vadd.f32 %v14339_v14, %v743_v56  ;;  %v14437_v35 = vpop.f32.mrf.mxu1  ;;  %v2422_v6 = vld [vmem:[%s16572_s10 + $0x38] sm:$0xff] }
 0x163   :  { %v745_v12 = vpop.f32.mrf.mxu0  ;;  %3058 = vmatprep.subr.bf16.mxu1 %v12670_v11  ;;  %2487 = vperm.xlu0 %12446, %v2425_v59   ;;  %v2426_v33 = vld [vmem:[%s16572_s10 + $0x58] sm:$0xff]  ;;  %v2428_v59 = vld [vmem:[%s16572_s10 + $0x68] sm:$0xff] }
 0x164   :  { %1019 = vst.msk [vmem:[#allocation2 + $0x90] sm:$0xff] %vm13835_vm3, %v11478_v36  ;;  %v879_v46 = vadd.f32 %v14341_v18, %v745_v12  ;;  %v2325_v18 = vld [vmem:[#allocation2 + $0x50] sm:$0xff]  ;;  %v14443_v52 = vpop.f32.mrf.mxu1  ;;  %2472 = vperm.xlu1 %12447, %v2422_v6   ;;  %v4636_v6 = vld [vmem:[%s16574_s6] sm:$0xff] }
 0x165   :  { %v1429_v24 = vpop.f32.mrf.mxu0  ;;  %v10569_v43 = vcombine.low %v2325_v18, %v2326_v51  ;;  %v2429_v36 = vld [vmem:[%s16572_s10 + $0x70] sm:$0xff]  ;;  %v2318_v51 = vld [vmem:[#allocation2 + $0x18] sm:$0xff] }
 0x166   :  { %v11479_v29 = vpack.c.bf16 %v879_v46, %v877_v61  ;;  %3059 = vmatpush1.bf16.msra.mxu1 %v10571_v47  ;;  %v1430_v57 = vadd.f32 %v1429_v24, %v14347_v23  ;;  %v14451_v4 = vpop.f32.mrf.mxu1 }
 0x167   :  { %v1431_v14 = vpop.f32.mrf.mxu0  ;;  %3060 = vmatprep.subr.bf16.mxu1 %v12672_v37  ;;  %2497 = vperm.xlu0 %12446, %v2427_v0  }
 0x168   :  { %1020 = vst.msk [vmem:[#allocation2 + $0x98] sm:$0xff] %vm13835_vm3, %v11479_v29  ;;  %v1432_v40 = vadd.f32 %v1431_v14, %v14349_v27  ;;  %v2323_v27 = vld [vmem:[#allocation2 + $0x40] sm:$0xff]  ;;  %v14457_v60 = vpop.f32.mrf.mxu1  ;;  %2482 = vperm.xlu1 %12447, %v2424_v31  }
 0x169   :  { %v1433_v50 = vpop.f32.mrf.mxu0  ;;  %v10567_v42 = vcombine.low %v2323_v27, %v2324_v26  ;;  %v2431_v29 = vld [vmem:[%s16572_s10 + $0x80] sm:$0xff]  ;;  %v2316_v26 = vld [vmem:[#allocation2 + $0x8] sm:$0xff] }
 0x16a   :  { %v11480_v1 = vpack.c.bf16 %v1432_v40, %v1430_v57  ;;  %3061 = vmatpush1.bf16.msra.mxu1 %v10569_v43  ;;  %v1434_v7 = vadd.f32 %v1433_v50, %v14355_v34  ;;  %v14465_v5 = vpop.f32.mrf.mxu1 }
 0x16b   :  { %v1435_v23 = vpop.f32.mrf.mxu0  ;;  %3062 = vmatprep.subr.bf16.mxu1 %v12674_v45  ;;  %2507 = vperm.xlu0 %12446, %v2429_v36  }
 0x16c   :  { %1648 = vst.msk [vmem:[#allocation2 + $0xa0] sm:$0xff] %vm13835_vm3, %v11480_v1  ;;  %v1436_v8 = vadd.f32 %v1435_v23, %v14357_v38  ;;  %v2321_v38 = vld [vmem:[#allocation2 + $0x30] sm:$0xff]  ;;  %v14471_v56 = vpop.f32.mrf.mxu1  ;;  %2492 = vperm.xlu1 %12447, %v2426_v33  }
 0x16d   :  { %v1439_v49 = vpop.f32.mrf.mxu0  ;;  %v10565_v20 = vcombine.low %v2321_v38, %v2322_v10  ;;  %v2433_v1 = vld [vmem:[%s16572_s10 + $0x90] sm:$0xff] }
 0x16e   :  { %v11481_v16 = vpack.c.bf16 %v1436_v8, %v1434_v7  ;;  %3063 = vmatpush1.bf16.msra.mxu1 %v10567_v42  ;;  %v1440_v17 = vadd.f32 %v1439_v49, %v14363_v48  ;;  %v14479_v15 = vpop.f32.mrf.mxu1 }
 0x16f   :  { %v1441_v34 = vpop.f32.mrf.mxu0  ;;  %3064 = vmatprep.subr.bf16.mxu1 %v12676_v13  ;;  %2517 = vperm.xlu0 %12446, %v2431_v29   ;;  %v2430_v13 = vld [vmem:[%s16572_s10 + $0x78] sm:$0xff] }
 0x170   :  { %1649 = vst.msk [vmem:[#allocation2 + $0xa8] sm:$0xff] %vm13835_vm3, %v11481_v16  ;;  %v1442_v19 = vadd.f32 %v1441_v34, %v14365_v30  ;;  %v2319_v30 = vld [vmem:[#allocation2 + $0x20] sm:$0xff]  ;;  %v14485_v24 = vpop.f32.mrf.mxu1  ;;  %2502 = vperm.xlu1 %12447, %v2428_v59  }
 0x171   :  { %v1443_v11 = vpop.f32.mrf.mxu0  ;;  %v10563_v47 = vcombine.low %v2319_v30, %v2320_v22 }
 0x172   :  { %v11482_v12 = vpack.c.bf16 %v1442_v19, %v1440_v17  ;;  %3065 = vmatpush1.bf16.msra.mxu1 %v10565_v20  ;;  %v1444_v61 = vadd.f32 %v1443_v11, %v14371_v54  ;;  %v14493_v18 = vpop.f32.mrf.mxu1  ;;  %v2432_v19 = vld [vmem:[%s16572_s10 + $0x88] sm:$0xff]  ;;  %v4638_v20 = vld [vmem:[%s16574_s6 + $0x10] sm:$0xff] }
 0x173   :  { %v1445_v48 = vpop.f32.mrf.mxu0  ;;  %3066 = vmatprep.subr.bf16.mxu1 %v12678_v28  ;;  %2527 = vperm.xlu0 %12446, %v2433_v1   ;;  %v4641_v1 = vld [vmem:[%s16574_s6 + $0x28] sm:$0xff] }
 0x174   :  { %1650 = vst.msk [vmem:[#allocation2 + $0xb0] sm:$0xff] %vm13835_vm3, %v11482_v12  ;;  %v1446_v46 = vadd.f32 %v1445_v48, %v14373_v41  ;;  %v2317_v41 = vld [vmem:[#allocation2 + $0x10] sm:$0xff]  ;;  %v14499_v50 = vpop.f32.mrf.mxu1  ;;  %2512 = vperm.xlu1 %12447, %v2430_v13   ;;  %v2434_v12 = vld [vmem:[%s16572_s10 + $0x98] sm:$0x3f]  ;;  %v4640_v48 = vld [vmem:[%s16574_s6 + $0x20] sm:$0xff] }
 0x175   :  { %v1449_v37 = vpop.f32.mrf.mxu0  ;;  %v10561_v43 = vcombine.low %v2317_v41, %v2318_v51  ;;  %v4637_v51 = vld [vmem:[%s16574_s6 + $0x8] sm:$0xff] }
 0x176   :  { %v11483_v14 = vpack.c.bf16 %v1446_v46, %v1444_v61  ;;  %3067 = vmatpush1.bf16.msra.mxu1 %v10563_v47  ;;  %v1450_v57 = vadd.f32 %v1449_v37, %v14379_v58  ;;  %v14507_v27 = vpop.f32.mrf.mxu1  ;;  %v4642_v37 = vld [vmem:[%s16574_s6 + $0x30] sm:$0xff] }
 0x177   :  { %v1451_v54 = vpop.f32.mrf.mxu0  ;;  %3068 = vmatprep.subr.bf16.mxu1 %v12680_v53  ;;  %4658 = vperm.xlu0 %12446, %v4636_v6  }
 0x178   :  { %1651 = vst.msk [vmem:[#allocation2 + $0xb8] sm:$0xff] %vm13835_vm3, %v11483_v14  ;;  %v1452_v40 = vadd.f32 %v1451_v54, %v14384_v44  ;;  %v2315_v44 = vld [vmem:[#allocation2] sm:$0xff]  ;;  %v14513_v10 = vpop.f32.mrf.mxu1  ;;  %2522 = vperm.xlu1 %12447, %v2432_v19  }
 0x179   :  { %v1453_v45 = vpop.f32.mrf.mxu0  ;;  %v10559_v42 = vcombine.low %v2315_v44, %v2316_v26 }
 0x17a   :  { %v11484_v23 = vpack.c.bf16 %v1452_v40, %v1450_v57  ;;  %3069 = vmatpush1.bf16.msra.mxu1 %v10561_v43  ;;  %v1454_v7 = vadd.f32 %v1453_v45, %v14390_v39  ;;  %v14521_v16 = vpop.f32.mrf.mxu1  ;;  %v4644_v57 = vld [vmem:[%s16574_s6 + $0x40] sm:$0xff] }
 0x17b   :  { %v1455_v58 = vpop.f32.mrf.mxu0  ;;  %3070 = vmatprep.subr.bf16.mxu1 %v12682_v32  ;;  %4668 = vperm.xlu0 %12446, %v4638_v20  }
 0x17c   :  { %1652 = vst.msk [vmem:[#allocation2 + $0xc0] sm:$0xff] %vm13835_vm3, %v11484_v23  ;;  %v1456_v8 = vadd.f32 %v1455_v58, %v14395_v55  ;;  %v14527_v38 = vpop.f32.mrf.mxu1  ;;  %2532 = vperm.xlu1 %12447, %v2434_v12   ;;  %v4646_v23 = vld [vmem:[%s16574_s6 + $0x50] sm:$0xff] }
 0x17d   :  { %v1459_v49 = vpop.f32.mrf.mxu0 }
 0x17e   :  { %v11485_v0 = vpack.c.bf16 %v1456_v8, %v1454_v7  ;;  %3071 = vmatpush1.bf16.msra.mxu1 %v10559_v42  ;;  %v1460_v55 = vadd.f32 %v1459_v49, %v14401_v63  ;;  %v14535_v11 = vpop.f32.mrf.mxu1  ;;  %v4648_v49 = vld [vmem:[%s16574_s6 + $0x60] sm:$0xff] }
 0x17f   :  { %v1461_v39 = vpop.f32.mrf.mxu0  ;;  %4678 = vperm.xlu0 %12446, %v4640_v48  }
 0x180   :  { %1653 = vst.msk [vmem:[#allocation2 + $0xc8] sm:$0xff] %vm13835_vm3, %v11485_v0  ;;  %v1462_v34 = vadd.f32 %v1461_v39, %v14409_v3  ;;  %v14541_v31 = vpop.f32.mrf.mxu1  ;;  %4663 = vperm.xlu1 %12447, %v4637_v51  }
 0x181   :  { %v1463_v17 = vpop.f32.mrf.mxu0 }
 0x182   :  { %v11486_v22 = vpack.c.bf16 %v1462_v34, %v1460_v55  ;;  %v1464_v63 = vadd.f32 %v1463_v17, %v14415_v25  ;;  %v14549_v61 = vpop.f32.mrf.mxu1  ;;  %v4645_v55 = vld [vmem:[%s16574_s6 + $0x48] sm:$0xff]  ;;  %v4650_v17 = vld [vmem:[%s16574_s6 + $0x70] sm:$0xff] }
 0x183   :  { %v1465_v28 = vpop.f32.mrf.mxu0  ;;  %4688 = vperm.xlu0 %12446, %v4642_v37  }
 0x184   :  { %1654 = vst.msk [vmem:[#allocation2 + $0xd0] sm:$0xff] %vm13835_vm3, %v11486_v22  ;;  %v1466_v3 = vadd.f32 %v1465_v28, %v14423_v9  ;;  %v14555_v47 = vpop.f32.mrf.mxu1 }
 0x185   :  { %v1469_v36 = vpop.f32.mrf.mxu0 }
 0x186   :  { %v11487_v30 = vpack.c.bf16 %v1466_v3, %v1464_v63  ;;  %v1470_v25 = vadd.f32 %v1469_v36, %v14429_v21  ;;  %v14563_v29 = vpop.f32.mrf.mxu1  ;;  %v4639_v21 = vld [vmem:[%s16574_s6 + $0x18] sm:$0xff]  ;;  %v4652_v36 = vld [vmem:[%s16574_s6 + $0x80] sm:$0xff] }
 0x187   :  { %v1471_v46 = vpop.f32.mrf.mxu0  ;;  %4673 = vperm.xlu1 %12447, %v4639_v21   ;;  %4698 = vperm.xlu0 %12446, %v4644_v57   ;;  %v4647_v63 = vld [vmem:[%s16574_s6 + $0x58] sm:$0xff] }
 0x188   :  { %1655 = vst.msk [vmem:[#allocation2 + $0xd8] sm:$0xff] %vm13835_vm3, %v11487_v30  ;;  %v1472_v9 = vadd.f32 %v1471_v46, %v14437_v35  ;;  %v14572_v41 = vpop.f32.mrf.mxu1 }
 0x189   :  { %v1473_v53 = vpop.f32.mrf.mxu0 }
 0x18a   :  { %v11488_v33 = vpack.c.bf16 %v1472_v9, %v1470_v25  ;;  %v1474_v35 = vadd.f32 %v1473_v53, %v14443_v52  ;;  %v14577_v26 = vpop.f32.mrf.mxu1 }
 0x18b   :  { %v1475_v14 = vpop.f32.mrf.mxu0  ;;  %4683 = vperm.xlu1 %12447, %v4641_v1   ;;  %4708 = vperm.xlu0 %12446, %v4646_v23   ;;  %v6471_v1 = vld [vmem:[%s16575_s11] sm:$0xff] }
 0x18c   :  { %1656 = vst.msk [vmem:[#allocation2 + $0xe0] sm:$0xff] %vm13835_vm3, %v11488_v33  ;;  %v1476_v54 = vadd.f32 %v1475_v14, %v14451_v4  ;;  %v14583_v32 = vpop.f32.mrf.mxu1  ;;  %v4654_v14 = vld [vmem:[%s16574_s6 + $0x90] sm:$0xff] }
 0x18d   :  { %v1479_v40 = vpop.f32.mrf.mxu0 }
 0x18e   :  { %v11489_v43 = vpack.c.bf16 %v1476_v54, %v1474_v35  ;;  %v1480_v52 = vadd.f32 %v1479_v40, %v14457_v60  ;;  %v14591_v44 = vpop.f32.mrf.mxu1  ;;  %v4643_v60 = vld [vmem:[%s16574_s6 + $0x38] sm:$0xff] }
 0x18f   :  { %v1481_v45 = vpop.f32.mrf.mxu0  ;;  %4693 = vperm.xlu1 %12447, %v4643_v60   ;;  %4718 = vperm.xlu0 %12446, %v4648_v49  }
 0x190   :  { %1657 = vst.msk [vmem:[#allocation2 + $0xe8] sm:$0xff] %vm13835_vm3, %v11489_v43  ;;  %v1482_v4 = vadd.f32 %v1481_v45, %v14465_v5  ;;  %v14600_v42 = vpop.f32.mrf.mxu1 }
 0x191   :  { %v1483_v59 = vpop.f32.mrf.mxu0 }
 0x192   :  { %v11490_v58 = vpack.c.bf16 %v1482_v4, %v1480_v52  ;;  %v1484_v5 = vadd.f32 %v1483_v59, %v14471_v56  ;;  %v14605_v0 = vpop.f32.mrf.mxu1 }
 0x193   :  { %v1485_v7 = vpop.f32.mrf.mxu0  ;;  %4703 = vperm.xlu1 %12447, %v4645_v55   ;;  %4728 = vperm.xlu0 %12446, %v4650_v17   ;;  %v4653_v17 = vld [vmem:[%s16574_s6 + $0x88] sm:$0xff] }
 0x194   :  { %1658 = vst.msk [vmem:[#allocation2 + $0xf0] sm:$0xff] %vm13835_vm3, %v11490_v58  ;;  %v1486_v8 = vadd.f32 %v1485_v7, %v14479_v15  ;;  %v14614_v34 = vpop.f32.mrf.mxu1  ;;  %v2342_v58 = vld [vmem:[#allocation2 + $0xd8] sm:$0xff] }
 0x195   :  { %v1489_v13 = vpop.f32.mrf.mxu0  ;;  %v12688_v7 = vld [vmem:[#allocation2 + $0xd4] ss:$8 sps:$4 sm:$0xff]  }
 0x196   :  { %v11491_v6 = vpack.c.bf16 %v1486_v8, %v1484_v5  ;;  %v1490_v56 = vadd.f32 %v1489_v13, %v14485_v24  ;;  %v14619_v22 = vpop.f32.mrf.mxu1  ;;  %v2341_v8 = vld [vmem:[#allocation2 + $0xd0] sm:$0xff] }
 0x197   :  { %v1491_v39 = vpop.f32.mrf.mxu0  ;;  %4713 = vperm.xlu1 %12447, %v4647_v63   ;;  %4738 = vperm.xlu0 %12446, %v4652_v36   ;;  %v2344_v35 = vld [vmem:[#allocation2 + $0xe8] sm:$0xff]  ;;  %v4655_v63 = vld [vmem:[%s16574_s6 + $0x98] sm:$0xf] }
 0x198   :  { %1659 = vst.msk [vmem:[#allocation2 + $0xf8] sm:$0xff] %vm13835_vm3, %v11491_v6  ;;  %v1492_v15 = vadd.f32 %v1491_v39, %v14493_v18  ;;  %v14628_v3 = vpop.f32.mrf.mxu1  ;;  %v12686_v54 = vld [vmem:[#allocation2 + $0xe4] ss:$8 sps:$4 sm:$0xff]   ;;  %v10585_v6 = vcombine.low %v2341_v8, %v2342_v58 }
 0x199   :  { %v1493_v19 = vpop.f32.mrf.mxu0  ;;  %v2340_v39 = vld [vmem:[#allocation2 + $0xc8] sm:$0xff]  ;;  %v6479_v58 = vld [vmem:[%s16575_s11 + $0x40] sm:$0xff] }
 0x19a   :  { %v11492_v20 = vpack.c.bf16 %v1492_v15, %v1490_v56  ;;  %v1494_v24 = vadd.f32 %v1493_v19, %v14499_v50  ;;  %v14633_v46 = vpop.f32.mrf.mxu1  ;;  %v4649_v50 = vld [vmem:[%s16574_s6 + $0x68] sm:$0xff]  ;;  %v6473_v19 = vld [vmem:[%s16575_s11 + $0x10] sm:$0xff] }
 0x19b   :  { %v1495_v28 = vpop.f32.mrf.mxu0  ;;  %v2345_v30 = vld [vmem:[#allocation2 + $0xf0] sm:$0xff]  ;;  %4723 = vperm.xlu1 %12447, %v4649_v50   ;;  %4748 = vperm.xlu0 %12446, %v4654_v14   ;;  %v12690_v15 = vld [vmem:[#allocation2 + $0xc4] ss:$8 sps:$4 sm:$0xff]  }
 0x19c   :  { %1660 = vst.msk [vmem:[#allocation2 + $0x100] sm:$0xff] %vm13835_vm3, %v11492_v20  ;;  %v1496_v18 = vadd.f32 %v1495_v28, %v14507_v27  ;;  %v14642_v33 = vpop.f32.mrf.mxu1  ;;  %v2339_v28 = vld [vmem:[#allocation2 + $0xc0] sm:$0xff]  ;;  %v2336_v14 = vld [vmem:[#allocation2 + $0xa8] sm:$0xff] }
 0x19d   :  { %v1499_v12 = vpop.f32.mrf.mxu0  ;;  %v10583_v36 = vcombine.low %v2339_v28, %v2340_v39  ;;  %v2332_v39 = vld [vmem:[#allocation2 + $0x88] sm:$0xff] }
 0x19e   :  { %v11493_v48 = vpack.c.bf16 %v1496_v18, %v1494_v24  ;;  %v1500_v27 = vadd.f32 %v1499_v12, %v14513_v10  ;;  %v14647_v40 = vpop.f32.mrf.mxu1  ;;  %v2343_v10 = vld [vmem:[#allocation2 + $0xe0] sm:$0xff] }
 0x19f   :  { %v1501_v25 = vpop.f32.mrf.mxu0  ;;  %v2346_v9 = vld [vmem:[#allocation2 + $0xf8] sm:$0xff]  ;;  %v10587_v4 = vcombine.low %v2343_v10, %v2344_v35  ;;  %6492 = vperm.xlu0 %12446, %v6471_v1  }
 0x1a0   :  { %v12684_v51 = vld [vmem:[#allocation2 + $0xf4] ss:$8 sps:$4 sm:$0xff]   ;;  %1661 = vst.msk [vmem:[#allocation2 + $0x108] sm:$0xff] %vm13835_vm3, %v11493_v48  ;;  %v1502_v37 = vadd.f32 %v1501_v25, %v14521_v16  ;;  %v10589_v53 = vcombine.low %v2345_v30, %v2346_v9  ;;  %v14656_v59 = vpop.f32.mrf.mxu1  ;;  %v6475_v48 = vld [vmem:[%s16575_s11 + $0x20] sm:$0xff] }
 0x1a1   :  { %v1503_v21 = vpop.f32.mrf.mxu0  ;;  %3072 = vmatprep.subr.bf16.mxu1 %v12684_v51  ;;  %v4651_v16 = vld [vmem:[%s16574_s6 + $0x78] sm:$0xff]  ;;  %s16578_s6 = sld [smem:[#allocation17_spill]] }
 0x1a2   :  { %v11494_v57 = vpack.c.bf16 %v1502_v37, %v1500_v27  ;;  %3073 = vmatpush2.bf16.msra.mxu1 %v10589_v53  ;;  %v1504_v45 = vadd.f32 %v1503_v21, %v14527_v38  ;;  %v14661_v5 = vpop.f32.mrf.mxu1  ;;  %4733 = vperm.xlu1 %12447, %v4651_v16   ;;  %v12766_v38 = vld [vmem:[%s16573_s2 + $0xc] ss:$16 sps:$4 sm:$0xff]   ;;  %v2337_v37 = vld [vmem:[#allocation2 + $0xb0] sm:$0xff] }
 0x1a3   :  { %v1505_v43 = vpop.f32.mrf.mxu0  ;;  %3074 = vmatprep.subr.bf16.mxu1 %v12686_v54  ;;  %10619 = vmatprep.mubr.msk.bf16.mxu0 %vm3025_vm4, %v12766_v38  ;;  %v2338_v25 = vld [vmem:[#allocation2 + $0xb8] sm:$0xff]  ;;  %v12694_v54 = vld [vmem:[#allocation2 + $0xa4] ss:$8 sps:$4 sm:$0xff]  }
 0x1a4   :  { %1662 = vst.msk [vmem:[#allocation2 + $0x110] sm:$0xff] %vm13835_vm3, %v11494_v57  ;;  %v1506_v52 = vadd.f32 %v1505_v43, %v14535_v11  ;;  %v14670_v55 = vpop.f32.mrf.mxu1  ;;  %6502 = vperm.xlu0 %12446, %v6473_v19   ;;  %v12692_v9 = vld [vmem:[#allocation2 + $0xb4] ss:$8 sps:$4 sm:$0xff]   ;;  %v10581_v53 = vcombine.low %v2337_v37, %v2338_v25  ;;  %v6472_v57 = vld [vmem:[%s16575_s11 + $0x8] sm:$0xff] }
 0x1a5   :  { %v1509_v23 = vpop.f32.mrf.mxu0  ;;  %v6477_v43 = vld [vmem:[%s16575_s11 + $0x30] sm:$0xff]  ;;  %v6476_v19 = vld [vmem:[%s16575_s11 + $0x28] sm:$0xff] }
 0x1a6   :  { %v11495_v60 = vpack.c.bf16 %v1506_v52, %v1504_v45  ;;  %3075 = vmatpush2.bf16.msra.mxu1 %v10587_v4  ;;  %v1510_v49 = vadd.f32 %v1509_v23, %v14541_v31  ;;  %v14679_v31 = vpop.f32.mrf.mxu1  ;;  %4743 = vperm.xlu1 %12447, %v4653_v17   ;;  %v6474_v45 = vld [vmem:[%s16575_s11 + $0x18] sm:$0xff]  ;;  %v12698_v17 = vld [vmem:[#allocation2 + $0x84] ss:$8 sps:$4 sm:$0xff]  }
 0x1a7   :  { %v1511_v11 = vpop.f32.mrf.mxu0  ;;  %3076 = vmatprep.subr.bf16.mxu1 %v12688_v7  ;;  %v12696_v38 = vld [vmem:[#allocation2 + $0x94] ss:$8 sps:$4 sm:$0xff]  }
 0x1a8   :  { %1663 = vst.msk [vmem:[#allocation2 + $0x118] sm:$0xff] %vm13835_vm3, %v11495_v60  ;;  %v1512_v13 = vadd.f32 %v1511_v11, %v14549_v61  ;;  %v14688_v12 = vpop.f32.mrf.mxu1  ;;  %6512 = vperm.xlu0 %12446, %v6475_v48   ;;  %v2334_v60 = vld [vmem:[#allocation2 + $0x98] sm:$0xff]  ;;  %v12872_v62 = vld [vmem:[%s16578_s6 + $0x4] ss:$16 sps:$4 sm:$0xff]  }
 0x1a9   :  { %v1513_v56 = vpop.f32.mrf.mxu0 }
 0x1aa   :  { %v11496_v20 = vpack.c.bf16 %v1512_v13, %v1510_v49  ;;  %3077 = vmatpush2.bf16.msra.mxu1 %v10585_v6  ;;  %v1514_v24 = vadd.f32 %v1513_v56, %v14555_v47  ;;  %v14693_v50 = vpop.f32.mrf.mxu1  ;;  %4753 = vperm.xlu1 %12447, %v4655_v63   ;;  %v2333_v13 = vld [vmem:[#allocation2 + $0x90] sm:$0xff]  ;;  %v6478_v63 = vld [vmem:[%s16575_s11 + $0x38] sm:$0xff] }
 0x1ab   :  { %v1515_v61 = vpop.f32.mrf.mxu0  ;;  %3078 = vmatprep.subr.bf16.mxu1 %v12690_v15  ;;  %v10577_v6 = vcombine.low %v2333_v13, %v2334_v60  ;;  %v6484_v60 = vld [vmem:[%s16575_s11 + $0x68] sm:$0xff] }
 0x1ac   :  { %1664 = vst.msk [vmem:[#allocation2 + $0x120] sm:$0xff] %vm13835_vm3, %v11496_v20  ;;  %v1516_v18 = vadd.f32 %v1515_v61, %v14563_v29  ;;  %v14699_v21 = vpop.f32.mrf.mxu1  ;;  %6522 = vperm.xlu0 %12446, %v6477_v43   ;;  %v6481_v20 = vld [vmem:[%s16575_s11 + $0x50] sm:$0xff] }
 0x1ad   :  { %v1519_v30 = vpop.f32.mrf.mxu0 }
 0x1ae   :  { %v11497_v51 = vpack.c.bf16 %v1516_v18, %v1514_v24  ;;  %3079 = vmatpush2.bf16.msra.mxu1 %v10583_v36  ;;  %v1520_v47 = vadd.f32 %v1519_v30, %v14572_v41  ;;  %v14707_v16 = vpop.f32.mrf.mxu1  ;;  %6497 = vperm.xlu1 %12447, %v6472_v57   ;;  %v6483_v30 = vld [vmem:[%s16575_s11 + $0x60] sm:$0xff] }
 0x1af   :  { %v1521_v27 = vpop.f32.mrf.mxu0  ;;  %3080 = vmatprep.subr.bf16.mxu1 %v12692_v9  ;;  %v12700_v9 = vld [vmem:[%s16573_s2] ss:$16 sps:$4 sm:$0xff]  }
 0x1b0   :  { %1665 = vst.msk [vmem:[#allocation2 + $0x128] sm:$0xff] %vm13835_vm3, %v11497_v51  ;;  %v1522_v29 = vadd.f32 %v1521_v27, %v14577_v26  ;;  %v2335_v26 = vld [vmem:[#allocation2 + $0xa0] sm:$0xff]  ;;  %v14716_v23 = vpop.f32.mrf.mxu1  ;;  %6532 = vperm.xlu0 %12446, %v6479_v58  }
 0x1b1   :  { %v1523_v35 = vpop.f32.mrf.mxu0  ;;  %v10579_v1 = vcombine.low %v2335_v26, %v2336_v14  ;;  %v6480_v14 = vld [vmem:[%s16575_s11 + $0x48] sm:$0xff] }
 0x1b2   :  { %v11498_v10 = vpack.c.bf16 %v1522_v29, %v1520_v47  ;;  %3081 = vmatpush2.bf16.msra.mxu1 %v10581_v53  ;;  %v1524_v52 = vadd.f32 %v1523_v35, %v14583_v32  ;;  %v14721_v8 = vpop.f32.mrf.mxu1  ;;  %6507 = vperm.xlu1 %12447, %v6474_v45   ;;  %v6485_v35 = vld [vmem:[%s16575_s11 + $0x70] sm:$0xff] }
 0x1b3   :  { %v1525_v41 = vpop.f32.mrf.mxu0  ;;  %3082 = vmatprep.subr.bf16.mxu1 %v12694_v54  ;;  %v12707_v45 = vld [vmem:[%s16573_s2 + $0x20] ss:$16 sps:$4 sm:$0xff]  }
 0x1b4   :  { %1666 = vst.msk [vmem:[#allocation2 + $0x130] sm:$0xff] %vm13835_vm3, %v11498_v10  ;;  %v1526_v4 = vadd.f32 %v1525_v41, %v14591_v44  ;;  %v14727_v56 = vpop.f32.mrf.mxu1  ;;  %6542 = vperm.xlu0 %12446, %v6481_v20   ;;  %v6487_v41 = vld [vmem:[%s16575_s11 + $0x80] sm:$0xff] }
 0x1b5   :  { %v2076_v7 = vpop.f32.mrf.mxu0 }
 0x1b6   :  { %v11499_v11 = vpack.c.bf16 %v1526_v4, %v1524_v52  ;;  %3083 = vmatpush2.bf16.msra.mxu1 %v10579_v1  ;;  %v2077_v32 = vadd.f32 %v2076_v7, %v14600_v42  ;;  %v14735_v28 = vpop.f32.mrf.mxu1  ;;  %6517 = vperm.xlu1 %12447, %v6476_v19   ;;  %v12716_v4 = vld [vmem:[%s16573_s2 + $0x44] ss:$16 sps:$4 sm:$0xff]  }
 0x1b7   :  { %v2078_v49 = vpop.f32.mrf.mxu0  ;;  %3084 = vmatprep.subr.bf16.mxu1 %v12696_v38  ;;  %v6489_v38 = vld [vmem:[%s16575_s11 + $0x90] sm:$0xff] }
 0x1b8   :  { %1667 = vst.msk [vmem:[#allocation2 + $0x138] sm:$0xff] %vm13835_vm3, %v11499_v11  ;;  %v2079_v44 = vadd.f32 %v2078_v49, %v14605_v0  ;;  %v2331_v0 = vld [vmem:[#allocation2 + $0x80] sm:$0xff]  ;;  %v14744_v48 = vpop.f32.mrf.mxu1  ;;  %6552 = vperm.xlu0 %12446, %v6483_v30   ;;  %v8195_v30 = vld [vmem:[%s16576_s7 + $0x28] sm:$0xff] }
 0x1b9   :  { %v2080_v15 = vpop.f32.mrf.mxu0  ;;  %v10575_v36 = vcombine.low %v2331_v0, %v2332_v39  ;;  %v12714_v39 = vld [vmem:[%s16573_s2 + $0x40] ss:$16 sps:$4 sm:$0xff]   ;;  %v8193_v0 = vld [vmem:[%s16576_s7 + $0x18] sm:$0xff] }
 0x1ba   :  { %v11500_v61 = vpack.c.bf16 %v2079_v44, %v2077_v32  ;;  %3085 = vmatpush2.bf16.msra.mxu1 %v10577_v6  ;;  %v2081_v24 = vadd.f32 %v2080_v15, %v14614_v34  ;;  %v14752_v27 = vpop.f32.mrf.mxu1  ;;  %v12709_v34 = vld [vmem:[%s16573_s2 + $0x24] ss:$16 sps:$4 sm:$0xff]   ;;  %6527 = vperm.xlu1 %12447, %v6478_v63   ;;  %v8191_v44 = vld [vmem:[%s16576_s7 + $0x8] sm:$0xff] }
 0x1bb   :  { %v2082_v42 = vpop.f32.mrf.mxu0  ;;  %3086 = vmatprep.subr.bf16.mxu1 %v12698_v17  ;;  %v12723_v17 = vld [vmem:[%s16573_s2 + $0x64] ss:$16 sps:$4 sm:$0xff]  }
 0x1bc   :  { %2295 = vst.msk [vmem:[#allocation2 + $0x140] sm:$0xff] %vm13835_vm3, %v11500_v61  ;;  %v2083_v18 = vadd.f32 %v2082_v42, %v14619_v22  ;;  %v14762_v29 = vpop.f32.mrf.mxu1  ;;  %6562 = vperm.xlu0 %12446, %v6485_v35   ;;  %v6488_v42 = vld [vmem:[%s16575_s11 + $0x88] sm:$0xff] }
 0x1bd   :  { %v2086_v25 = vpop.f32.mrf.mxu0 }
 0x1be   :  { %v11501_v51 = vpack.c.bf16 %v2083_v18, %v2081_v24  ;;  %3087 = vmatpush2.bf16.msra.mxu1 %v10575_v36  ;;  %v2087_v37 = vadd.f32 %v2086_v25, %v14628_v3  ;;  %6537 = vperm.xlu1 %12447, %v6480_v14   ;;  %v14770_v43 = vpop.f32.mrf.mxu1  ;;  %v6482_v3 = vld [vmem:[%s16575_s11 + $0x58] sm:$0xff] }
 0x1bf   :  { %v2088_v22 = vpop.f32.mrf.mxu0  ;;  %3729 = vmatprep.subr.bf16.mxu1 %v13212_v2  ;;  %v8197_v14 = vld [vmem:[%s16576_s7 + $0x38] sm:$0xff] }
 0x1c0   :  { %2296 = vst.msk [vmem:[#allocation2 + $0x148] sm:$0xff] %vm13835_vm3, %v11501_v51  ;;  %v2089_v47 = vadd.f32 %v2088_v22, %v14633_v46  ;;  %v14788_v58 = vpop.f32.mrf.mxu1  ;;  %6572 = vperm.xlu0 %12446, %v6487_v41   ;;  %v12728_v41 = vld [vmem:[%s16573_s2 + $0x80] ss:$16 sps:$4 sm:$0xff]  }
 0x1c1   :  { %v2090_v53 = vpop.f32.mrf.mxu0  ;;  %3089 = vmatmul.mubr.bf16.vlgmr.msra.gmra.mxu1 %v12700_v9  ;;  %v12721_v9 = vld [vmem:[%s16573_s2 + $0x60] ss:$16 sps:$4 sm:$0xff]  }
 0x1c2   :  { %v11502_v54 = vpack.c.bf16 %v2089_v47, %v2087_v37  ;;  %3098 = vmatprep.mubr.bf16.mxu1 %v12709_v34  ;;  %v2091_v46 = vadd.f32 %v2090_v53, %v14642_v33  ;;  %6547 = vperm.xlu1 %12447, %v6482_v3   ;;  %v14800_v13 = vpop.f32.mrf.mxu1  ;;  %v12730_v34 = vld [vmem:[%s16573_s2 + $0x84] ss:$16 sps:$4 sm:$0xff]  }
 0x1c3   :  { %v2092_v57 = vpop.f32.mrf.mxu0  ;;  %v8192_v53 = vld [vmem:[%s16576_s7 + $0x10] sm:$0xff] }
 0x1c4   :  { %2297 = vst.msk [vmem:[#allocation2 + $0x150] sm:$0xff] %vm13835_vm3, %v11502_v54  ;;  %v2093_v10 = vadd.f32 %v2092_v57, %v14647_v40  ;;  %6582 = vperm.xlu0 %12446, %v6489_v38   ;;  %v14818_v20 = vpop.f32.mrf.mxu1 }
 0x1c5   :  { %v2096_v26 = vpop.f32.mrf.mxu0 }
 0x1c6   :  { %v11503_v52 = vpack.c.bf16 %v2093_v10, %v2091_v46  ;;  %v2097_v33 = vadd.f32 %v2096_v26, %v14656_v59  ;;  %6557 = vperm.xlu1 %12447, %v6484_v60   ;;  %v6486_v59 = vld [vmem:[%s16575_s11 + $0x78] sm:$0xff]  ;;  %v14830_v18 = vpop.f32.mrf.mxu1  ;;  %v9212_v46 = vld [vmem:[%s16528_s15] sm:$0xff]  ;;  %s16580_s11 = sld [smem:[#allocation20_spill]] }
 0x1c7   :  { %v2098_v1 = vpop.f32.mrf.mxu0 }
 0x1c8   :  { %2298 = vst.msk [vmem:[#allocation2 + $0x158] sm:$0xff] %vm13835_vm3, %v11503_v52  ;;  %v2099_v40 = vadd.f32 %v2098_v1, %v14661_v5  ;;  %8206 = vperm.xlu0 %12446, %v8191_v44   ;;  %v14848_v37 = vpop.f32.mrf.mxu1 }
 0x1c9   :  { %v2100_v7 = vpop.f32.mrf.mxu0  ;;  %3099 = vmatmul.mubr.bf16.gmra.mxu1 %v12707_v45  ;;  %v12733_v45 = vld [vmem:[%s16573_s2 + $0xa4] ss:$16 sps:$4 sm:$0xff]  }
 0x1ca   :  { %v11504_v11 = vpack.c.bf16 %v2099_v40, %v2097_v33  ;;  %3108 = vmatprep.mubr.bf16.mxu1 %v12716_v4  ;;  %v2101_v5 = vadd.f32 %v2100_v7, %v14670_v55  ;;  %6567 = vperm.xlu1 %12447, %v6486_v59   ;;  %v14860_v57 = vpop.f32.mrf.mxu1  ;;  %v9214_v59 = vld [vmem:[%s16528_s15 + $0x10] sm:$0xff] }
 0x1cb   :  { %v2102_v49 = vpop.f32.mrf.mxu0 }
 0x1cc   :  { %2299 = vst.msk [vmem:[#allocation2 + $0x160] sm:$0xff] %vm13835_vm3, %v11504_v11  ;;  %v2103_v32 = vadd.f32 %v2102_v49, %v14679_v31  ;;  %8216 = vperm.xlu0 %12446, %v8193_v0   ;;  %v8196_v49 = vld [vmem:[%s16576_s7 + $0x30] sm:$0xff] }
 0x1cd   :  { %v2106_v6 = vpop.f32.mrf.mxu0  ;;  %v2357_v0 = vld [vmem:[#allocation2 + $0x150] sm:$0xff] }
 0x1ce   :  { %v11505_v15 = vpack.c.bf16 %v2103_v32, %v2101_v5  ;;  %v2107_v55 = vadd.f32 %v2106_v6, %v14688_v12  ;;  %6577 = vperm.xlu1 %12447, %v6488_v42   ;;  %v8190_v12 = vld [vmem:[%s16576_s7] sm:$0xff] }
 0x1cf   :  { %v2108_v19 = vpop.f32.mrf.mxu0 }
 0x1d0   :  { %2300 = vst.msk [vmem:[#allocation2 + $0x168] sm:$0xff] %vm13835_vm3, %v11505_v15  ;;  %v2109_v31 = vadd.f32 %v2108_v19, %v14693_v50  ;;  %8226 = vperm.xlu0 %12446, %v8195_v30   ;;  %v12731_v15 = vld [vmem:[%s16573_s2 + $0xa0] ss:$16 sps:$4 sm:$0xff]  }
 0x1d1   :  { %v2110_v61 = vpop.f32.mrf.mxu0  ;;  %3109 = vmatmul.mubr.bf16.gmra.mxu1 %v12714_v39 }
 0x1d2   :  { %v11506_v63 = vpack.c.bf16 %v2109_v31, %v2107_v55  ;;  %3118 = vmatprep.mubr.bf16.mxu1 %v12723_v17  ;;  %v2111_v50 = vadd.f32 %v2110_v61, %v14699_v21  ;;  %8201 = vperm.xlu1 %12447, %v8190_v12   ;;  %v8198_v17 = vld [vmem:[%s16576_s7 + $0x40] sm:$0xff]  ;;  %v2358_v55 = vld [vmem:[#allocation2 + $0x158] sm:$0xff] }
 0x1d3   :  { %v2112_v24 = vpop.f32.mrf.mxu0  ;;  %v2359_v32 = vld [vmem:[#allocation2 + $0x160] sm:$0xff]  ;;  %v12710_v31 = vld [vmem:[#allocation2 + $0x154] ss:$8 sps:$4 sm:$0xff]  }
 0x1d4   :  { %2301 = vst.msk [vmem:[#allocation2 + $0x170] sm:$0xff] %vm13835_vm3, %v11506_v63  ;;  %v2113_v36 = vadd.f32 %v2112_v24, %v14707_v16  ;;  %8236 = vperm.xlu0 %12446, %v8197_v14   ;;  %v9603_v61 = vld [vmem:[%s16531_s18] sm:$0xff]  ;;  %v9215_v14 = vld [vmem:[%s16528_s15 + $0x18] sm:$0xff] }
 0x1d5   :  { %v2116_v25 = vpop.f32.mrf.mxu0 }
 0x1d6   :  { %v11507_v51 = vpack.c.bf16 %v2113_v36, %v2111_v50  ;;  %v2117_v21 = vadd.f32 %v2116_v25, %v14716_v23  ;;  %8211 = vperm.xlu1 %12447, %v8192_v53   ;;  %v8194_v23 = vld [vmem:[%s16576_s7 + $0x20] sm:$0xff]  ;;  %v10601_v50 = vcombine.low %v2357_v0, %v2358_v55  ;;  %v2356_v36 = vld [vmem:[#allocation2 + $0x148] sm:$0xff] }
 0x1d7   :  { %v2118_v22 = vpop.f32.mrf.mxu0  ;;  %v2360_v60 = vld [vmem:[#allocation2 + $0x168] sm:$0xff]  ;;  %v12734_v53 = vld [vmem:[%s16573_s2 + $0xc0] ss:$16 sps:$4 sm:$0xff]  }
 0x1d8   :  { %2302 = vst.msk [vmem:[#allocation2 + $0x178] sm:$0xff] %vm13835_vm3, %v11507_v51  ;;  %v2119_v16 = vadd.f32 %v2118_v22, %v14721_v8  ;;  %9218 = vperm.xlu0 %12446, %v9212_v46   ;;  %v12705_v11 = vld [vmem:[#allocation2 + $0x164] ss:$8 sps:$4 sm:$0xff]   ;;  %v10603_v39 = vcombine.low %v2359_v32, %v2360_v60  ;;  %v2353_v46 = vld [vmem:[#allocation2 + $0x130] sm:$0xff] }
 0x1d9   :  { %v2120_v47 = vpop.f32.mrf.mxu0  ;;  %3119 = vmatmul.mubr.bf16.gmra.mxu1 %v12721_v9  ;;  %v12712_v25 = vld [vmem:[#allocation2 + $0x144] ss:$8 sps:$4 sm:$0xff]  }
 0x1da   :  { %v11508_v35 = vpack.c.bf16 %v2119_v16, %v2117_v21  ;;  %3128 = vmatprep.mubr.bf16.mxu1 %v12730_v34  ;;  %v2121_v8 = vadd.f32 %v2120_v47, %v14727_v56  ;;  %8221 = vperm.xlu1 %12447, %v8194_v23   ;;  %v9213_v9 = vld [vmem:[%s16528_s15 + $0x8] sm:$0xff]  ;;  %v10014_v51 = vld [vmem:[%s16536_s23] sm:$0xff]  ;;  %v12717_v23 = vld [vmem:[#allocation2 + $0x134] ss:$8 sps:$4 sm:$0xff]  }
 0x1db   :  { %v2122_v54 = vpop.f32.mrf.mxu0  ;;  %v2361_v4 = vld [vmem:[#allocation2 + $0x170] sm:$0xff]  ;;  %v2355_v22 = vld [vmem:[#allocation2 + $0x140] sm:$0xff]  ;;  %v2348_v55 = vld [vmem:[#allocation2 + $0x108] sm:$0xff] }
 0x1dc   :  { %2303 = vst.msk [vmem:[#allocation2 + $0x180] sm:$0xff] %vm13835_vm3, %v11508_v35  ;;  %v2123_v3 = vadd.f32 %v2122_v54, %v14735_v28  ;;  %v14878_v28 = vpop.f32.mrf.mxu1  ;;  %9228 = vperm.xlu0 %12446, %v9214_v59   ;;  %v10599_v47 = vcombine.low %v2355_v22, %v2356_v36  ;;  %v2354_v54 = vld [vmem:[#allocation2 + $0x138] sm:$0xff] }
 0x1dd   :  { %v2126_v10 = vpop.f32.mrf.mxu0  ;;  %v2350_v59 = vld [vmem:[#allocation2 + $0x118] sm:$0xff] }
 0x1de   :  { %v11509_v26 = vpack.c.bf16 %v2123_v3, %v2121_v8  ;;  %v2127_v33 = vadd.f32 %v2126_v10, %v14744_v48  ;;  %8231 = vperm.xlu1 %12447, %v8196_v49   ;;  %v10104_v8 = vld [vmem:[%s16540_s27] sm:$0x3] }
 0x1df   :  { %v2128_v52 = vpop.f32.mrf.mxu0  ;;  %v2362_v56 = vld [vmem:[#allocation2 + $0x178] sm:$0xff] }
 0x1e0   :  { %v12703_v1 = vld [vmem:[#allocation2 + $0x174] ss:$8 sps:$4 sm:$0xff]   ;;  %2304 = vst.msk [vmem:[#allocation2 + $0x188] sm:$0xff] %vm13835_vm3, %v11509_v26  ;;  %v2129_v40 = vadd.f32 %v2128_v52, %v14752_v27  ;;  %v10605_v7 = vcombine.low %v2361_v4, %v2362_v56  ;;  %v14890_v27 = vpop.f32.mrf.mxu1  ;;  %9607 = vperm.xlu0 %12446, %v9603_v61   ;;  %v2352_v4 = vld [vmem:[#allocation2 + $0x128] sm:$0xff] }
 0x1e1   :  { %v2130_v38 = vpop.f32.mrf.mxu0  ;;  %3189 = vmatprep.subr.bf16.mxu0 %v12703_v1  ;;  %3129 = vmatmul.mubr.bf16.gmra.mxu1 %v12728_v41  ;;  %v12719_v56 = vld [vmem:[#allocation2 + $0x124] ss:$8 sps:$4 sm:$0xff]  }
 0x1e2   :  { %v11510_v5 = vpack.c.bf16 %v2129_v40, %v2127_v33  ;;  %3190 = vmatpush1.bf16.msra.mxu0 %v10605_v7  ;;  %3138 = vmatprep.mubr.bf16.mxu1 %v12733_v45  ;;  %v2131_v44 = vadd.f32 %v2130_v38, %v14762_v29  ;;  %v14908_v63 = vpop.f32.mrf.mxu1  ;;  %v10597_v45 = vcombine.low %v2353_v46, %v2354_v54  ;;  %v9604_v1 = vld [vmem:[%s16531_s18 + $0x8] sm:$0xff]  ;;  %v2351_v7 = vld [vmem:[#allocation2 + $0x120] sm:$0xff] }
 0x1e3   :  { %v2132_v48 = vpop.f32.mrf.mxu0  ;;  %3191 = vmatprep.subr.bf16.mxu0 %v12705_v11  ;;  %8241 = vperm.xlu1 %12447, %v8198_v17   ;;  %v10595_v38 = vcombine.low %v2351_v7, %v2352_v4  ;;  %v10023_v11 = vld [vmem:[%s16538_s25] sm:$0xff]  ;;  %v12764_v4 = vld [vmem:[%s16573_s2 + $0x8] ss:$16 sps:$4 sm:$0xff]  }
 0x1e4   :  { %2305 = vst.msk [vmem:[#allocation2 + $0x190] sm:$0xff] %vm13835_vm3, %v11510_v5  ;;  %v2133_v6 = vadd.f32 %v2132_v48, %v14770_v43  ;;  %v12736_v43 = vld [vmem:[%s16573_s2 + $0xc4] ss:$16 sps:$4 sm:$0xff]   ;;  %10017 = vperm.xlu0 %12446, %v10014_v51   ;;  %v12742_v48 = vld [vmem:[%s16573_s2 + $0xe0] ss:$16 sps:$4 sm:$0xff]   ;;  %v12796_v7 = vld [vmem:[%s16577_s5 + $0x28] sm:$0xff]  }
 0x1e5   :  { %v2136_v19 = vpop.f32.mrf.mxu0  ;;  %v12724_v5 = vld [vmem:[#allocation2 + $0x114] ss:$8 sps:$4 sm:$0xff]  }
 0x1e6   :  { %v11511_v29 = vpack.c.bf16 %v2133_v6, %v2131_v44  ;;  %3192 = vmatpush1.bf16.msra.mxu0 %v10603_v39  ;;  %v2137_v24 = vadd.f32 %v2136_v19, %v14788_v58  ;;  %v2349_v6 = vld [vmem:[#allocation2 + $0x110] sm:$0xff] }
 0x1e7   :  { %v2138_v42 = vpop.f32.mrf.mxu0  ;;  %3193 = vmatprep.subr.bf16.mxu0 %v12710_v31  ;;  %9223 = vperm.xlu1 %12447, %v9213_v9   ;;  %v10593_v17 = vcombine.low %v2349_v6, %v2350_v59  ;;  %v12726_v31 = vld [vmem:[#allocation2 + $0x104] ss:$8 sps:$4 sm:$0xff]   ;;  %v12799_v59 = vld [vmem:[%s16577_s5 + $0x18] sm:$0xff]  }
 0x1e8   :  { %2306 = vst.msk [vmem:[#allocation2 + $0x198] sm:$0xff] %vm13835_vm3, %v11511_v29  ;;  %v2139_v12 = vadd.f32 %v2138_v42, %v14800_v13  ;;  %v2025_v13 = vpop.f32.mrf.mxu1  ;;  %10107 = vperm.xlu0 %12446, %v10104_v8   ;;  %v2347_v42 = vld [vmem:[#allocation2 + $0x100] sm:$0xff]  ;;  %v12781_v6 = vld [vmem:[%s16573_s2 + $0xa8] ss:$16 sps:$4 sm:$0xff]  }
 0x1e9   :  { %v2140_v30 = vpop.f32.mrf.mxu0  ;;  %3139 = vmatmul.mubr.bf16.gmra.mxu1 %v12731_v15 }
 0x1ea   :  { %v11512_v34 = vpack.c.bf16 %v2139_v12, %v2137_v24  ;;  %3194 = vmatpush1.bf16.msra.mxu0 %v10601_v50  ;;  %3148 = vmatprep.mubr.bf16.mxu1 %v12736_v43  ;;  %v2141_v21 = vadd.f32 %v2140_v30, %v14818_v20  ;;  %v2027_v10 = vpop.f32.mrf.mxu1  ;;  %v10591_v12 = vcombine.low %v2347_v42, %v2348_v55  ;;  %v12751_v50 = vld [vmem:[%s16573_s2 + $0x100] ss:$16 sps:$4 sm:$0xff]   ;;  %v12762_v30 = vld [vmem:[%s16573_s2 + $0x124] ss:$16 sps:$4 sm:$0x7f]  }
 0x1eb   :  { %v2142_v58 = vpop.f32.mrf.mxu0  ;;  %3195 = vmatprep.subr.bf16.mxu0 %v12712_v25  ;;  %9233 = vperm.xlu1 %12447, %v9215_v14   ;;  %v12788_v55 = vld [vmem:[%s16573_s2 + $0x10c] ss:$16 sps:$4 sm:$0xff]   ;;  %v12793_v42 = vld [vmem:[%s16573_s2 + $0x128] ss:$16 sps:$4 sm:$0x7f]  }
 0x1ec   :  { %2307 = vst.msk [vmem:[#allocation2 + $0x1a0] sm:$0xff] %vm13835_vm3, %v11512_v34  ;;  %v2143_v16 = vadd.f32 %v2142_v58, %v14830_v18  ;;  %v12744_v18 = vld [vmem:[%s16573_s2 + $0xe4] ss:$16 sps:$4 sm:$0xff]   ;;  %v2029_v60 = vpop.f32.mrf.mxu1 }
 0x1ed   :  { %v2146_v35 = vpop.f32.mrf.mxu0 }
 0x1ee   :  { %v11513_v20 = vpack.c.bf16 %v2143_v16, %v2141_v21  ;;  %3196 = vmatpush1.bf16.msra.mxu0 %v10599_v47  ;;  %v2147_v41 = vadd.f32 %v2146_v35, %v14848_v37  ;;  %v2033_v44 = vpop.f32.mrf.mxu1 }
 0x1ef   :  { %v2148_v3 = vpop.f32.mrf.mxu0  ;;  %3197 = vmatprep.subr.bf16.mxu0 %v12717_v23  ;;  %9612 = vperm.xlu1 %12447, %v9604_v1   ;;  %v12795_v1 = vld [vmem:[%s16577_s5 + $0x30] sm:$0xff]  }
 0x1f0   :  { %2308 = vst.msk [vmem:[#allocation2 + $0x1a8] sm:$0xff] %vm13835_vm3, %v11513_v20  ;;  %v2149_v26 = vadd.f32 %v2148_v3, %v14860_v57  ;;  %v2035_v29 = vpop.f32.mrf.mxu1 }
 0x1f1   :  { %v2150_v52 = vpop.f32.mrf.mxu0  ;;  %3149 = vmatmul.mubr.bf16.gmra.mxu1 %v12734_v53  ;;  %v12760_v53 = vld [vmem:[%s16573_s2 + $0x120] ss:$16 sps:$4 sm:$0x7f]  }
 0x1f2   :  { %v11514_v33 = vpack.c.bf16 %v2149_v26, %v2147_v41  ;;  %3198 = vmatpush1.bf16.msra.mxu0 %v10597_v45  ;;  %3158 = vmatprep.mubr.bf16.mxu1 %v12744_v18  ;;  %v2151_v37 = vadd.f32 %v2150_v52, %v14878_v28  ;;  %v12753_v28 = vld [vmem:[%s16573_s2 + $0x104] ss:$16 sps:$4 sm:$0xff]   ;;  %v2037_v25 = vpop.f32.mrf.mxu1  ;;  %v12794_v41 = vld [vmem:[%s16577_s5 + $0x38] sm:$0xff]   ;;  %v12763_v52 = vld [vmem:[#allocation2 + $0x180] ss:$8 sps:$4 sm:$0xff]  }
 0x1f3   :  { %v2152_v40 = vpop.f32.mrf.mxu0  ;;  %3199 = vmatprep.subr.bf16.mxu0 %v12719_v56  ;;  %10026 = vperm.xlu1 %12447, %v10023_v11   ;;  %v12757_v26 = vld [vmem:[#allocation2 + $0x190] ss:$8 sps:$4 sm:$0xff]   ;;  %v12758_v45 = vld [vmem:[#allocation2 + $0x184] ss:$8 sps:$4 sm:$0xff]  }
 0x1f4   :  { %2309 = vst.msk [vmem:[#allocation2 + $0x1b0] sm:$0xff] %vm13835_vm3, %v11514_v33  ;;  %v2153_v57 = vadd.f32 %v2152_v40, %v14890_v27  ;;  %3730 = vmatpush1.bf16.msra.mxu1 %v12794_v41  ;;  %v12767_v56 = vld [vmem:[%s16573_s2 + $0x2c] ss:$16 sps:$4 sm:$0xff]   ;;  %v12769_v33 = vld [vmem:[%s16573_s2 + $0x28] ss:$16 sps:$4 sm:$0xff]  }
 0x1f5   :  { %v2156_v49 = vpop.f32.mrf.mxu0  ;;  %3731 = vmatprep.subr.bf16.mxu1 %v13212_v2  ;;  %v12770_v40 = vld [vmem:[%s16573_s2 + $0x4c] ss:$16 sps:$4 sm:$0xff]   ;;  %v12775_v11 = vld [vmem:[%s16573_s2 + $0x68] ss:$16 sps:$4 sm:$0xff]  }
 0x1f6   :  { %v11515_v32 = vpack.c.bf16 %v2153_v57, %v2151_v37  ;;  %3200 = vmatpush1.bf16.msra.mxu0 %v10595_v38  ;;  %v2157_v39 = vadd.f32 %v2156_v49, %v14908_v63  ;;  %v12773_v37 = vld [vmem:[%s16573_s2 + $0x6c] ss:$16 sps:$4 sm:$0xff]   ;;  %v12797_v57 = vld [vmem:[%s16577_s5 + $0x20] sm:$0xff]  }
 0x1f7   :  { %v2158_v27 = vpop.f32.mrf.mxu0  ;;  %3201 = vmatprep.subr.bf16.mxu0 %v12724_v5  ;;  %v12749_v3 = vld [vmem:[#allocation2 + $0x1a4] ss:$8 sps:$4 sm:$0xff]   ;;  %v12754_v46 = vld [vmem:[#allocation2 + $0x1a0] ss:$8 sps:$4 sm:$0xff]  }
 0x1f8   :  { %2310 = vst.msk [vmem:[#allocation2 + $0x1b8] sm:$0xff] %vm13835_vm3, %v11515_v32  ;;  %v2159_v15 = vadd.f32 %v2158_v27, %v2025_v13  ;;  %v2039_v13 = vpop.f32.mrf.mxu1  ;;  %3732 = vmatpush1.bf16.msra.mxu1 %v12795_v1  ;;  %v12798_v38 = vld [vmem:[%s16577_s5 + $0x88] sm:$0xff]   ;;  %v12800_v5 = vld [vmem:[%s16577_s5 + $0x80] sm:$0xff]   ;;  %v12803_v27 = vld [vmem:[%s16577_s5 + $0x70] sm:$0xff]  }
 0x1f9   :  { %v2160_v19 = vpop.f32.mrf.mxu0  ;;  %3159 = vmatmul.mubr.bf16.gmra.mxu1 %v12742_v48  ;;  %3733 = vmatprep.subr.bf16.mxu1 %v13212_v2  ;;  %v12776_v49 = vld [vmem:[%s16573_s2 + $0x8c] ss:$16 sps:$4 sm:$0xff]   ;;  %v12778_v32 = vld [vmem:[%s16573_s2 + $0x88] ss:$16 sps:$4 sm:$0xff]  }
 0x1fa   :  { %v11516_v61 = vpack.c.bf16 %v2159_v15, %v2157_v39  ;;  %3202 = vmatpush1.bf16.msra.mxu0 %v10593_v17  ;;  %3168 = vmatprep.mubr.bf16.mxu1 %v12753_v28  ;;  %v2161_v0 = vadd.f32 %v2160_v19, %v2027_v10  ;;  %v12755_v10 = vld [vmem:[#allocation2 + $0x194] ss:$8 sps:$4 sm:$0xff]   ;;  %v12784_v15 = vld [vmem:[%s16573_s2 + $0xc8] ss:$16 sps:$4 sm:$0xff]  }
 0x1fb   :  { %v2162_v43 = vpop.f32.mrf.mxu0  ;;  %3203 = vmatprep.subr.bf16.mxu0 %v12726_v31  ;;  %v12801_v48 = vld [vmem:[%s16577_s5 + $0x78] sm:$0xff]  }
 0x1fc   :  { %2311 = vst.msk [vmem:[#allocation2 + $0x1c0] sm:$0xff] %vm13835_vm3, %v11516_v61  ;;  %v2163_v24 = vadd.f32 %v2162_v43, %v2029_v60  ;;  %3734 = vmatpush1.bf16.msra.mxu1 %v12796_v7  ;;  %v12772_v60 = vld [vmem:[%s16573_s2 + $0x48] ss:$16 sps:$4 sm:$0xff]   ;;  %v12779_v28 = vld [vmem:[%s16573_s2 + $0xac] ss:$16 sps:$4 sm:$0xff]   ;;  %v12806_v43 = vld [vmem:[%s16577_s5 + $0x60] sm:$0xff]  }
 0x1fd   :  { %v2166_v63 = vpop.f32.mrf.mxu0  ;;  %3735 = vmatprep.subr.bf16.mxu1 %v13212_v2  ;;  %v12782_v39 = vld [vmem:[%s16573_s2 + $0xcc] ss:$16 sps:$4 sm:$0xff]   ;;  %v12787_v19 = vld [vmem:[%s16573_s2 + $0xe8] ss:$16 sps:$4 sm:$0xff]  }
 0x1fe   :  { %v11517_v36 = vpack.c.bf16 %v2163_v24, %v2161_v0  ;;  %3204 = vmatpush1.bf16.msra.mxu0 %v10591_v12  ;;  %v2167_v51 = vadd.f32 %v2166_v63, %v2033_v44  ;;  %v12802_v44 = vld [vmem:[%s16577_s5 + $0x10] sm:$0xff]   ;;  %v12785_v17 = vld [vmem:[%s16573_s2 + $0xec] ss:$16 sps:$4 sm:$0xff]   ;;  %v12790_v31 = vld [vmem:[%s16573_s2 + $0x108] ss:$16 sps:$4 sm:$0xff]  }
 0x1ff   :  { %v2168_v9 = vpop.f32.mrf.mxu0  ;;  %v12746_v20 = vld [vmem:[#allocation2 + $0x1b4] ss:$8 sps:$4 sm:$0xff]   ;;  %v12748_v18 = vld [vmem:[#allocation2 + $0x1b0] ss:$8 sps:$4 sm:$0xff]   ;;  %v12805_v0 = vld [vmem:[%s16577_s5 + $0x8] sm:$0xff]  }
 0x200   :  { %2312 = vst.msk [vmem:[#allocation2 + $0x1c8] sm:$0xff] %vm13835_vm3, %v11517_v36  ;;  %v2169_v34 = vadd.f32 %v2168_v9, %v2035_v29  ;;  %3736 = vmatpush1.bf16.msra.mxu1 %v12797_v57  ;;  %v12791_v61 = vld [vmem:[%s16573_s2 + $0x12c] ss:$16 sps:$4 sm:$0x7f]   ;;  %v12808_v12 = vld [vmem:[%s16577_s5] sm:$0xff]   ;;  %v12809_v63 = vld [vmem:[%s16577_s5 + $0x50] sm:$0xff]  }
 0x201   :  { %v2170_v58 = vpop.f32.mrf.mxu0  ;;  %3169 = vmatmul.mubr.bf16.gmra.mxu1 %v12751_v50  ;;  %3737 = vmatprep.subr.bf16.mxu1 %v13212_v2  ;;  %v12804_v29 = vld [vmem:[%s16577_s5 + $0x68] sm:$0xff]   ;;  %v12807_v24 = vld [vmem:[%s16577_s5 + $0x58] sm:$0xff]   ;;  %v12812_v9 = vld [vmem:[%s16577_s5 + $0x40] sm:$0xff]  }
 0x202   :  { %v11518_v22 = vpack.c.bf16 %v2169_v34, %v2167_v51  ;;  %3178 = vmatprep.mubr.bf16.mxu1 %v12762_v30  ;;  %v2171_v16 = vadd.f32 %v2170_v58, %v2037_v25  ;;  %v12810_v50 = vld [vmem:[%s16577_s5 + $0x48] sm:$0x7f]   ;;  %v12811_v36 = vld [vmem:[%s16577_s5 + $0x98] sm:$0x7f]   ;;  %v12813_v51 = vld [vmem:[%s16577_s5 + $0x90] sm:$0xff]  }
 0x203   :  { %v2172_v21 = vpop.f32.mrf.mxu0  ;;  %v3727_v30 = vsel %vm3725_vm5, %v12810_v50, 0  ;;  %v4025_v25 = vsel %vm3725_vm5, %v12811_v36, 0 }
 0x204   :  { %2313 = vst.msk [vmem:[#allocation2 + $0x1d0] sm:$0xff] %vm13835_vm3, %v11518_v22  ;;  %v2173_v47 = vadd.f32 %v2172_v21, %v2039_v13  ;;  %3738 = vmatpush1.bf16.msra.mxu1 %v12799_v59 }
 0x205   :  { %3739 = vmatprep.subr.bf16.mxu1 %v13212_v2 }
 0x206   :  { %v11519_v14 = vpack.c.bf16 %v2173_v47, %v2171_v16 }
 0x207   :  { %v12740_v23 = vld [vmem:[#allocation2 + $0x1c4] ss:$8 sps:$4 sm:$0xff]   ;;  %v12745_v8 = vld [vmem:[#allocation2 + $0x1c0] ss:$8 sps:$4 sm:$0xff]  }
 0x208   :  { %2314 = vst.msk [vmem:[#allocation2 + $0x1d8] sm:$0xff] %vm13835_vm3, %v11519_v14  ;;  %3740 = vmatpush1.bf16.msra.mxu1 %v12802_v44 }
 0x209   :  { %3179 = vmatmul.mubr.bf16.gmra.mxu1 %v12760_v53  ;;  %3741 = vmatprep.subr.bf16.mxu1 %v13212_v2 }
 0x20c   :  { %3742 = vmatpush1.bf16.msra.mxu1 %v12805_v0 }
 0x20d   :  { %3743 = vmatprep.subr.bf16.mxu1 %v13212_v2 }
 0x20f   :  { %v12737_v35 = vld [vmem:[#allocation2 + $0x1d4] ss:$8 sps:$4 sm:$0xff]   ;;  %v12739_v54 = vld [vmem:[#allocation2 + $0x1d0] ss:$8 sps:$4 sm:$0xff]  }
 0x210   :  { %3209 = vmatprep.subr.bf16.mxu0 %v12737_v35  ;;  %3744 = vmatpush1.bf16.msra.mxu1 %v12808_v12 }
 0x211   :  { %3210 = vmatpush2.bf16.msra.mxu0 %v12739_v54  ;;  %3757 = vmatprep.subr.bf16.mxu1 %v13212_v2 }
 0x212   :  { %3211 = vmatprep.subr.bf16.mxu0 %v12740_v23 }
 0x214   :  { %3758 = vmatpush2.bf16.msra.mxu1 %v3727_v30 }
 0x215   :  { %3212 = vmatpush2.bf16.msra.mxu0 %v12745_v8  ;;  %3759 = vmatprep.subr.bf16.mxu1 %v13212_v2 }
 0x216   :  { %3213 = vmatprep.subr.bf16.mxu0 %v12746_v20 }
 0x218   :  { %3760 = vmatpush2.bf16.msra.mxu1 %v12812_v9 }
 0x219   :  { %3214 = vmatpush2.bf16.msra.mxu0 %v12748_v18  ;;  %4323 = vmatprep.subr.bf16.mxu1 %v13212_v2 }
 0x21a   :  { %3215 = vmatprep.subr.bf16.mxu0 %v12749_v3 }
 0x21d   :  { %3216 = vmatpush2.bf16.msra.mxu0 %v12754_v46 }
 0x21e   :  { %3217 = vmatprep.subr.bf16.mxu0 %v12755_v10 }
 0x221   :  { %3218 = vmatpush2.bf16.msra.mxu0 %v12757_v26  ;;  %v2438_v26 = vpop.permute.xlu0 %2437 }
 0x222   :  { %3219 = vmatprep.subr.bf16.mxu0 %v12758_v45 }
 0x225   :  { %3220 = vmatpush2.bf16.msra.mxu0 %v12763_v52 }
 0x226   :  { %4027 = vmatprep.subr.bf16.mxu0 %v13212_v2 }
 0x228   :  { %3222 = vmatmul.mubr.bf16.vlgmr.msra.gmra.mxu0 %v12764_v4 }
 0x229   :  { %10620 = vmatprep.mubr.msk.bf16.mxu0 %vm3025_vm4, %v12767_v56  ;;  %4028 = vmatpush1.bf16.msra.mxu0 %v12798_v38 }
 0x22a   :  { %4029 = vmatprep.subr.bf16.mxu0 %v13212_v2 }
 0x22d   :  { %4030 = vmatpush1.bf16.msra.mxu0 %v12800_v5 }
 0x22e   :  { %4031 = vmatprep.subr.bf16.mxu0 %v13212_v2 }
 0x230   :  { %3232 = vmatmul.mubr.bf16.gmra.mxu0 %v12769_v33 }
 0x231   :  { %10621 = vmatprep.mubr.msk.bf16.mxu0 %vm3025_vm4, %v12770_v40  ;;  %4032 = vmatpush1.bf16.msra.mxu0 %v12801_v48  ;;  %v2443_v40 = vpop.permute.xlu0 %2442 }
 0x232   :  { %4033 = vmatprep.subr.bf16.mxu0 %v13212_v2 }
 0x235   :  { %4034 = vmatpush1.bf16.msra.mxu0 %v12803_v27  ;;  %v2458_v30 = vpop.permute.xlu0 %2457 }
 0x236   :  { %4035 = vmatprep.subr.bf16.mxu0 %v13212_v2 }
 0x238   :  { %3242 = vmatmul.mubr.bf16.gmra.mxu0 %v12772_v60  ;;  %v2448_v60 = vpop.permute.xlu1 %2447 }
 0x239   :  { %10622 = vmatprep.mubr.msk.bf16.mxu0 %vm3025_vm4, %v12773_v37  ;;  %4036 = vmatpush1.bf16.msra.mxu0 %v12804_v29 }
 0x23a   :  { %4037 = vmatprep.subr.bf16.mxu0 %v13212_v2 }
 0x23d   :  { %4038 = vmatpush1.bf16.msra.mxu0 %v12806_v43 }
 0x23e   :  { %4039 = vmatprep.subr.bf16.mxu0 %v13212_v2 }
 0x240   :  { %3252 = vmatmul.mubr.bf16.gmra.mxu0 %v12775_v11 }
 0x241   :  { %10623 = vmatprep.mubr.msk.bf16.mxu0 %vm3025_vm4, %v12776_v49  ;;  %4040 = vmatpush1.bf16.msra.mxu0 %v12807_v24 }
 0x242   :  { %4041 = vmatprep.subr.bf16.mxu0 %v13212_v2 }
 0x245   :  { %4042 = vmatpush1.bf16.msra.mxu0 %v12809_v63 }
 0x246   :  { %4055 = vmatprep.subr.bf16.mxu0 %v13212_v2 }
 0x248   :  { %3262 = vmatmul.mubr.bf16.gmra.mxu0 %v12778_v32 }
 0x249   :  { %10624 = vmatprep.mubr.msk.bf16.mxu0 %vm3025_vm4, %v12779_v28  ;;  %4056 = vmatpush2.bf16.msra.mxu0 %v4025_v25 }
 0x24a   :  { %4057 = vmatprep.subr.bf16.mxu0 %v13212_v2 }
 0x24d   :  { %4058 = vmatpush2.bf16.msra.mxu0 %v12813_v51 }
 0x250   :  { %3272 = vmatmul.mubr.bf16.gmra.mxu0 %v12781_v6 }
 0x251   :  { %10625 = vmatprep.mubr.msk.bf16.mxu0 %vm3025_vm4, %v12782_v39 }
 0x258   :  { %3282 = vmatmul.mubr.bf16.gmra.mxu0 %v12784_v15 }
 0x259   :  { %10626 = vmatprep.mubr.msk.bf16.mxu0 %vm3025_vm4, %v12785_v17 }
 0x260   :  { %3292 = vmatmul.mubr.bf16.gmra.mxu0 %v12787_v19 }
 0x261   :  { %10627 = vmatprep.mubr.msk.bf16.mxu0 %vm3025_vm4, %v12788_v55 }
 0x268   :  { %3302 = vmatmul.mubr.bf16.gmra.mxu0 %v12790_v31  ;;  %v2453_v31 = vpop.permute.xlu1 %2452 }
 0x269   :  { %10628 = vmatprep.mubr.msk.bf16.mxu0 %vm3025_vm4, %v12791_v61 }
 0x270   :  { %3312 = vmatmul.mubr.bf16.gmra.mxu0 %v12793_v42 }
 0x281   :  { %v3090_v34 = vpop.f32.mrf.mxu1 }
 0x282   :  { %v3091_v52 = vadd.f32 %v3090_v34, %v2438_v26 }
 0x283   :  { %v3092_v58 = vpop.f32.mrf.mxu1 }
 0x284   :  { %v3093_v1 = vadd.f32 %v3092_v58, %v2438_v26 }
 0x285   :  { %v3094_v22 = vpop.f32.mrf.mxu1 }
 0x286   :  { %v3095_v37 = vadd.f32 %v3094_v22, %v2443_v40 }
 0x287   :  { %v3096_v13 = vpop.f32.mrf.mxu1 }
 0x288   :  { %v3097_v38 = vadd.f32 %v3096_v13, %v2443_v40 }
 0x289   :  { %v3100_v21 = vpop.f32.mrf.mxu1 }
 0x28a   :  { %v3101_v59 = vadd.f32 %v3100_v21, %v2448_v60 }
 0x28b   :  { %v3102_v16 = vpop.f32.mrf.mxu1 }
 0x28c   :  { %v3103_v15 = vadd.f32 %v3102_v16, %v2448_v60 }
 0x28d   :  { %v3104_v47 = vpop.f32.mrf.mxu1 }
 0x28e   :  { %v3105_v29 = vadd.f32 %v3104_v47, %v2453_v31 }
 0x28f   :  { %v3106_v53 = vpop.f32.mrf.mxu1 }
 0x290   :  { %v3107_v12 = vadd.f32 %v3106_v53, %v2453_v31  ;;  %v2463_v53 = vpop.permute.xlu1 %2462 }
 0x291   :  { %v3110_v14 = vpop.f32.mrf.mxu1 }
 0x292   :  { %v3111_v9 = vadd.f32 %v3110_v14, %v2458_v30  ;;  %v12820_v14 = vld [vmem:[%s16577_s5 + $0xd8] sm:$0xff]  }
 0x293   :  { %v3112_v35 = vpop.f32.mrf.mxu1 }
 0x294   :  { %v3113_v13 = vadd.f32 %v3112_v35, %v2458_v30 }
 0x295   :  { %v15124_v54 = vpop.f32.mrf.mxu1 }
 0x297   :  { %v15126_v23 = vpop.f32.mrf.mxu1 }
 0x298   :  { %v3117_v60 = vadd.f32 %v15126_v23, %v2463_v53 }
 0x299   :  { %v15128_v8 = vpop.f32.mrf.mxu1 }
 0x29b   :  { %v15130_v20 = vpop.f32.mrf.mxu1 }
 0x29d   :  { %v15132_v18 = vpop.f32.mrf.mxu1 }
 0x29f   :  { %v15134_v3 = vpop.f32.mrf.mxu1 }
 0x2a1   :  { %v15136_v46 = vpop.f32.mrf.mxu1 }
 0x2a3   :  { %v15138_v10 = vpop.f32.mrf.mxu1 }
 0x2a5   :  { %v15140_v41 = vpop.f32.mrf.mxu1 }
 0x2a7   :  { %v15142_v45 = vpop.f32.mrf.mxu1 }
 0x2a9   :  { %v15144_v4 = vpop.f32.mrf.mxu1 }
 0x2ab   :  { %v15146_v11 = vpop.f32.mrf.mxu1 }
 0x2ad   :  { %v15148_v6 = vpop.f32.mrf.mxu1 }
 0x2af   :  { %v15152_v0 = vpop.f32.mrf.mxu1 }
 0x2b1   :  { %v15156_v58 = vpop.f32.mrf.mxu1 }
 0x2e8   :  { %v3223_v56 = vpop.f32.mrf.mxu0 }
 0x2e9   :  { %v3224_v33 = vadd.f32 %v3223_v56, %v3091_v52  ;;  %v3115_v52 = vadd.f32 %v15124_v54, %v2463_v53 }
 0x2ea   :  { %v3225_v7 = vpop.f32.mrf.mxu0 }
 0x2eb   :  { %v3226_v57 = vadd.f32 %v3225_v7, %v3093_v1  ;;  %v3322_v5 = vmax.f32 %v3224_v33, 0.0  ;;  %v15164_v33 = vpop.f32.mrf.mxu1 }
 0x2ec   :  { %v3227_v49 = vpop.f32.mrf.mxu0 }
 0x2ed   :  { %v3323_v48 = vmax.f32 %v3226_v57, 0.0  ;;  %v3228_v32 = vadd.f32 %v3227_v49, %v3095_v37  ;;  %v15180_v23 = vpop.f32.mrf.mxu1 }
 0x2ee   :  { %v3229_v28 = vpop.f32.mrf.mxu0 }
 0x2ef   :  { %v11520_v44 = vpack.c.bf16 %v3323_v48, %v3322_v5  ;;  %v3230_v27 = vadd.f32 %v3229_v28, %v3097_v38  ;;  %v3324_v17 = vmax.f32 %v3228_v32, 0.0  ;;  %v2468_v38 = vpop.permute.xlu0 %2467  ;;  %v12824_v28 = vld [vmem:[%s16577_s5 + $0xd0] sm:$0xff]  }
 0x2f0   :  { %v3233_v39 = vpop.f32.mrf.mxu0 }
 0x2f1   :  { %3482 = vst.msk [vmem:[#allocation3] sm:$0xff] %vm13835_vm3, %v11520_v44  ;;  %v3325_v19 = vmax.f32 %v3230_v27, 0.0  ;;  %v3234_v55 = vadd.f32 %v3233_v39, %v3101_v59  ;;  %v3121_v59 = vadd.f32 %v15128_v8, %v2468_v38  ;;  %v3123_v44 = vadd.f32 %v15130_v20, %v2468_v38 }
 0x2f2   :  { %v3235_v61 = vpop.f32.mrf.mxu0 }
 0x2f3   :  { %v11521_v43 = vpack.c.bf16 %v3325_v19, %v3324_v17  ;;  %v3236_v42 = vadd.f32 %v3235_v61, %v3103_v15  ;;  %v3326_v63 = vmax.f32 %v3234_v55, 0.0  ;;  %v2473_v15 = vpop.permute.xlu1 %2472  ;;  %v12828_v61 = vld [vmem:[%s16577_s5 + $0xc8] sm:$0xff]  }
 0x2f4   :  { %v3237_v24 = vpop.f32.mrf.mxu0  ;;  %v3125_v19 = vadd.f32 %v15132_v18, %v2473_v15 }
 0x2f5   :  { %3483 = vst.msk [vmem:[#allocation3 + $0x8] sm:$0xff] %vm13835_vm3, %v11521_v43  ;;  %v3327_v50 = vmax.f32 %v3236_v42, 0.0  ;;  %v3238_v36 = vadd.f32 %v3237_v24, %v3105_v29  ;;  %v15193_v29 = vpop.f32.mrf.mxu1  ;;  %v3127_v24 = vadd.f32 %v15134_v3, %v2473_v15 }
 0x2f6   :  { %v3239_v25 = vpop.f32.mrf.mxu0 }
 0x2f7   :  { %v11522_v51 = vpack.c.bf16 %v3327_v50, %v3326_v63  ;;  %v3240_v34 = vadd.f32 %v3239_v25, %v3107_v12  ;;  %v3328_v21 = vmax.f32 %v3238_v36, 0.0  ;;  %v2478_v50 = vpop.permute.xlu0 %2477 }
 0x2f8   :  { %v3243_v22 = vpop.f32.mrf.mxu0  ;;  %v3131_v30 = vadd.f32 %v15136_v46, %v2478_v50 }
 0x2f9   :  { %3484 = vst.msk [vmem:[#allocation3 + $0x10] sm:$0xff] %vm13835_vm3, %v11522_v51  ;;  %v3329_v16 = vmax.f32 %v3240_v34, 0.0  ;;  %v3244_v47 = vadd.f32 %v3243_v22, %v3111_v9  ;;  %v15210_v9 = vpop.f32.mrf.mxu1  ;;  %v12832_v34 = vld [vmem:[%s16577_s5 + $0xc0] sm:$0xff]   ;;  %v3133_v22 = vadd.f32 %v15138_v10, %v2478_v50 }
 0x2fa   :  { %v3245_v26 = vpop.f32.mrf.mxu0 }
 0x2fb   :  { %v11523_v56 = vpack.c.bf16 %v3329_v16, %v3328_v21  ;;  %v3246_v1 = vadd.f32 %v3245_v26, %v3113_v13  ;;  %v3330_v54 = vmax.f32 %v3244_v47, 0.0  ;;  %v2483_v16 = vpop.permute.xlu1 %2482 }
 0x2fc   :  { %v3247_v35 = vpop.f32.mrf.mxu0  ;;  %v15166_v40 = vld [vmem:[#allocation3] ss:$8 sps:$4 sm:$0xff]   ;;  %v15168_v7 = vld [vmem:[#allocation3 + $0x4] ss:$8 sps:$4 sm:$0xff]   ;;  %v3135_v53 = vadd.f32 %v15140_v41, %v2483_v16 }
 0x2fd   :  { %3485 = vst.msk [vmem:[#allocation3 + $0x18] sm:$0xff] %vm13835_vm3, %v11523_v56  ;;  %v3331_v37 = vmax.f32 %v3246_v1, 0.0  ;;  %v3248_v57 = vadd.f32 %v3247_v35, %v3115_v52  ;;  %10679 = vmatprep.mubr.msk.bf16.mxu1 %vm3694_vm6, %v15168_v7  ;;  %10739 = vmatprep.mubr.msk.bf16.mxu0 %vm3694_vm6, %v15168_v7  ;;  %v12836_v56 = vld [vmem:[%s16577_s5 + $0xb8] sm:$0xff]   ;;  %v15223_v1 = vpop.f32.mrf.mxu1 }
 0x2fe   :  { %v3249_v49 = vpop.f32.mrf.mxu0  ;;  %3762 = vmatmul.mubr.bf16.vlgmr.msra.gmra.mxu1 %v15166_v40  ;;  %4060 = vmatmul.mubr.bf16.vlgmr.msra.gmra.mxu0 %v15166_v40 }
 0x2ff   :  { %v11524_v5 = vpack.c.bf16 %v3331_v37, %v3330_v54  ;;  %v3250_v48 = vadd.f32 %v3249_v49, %v3117_v60  ;;  %4324 = vmatpush1.bf16.msra.mxu1 %v12820_v14  ;;  %v3332_v8 = vmax.f32 %v3248_v57, 0.0  ;;  %v3137_v60 = vadd.f32 %v15142_v45, %v2483_v16  ;;  %v2488_v57 = vpop.permute.xlu0 %2487 }
 0x300   :  { %v3253_v32 = vpop.f32.mrf.mxu0  ;;  %4325 = vmatprep.subr.bf16.mxu1 %v13212_v2  ;;  %v3141_v49 = vadd.f32 %v15144_v4, %v2488_v57 }
 0x301   :  { %3486 = vst.msk [vmem:[#allocation3 + $0x20] sm:$0xff] %vm13835_vm3, %v11524_v5  ;;  %v3333_v27 = vmax.f32 %v3250_v48, 0.0  ;;  %v3254_v39 = vadd.f32 %v3253_v32, %v3121_v59  ;;  %v15240_v5 = vpop.f32.mrf.mxu1  ;;  %v12840_v32 = vld [vmem:[%s16577_s5 + $0xb0] sm:$0xff]  }
 0x302   :  { %v3255_v17 = vpop.f32.mrf.mxu0 }
 0x303   :  { %v11525_v55 = vpack.c.bf16 %v3333_v27, %v3332_v8  ;;  %v3256_v31 = vadd.f32 %v3255_v17, %v3123_v44  ;;  %4326 = vmatpush1.bf16.msra.mxu1 %v12824_v28  ;;  %v3334_v18 = vmax.f32 %v3254_v39, 0.0  ;;  %v3143_v28 = vadd.f32 %v15146_v11, %v2488_v57  ;;  %v2493_v27 = vpop.permute.xlu1 %2492 }
 0x304   :  { %v3257_v20 = vpop.f32.mrf.mxu0  ;;  %v15195_v43 = vld [vmem:[#allocation3 + $0x14] ss:$8 sps:$4 sm:$0xff]   ;;  %v15197_v42 = vld [vmem:[#allocation3 + $0x10] ss:$8 sps:$4 sm:$0xff]   ;;  %4327 = vmatprep.subr.bf16.mxu1 %v13212_v2  ;;  %v3145_v15 = vadd.f32 %v15148_v6, %v2493_v27 }
 0x305   :  { %3487 = vst.msk [vmem:[#allocation3 + $0x28] sm:$0xff] %vm13835_vm3, %v11525_v55  ;;  %v3335_v12 = vmax.f32 %v3256_v31, 0.0  ;;  %v3258_v63 = vadd.f32 %v3257_v20, %v3125_v19  ;;  %10680 = vmatprep.mubr.msk.bf16.mxu1 %vm3694_vm6, %v15195_v43  ;;  %10740 = vmatprep.mubr.msk.bf16.mxu0 %vm3694_vm6, %v15195_v43  ;;  %v12844_v55 = vld [vmem:[%s16577_s5 + $0xa8] sm:$0xff]   ;;  %v15253_v31 = vpop.f32.mrf.mxu1 }
 0x306   :  { %v3259_v36 = vpop.f32.mrf.mxu0  ;;  %3770 = vmatmul.mubr.bf16.gmra.mxu1 %v15197_v42  ;;  %4068 = vmatmul.mubr.bf16.gmra.mxu0 %v15197_v42 }
 0x307   :  { %v11526_v25 = vpack.c.bf16 %v3335_v12, %v3334_v18  ;;  %v3260_v3 = vadd.f32 %v3259_v36, %v3127_v24  ;;  %4328 = vmatpush1.bf16.msra.mxu1 %v12828_v61  ;;  %v3336_v46 = vmax.f32 %v3258_v63, 0.0  ;;  %v3147_v24 = vadd.f32 %v15152_v0, %v2493_v27  ;;  %v2498_v63 = vpop.permute.xlu0 %2497 }
 0x308   :  { %v3263_v51 = vpop.f32.mrf.mxu0  ;;  %4329 = vmatprep.subr.bf16.mxu1 %v13212_v2  ;;  %v3151_v36 = vadd.f32 %v15156_v58, %v2498_v63 }
 0x309   :  { %3488 = vst.msk [vmem:[#allocation3 + $0x30] sm:$0xff] %vm13835_vm3, %v11526_v25  ;;  %v3337_v13 = vmax.f32 %v3260_v3, 0.0  ;;  %v3264_v21 = vadd.f32 %v3263_v51, %v3131_v30  ;;  %v15270_v25 = vpop.f32.mrf.mxu1  ;;  %v12848_v51 = vld [vmem:[%s16577_s5 + $0xa0] sm:$0xff]  }
 0x30a   :  { %v3265_v47 = vpop.f32.mrf.mxu0 }
 0x30b   :  { %v11527_v26 = vpack.c.bf16 %v3337_v13, %v3336_v46  ;;  %v3266_v52 = vadd.f32 %v3265_v47, %v3133_v22  ;;  %4330 = vmatpush1.bf16.msra.mxu1 %v12832_v34  ;;  %v3338_v41 = vmax.f32 %v3264_v21, 0.0  ;;  %v3153_v34 = vadd.f32 %v15164_v33, %v2498_v63  ;;  %v12852_v13 = vld [vmem:[%s16577_s5 + $0xe8] sm:$0x7f]   ;;  %v2503_v21 = vpop.permute.xlu1 %2502  ;;  %v2508_v57 = vpop.permute.xlu0 %2507 }
 0x30c   :  { %v3267_v10 = vpop.f32.mrf.mxu0  ;;  %v15225_v14 = vld [vmem:[#allocation3 + $0x24] ss:$8 sps:$4 sm:$0xff]   ;;  %v15227_v35 = vld [vmem:[#allocation3 + $0x20] ss:$8 sps:$4 sm:$0xff]   ;;  %4331 = vmatprep.subr.bf16.mxu1 %v13212_v2  ;;  %v3155_v47 = vadd.f32 %v15180_v23, %v2503_v21  ;;  %v3157_v33 = vadd.f32 %v15193_v29, %v2503_v21  ;;  %v4321_v23 = vsel %vm3725_vm5, %v12852_v13, 0  ;;  %v3161_v29 = vadd.f32 %v15210_v9, %v2508_v57 }
 0x30d   :  { %3489 = vst.msk [vmem:[#allocation3 + $0x38] sm:$0xff] %vm13835_vm3, %v11527_v26  ;;  %v3339_v54 = vmax.f32 %v3266_v52, 0.0  ;;  %v3268_v37 = vadd.f32 %v3267_v10, %v3135_v53  ;;  %10681 = vmatprep.mubr.msk.bf16.mxu1 %vm3694_vm6, %v15225_v14  ;;  %10741 = vmatprep.mubr.msk.bf16.mxu0 %vm3694_vm6, %v15225_v14  ;;  %v3172_v52 = vpop.f32.mrf.mxu1 }
 0x30e   :  { %v3269_v38 = vpop.f32.mrf.mxu0  ;;  %3778 = vmatmul.mubr.bf16.gmra.mxu1 %v15227_v35  ;;  %4076 = vmatmul.mubr.bf16.gmra.mxu0 %v15227_v35 }
 0x30f   :  { %v11528_v59 = vpack.c.bf16 %v3339_v54, %v3338_v41  ;;  %v3270_v45 = vadd.f32 %v3269_v38, %v3137_v60  ;;  %4332 = vmatpush1.bf16.msra.mxu1 %v12836_v56  ;;  %v3340_v4 = vmax.f32 %v3268_v37, 0.0 }
 0x310   :  { %v3273_v48 = vpop.f32.mrf.mxu0  ;;  %4333 = vmatprep.subr.bf16.mxu1 %v13212_v2 }
 0x311   :  { %3490 = vst.msk [vmem:[#allocation3 + $0x40] sm:$0xff] %vm13835_vm3, %v11528_v59  ;;  %v3341_v44 = vmax.f32 %v3270_v45, 0.0  ;;  %v3274_v8 = vadd.f32 %v3273_v48, %v3141_v49  ;;  %v3174_v45 = vpop.f32.mrf.mxu1 }
 0x312   :  { %v3275_v39 = vpop.f32.mrf.mxu0 }
 0x313   :  { %v11529_v17 = vpack.c.bf16 %v3341_v44, %v3340_v4  ;;  %v3276_v19 = vadd.f32 %v3275_v39, %v3143_v28  ;;  %4334 = vmatpush1.bf16.msra.mxu1 %v12840_v32  ;;  %v3342_v6 = vmax.f32 %v3274_v8, 0.0  ;;  %v12853_v32 = vld [vmem:[%s16577_s5 + $0xe0] sm:$0xff]   ;;  %v3163_v28 = vadd.f32 %v15223_v1, %v2508_v57  ;;  %v2513_v8 = vpop.permute.xlu1 %2512  ;;  %s16579_s5 = sld [smem:[#allocation19_spill]] }
 0x314   :  { %v3277_v11 = vpop.f32.mrf.mxu0  ;;  %v15255_v61 = vld [vmem:[#allocation3 + $0x34] ss:$8 sps:$4 sm:$0xff]   ;;  %v15257_v20 = vld [vmem:[#allocation3 + $0x30] ss:$8 sps:$4 sm:$0xff]   ;;  %4335 = vmatprep.subr.bf16.mxu1 %v13212_v2  ;;  %v3165_v39 = vadd.f32 %v15240_v5, %v2513_v8  ;;  %v3167_v1 = vadd.f32 %v15253_v31, %v2513_v8  ;;  %v2518_v5 = vpop.permute.xlu0 %2517 }
 0x315   :  { %3491 = vst.msk [vmem:[#allocation3 + $0x48] sm:$0xff] %vm13835_vm3, %v11529_v17  ;;  %v3343_v18 = vmax.f32 %v3276_v19, 0.0  ;;  %v3278_v12 = vadd.f32 %v3277_v11, %v3145_v15  ;;  %10682 = vmatprep.mubr.msk.bf16.mxu1 %vm3694_vm6, %v15255_v61  ;;  %10742 = vmatprep.mubr.msk.bf16.mxu0 %vm3694_vm6, %v15255_v61  ;;  %v3176_v19 = vpop.f32.mrf.mxu1 }
 0x316   :  { %v3279_v50 = vpop.f32.mrf.mxu0  ;;  %3786 = vmatmul.mubr.bf16.gmra.mxu1 %v15257_v20  ;;  %4084 = vmatmul.mubr.bf16.gmra.mxu0 %v15257_v20 }
 0x317   :  { %v11530_v30 = vpack.c.bf16 %v3343_v18, %v3342_v6  ;;  %v3280_v0 = vadd.f32 %v3279_v50, %v3147_v24  ;;  %4336 = vmatpush1.bf16.msra.mxu1 %v12844_v55  ;;  %v3344_v58 = vmax.f32 %v3278_v12, 0.0  ;;  %v3171_v50 = vadd.f32 %v15270_v25, %v2518_v5 }
 0x318   :  { %v3283_v3 = vpop.f32.mrf.mxu0  ;;  %4337 = vmatprep.subr.bf16.mxu1 %v13212_v2 }
 0x319   :  { %3492 = vst.msk [vmem:[#allocation3 + $0x50] sm:$0xff] %vm13835_vm3, %v11530_v30  ;;  %v3345_v22 = vmax.f32 %v3280_v0, 0.0  ;;  %v3284_v46 = vadd.f32 %v3283_v3, %v3151_v36  ;;  %v3180_v30 = vpop.f32.mrf.mxu1  ;;  %v3173_v3 = vadd.f32 %v3172_v52, %v2518_v5 }
 0x31a   :  { %v3285_v16 = vpop.f32.mrf.mxu0 }
 0x31b   :  { %v11531_v53 = vpack.c.bf16 %v3345_v22, %v3344_v58  ;;  %v3286_v26 = vadd.f32 %v3285_v16, %v3153_v34  ;;  %4338 = vmatpush1.bf16.msra.mxu1 %v12848_v51  ;;  %v3346_v41 = vmax.f32 %v3284_v46, 0.0  ;;  %v2523_v22 = vpop.permute.xlu1 %2522  ;;  %v3182_v16 = vpop.f32.mrf.mxu1 }
 0x31c   :  { %v3287_v56 = vpop.f32.mrf.mxu0  ;;  %v15284_v10 = vld [vmem:[#allocation3 + $0x44] ss:$8 sps:$4 sm:$0xff]   ;;  %v15286_v60 = vld [vmem:[#allocation3 + $0x40] ss:$8 sps:$4 sm:$0xff]   ;;  %4351 = vmatprep.subr.bf16.mxu1 %v13212_v2  ;;  %v3175_v13 = vadd.f32 %v3174_v45, %v2523_v22 }
 0x31d   :  { %3493 = vst.msk [vmem:[#allocation3 + $0x58] sm:$0xff] %vm13835_vm3, %v11531_v53  ;;  %v3347_v54 = vmax.f32 %v3286_v26, 0.0  ;;  %v3288_v37 = vadd.f32 %v3287_v56, %v3155_v47  ;;  %10683 = vmatprep.mubr.msk.bf16.mxu1 %vm3694_vm6, %v15284_v10  ;;  %10743 = vmatprep.mubr.msk.bf16.mxu0 %vm3694_vm6, %v15284_v10  ;;  %v3177_v56 = vadd.f32 %v3176_v19, %v2523_v22 }
 0x31e   :  { %v3289_v38 = vpop.f32.mrf.mxu0  ;;  %3794 = vmatmul.mubr.bf16.gmra.mxu1 %v15286_v60  ;;  %4092 = vmatmul.mubr.bf16.gmra.mxu0 %v15286_v60 }
 0x31f   :  { %v11532_v49 = vpack.c.bf16 %v3347_v54, %v3346_v41  ;;  %v3290_v59 = vadd.f32 %v3289_v38, %v3157_v33  ;;  %4352 = vmatpush2.bf16.msra.mxu1 %v4321_v23  ;;  %v3348_v4 = vmax.f32 %v3288_v37, 0.0  ;;  %v2528_v33 = vpop.permute.xlu0 %2527  ;;  %v3184_v37 = vpop.f32.mrf.mxu1 }
 0x320   :  { %v3293_v48 = vpop.f32.mrf.mxu0  ;;  %4353 = vmatprep.subr.bf16.mxu1 %v13212_v2  ;;  %v3181_v57 = vadd.f32 %v3180_v30, %v2528_v33  ;;  %v3183_v45 = vadd.f32 %v3182_v16, %v2528_v33 }
 0x321   :  { %3494 = vst.msk [vmem:[#allocation3 + $0x60] sm:$0xff] %vm13835_vm3, %v11532_v49  ;;  %v3349_v9 = vmax.f32 %v3290_v59, 0.0  ;;  %v3294_v44 = vadd.f32 %v3293_v48, %v3161_v29  ;;  %v2533_v59 = vpop.permute.xlu1 %2532 }
 0x322   :  { %v3295_v27 = vpop.f32.mrf.mxu0 }
 0x323   :  { %v11533_v15 = vpack.c.bf16 %v3349_v9, %v3348_v4  ;;  %v3296_v17 = vadd.f32 %v3295_v27, %v3163_v28  ;;  %4354 = vmatpush2.bf16.msra.mxu1 %v12853_v32  ;;  %v3350_v6 = vmax.f32 %v3294_v44, 0.0  ;;  %v3186_v4 = vpop.f32.mrf.mxu1  ;;  %v3185_v44 = vadd.f32 %v3184_v37, %v2533_v59 }
 0x324   :  { %v3297_v55 = vpop.f32.mrf.mxu0  ;;  %v15307_v11 = vld [vmem:[#allocation3 + $0x54] ss:$8 sps:$4 sm:$0xff]   ;;  %v15309_v24 = vld [vmem:[#allocation3 + $0x50] ss:$8 sps:$4 sm:$0xff]   ;;  %5269 = vmatprep.subr.bf16.mxu1 %v13212_v2  ;;  %v3187_v19 = vadd.f32 %v3186_v4, %v2533_v59 }
 0x325   :  { %3495 = vst.msk [vmem:[#allocation3 + $0x68] sm:$0xff] %vm13835_vm3, %v11533_v15  ;;  %v3351_v18 = vmax.f32 %v3296_v17, 0.0  ;;  %v3298_v12 = vadd.f32 %v3297_v55, %v3165_v39  ;;  %10684 = vmatprep.mubr.msk.bf16.mxu1 %vm3694_vm6, %v15307_v11  ;;  %10744 = vmatprep.mubr.msk.bf16.mxu0 %vm3694_vm6, %v15307_v11 }
 0x326   :  { %v3299_v63 = vpop.f32.mrf.mxu0  ;;  %3802 = vmatmul.mubr.bf16.gmra.mxu1 %v15309_v24  ;;  %4100 = vmatmul.mubr.bf16.gmra.mxu0 %v15309_v24 }
 0x327   :  { %v11534_v36 = vpack.c.bf16 %v3351_v18, %v3350_v6  ;;  %v3300_v31 = vadd.f32 %v3299_v63, %v3167_v1  ;;  %v3352_v51 = vmax.f32 %v3298_v12, 0.0 }
 0x328   :  { %v3303_v0 = vpop.f32.mrf.mxu0 }
 0x329   :  { %3496 = vst.msk [vmem:[#allocation3 + $0x70] sm:$0xff] %vm13835_vm3, %v11534_v36  ;;  %v3353_v34 = vmax.f32 %v3300_v31, 0.0  ;;  %v3304_v58 = vadd.f32 %v3303_v0, %v3171_v50 }
 0x32a   :  { %v3305_v46 = vpop.f32.mrf.mxu0 }
 0x32b   :  { %v11535_v21 = vpack.c.bf16 %v3353_v34, %v3352_v51  ;;  %v3306_v25 = vadd.f32 %v3305_v46, %v3173_v3  ;;  %v3354_v52 = vmax.f32 %v3304_v58, 0.0 }
 0x32c   :  { %v3307_v47 = vpop.f32.mrf.mxu0  ;;  %v15324_v53 = vld [vmem:[#allocation3 + $0x64] ss:$8 sps:$4 sm:$0xff]   ;;  %v15326_v26 = vld [vmem:[#allocation3 + $0x60] ss:$8 sps:$4 sm:$0xff]  }
 0x32d   :  { %3497 = vst.msk [vmem:[#allocation3 + $0x78] sm:$0xff] %vm13835_vm3, %v11535_v21  ;;  %v3355_v41 = vmax.f32 %v3306_v25, 0.0  ;;  %v3308_v54 = vadd.f32 %v3307_v47, %v3175_v13  ;;  %10685 = vmatprep.mubr.msk.bf16.mxu1 %vm3694_vm6, %v15324_v53  ;;  %10745 = vmatprep.mubr.msk.bf16.mxu0 %vm3694_vm6, %v15324_v53 }
 0x32e   :  { %v3309_v23 = vpop.f32.mrf.mxu0  ;;  %3810 = vmatmul.mubr.bf16.gmra.mxu1 %v15326_v26  ;;  %4108 = vmatmul.mubr.bf16.gmra.mxu0 %v15326_v26 }
 0x32f   :  { %v11536_v38 = vpack.c.bf16 %v3355_v41, %v3354_v52  ;;  %v3310_v29 = vadd.f32 %v3309_v23, %v3177_v56  ;;  %v3356_v48 = vmax.f32 %v3308_v54, 0.0 }
 0x330   :  { %v3313_v49 = vpop.f32.mrf.mxu0 }
 0x331   :  { %3498 = vst.msk [vmem:[#allocation3 + $0x80] sm:$0xff] %vm13835_vm3, %v11536_v38  ;;  %v3357_v32 = vmax.f32 %v3310_v29, 0.0  ;;  %v3314_v28 = vadd.f32 %v3313_v49, %v3181_v57 }
 0x332   :  { %v3315_v9 = vpop.f32.mrf.mxu0 }
 0x333   :  { %v11537_v8 = vpack.c.bf16 %v3357_v32, %v3356_v48  ;;  %v3316_v27 = vadd.f32 %v3315_v9, %v3183_v45  ;;  %v3358_v55 = vmax.f32 %v3314_v28, 0.0 }
 0x334   :  { %v3317_v39 = vpop.f32.mrf.mxu0  ;;  %v12841_v15 = vld [vmem:[#allocation3 + $0x74] ss:$8 sps:$4 sm:$0xff]   ;;  %v12843_v17 = vld [vmem:[#allocation3 + $0x70] ss:$8 sps:$4 sm:$0xff]  }
 0x335   :  { %3499 = vst.msk [vmem:[#allocation3 + $0x88] sm:$0xff] %vm13835_vm3, %v11537_v8  ;;  %v3359_v1 = vmax.f32 %v3316_v27, 0.0  ;;  %v3318_v6 = vadd.f32 %v3317_v39, %v3185_v44  ;;  %10686 = vmatprep.mubr.msk.bf16.mxu1 %vm3694_vm6, %v12841_v15  ;;  %10746 = vmatprep.mubr.msk.bf16.mxu0 %vm3694_vm6, %v12841_v15 }
 0x336   :  { %v3319_v18 = vpop.f32.mrf.mxu0  ;;  %3818 = vmatmul.mubr.bf16.gmra.mxu1 %v12843_v17  ;;  %4116 = vmatmul.mubr.bf16.gmra.mxu0 %v12843_v17 }
 0x337   :  { %v11538_v12 = vpack.c.bf16 %v3359_v1, %v3358_v55  ;;  %v3320_v5 = vadd.f32 %v3319_v18, %v3187_v19  ;;  %v3360_v63 = vmax.f32 %v3318_v6, 0.0 }
 0x339   :  { %3500 = vst.msk [vmem:[#allocation3 + $0x90] sm:$0xff] %vm13835_vm3, %v11538_v12  ;;  %v3361_v50 = vmax.f32 %v3320_v5, 0.0  ;;  %vm7628_vm3 = vcmask 142336  }
 0x33b   :  { %v11539_v36 = vpack.c.bf16 %v3361_v50, %v3360_v63 }
 0x33c   :  { %v12845_v31 = vld [vmem:[#allocation3 + $0x84] ss:$8 sps:$4 sm:$0xff]   ;;  %v12847_v30 = vld [vmem:[#allocation3 + $0x80] ss:$8 sps:$4 sm:$0xff]  }
 0x33d   :  { %3504 = vst.msk [vmem:[#allocation3 + $0x98] sm:$0x77] %vm3503_vm9, %v11539_v36  ;;  %10687 = vmatprep.mubr.msk.bf16.mxu1 %vm3694_vm6, %v12845_v31  ;;  %10747 = vmatprep.mubr.msk.bf16.mxu0 %vm3694_vm6, %v12845_v31  ;;  %vm9439_vm9 = vcmask 64512  }
 0x33e   :  { %3826 = vmatmul.mubr.bf16.gmra.mxu1 %v12847_v30  ;;  %4124 = vmatmul.mubr.bf16.gmra.mxu0 %v12847_v30 }
 0x344   :  { %v12849_v0 = vld [vmem:[#allocation3 + $0x94] ss:$8 sps:$4 sm:$0x7f]   ;;  %v12851_v3 = vld [vmem:[#allocation3 + $0x90] ss:$8 sps:$4 sm:$0x7f]  }
 0x345   :  { %10688 = vmatprep.mubr.msk.bf16.mxu1 %vm3694_vm6, %v12849_v0  ;;  %10748 = vmatprep.mubr.msk.bf16.mxu0 %vm3694_vm6, %v12849_v0 }
 0x346   :  { %3834 = vmatmul.mubr.bf16.gmra.mxu1 %v12851_v3  ;;  %4132 = vmatmul.mubr.bf16.gmra.mxu0 %v12851_v3 }
 0x347   :  { %10799 = vmatprep.mubr.msk.bf16.mxu1 %vm3694_vm6, %v15168_v7  ;;  %5188 = vmatprep.mubr.bf16.mxu0 %v12872_v62 }
 0x34e   :  { %4356 = vmatmul.mubr.bf16.vlgmr.msra.gmra.mxu1 %v15166_v40 }
 0x34f   :  { %10800 = vmatprep.mubr.msk.bf16.mxu1 %vm3694_vm6, %v15195_v43 }
 0x356   :  { %4364 = vmatmul.mubr.bf16.gmra.mxu1 %v15197_v42 }
 0x357   :  { %10801 = vmatprep.mubr.msk.bf16.mxu1 %vm3694_vm6, %v15225_v14 }
 0x35e   :  { %4372 = vmatmul.mubr.bf16.gmra.mxu1 %v15227_v35 }
 0x35f   :  { %10802 = vmatprep.mubr.msk.bf16.mxu1 %vm3694_vm6, %v15255_v61 }
 0x366   :  { %4380 = vmatmul.mubr.bf16.gmra.mxu1 %v15257_v20 }
 0x367   :  { %10803 = vmatprep.mubr.msk.bf16.mxu1 %vm3694_vm6, %v15284_v10 }
 0x36e   :  { %4388 = vmatmul.mubr.bf16.gmra.mxu1 %v15286_v60 }
 0x36f   :  { %10804 = vmatprep.mubr.msk.bf16.mxu1 %vm3694_vm6, %v15307_v11 }
 0x376   :  { %4396 = vmatmul.mubr.bf16.gmra.mxu1 %v15309_v24 }
 0x377   :  { %10805 = vmatprep.mubr.msk.bf16.mxu1 %vm3694_vm6, %v15324_v53 }
 0x37e   :  { %4404 = vmatmul.mubr.bf16.gmra.mxu1 %v15326_v26 }
 0x37f   :  { %10806 = vmatprep.mubr.msk.bf16.mxu1 %vm3694_vm6, %v12841_v15 }
 0x386   :  { %4412 = vmatmul.mubr.bf16.gmra.mxu1 %v12843_v17 }
 0x387   :  { %10807 = vmatprep.mubr.msk.bf16.mxu1 %vm3694_vm6, %v12845_v31 }
 0x38e   :  { %4420 = vmatmul.mubr.bf16.gmra.mxu1 %v12847_v30 }
 0x38f   :  { %10808 = vmatprep.mubr.msk.bf16.mxu1 %vm3694_vm6, %v12849_v0  ;;  %vm8771_vm6 = vcmask 146432  }
 0x396   :  { %4428 = vmatmul.mubr.bf16.gmra.mxu1 %v12851_v3 }
 0x3be   :  { %v3763_v40 = vpop.f32.mrf.mxu1  ;;  %v4061_v7 = vpop.f32.mrf.mxu0 }
 0x3bf   :  { %v11540_v43 = vpack.c.bf16 %v3763_v40, %v3763_v40  ;;  %v11560_v42 = vpack.c.bf16 %v4061_v7, %v4061_v7 }
 0x3c0   :  { %v3765_v14 = vpop.f32.mrf.mxu1  ;;  %v4063_v35 = vpop.f32.mrf.mxu0 }
 0x3c1   :  { %3923 = vst.msk [vmem:[#allocation2] sm:$0xf] %vm3922_vm10, %v11540_v43  ;;  %4220 = vst.msk [vmem:[#allocation2 + $0xa0] sm:$0xf] %vm3922_vm10, %v11560_v42 }
 0x3c2   :  { %v3766_v61 = vpop.f32.mrf.mxu1  ;;  %v4064_v20 = vpop.f32.mrf.mxu0 }
 0x3c3   :  { %v11541_v10 = vpack.c.bf16 %v3766_v61, %v3766_v61  ;;  %v11561_v60 = vpack.c.bf16 %v4064_v20, %v4064_v20 }
 0x3c4   :  { %v3768_v11 = vpop.f32.mrf.mxu1  ;;  %v4066_v24 = vpop.f32.mrf.mxu0 }
 0x3c5   :  { %3924 = vst.msk [vmem:[#allocation2 + $0x8] sm:$0xf] %vm3922_vm10, %v11541_v10  ;;  %4221 = vst.msk [vmem:[#allocation2 + $0xa8] sm:$0xf] %vm3922_vm10, %v11561_v60 }
 0x3c6   :  { %v3771_v51 = vpop.f32.mrf.mxu1  ;;  %v4069_v34 = vpop.f32.mrf.mxu0 }
 0x3c7   :  { %v11542_v58 = vpack.c.bf16 %v3771_v51, %v3771_v51  ;;  %v11562_v22 = vpack.c.bf16 %v4069_v34, %v4069_v34 }
 0x3c8   :  { %v3773_v46 = vpop.f32.mrf.mxu1  ;;  %v4071_v13 = vpop.f32.mrf.mxu0 }
 0x3c9   :  { %3925 = vst.msk [vmem:[#allocation2 + $0x10] sm:$0xf] %vm3922_vm10, %v11542_v58  ;;  %4222 = vst.msk [vmem:[#allocation2 + $0xb0] sm:$0xf] %vm3922_vm10, %v11562_v22 }
 0x3ca   :  { %v3774_v21 = vpop.f32.mrf.mxu1  ;;  %v4072_v25 = vpop.f32.mrf.mxu0 }
 0x3cb   :  { %v11543_v16 = vpack.c.bf16 %v3774_v21, %v3774_v21  ;;  %v11563_v47 = vpack.c.bf16 %v4072_v25, %v4072_v25 }
 0x3cc   :  { %v3776_v53 = vpop.f32.mrf.mxu1  ;;  %v4074_v26 = vpop.f32.mrf.mxu0 }
 0x3cd   :  { %3926 = vst.msk [vmem:[#allocation2 + $0x18] sm:$0xf] %vm3922_vm10, %v11543_v16  ;;  %4223 = vst.msk [vmem:[#allocation2 + $0xb8] sm:$0xf] %vm3922_vm10, %v11563_v47 }
 0x3ce   :  { %v3779_v33 = vpop.f32.mrf.mxu1  ;;  %v4077_v56 = vpop.f32.mrf.mxu0 }
 0x3cf   :  { %v11544_v52 = vpack.c.bf16 %v3779_v33, %v3779_v33  ;;  %v11564_v41 = vpack.c.bf16 %v4077_v56, %v4077_v56 }
 0x3d0   :  { %v3781_v54 = vpop.f32.mrf.mxu1  ;;  %v4079_v37 = vpop.f32.mrf.mxu0 }
 0x3d1   :  { %3927 = vst.msk [vmem:[#allocation2 + $0x20] sm:$0xf] %vm3922_vm10, %v11544_v52  ;;  %4224 = vst.msk [vmem:[#allocation2 + $0xc0] sm:$0xf] %vm3922_vm10, %v11564_v41 }
 0x3d2   :  { %v3782_v23 = vpop.f32.mrf.mxu1  ;;  %v4080_v57 = vpop.f32.mrf.mxu0 }
 0x3d3   :  { %v11545_v38 = vpack.c.bf16 %v3782_v23, %v3782_v23  ;;  %v11565_v29 = vpack.c.bf16 %v4080_v57, %v4080_v57  ;;  %v12916_v23 = vld [vmem:[%s16578_s6 + $0xc] ss:$16 sps:$4 sm:$0xff]  }
 0x3d4   :  { %v3784_v49 = vpop.f32.mrf.mxu1  ;;  %v4082_v59 = vpop.f32.mrf.mxu0  ;;  %10899 = vmatprep.mubr.msk.bf16.mxu1 %vm3025_vm4, %v12916_v23 }
 0x3d5   :  { %3928 = vst.msk [vmem:[#allocation2 + $0x28] sm:$0xf] %vm3922_vm10, %v11545_v38  ;;  %4225 = vst.msk [vmem:[#allocation2 + $0xc8] sm:$0xf] %vm3922_vm10, %v11565_v29 }
 0x3d6   :  { %v3787_v45 = vpop.f32.mrf.mxu1  ;;  %v4085_v48 = vpop.f32.mrf.mxu0 }
 0x3d7   :  { %v11546_v32 = vpack.c.bf16 %v3787_v45, %v3787_v45  ;;  %v11566_v28 = vpack.c.bf16 %v4085_v48, %v4085_v48 }
 0x3d8   :  { %v3789_v4 = vpop.f32.mrf.mxu1  ;;  %v4087_v9 = vpop.f32.mrf.mxu0 }
 0x3d9   :  { %3929 = vst.msk [vmem:[#allocation2 + $0x30] sm:$0xf] %vm3922_vm10, %v11546_v32  ;;  %4226 = vst.msk [vmem:[#allocation2 + $0xd0] sm:$0xf] %vm3922_vm10, %v11566_v28 }
 0x3da   :  { %v3790_v44 = vpop.f32.mrf.mxu1  ;;  %v4088_v8 = vpop.f32.mrf.mxu0 }
 0x3db   :  { %v11547_v27 = vpack.c.bf16 %v3790_v44, %v3790_v44  ;;  %v11567_v39 = vpack.c.bf16 %v4088_v8, %v4088_v8 }
 0x3dc   :  { %v3792_v15 = vpop.f32.mrf.mxu1  ;;  %v4090_v17 = vpop.f32.mrf.mxu0 }
 0x3dd   :  { %3930 = vst.msk [vmem:[#allocation2 + $0x38] sm:$0xf] %vm3922_vm10, %v11547_v27  ;;  %4227 = vst.msk [vmem:[#allocation2 + $0xd8] sm:$0xf] %vm3922_vm10, %v11567_v39 }
 0x3de   :  { %v3795_v19 = vpop.f32.mrf.mxu1  ;;  %v4093_v55 = vpop.f32.mrf.mxu0 }
 0x3df   :  { %v11548_v1 = vpack.c.bf16 %v3795_v19, %v3795_v19  ;;  %v11568_v6 = vpack.c.bf16 %v4093_v55, %v4093_v55 }
 0x3e0   :  { %v3797_v18 = vpop.f32.mrf.mxu1  ;;  %v4095_v12 = vpop.f32.mrf.mxu0 }
 0x3e1   :  { %3931 = vst.msk [vmem:[#allocation2 + $0x40] sm:$0xf] %vm3922_vm10, %v11548_v1  ;;  %4228 = vst.msk [vmem:[#allocation2 + $0xe0] sm:$0xf] %vm3922_vm10, %v11568_v6 }
 0x3e2   :  { %v3798_v5 = vpop.f32.mrf.mxu1  ;;  %v4096_v63 = vpop.f32.mrf.mxu0 }
 0x3e3   :  { %v11549_v50 = vpack.c.bf16 %v3798_v5, %v3798_v5  ;;  %v11569_v36 = vpack.c.bf16 %v4096_v63, %v4096_v63 }
 0x3e4   :  { %v3800_v31 = vpop.f32.mrf.mxu1  ;;  %v4098_v30 = vpop.f32.mrf.mxu0 }
 0x3e5   :  { %3932 = vst.msk [vmem:[#allocation2 + $0x48] sm:$0xf] %vm3922_vm10, %v11549_v50  ;;  %4229 = vst.msk [vmem:[#allocation2 + $0xe8] sm:$0xf] %vm3922_vm10, %v11569_v36  ;;  %v12858_v50 = vld [vmem:[#allocation2 + $0xd0] ss:$8 sps:$4 sm:$0xff]  }
 0x3e6   :  { %v3803_v0 = vpop.f32.mrf.mxu1  ;;  %v4101_v3 = vpop.f32.mrf.mxu0 }
 0x3e7   :  { %v11550_v62 = vpack.c.bf16 %v3803_v0, %v3803_v0  ;;  %v11570_v40 = vpack.c.bf16 %v4101_v3, %v4101_v3 }
 0x3e8   :  { %v3805_v7 = vpop.f32.mrf.mxu1  ;;  %v4103_v43 = vpop.f32.mrf.mxu0 }
 0x3e9   :  { %3933 = vst.msk [vmem:[#allocation2 + $0x50] sm:$0xf] %vm3922_vm10, %v11550_v62  ;;  %4230 = vst.msk [vmem:[#allocation2 + $0xf0] sm:$0xf] %vm3922_vm10, %v11570_v40  ;;  %v12860_v7 = vld [vmem:[#allocation2 + $0xc0] ss:$8 sps:$4 sm:$0xff]  }
 0x3ea   :  { %v3806_v42 = vpop.f32.mrf.mxu1  ;;  %v4104_v14 = vpop.f32.mrf.mxu0 }
 0x3eb   :  { %v11551_v35 = vpack.c.bf16 %v3806_v42, %v3806_v42  ;;  %v11571_v61 = vpack.c.bf16 %v4104_v14, %v4104_v14 }
 0x3ec   :  { %v3808_v20 = vpop.f32.mrf.mxu1  ;;  %v4106_v10 = vpop.f32.mrf.mxu0  ;;  %v12856_v19 = vld [vmem:[#allocation2 + $0xe0] ss:$8 sps:$4 sm:$0xff]  }
 0x3ed   :  { %3934 = vst.msk [vmem:[#allocation2 + $0x58] sm:$0xf] %vm3922_vm10, %v11551_v35  ;;  %4231 = vst.msk [vmem:[#allocation2 + $0xf8] sm:$0xf] %vm3922_vm10, %v11571_v61  ;;  %v12861_v35 = vld [vmem:[#allocation2 + $0x40] ss:$8 sps:$4 sm:$0xff]  }
 0x3ee   :  { %v3811_v60 = vpop.f32.mrf.mxu1  ;;  %v4109_v11 = vpop.f32.mrf.mxu0  ;;  %v12862_v61 = vld [vmem:[#allocation2 + $0xb0] ss:$8 sps:$4 sm:$0xff]  }
 0x3ef   :  { %v11552_v24 = vpack.c.bf16 %v3811_v60, %v3811_v60  ;;  %v11572_v51 = vpack.c.bf16 %v4109_v11, %v4109_v11  ;;  %v12863_v11 = vld [vmem:[#allocation2 + $0x30] ss:$8 sps:$4 sm:$0xff]  }
 0x3f0   :  { %v3813_v34 = vpop.f32.mrf.mxu1  ;;  %v4111_v58 = vpop.f32.mrf.mxu0 }
 0x3f1   :  { %3935 = vst.msk [vmem:[#allocation2 + $0x60] sm:$0xf] %vm3922_vm10, %v11552_v24  ;;  %4232 = vst.msk [vmem:[#allocation2 + $0x100] sm:$0xf] %vm3922_vm10, %v11572_v51  ;;  %v12864_v24 = vld [vmem:[#allocation2 + $0xa0] ss:$8 sps:$4 sm:$0xff]  }
 0x3f2   :  { %v3814_v22 = vpop.f32.mrf.mxu1  ;;  %v4112_v46 = vpop.f32.mrf.mxu0 }
 0x3f3   :  { %v11553_v13 = vpack.c.bf16 %v3814_v22, %v3814_v22  ;;  %v11573_v21 = vpack.c.bf16 %v4112_v46, %v4112_v46  ;;  %v12865_v22 = vld [vmem:[#allocation2 + $0x20] ss:$8 sps:$4 sm:$0xff]  }
 0x3f4   :  { %v3816_v25 = vpop.f32.mrf.mxu1  ;;  %v4114_v16 = vpop.f32.mrf.mxu0  ;;  %v12854_v47 = vld [vmem:[#allocation2 + $0xf0] ss:$8 sps:$4 sm:$0xff]  }
 0x3f5   :  { %3936 = vst.msk [vmem:[#allocation2 + $0x68] sm:$0xf] %vm3922_vm10, %v11553_v13  ;;  %4233 = vst.msk [vmem:[#allocation2 + $0x108] sm:$0xf] %vm3922_vm10, %v11573_v21  ;;  %11806 = vmatprep.subr.bf16.mxu0 %v12854_v47  ;;  %v12859_v40 = vld [vmem:[#allocation2 + $0x50] ss:$8 sps:$4 sm:$0xff]  }
 0x3f6   :  { %v3819_v53 = vpop.f32.mrf.mxu1  ;;  %v4117_v26 = vpop.f32.mrf.mxu0  ;;  %v12867_v16 = vld [vmem:[#allocation2 + $0x10] ss:$8 sps:$4 sm:$0xff]  }
 0x3f7   :  { %v11554_v33 = vpack.c.bf16 %v3819_v53, %v3819_v53  ;;  %v11574_v56 = vpack.c.bf16 %v4117_v26, %v4117_v26 }
 0x3f8   :  { %v3821_v52 = vpop.f32.mrf.mxu1  ;;  %v4119_v41 = vpop.f32.mrf.mxu0 }
 0x3f9   :  { %3937 = vst.msk [vmem:[#allocation2 + $0x70] sm:$0xf] %vm3922_vm10, %v11554_v33  ;;  %4234 = vst.msk [vmem:[#allocation2 + $0x110] sm:$0xf] %vm3922_vm10, %v11574_v56  ;;  %v12869_v56 = vld [vmem:[#allocation2] ss:$8 sps:$4 sm:$0xff]  }
 0x3fa   :  { %v3822_v54 = vpop.f32.mrf.mxu1  ;;  %v4120_v37 = vpop.f32.mrf.mxu0  ;;  %v12870_v52 = vld [vmem:[%s16578_s6] ss:$16 sps:$4 sm:$0xff]  }
 0x3fb   :  { %v11555_v57 = vpack.c.bf16 %v3822_v54, %v3822_v54  ;;  %v11575_v38 = vpack.c.bf16 %v4120_v37, %v4120_v37  ;;  %v12875_v54 = vld [vmem:[%s16578_s6 + $0x24] ss:$16 sps:$4 sm:$0xff]  }
 0x3fc   :  { %v3824_v29 = vpop.f32.mrf.mxu1  ;;  %v4122_v49 = vpop.f32.mrf.mxu0  ;;  %v12857_v63 = vld [vmem:[#allocation2 + $0x60] ss:$8 sps:$4 sm:$0xff]  }
 0x3fd   :  { %3938 = vst.msk [vmem:[#allocation2 + $0x78] sm:$0xf] %vm3922_vm10, %v11555_v57  ;;  %4235 = vst.msk [vmem:[#allocation2 + $0x118] sm:$0xf] %vm3922_vm10, %v11575_v38  ;;  %v12873_v49 = vld [vmem:[%s16578_s6 + $0x20] ss:$16 sps:$4 sm:$0xff]  }
 0x3fe   :  { %v3827_v59 = vpop.f32.mrf.mxu1  ;;  %v4125_v45 = vpop.f32.mrf.mxu0 }
 0x3ff   :  { %v11556_v48 = vpack.c.bf16 %v3827_v59, %v3827_v59  ;;  %v11576_v32 = vpack.c.bf16 %v4125_v45, %v4125_v45  ;;  %v12878_v45 = vld [vmem:[%s16578_s6 + $0x44] ss:$16 sps:$4 sm:$0xff]  }
 0x400   :  { %v3829_v28 = vpop.f32.mrf.mxu1  ;;  %v4127_v4 = vpop.f32.mrf.mxu0 }
 0x401   :  { %3939 = vst.msk [vmem:[#allocation2 + $0x80] sm:$0xf] %vm3922_vm10, %v11556_v48  ;;  %4236 = vst.msk [vmem:[#allocation2 + $0x120] sm:$0xf] %vm3922_vm10, %v11576_v32 }
 0x402   :  { %v3830_v9 = vpop.f32.mrf.mxu1  ;;  %v4128_v44 = vpop.f32.mrf.mxu0 }
 0x403   :  { %v11557_v8 = vpack.c.bf16 %v3830_v9, %v3830_v9  ;;  %v11577_v27 = vpack.c.bf16 %v4128_v44, %v4128_v44  ;;  %v12876_v44 = vld [vmem:[%s16578_s6 + $0x40] ss:$16 sps:$4 sm:$0xff]  }
 0x404   :  { %v3832_v39 = vpop.f32.mrf.mxu1  ;;  %v4130_v15 = vpop.f32.mrf.mxu0  ;;  %v12855_v17 = vld [vmem:[#allocation2 + $0x70] ss:$8 sps:$4 sm:$0xff]  }
 0x405   :  { %3940 = vst.msk [vmem:[#allocation2 + $0x88] sm:$0xf] %vm3922_vm10, %v11557_v8  ;;  %4237 = vst.msk [vmem:[#allocation2 + $0x128] sm:$0xf] %vm3922_vm10, %v11577_v27  ;;  %11807 = vmatpush3.bf16.msra.mxu0 %v12855_v17  ;;  %v12883_v27 = vld [vmem:[%s16578_s6 + $0x64] ss:$16 sps:$4 sm:$0xff]  }
 0x406   :  { %v3835_v55 = vpop.f32.mrf.mxu1  ;;  %v4133_v1 = vpop.f32.mrf.mxu0  ;;  %11808 = vmatprep.subr.bf16.mxu0 %v12856_v19 }
 0x407   :  { %v11558_v6 = vpack.c.bf16 %v3835_v55, %v3835_v55  ;;  %v11578_v18 = vpack.c.bf16 %v4133_v1, %v4133_v1 }
 0x408   :  { %v3837_v12 = vpop.f32.mrf.mxu1  ;;  %v4135_v5 = vpop.f32.mrf.mxu0 }
 0x409   :  { %3941 = vst.msk [vmem:[#allocation2 + $0x90] sm:$0xf] %vm3922_vm10, %v11558_v6  ;;  %4238 = vst.msk [vmem:[#allocation2 + $0x130] sm:$0xf] %vm3922_vm10, %v11578_v18  ;;  %11809 = vmatpush3.bf16.msra.mxu0 %v12857_v63  ;;  %v12881_v18 = vld [vmem:[%s16578_s6 + $0x60] ss:$16 sps:$4 sm:$0xff]  }
 0x40a   :  { %v3838_v36 = vpop.f32.mrf.mxu1  ;;  %v4136_v31 = vpop.f32.mrf.mxu0  ;;  %11810 = vmatprep.subr.bf16.mxu0 %v12858_v50  ;;  %v12888_v5 = vld [vmem:[%s16578_s6 + $0x84] ss:$16 sps:$4 sm:$0xff]  }
 0x40b   :  { %v11559_v30 = vpack.c.bf16 %v3838_v36, %v3838_v36  ;;  %v11579_v0 = vpack.c.bf16 %v4136_v31, %v4136_v31 }
 0x40c   :  { %v3840_v3 = vpop.f32.mrf.mxu1  ;;  %v4138_v62 = vpop.f32.mrf.mxu0  ;;  %v12868_v47 = vld [vmem:[#allocation2 + $0x80] ss:$8 sps:$4 sm:$0xff]  }
 0x40d   :  { %3943 = vst.msk [vmem:[#allocation2 + $0x98] sm:$0x7] %vm3942_vm11, %v11559_v30  ;;  %4239 = vst.msk [vmem:[#allocation2 + $0x138] sm:$0x7] %vm3942_vm11, %v11579_v0  ;;  %11811 = vmatpush3.bf16.msra.mxu0 %v12859_v40  ;;  %v12886_v62 = vld [vmem:[%s16578_s6 + $0x80] ss:$16 sps:$4 sm:$0xff]  }
 0x40e   :  { %v4357_v43 = vpop.f32.mrf.mxu1  ;;  %11812 = vmatprep.subr.bf16.mxu0 %v12860_v7  ;;  %v12893_v7 = vld [vmem:[%s16578_s6 + $0xa4] ss:$16 sps:$4 sm:$0xff]  }
 0x40f   :  { %v11580_v42 = vpack.c.bf16 %v4357_v43, %v4357_v43 }
 0x410   :  { %v4359_v14 = vpop.f32.mrf.mxu1 }
 0x411   :  { %4516 = vst.msk [vmem:[#allocation2 + $0x140] sm:$0xf] %vm3922_vm10, %v11580_v42  ;;  %11813 = vmatpush3.bf16.msra.mxu0 %v12861_v35 }
 0x412   :  { %v4360_v20 = vpop.f32.mrf.mxu1  ;;  %11814 = vmatprep.subr.bf16.mxu0 %v12862_v61 }
 0x413   :  { %v11581_v10 = vpack.c.bf16 %v4360_v20, %v4360_v20 }
 0x414   :  { %v4362_v60 = vpop.f32.mrf.mxu1  ;;  %v12866_v46 = vld [vmem:[#allocation2 + $0x90] ss:$8 sps:$4 sm:$0xff]  }
 0x415   :  { %4517 = vst.msk [vmem:[#allocation2 + $0x148] sm:$0xf] %vm3922_vm10, %v11581_v10  ;;  %11815 = vmatpush3.bf16.msra.mxu0 %v12863_v11  ;;  %v12889_v14 = vld [vmem:[#allocation2 + $0x130] ss:$8 sps:$4 sm:$0xff]   ;;  %v12890_v10 = vld [vmem:[#allocation2 + $0x120] ss:$8 sps:$4 sm:$0xff]  }
 0x416   :  { %v4365_v51 = vpop.f32.mrf.mxu1  ;;  %11816 = vmatprep.subr.bf16.mxu0 %v12864_v24  ;;  %v12891_v60 = vld [vmem:[%s16578_s6 + $0xa0] ss:$16 sps:$4 sm:$0xff]   ;;  %v12898_v24 = vld [vmem:[%s16578_s6 + $0xc4] ss:$16 sps:$4 sm:$0xff]  }
 0x417   :  { %v11582_v34 = vpack.c.bf16 %v4365_v51, %v4365_v51 }
 0x418   :  { %v4367_v58 = vpop.f32.mrf.mxu1 }
 0x419   :  { %4518 = vst.msk [vmem:[#allocation2 + $0x150] sm:$0xf] %vm3922_vm10, %v11582_v34  ;;  %11817 = vmatpush3.bf16.msra.mxu0 %v12865_v22  ;;  %v12894_v58 = vld [vmem:[#allocation2 + $0x110] ss:$8 sps:$4 sm:$0xff]  }
 0x41a   :  { %v4368_v13 = vpop.f32.mrf.mxu1  ;;  %11818 = vmatprep.subr.bf16.mxu0 %v12866_v46 }
 0x41b   :  { %v11583_v21 = vpack.c.bf16 %v4368_v13, %v4368_v13 }
 0x41c   :  { %v4370_v25 = vpop.f32.mrf.mxu1  ;;  %v12885_v3 = vld [vmem:[#allocation2 + $0x140] ss:$8 sps:$4 sm:$0xff]  }
 0x41d   :  { %4519 = vst.msk [vmem:[#allocation2 + $0x158] sm:$0xf] %vm3922_vm10, %v11583_v21  ;;  %11819 = vmatpush3.bf16.msra.mxu0 %v12867_v16  ;;  %v12895_v21 = vld [vmem:[#allocation2 + $0x100] ss:$8 sps:$4 sm:$0xff]  }
 0x41e   :  { %v4373_v53 = vpop.f32.mrf.mxu1  ;;  %11820 = vmatprep.subr.bf16.mxu0 %v12868_v47  ;;  %v12896_v25 = vld [vmem:[%s16578_s6 + $0xc0] ss:$16 sps:$4 sm:$0xff]   ;;  %v12901_v47 = vld [vmem:[%s16578_s6 + $0xe4] ss:$16 sps:$4 sm:$0xff]  }
 0x41f   :  { %v11584_v26 = vpack.c.bf16 %v4373_v53, %v4373_v53 }
 0x420   :  { %v4375_v33 = vpop.f32.mrf.mxu1 }
 0x421   :  { %4520 = vst.msk [vmem:[#allocation2 + $0x160] sm:$0xf] %vm3922_vm10, %v11584_v26  ;;  %11821 = vmatpush3.bf16.msra.mxu0 %v12869_v56 }
 0x422   :  { %v4376_v41 = vpop.f32.mrf.mxu1 }
 0x423   :  { %v11585_v37 = vpack.c.bf16 %v4376_v41, %v4376_v41  ;;  %v12899_v41 = vld [vmem:[%s16578_s6 + $0xe0] ss:$16 sps:$4 sm:$0xff]  }
 0x424   :  { %v4378_v23 = vpop.f32.mrf.mxu1  ;;  %5189 = vmatmul.mubr.bf16.vlgmr.msra.gmra.mxu0 %v12870_v52  ;;  %v12884_v36 = vld [vmem:[#allocation2 + $0x150] ss:$8 sps:$4 sm:$0xff]  }
 0x425   :  { %4521 = vst.msk [vmem:[#allocation2 + $0x168] sm:$0xf] %vm3922_vm10, %v11585_v37  ;;  %5196 = vmatprep.mubr.bf16.mxu0 %v12875_v54  ;;  %v12904_v37 = vld [vmem:[%s16578_s6 + $0x104] ss:$16 sps:$4 sm:$0xff]  }
 0x426   :  { %v4381_v57 = vpop.f32.mrf.mxu1 }
 0x427   :  { %v11586_v38 = vpack.c.bf16 %v4381_v57, %v4381_v57 }
 0x428   :  { %v4383_v29 = vpop.f32.mrf.mxu1 }
 0x429   :  { %4522 = vst.msk [vmem:[#allocation2 + $0x170] sm:$0xf] %vm3922_vm10, %v11586_v38  ;;  %v12902_v38 = vld [vmem:[%s16578_s6 + $0x100] ss:$16 sps:$4 sm:$0xff]  }
 0x42a   :  { %v4384_v59 = vpop.f32.mrf.mxu1  ;;  %v12909_v29 = vld [vmem:[%s16578_s6 + $0x124] ss:$16 sps:$4 sm:$0x3f]  }
 0x42b   :  { %v11587_v48 = vpack.c.bf16 %v4384_v59, %v4384_v59 }
 0x42c   :  { %v4386_v32 = vpop.f32.mrf.mxu1  ;;  %5197 = vmatmul.mubr.bf16.gmra.mxu0 %v12873_v49  ;;  %v12880_v6 = vld [vmem:[#allocation2 + $0x160] ss:$8 sps:$4 sm:$0xff]  }
 0x42d   :  { %4523 = vst.msk [vmem:[#allocation2 + $0x178] sm:$0xf] %vm3922_vm10, %v11587_v48  ;;  %5204 = vmatprep.mubr.bf16.mxu0 %v12878_v45  ;;  %v12907_v45 = vld [vmem:[%s16578_s6 + $0x120] ss:$16 sps:$4 sm:$0x3f]  }
 0x42e   :  { %v4389_v28 = vpop.f32.mrf.mxu1 }
 0x42f   :  { %v11588_v4 = vpack.c.bf16 %v4389_v28, %v4389_v28 }
 0x430   :  { %v4391_v9 = vpop.f32.mrf.mxu1 }
 0x431   :  { %4524 = vst.msk [vmem:[#allocation2 + $0x180] sm:$0xf] %vm3922_vm10, %v11588_v4  ;;  %v12914_v9 = vld [vmem:[%s16578_s6 + $0x8] ss:$16 sps:$4 sm:$0xff]  }
 0x432   :  { %v4392_v8 = vpop.f32.mrf.mxu1 }
 0x433   :  { %v11589_v39 = vpack.c.bf16 %v4392_v8, %v4392_v8  ;;  %v12919_v8 = vld [vmem:[%s16578_s6 + $0x28] ss:$16 sps:$4 sm:$0xff]  }
 0x434   :  { %v4394_v15 = vpop.f32.mrf.mxu1  ;;  %v12879_v17 = vld [vmem:[#allocation2 + $0x170] ss:$8 sps:$4 sm:$0xff]   ;;  %5205 = vmatmul.mubr.bf16.gmra.mxu0 %v12876_v44  ;;  %v12917_v44 = vld [vmem:[%s16578_s6 + $0x2c] ss:$16 sps:$4 sm:$0xff]  }
 0x435   :  { %4525 = vst.msk [vmem:[#allocation2 + $0x188] sm:$0xf] %vm3922_vm10, %v11589_v39  ;;  %5270 = vmatpush1.bf16.msra.mxu1 %v12879_v17  ;;  %5212 = vmatprep.mubr.bf16.mxu0 %v12883_v27  ;;  %v12920_v27 = vld [vmem:[%s16578_s6 + $0x4c] ss:$16 sps:$4 sm:$0xff]   ;;  %v12922_v39 = vld [vmem:[%s16578_s6 + $0x48] ss:$16 sps:$4 sm:$0xff]  }
 0x436   :  { %v4397_v19 = vpop.f32.mrf.mxu1  ;;  %5271 = vmatprep.subr.bf16.mxu1 %v13212_v2  ;;  %v12923_v15 = vld [vmem:[%s16578_s6 + $0x6c] ss:$16 sps:$4 sm:$0xff]   ;;  %v12925_v17 = vld [vmem:[%s16578_s6 + $0x68] ss:$16 sps:$4 sm:$0xff]  }
 0x437   :  { %v11590_v55 = vpack.c.bf16 %v4397_v19, %v4397_v19  ;;  %v12926_v19 = vld [vmem:[%s16578_s6 + $0x8c] ss:$16 sps:$4 sm:$0xff]  }
 0x438   :  { %v4399_v1 = vpop.f32.mrf.mxu1 }
 0x439   :  { %4526 = vst.msk [vmem:[#allocation2 + $0x190] sm:$0xf] %vm3922_vm10, %v11590_v55  ;;  %5272 = vmatpush1.bf16.msra.mxu1 %v12880_v6  ;;  %v12928_v55 = vld [vmem:[%s16578_s6 + $0x88] ss:$16 sps:$4 sm:$0xff]   ;;  %v12929_v1 = vld [vmem:[%s16578_s6 + $0xac] ss:$16 sps:$4 sm:$0xff]  }
 0x43a   :  { %v4400_v12 = vpop.f32.mrf.mxu1  ;;  %5273 = vmatprep.subr.bf16.mxu1 %v13212_v2  ;;  %v12931_v6 = vld [vmem:[%s16578_s6 + $0xa8] ss:$16 sps:$4 sm:$0xff]  }
 0x43b   :  { %v11591_v63 = vpack.c.bf16 %v4400_v12, %v4400_v12  ;;  %v12934_v12 = vld [vmem:[%s16578_s6 + $0xc8] ss:$16 sps:$4 sm:$0xff]  }
 0x43c   :  { %v4402_v50 = vpop.f32.mrf.mxu1  ;;  %5213 = vmatmul.mubr.bf16.gmra.mxu0 %v12881_v18  ;;  %v12913_v4 = vld [vmem:[#allocation2 + $0x180] ss:$8 sps:$4 sm:$0xff]   ;;  %v12932_v18 = vld [vmem:[%s16578_s6 + $0xcc] ss:$16 sps:$4 sm:$0xff]  }
 0x43d   :  { %4527 = vst.msk [vmem:[#allocation2 + $0x198] sm:$0xf] %vm3922_vm10, %v11591_v63  ;;  %5274 = vmatpush1.bf16.msra.mxu1 %v12884_v36  ;;  %5220 = vmatprep.mubr.bf16.mxu0 %v12888_v5  ;;  %v12935_v5 = vld [vmem:[%s16578_s6 + $0xec] ss:$16 sps:$4 sm:$0xff]   ;;  %v12937_v63 = vld [vmem:[%s16578_s6 + $0xe8] ss:$16 sps:$4 sm:$0xff]  }
 0x43e   :  { %v4405_v31 = vpop.f32.mrf.mxu1  ;;  %5275 = vmatprep.subr.bf16.mxu1 %v13212_v2  ;;  %v12938_v50 = vld [vmem:[%s16578_s6 + $0x10c] ss:$16 sps:$4 sm:$0xff]   ;;  %v12944_v36 = vld [vmem:[%s16579_s5 + $0x20] sm:$0x7f]  }
 0x43f   :  { %v11592_v30 = vpack.c.bf16 %v4405_v31, %v4405_v31  ;;  %12434 = vmatprep.subr.msk.bf16.mxu0 %vm3725_vm5, %v12944_v36  ;;  %v5644_v31 = vsel %vm3725_vm5, %v12944_v36, 0 }
 0x440   :  { %v4407_v0 = vpop.f32.mrf.mxu1  ;;  %12137 = vmatpush3.bf16.msra.mxu0 %v5644_v31 }
 0x441   :  { %4528 = vst.msk [vmem:[#allocation2 + $0x1a0] sm:$0xf] %vm3922_vm10, %v11592_v30  ;;  %5276 = vmatpush1.bf16.msra.mxu1 %v12885_v3  ;;  %v12940_v30 = vld [vmem:[%s16578_s6 + $0x108] ss:$16 sps:$4 sm:$0xff]  }
 0x442   :  { %v4408_v40 = vpop.f32.mrf.mxu1  ;;  %5277 = vmatprep.subr.bf16.mxu1 %v13212_v2  ;;  %v12941_v0 = vld [vmem:[%s16578_s6 + $0x12c] ss:$16 sps:$4 sm:$0x3f]   ;;  %v12943_v3 = vld [vmem:[%s16578_s6 + $0x128] ss:$16 sps:$4 sm:$0x3f]  }
 0x443   :  { %v11593_v43 = vpack.c.bf16 %v4408_v40, %v4408_v40 }
 0x444   :  { %v4410_v42 = vpop.f32.mrf.mxu1  ;;  %5221 = vmatmul.mubr.bf16.gmra.mxu0 %v12886_v62  ;;  %v12912_v28 = vld [vmem:[#allocation2 + $0x190] ss:$8 sps:$4 sm:$0xff]   ;;  %v12946_v62 = vld [vmem:[%s16579_s5 + $0x48] sm:$0x7f]  }
 0x445   :  { %4529 = vst.msk [vmem:[#allocation2 + $0x1a8] sm:$0xf] %vm3922_vm10, %v11593_v43  ;;  %5278 = vmatpush1.bf16.msra.mxu1 %v12889_v14  ;;  %5228 = vmatprep.mubr.bf16.mxu0 %v12893_v7  ;;  %v5902_v40 = vsel %vm3725_vm5, %v12946_v62, 0  ;;  %v12945_v7 = vld [vmem:[%s16579_s5 + $0x18] sm:$0xff]   ;;  %v12947_v43 = vld [vmem:[%s16579_s5 + $0x40] sm:$0xff]   ;;  %v12948_v42 = vld [vmem:[%s16579_s5 + $0x10] sm:$0xff]  }
 0x446   :  { %v4413_v35 = vpop.f32.mrf.mxu1  ;;  %5279 = vmatprep.subr.bf16.mxu1 %v13212_v2  ;;  %12138 = vmatprep.subr.bf16.mxu0 %v12945_v7  ;;  %v12949_v14 = vld [vmem:[%s16579_s5 + $0x38] sm:$0xff]  }
 0x447   :  { %v11594_v61 = vpack.c.bf16 %v4413_v35, %v4413_v35  ;;  %12139 = vmatpush3.bf16.msra.mxu0 %v12945_v7  ;;  %v12950_v35 = vld [vmem:[%s16579_s5 + $0x8] sm:$0xff]  }
 0x448   :  { %v4415_v20 = vpop.f32.mrf.mxu1  ;;  %12140 = vmatprep.subr.bf16.mxu0 %v12948_v42 }
 0x449   :  { %4530 = vst.msk [vmem:[#allocation2 + $0x1b0] sm:$0xf] %vm3922_vm10, %v11594_v61  ;;  %5280 = vmatpush1.bf16.msra.mxu1 %v12890_v10  ;;  %v12952_v61 = vld [vmem:[%s16579_s5 + $0x30] sm:$0xff]   ;;  %v12953_v20 = vld [vmem:[%s16579_s5] sm:$0xff]   ;;  %v12954_v10 = vld [vmem:[%s16579_s5 + $0x28] sm:$0xff]  }
 0x44a   :  { %v4416_v11 = vpop.f32.mrf.mxu1  ;;  %5281 = vmatprep.subr.bf16.mxu1 %v13212_v2 }
 0x44b   :  { %v11595_v51 = vpack.c.bf16 %v4416_v11, %v4416_v11  ;;  %12141 = vmatpush3.bf16.msra.mxu0 %v12948_v42 }
 0x44c   :  { %v4418_v34 = vpop.f32.mrf.mxu1  ;;  %5229 = vmatmul.mubr.bf16.gmra.mxu0 %v12891_v60  ;;  %v12911_v32 = vld [vmem:[#allocation2 + $0x1a0] ss:$8 sps:$4 sm:$0xff]   ;;  %12142 = vmatprep.subr.bf16.mxu0 %v12950_v35 }
 0x44d   :  { %4531 = vst.msk [vmem:[#allocation2 + $0x1b8] sm:$0xf] %vm3922_vm10, %v11595_v51  ;;  %5282 = vmatpush1.bf16.msra.mxu1 %v12894_v58  ;;  %5236 = vmatprep.mubr.bf16.mxu0 %v12898_v24 }
 0x44e   :  { %v4421_v22 = vpop.f32.mrf.mxu1  ;;  %5283 = vmatprep.subr.bf16.mxu1 %v13212_v2 }
 0x44f   :  { %v11596_v46 = vpack.c.bf16 %v4421_v22, %v4421_v22  ;;  %12143 = vmatpush3.bf16.msra.mxu0 %v12950_v35 }
 0x450   :  { %v4423_v13 = vpop.f32.mrf.mxu1  ;;  %12144 = vmatprep.subr.bf16.mxu0 %v12953_v20 }
 0x451   :  { %4532 = vst.msk [vmem:[#allocation2 + $0x1c0] sm:$0xf] %vm3922_vm10, %v11596_v46  ;;  %5284 = vmatpush1.bf16.msra.mxu1 %v12895_v21  ;;  %v15613_v21 = vld [vmem:[%s16579_s5 + $0x70] sm:$0x7f]  }
 0x452   :  { %v4424_v16 = vpop.f32.mrf.mxu1  ;;  %5289 = vmatprep.subr.bf16.mxu1 %v13212_v2 }
 0x453   :  { %v11597_v53 = vpack.c.bf16 %v4424_v16, %v4424_v16  ;;  %12145 = vmatpush3.bf16.msra.mxu0 %v12953_v20 }
 0x454   :  { %v4426_v26 = vpop.f32.mrf.mxu1  ;;  %5237 = vmatmul.mubr.bf16.gmra.mxu0 %v12896_v25  ;;  %v12910_v48 = vld [vmem:[#allocation2 + $0x1b0] ss:$8 sps:$4 sm:$0xff]   ;;  %12436 = vmatprep.subr.msk.bf16.mxu0 %vm3725_vm5, %v15613_v21 }
 0x455   :  { %4533 = vst.msk [vmem:[#allocation2 + $0x1c8] sm:$0xf] %vm3922_vm10, %v11597_v53  ;;  %5244 = vmatprep.mubr.bf16.mxu0 %v12901_v47 }
 0x456   :  { %v4429_v33 = vpop.f32.mrf.mxu1 }
 0x457   :  { %v11598_v56 = vpack.c.bf16 %v4429_v33, %v4429_v33 }
 0x458   :  { %v4431_v52 = vpop.f32.mrf.mxu1 }
 0x459   :  { %4534 = vst.msk [vmem:[#allocation2 + $0x1d0] sm:$0xf] %vm3922_vm10, %v11598_v56 }
 0x45a   :  { %v4432_v54 = vpop.f32.mrf.mxu1 }
 0x45b   :  { %v11599_v23 = vpack.c.bf16 %v4432_v54, %v4432_v54 }
 0x45c   :  { %v4434_v57 = vpop.f32.mrf.mxu1  ;;  %5245 = vmatmul.mubr.bf16.gmra.mxu0 %v12899_v41  ;;  %v12906_v59 = vld [vmem:[#allocation2 + $0x1c0] ss:$8 sps:$4 sm:$0xff]  }
 0x45d   :  { %4535 = vst.msk [vmem:[#allocation2 + $0x1d8] sm:$0x7] %vm3942_vm11, %v11599_v23  ;;  %5252 = vmatprep.mubr.bf16.mxu0 %v12904_v37  ;;  %vm10183_vm11 = vcmask 9216  }
 0x464   :  { %v12905_v49 = vld [vmem:[#allocation2 + $0x1d0] ss:$8 sps:$4 sm:$0xff]   ;;  %5253 = vmatmul.mubr.bf16.gmra.mxu0 %v12902_v38 }
 0x465   :  { %5290 = vmatpush2.bf16.msra.mxu1 %v12905_v49  ;;  %5260 = vmatprep.mubr.bf16.mxu0 %v12909_v29  ;;  %v4659_v29 = vpop.permute.xlu0 %4658 }
 0x466   :  { %5291 = vmatprep.subr.bf16.mxu1 %v13212_v2 }
 0x469   :  { %5292 = vmatpush2.bf16.msra.mxu1 %v12906_v59 }
 0x46a   :  { %5293 = vmatprep.subr.bf16.mxu1 %v13212_v2 }
 0x46c   :  { %5261 = vmatmul.mubr.bf16.gmra.mxu0 %v12907_v45 }
 0x46d   :  { %5294 = vmatpush2.bf16.msra.mxu1 %v12910_v48 }
 0x46e   :  { %5295 = vmatprep.subr.bf16.mxu1 %v13212_v2 }
 0x471   :  { %5296 = vmatpush2.bf16.msra.mxu1 %v12911_v32 }
 0x472   :  { %5297 = vmatprep.subr.bf16.mxu1 %v13212_v2 }
 0x475   :  { %5298 = vmatpush2.bf16.msra.mxu1 %v12912_v28  ;;  %v4664_v28 = vpop.permute.xlu1 %4663 }
 0x476   :  { %5299 = vmatprep.subr.bf16.mxu1 %v13212_v2 }
 0x479   :  { %5300 = vmatpush2.bf16.msra.mxu1 %v12913_v4  ;;  %v4674_v36 = vpop.permute.xlu1 %4673 }
 0x47a   :  { %12435 = vmatprep.subr.msk.bf16.mxu1 %vm3725_vm5, %v12946_v62 }
 0x47c   :  { %5302 = vmatmul.mubr.bf16.vlgmr.msra.gmra.mxu1 %v12914_v9 }
 0x47d   :  { %10900 = vmatprep.mubr.msk.bf16.mxu1 %vm3025_vm4, %v12917_v44  ;;  %12167 = vmatpush3.bf16.msra.mxu1 %v5902_v40 }
 0x47e   :  { %12168 = vmatprep.subr.bf16.mxu1 %v12947_v43 }
 0x481   :  { %12169 = vmatpush3.bf16.msra.mxu1 %v12947_v43 }
 0x482   :  { %12170 = vmatprep.subr.bf16.mxu1 %v12949_v14 }
 0x484   :  { %5310 = vmatmul.mubr.bf16.gmra.mxu1 %v12919_v8 }
 0x485   :  { %10901 = vmatprep.mubr.msk.bf16.mxu1 %vm3025_vm4, %v12920_v27  ;;  %12171 = vmatpush3.bf16.msra.mxu1 %v12949_v14 }
 0x486   :  { %12172 = vmatprep.subr.bf16.mxu1 %v12952_v61 }
 0x489   :  { %12173 = vmatpush3.bf16.msra.mxu1 %v12952_v61 }
 0x48a   :  { %12174 = vmatprep.subr.bf16.mxu1 %v12954_v10 }
 0x48c   :  { %5318 = vmatmul.mubr.bf16.gmra.mxu1 %v12922_v39 }
 0x48d   :  { %10902 = vmatprep.mubr.msk.bf16.mxu1 %vm3025_vm4, %v12923_v15  ;;  %12175 = vmatpush3.bf16.msra.mxu1 %v12954_v10 }
 0x494   :  { %5326 = vmatmul.mubr.bf16.gmra.mxu1 %v12925_v17 }
 0x495   :  { %10903 = vmatprep.mubr.msk.bf16.mxu1 %vm3025_vm4, %v12926_v19  ;;  %v4669_v19 = vpop.permute.xlu0 %4668 }
 0x499   :  { %v4679_v42 = vpop.permute.xlu0 %4678 }
 0x49c   :  { %5334 = vmatmul.mubr.bf16.gmra.mxu1 %v12928_v55 }
 0x49d   :  { %10904 = vmatprep.mubr.msk.bf16.mxu1 %vm3025_vm4, %v12929_v1 }
 0x4a4   :  { %5342 = vmatmul.mubr.bf16.gmra.mxu1 %v12931_v6 }
 0x4a5   :  { %10905 = vmatprep.mubr.msk.bf16.mxu1 %vm3025_vm4, %v12932_v18 }
 0x4ac   :  { %5350 = vmatmul.mubr.bf16.gmra.mxu1 %v12934_v12 }
 0x4ad   :  { %10906 = vmatprep.mubr.msk.bf16.mxu1 %vm3025_vm4, %v12935_v5 }
 0x4b4   :  { %5358 = vmatmul.mubr.bf16.gmra.mxu1 %v12937_v63 }
 0x4b5   :  { %10907 = vmatprep.mubr.msk.bf16.mxu1 %vm3025_vm4, %v12938_v50 }
 0x4bc   :  { %5366 = vmatmul.mubr.bf16.gmra.mxu1 %v12940_v30 }
 0x4bd   :  { %10908 = vmatprep.mubr.msk.bf16.mxu1 %vm3025_vm4, %v12941_v0 }
 0x4c4   :  { %5374 = vmatmul.mubr.bf16.gmra.mxu1 %v12943_v3 }
 0x4e4   :  { %v11822_v60 = vpop.f32.mrf.mxu0 }
 0x4e6   :  { %v11823_v11 = vpop.f32.mrf.mxu0 }
 0x4e7   :  { %v11824_v57 = vadd.f32 %v11823_v11, %v11822_v60 }
 0x4e8   :  { %v11825_v24 = vpop.f32.mrf.mxu0 }
 0x4e9   :  { %v5191_v59 = vadd.f32 %v11824_v57, %v4659_v29  ;;  %v4689_v29 = vpop.permute.xlu0 %4688 }
 0x4ea   :  { %v11826_v51 = vpop.f32.mrf.mxu0 }
 0x4eb   :  { %v11827_v49 = vadd.f32 %v11826_v51, %v11825_v24  ;;  %v4684_v51 = vpop.permute.xlu1 %4683 }
 0x4ec   :  { %v11828_v34 = vpop.f32.mrf.mxu0 }
 0x4ed   :  { %v5194_v8 = vadd.f32 %v11827_v49, %v4664_v28 }
 0x4ee   :  { %v11829_v58 = vpop.f32.mrf.mxu0 }
 0x4ef   :  { %v11830_v9 = vadd.f32 %v11829_v58, %v11828_v34 }
 0x4f0   :  { %v11831_v22 = vpop.f32.mrf.mxu0 }
 0x4f1   :  { %v5199_v18 = vadd.f32 %v11830_v9, %v4669_v19  ;;  %v4694_v9 = vpop.permute.xlu1 %4693 }
 0x4f2   :  { %v11832_v46 = vpop.f32.mrf.mxu0 }
 0x4f3   :  { %v11833_v1 = vadd.f32 %v11832_v46, %v11831_v22 }
 0x4f4   :  { %v11834_v13 = vpop.f32.mrf.mxu0 }
 0x4f5   :  { %v5202_v3 = vadd.f32 %v11833_v1, %v4674_v36 }
 0x4f6   :  { %v11835_v25 = vpop.f32.mrf.mxu0 }
 0x4f7   :  { %v11836_v30 = vadd.f32 %v11835_v25, %v11834_v13 }
 0x4f8   :  { %v11837_v16 = vpop.f32.mrf.mxu0 }
 0x4f9   :  { %v5207_v20 = vadd.f32 %v11836_v30, %v4679_v42 }
 0x4fa   :  { %v11838_v47 = vpop.f32.mrf.mxu0 }
 0x4fb   :  { %v11839_v35 = vadd.f32 %v11838_v47, %v11837_v16 }
 0x4fc   :  { %v11840_v53 = vpop.f32.mrf.mxu0 }
 0x4fd   :  { %v5210_v13 = vadd.f32 %v11839_v35, %v4684_v51 }
 0x4fe   :  { %v11841_v26 = vpop.f32.mrf.mxu0 }
 0x4ff   :  { %v11842_v22 = vadd.f32 %v11841_v26, %v11840_v53 }
 0x500   :  { %v15617_v33 = vpop.f32.mrf.mxu0 }
 0x502   :  { %v15619_v56 = vpop.f32.mrf.mxu0 }
 0x503   :  { %v11845_v53 = vadd.f32 %v15619_v56, %v15617_v33  ;;  %v12963_v33 = vld [vmem:[%s16579_s5 + $0x68] sm:$0xff]  }
 0x504   :  { %v15621_v52 = vpop.f32.mrf.mxu0 }
 0x506   :  { %v15623_v41 = vpop.f32.mrf.mxu0 }
 0x507   :  { %v11848_v56 = vadd.f32 %v15623_v41, %v15621_v52  ;;  %v12965_v52 = vld [vmem:[%s16579_s5 + $0x60] sm:$0xff]  }
 0x508   :  { %v15625_v54 = vpop.f32.mrf.mxu0 }
 0x50a   :  { %v15627_v37 = vpop.f32.mrf.mxu0 }
 0x50b   :  { %v11851_v41 = vadd.f32 %v15627_v37, %v15625_v54 }
 0x50c   :  { %v15629_v23 = vpop.f32.mrf.mxu0 }
 0x50e   :  { %v15631_v38 = vpop.f32.mrf.mxu0 }
 0x50f   :  { %v11854_v54 = vadd.f32 %v15631_v38, %v15629_v23  ;;  %v12968_v23 = vld [vmem:[%s16579_s5 + $0x50] sm:$0xff]  }
 0x510   :  { %v15633_v45 = vpop.f32.mrf.mxu0 }
 0x512   :  { %v15635_v27 = vpop.f32.mrf.mxu0 }
 0x513   :  { %v11857_v38 = vadd.f32 %v15635_v27, %v15633_v45 }
 0x514   :  { %v15638_v12 = vpop.f32.mrf.mxu0 }
 0x516   :  { %v15641_v62 = vpop.f32.mrf.mxu0 }
 0x518   :  { %v15644_v10 = vpop.f32.mrf.mxu0 }
 0x51a   :  { %v15649_v25 = vpop.f32.mrf.mxu0 }
 0x53c   :  { %v5303_v48 = vpop.f32.mrf.mxu1 }
 0x53d   :  { %v5304_v32 = vadd.f32 %v5303_v48, %v5191_v59  ;;  %v5215_v59 = vadd.f32 %v11842_v22, %v4689_v29  ;;  %v15658_v48 = vpop.f32.mrf.mxu0 }
 0x53e   :  { %v5305_v4 = vpop.f32.mrf.mxu1 }
 0x53f   :  { %v5382_v44 = vmax.f32 %v5304_v32, 0.0  ;;  %v15670_v19 = vpop.f32.mrf.mxu0 }
 0x540   :  { %v5306_v39 = vpop.f32.mrf.mxu1 }
 0x541   :  { %v11600_v15 = vpack.c.bf16 %v5382_v44, %v5382_v44  ;;  %v5307_v17 = vadd.f32 %v5306_v39, %v5194_v8  ;;  %v6158_v39 = vsel %vm3725_vm5, %v15613_v21, 0  ;;  %vm8787_vm5 = vcmask 1040384  }
 0x542   :  { %v5308_v55 = vpop.f32.mrf.mxu1 }
 0x543   :  { %5482 = vst.msk [vmem:[#allocation4] sm:$0xf] %vm3922_vm10, %v11600_v15  ;;  %v5383_v6 = vmax.f32 %v5307_v17, 0.0  ;;  %v5218_v17 = vadd.f32 %v11845_v53, %v4694_v9 }
 0x544   :  { %v5311_v5 = vpop.f32.mrf.mxu1 }
 0x545   :  { %v11601_v63 = vpack.c.bf16 %v5383_v6, %v5383_v6  ;;  %v5312_v50 = vadd.f32 %v5311_v5, %v5199_v18  ;;  %v4699_v6 = vpop.permute.xlu0 %4698 }
 0x546   :  { %v5313_v31 = vpop.f32.mrf.mxu1 }
 0x547   :  { %5483 = vst.msk [vmem:[#allocation4 + $0x4] sm:$0xf] %vm3922_vm10, %v11601_v63  ;;  %v5384_v0 = vmax.f32 %v5312_v50, 0.0  ;;  %v5223_v63 = vadd.f32 %v11848_v56, %v4699_v6  ;;  %v15682_v50 = vpop.f32.mrf.mxu0 }
 0x548   :  { %v5314_v40 = vpop.f32.mrf.mxu1 }
 0x549   :  { %v11602_v7 = vpack.c.bf16 %v5384_v0, %v5384_v0  ;;  %v5315_v43 = vadd.f32 %v5314_v40, %v5202_v3  ;;  %v4704_v0 = vpop.permute.xlu1 %4703  ;;  %v11868_v42 = vpop.f32.mrf.mxu0 }
 0x54a   :  { %v5316_v14 = vpop.f32.mrf.mxu1 }
 0x54b   :  { %5484 = vst.msk [vmem:[#allocation4 + $0x8] sm:$0xf] %vm3922_vm10, %v11602_v7  ;;  %v5385_v61 = vmax.f32 %v5315_v43, 0.0  ;;  %v12967_v7 = vld [vmem:[%s16579_s5 + $0x58] sm:$0xff]   ;;  %v5226_v43 = vadd.f32 %v11851_v41, %v4704_v0  ;;  %v11870_v51 = vpop.f32.mrf.mxu0  ;;  %v11869_v41 = vadd.f32 %v11868_v42, %v15682_v50 }
 0x54c   :  { %v5319_v60 = vpop.f32.mrf.mxu1 }
 0x54d   :  { %v11603_v11 = vpack.c.bf16 %v5385_v61, %v5385_v61  ;;  %v5320_v24 = vadd.f32 %v5319_v60, %v5207_v20  ;;  %v4709_v20 = vpop.permute.xlu0 %4708  ;;  %v11871_v29 = vpop.f32.mrf.mxu0 }
 0x54e   :  { %v5321_v34 = vpop.f32.mrf.mxu1  ;;  %v15646_v58 = vld [vmem:[#allocation4] sm:$0xff]  }
 0x54f   :  { %5485 = vst.msk [vmem:[#allocation4 + $0xc] sm:$0xf] %vm3922_vm10, %v11603_v11  ;;  %v5386_v46 = vmax.f32 %v5320_v24, 0.0  ;;  %12146 = vmatprep.mubr.msk.bf16.mxu0 %vm5612_vm12, %v15646_v58  ;;  %12176 = vmatprep.mubr.msk.bf16.mxu1 %vm5612_vm12, %v15646_v58  ;;  %v5231_v24 = vadd.f32 %v11854_v54, %v4709_v20 }
 0x550   :  { %v5322_v16 = vpop.f32.mrf.mxu1 }
 0x551   :  { %v11604_v47 = vpack.c.bf16 %v5386_v46, %v5386_v46  ;;  %v5323_v57 = vadd.f32 %v5322_v16, %v5210_v13  ;;  %v4714_v13 = vpop.permute.xlu1 %4713 }
 0x552   :  { %v5324_v49 = vpop.f32.mrf.mxu1  ;;  %v5234_v27 = vadd.f32 %v11857_v38, %v4714_v13 }
 0x553   :  { %5486 = vst.msk [vmem:[#allocation4 + $0x10] sm:$0xf] %vm3922_vm10, %v11604_v47  ;;  %v5387_v26 = vmax.f32 %v5323_v57, 0.0  ;;  %v11860_v57 = vadd.f32 %v15641_v62, %v15638_v12  ;;  %v11863_v12 = vadd.f32 %v15649_v25, %v15644_v10 }
 0x554   :  { %v5327_v32 = vpop.f32.mrf.mxu1 }
 0x555   :  { %v11605_v28 = vpack.c.bf16 %v5387_v26, %v5387_v26  ;;  %v5328_v4 = vadd.f32 %v5327_v32, %v5215_v59  ;;  %v4719_v59 = vpop.permute.xlu0 %4718 }
 0x556   :  { %v5329_v44 = vpop.f32.mrf.mxu1  ;;  %v15660_v8 = vld [vmem:[#allocation4 + $0x8] sm:$0xff]  }
 0x557   :  { %5487 = vst.msk [vmem:[#allocation4 + $0x14] sm:$0xf] %vm3922_vm10, %v11605_v28  ;;  %v5388_v15 = vmax.f32 %v5328_v4, 0.0  ;;  %12147 = vmatmul.mubr.msk.bf16.vlgmr.msra.gmra.mxu0 %vm5612_vm12, %v15660_v8  ;;  %12177 = vmatmul.mubr.msk.bf16.vlgmr.msra.gmra.mxu1 %vm5612_vm12, %v15660_v8  ;;  %v5239_v28 = vadd.f32 %v11860_v57, %v4719_v59  ;;  %v11873_v4 = vpop.f32.mrf.mxu0 }
 0x558   :  { %v5330_v55 = vpop.f32.mrf.mxu1  ;;  %12197 = vmatpush3.bf16.msra.mxu0 %v6158_v39 }
 0x559   :  { %v11606_v21 = vpack.c.bf16 %v5388_v15, %v5388_v15  ;;  %v5331_v1 = vadd.f32 %v5330_v55, %v5218_v17  ;;  %12198 = vmatprep.subr.bf16.mxu0 %v12963_v33  ;;  %v11866_v17 = vadd.f32 %v15670_v19, %v15658_v48  ;;  %v11874_v10 = vpop.f32.mrf.mxu0 }
 0x55a   :  { %v5332_v18 = vpop.f32.mrf.mxu1  ;;  %v11875_v20 = vadd.f32 %v11874_v10, %v11873_v4 }
 0x55b   :  { %5488 = vst.msk [vmem:[#allocation4 + $0x18] sm:$0xf] %vm3922_vm10, %v11606_v21  ;;  %v5389_v5 = vmax.f32 %v5331_v1, 0.0  ;;  %v4729_v18 = vpop.permute.xlu0 %4728 }
 0x55c   :  { %v5335_v36 = vpop.f32.mrf.mxu1  ;;  %12199 = vmatpush3.bf16.msra.mxu0 %v12963_v33  ;;  %v4724_v33 = vpop.permute.xlu1 %4723  ;;  %v5247_v19 = vadd.f32 %v11866_v17, %v4729_v18 }
 0x55d   :  { %v11607_v31 = vpack.c.bf16 %v5389_v5, %v5389_v5  ;;  %v5336_v30 = vadd.f32 %v5335_v36, %v5223_v63  ;;  %12200 = vmatprep.subr.bf16.mxu0 %v12965_v52  ;;  %v5242_v21 = vadd.f32 %v11863_v12, %v4724_v33  ;;  %v11876_v5 = vpop.f32.mrf.mxu0 }
 0x55e   :  { %v5337_v3 = vpop.f32.mrf.mxu1  ;;  %v15684_v40 = vld [vmem:[#allocation4 + $0x10] sm:$0xff]  }
 0x55f   :  { %5489 = vst.msk [vmem:[#allocation4 + $0x1c] sm:$0xf] %vm3922_vm10, %v11607_v31  ;;  %v5390_v37 = vmax.f32 %v5336_v30, 0.0  ;;  %12150 = vmatprep.mubr.msk.bf16.mxu0 %vm5612_vm12, %v15684_v40  ;;  %12180 = vmatprep.mubr.msk.bf16.mxu1 %vm5612_vm12, %v15684_v40 }
 0x560   :  { %v5338_v14 = vpop.f32.mrf.mxu1  ;;  %12201 = vmatpush3.bf16.msra.mxu0 %v12965_v52  ;;  %v4734_v30 = vpop.permute.xlu1 %4733 }
 0x561   :  { %v11608_v35 = vpack.c.bf16 %v5390_v37, %v5390_v37  ;;  %v5339_v61 = vadd.f32 %v5338_v14, %v5226_v43  ;;  %12202 = vmatprep.subr.bf16.mxu0 %v12967_v7  ;;  %v5250_v37 = vadd.f32 %v11869_v41, %v4734_v30  ;;  %v11877_v43 = vpop.f32.mrf.mxu0 }
 0x562   :  { %v5340_v60 = vpop.f32.mrf.mxu1  ;;  %v11878_v13 = vadd.f32 %v11877_v43, %v11876_v5 }
 0x563   :  { %5490 = vst.msk [vmem:[#allocation4 + $0x20] sm:$0xf] %vm3922_vm10, %v11608_v35  ;;  %v5391_v11 = vmax.f32 %v5339_v61, 0.0  ;;  %v4739_v35 = vpop.permute.xlu0 %4738  ;;  %v11879_v38 = vpop.f32.mrf.mxu0 }
 0x564   :  { %v5343_v34 = vpop.f32.mrf.mxu1  ;;  %12203 = vmatpush3.bf16.msra.mxu0 %v12967_v7  ;;  %v11872_v7 = vadd.f32 %v11871_v29, %v11870_v51 }
 0x565   :  { %v11609_v22 = vpack.c.bf16 %v5391_v11, %v5391_v11  ;;  %v5344_v46 = vadd.f32 %v5343_v34, %v5231_v24  ;;  %12204 = vmatprep.subr.bf16.mxu0 %v12968_v23  ;;  %v4744_v34 = vpop.permute.xlu1 %4743 }
 0x566   :  { %v5345_v16 = vpop.f32.mrf.mxu1  ;;  %v15702_v47 = vld [vmem:[#allocation4 + $0x18] sm:$0xff]   ;;  %v5258_v57 = vadd.f32 %v11875_v20, %v4744_v34 }
 0x567   :  { %5491 = vst.msk [vmem:[#allocation4 + $0x24] sm:$0xf] %vm3922_vm10, %v11609_v22  ;;  %v5392_v45 = vmax.f32 %v5344_v46, 0.0  ;;  %12151 = vmatmul.mubr.msk.bf16.gmra.mxu0 %vm5612_vm12, %v15702_v47  ;;  %12181 = vmatmul.mubr.msk.bf16.gmra.mxu1 %vm5612_vm12, %v15702_v47 }
 0x568   :  { %v5346_v49 = vpop.f32.mrf.mxu1  ;;  %12205 = vmatpush3.bf16.msra.mxu0 %v12968_v23  ;;  %v5255_v23 = vadd.f32 %v11872_v7, %v4739_v35 }
 0x569   :  { %v11610_v53 = vpack.c.bf16 %v5392_v45, %v5392_v45  ;;  %v5347_v26 = vadd.f32 %v5346_v49, %v5234_v27  ;;  %7091 = vmatprep.subr.bf16.mxu0 %v13212_v2  ;;  %v11880_v45 = vpop.f32.mrf.mxu0 }
 0x56a   :  { %v5348_v32 = vpop.f32.mrf.mxu1  ;;  %v11881_v59 = vadd.f32 %v11880_v45, %v11879_v38 }
 0x56b   :  { %5492 = vst.msk [vmem:[#allocation4 + $0x28] sm:$0xf] %vm3922_vm10, %v11610_v53  ;;  %v5393_v62 = vmax.f32 %v5347_v26, 0.0  ;;  %v4749_v53 = vpop.permute.xlu0 %4748 }
 0x56c   :  { %v5351_v9 = vpop.f32.mrf.mxu1  ;;  %v5263_v12 = vadd.f32 %v11878_v13, %v4749_v53 }
 0x56d   :  { %v11611_v44 = vpack.c.bf16 %v5393_v62, %v5393_v62  ;;  %v5352_v39 = vadd.f32 %v5351_v9, %v5239_v28  ;;  %v4754_v9 = vpop.permute.xlu1 %4753 }
 0x56e   :  { %v5353_v56 = vpop.f32.mrf.mxu1  ;;  %v15715_v15 = vld [vmem:[#allocation4 + $0x20] sm:$0xff]  }
 0x56f   :  { %5493 = vst.msk [vmem:[#allocation4 + $0x2c] sm:$0xf] %vm3922_vm10, %v11611_v44  ;;  %v5394_v55 = vmax.f32 %v5352_v39, 0.0  ;;  %12154 = vmatprep.mubr.msk.bf16.mxu0 %vm5612_vm12, %v15715_v15  ;;  %12184 = vmatprep.mubr.msk.bf16.mxu1 %vm5612_vm12, %v15715_v15  ;;  %v5266_v56 = vadd.f32 %v11881_v59, %v4754_v9 }
 0x570   :  { %v5354_v25 = vpop.f32.mrf.mxu1 }
 0x571   :  { %v11612_v1 = vpack.c.bf16 %v5394_v55, %v5394_v55  ;;  %v5355_v6 = vadd.f32 %v5354_v25, %v5242_v21 }
 0x572   :  { %v5356_v52 = vpop.f32.mrf.mxu1 }
 0x573   :  { %5494 = vst.msk [vmem:[#allocation4 + $0x30] sm:$0xf] %vm3922_vm10, %v11612_v1  ;;  %v5395_v48 = vmax.f32 %v5355_v6, 0.0 }
 0x574   :  { %v5359_v63 = vpop.f32.mrf.mxu1 }
 0x575   :  { %v11613_v36 = vpack.c.bf16 %v5395_v48, %v5395_v48  ;;  %v5360_v31 = vadd.f32 %v5359_v63, %v5247_v19 }
 0x576   :  { %v5361_v0 = vpop.f32.mrf.mxu1  ;;  %v15726_v3 = vld [vmem:[#allocation4 + $0x28] sm:$0xff]  }
 0x577   :  { %5495 = vst.msk [vmem:[#allocation4 + $0x34] sm:$0xf] %vm3922_vm10, %v11613_v36  ;;  %v5396_v54 = vmax.f32 %v5360_v31, 0.0  ;;  %12155 = vmatmul.mubr.msk.bf16.gmra.mxu0 %vm5612_vm12, %v15726_v3  ;;  %12185 = vmatmul.mubr.msk.bf16.gmra.mxu1 %vm5612_vm12, %v15726_v3 }
 0x578   :  { %v5362_v14 = vpop.f32.mrf.mxu1 }
 0x579   :  { %v11614_v50 = vpack.c.bf16 %v5396_v54, %v5396_v54  ;;  %v5363_v42 = vadd.f32 %v5362_v14, %v5250_v37 }
 0x57a   :  { %v5364_v61 = vpop.f32.mrf.mxu1 }
 0x57b   :  { %5496 = vst.msk [vmem:[#allocation4 + $0x38] sm:$0xf] %vm3922_vm10, %v11614_v50  ;;  %v5397_v60 = vmax.f32 %v5363_v42, 0.0 }
 0x57c   :  { %v5367_v11 = vpop.f32.mrf.mxu1 }
 0x57d   :  { %v11615_v24 = vpack.c.bf16 %v5397_v60, %v5397_v60  ;;  %v5368_v51 = vadd.f32 %v5367_v11, %v5255_v23  ;;  %v13025_v11 = vld [vmem:[%s16580_s11 + $0xc] ss:$16 sps:$4 sm:$0xff]  }
 0x57e   :  { %v5369_v22 = vpop.f32.mrf.mxu1  ;;  %v12960_v46 = vld [vmem:[#allocation4 + $0x30] sm:$0xff]  }
 0x57f   :  { %5497 = vst.msk [vmem:[#allocation4 + $0x3c] sm:$0xf] %vm3922_vm10, %v11615_v24  ;;  %v5398_v16 = vmax.f32 %v5368_v51, 0.0  ;;  %12158 = vmatprep.mubr.msk.bf16.mxu0 %vm5612_vm12, %v12960_v46  ;;  %12188 = vmatprep.mubr.msk.bf16.mxu1 %vm5612_vm12, %v12960_v46 }
 0x580   :  { %v5370_v27 = vpop.f32.mrf.mxu1 }
 0x581   :  { %v11616_v29 = vpack.c.bf16 %v5398_v16, %v5398_v16  ;;  %v5371_v49 = vadd.f32 %v5370_v27, %v5258_v57 }
 0x582   :  { %v5372_v26 = vpop.f32.mrf.mxu1 }
 0x583   :  { %5498 = vst.msk [vmem:[#allocation4 + $0x40] sm:$0xf] %vm3922_vm10, %v11616_v29  ;;  %v5399_v32 = vmax.f32 %v5371_v49, 0.0 }
 0x584   :  { %v5375_v62 = vpop.f32.mrf.mxu1 }
 0x585   :  { %v11617_v28 = vpack.c.bf16 %v5399_v32, %v5399_v32  ;;  %v5376_v4 = vadd.f32 %v5375_v62, %v5263_v12 }
 0x586   :  { %v5377_v44 = vpop.f32.mrf.mxu1  ;;  %v12962_v39 = vld [vmem:[#allocation4 + $0x38] sm:$0xff]  }
 0x587   :  { %5499 = vst.msk [vmem:[#allocation4 + $0x44] sm:$0xf] %vm3922_vm10, %v11617_v28  ;;  %v5400_v33 = vmax.f32 %v5376_v4, 0.0  ;;  %12159 = vmatmul.mubr.msk.bf16.gmra.mxu0 %vm5612_vm12, %v12962_v39  ;;  %12189 = vmatmul.mubr.msk.bf16.gmra.mxu1 %vm5612_vm12, %v12962_v39 }
 0x588   :  { %v5378_v17 = vpop.f32.mrf.mxu1 }
 0x589   :  { %v11618_v55 = vpack.c.bf16 %v5400_v33, %v5400_v33  ;;  %v5379_v21 = vadd.f32 %v5378_v17, %v5266_v56 }
 0x58a   :  { %v5380_v10 = vpop.f32.mrf.mxu1 }
 0x58b   :  { %5500 = vst.msk [vmem:[#allocation4 + $0x48] sm:$0xf] %vm3922_vm10, %v11618_v55  ;;  %v5401_v25 = vmax.f32 %v5379_v21, 0.0  ;;  %vm9514_vm10 = vcmask 27648  }
 0x58d   :  { %v11619_v1 = vpack.c.bf16 %v5401_v25, %v5401_v25 }
 0x58e   :  { %v12964_v6 = vld [vmem:[#allocation4 + $0x40] sm:$0xff]  }
 0x58f   :  { %5502 = vst.msk [vmem:[#allocation4 + $0x4c] sm:$0x3] %vm5501_vm13, %v11619_v1  ;;  %12162 = vmatprep.mubr.msk.bf16.mxu0 %vm5612_vm12, %v12964_v6  ;;  %12192 = vmatprep.mubr.msk.bf16.mxu1 %vm5612_vm12, %v12964_v6 }
 0x596   :  { %v12966_v18 = vld [vmem:[#allocation4 + $0x48] sm:$0x3f]  }
 0x597   :  { %12163 = vmatmul.mubr.msk.bf16.gmra.mxu0 %vm5612_vm12, %v12966_v18  ;;  %12193 = vmatmul.mubr.msk.bf16.gmra.mxu1 %vm5612_vm12, %v12966_v18 }
 0x598   :  { %12206 = vmatprep.mubr.msk.bf16.mxu0 %vm5612_vm12, %v15646_v58  ;;  %v12987_v58 = vld [vmem:[%s16580_s11 + $0x4] ss:$16 sps:$4 sm:$0xff]  }
 0x599   :  { %7011 = vmatprep.mubr.bf16.mxu1 %v12987_v58 }
 0x59f   :  { %12207 = vmatmul.mubr.msk.bf16.vlgmr.msra.gmra.mxu0 %vm5612_vm12, %v15660_v8 }
 0x5a0   :  { %12210 = vmatprep.mubr.msk.bf16.mxu0 %vm5612_vm12, %v15684_v40 }
 0x5a7   :  { %12211 = vmatmul.mubr.msk.bf16.gmra.mxu0 %vm5612_vm12, %v15702_v47 }
 0x5a8   :  { %12214 = vmatprep.mubr.msk.bf16.mxu0 %vm5612_vm12, %v15715_v15 }
 0x5af   :  { %12215 = vmatmul.mubr.msk.bf16.gmra.mxu0 %vm5612_vm12, %v15726_v3 }
 0x5b0   :  { %12218 = vmatprep.mubr.msk.bf16.mxu0 %vm5612_vm12, %v12960_v46 }
 0x5b7   :  { %12219 = vmatmul.mubr.msk.bf16.gmra.mxu0 %vm5612_vm12, %v12962_v39 }
 0x5b8   :  { %12222 = vmatprep.mubr.msk.bf16.mxu0 %vm5612_vm12, %v12964_v6 }
 0x5bf   :  { %12223 = vmatmul.mubr.msk.bf16.gmra.mxu0 %vm5612_vm12, %v12966_v18 }
 0x5c0   :  { %11134 = vmatprep.mubr.msk.bf16.mxu0 %vm3025_vm4, %v13025_v11 }
 0x617   :  { %v12148_v8 = vpop.f32.mrf.mxu0  ;;  %v12178_v40 = vpop.f32.mrf.mxu1 }
 0x618   :  { %v11622_v47 = vpack.c.bf16 %v12148_v8, %v12148_v8  ;;  %v11642_v15 = vpack.c.bf16 %v12178_v40, %v12178_v40 }
 0x619   :  { %v5680_v52 = vpop.f32.mrf.mxu0  ;;  %v5938_v41 = vpop.f32.mrf.mxu1 }
 0x61a   :  { %5842 = vst.msk [vmem:[#allocation2 + $0x10] sm:$0xf] %vm5839_vm14, %v11622_v47  ;;  %6099 = vst.msk [vmem:[#allocation2 + $0xb0] sm:$0xf] %vm5839_vm14, %v11642_v15  ;;  %v11620_v48 = vpack.c.bf16 %v5680_v52, %v5680_v52  ;;  %v11640_v19 = vpack.c.bf16 %v5938_v41, %v5938_v41 }
 0x61b   :  { %v12149_v5 = vpop.f32.mrf.mxu0  ;;  %v12179_v63 = vpop.f32.mrf.mxu1 }
 0x61c   :  { %5840 = vst.msk [vmem:[#allocation2] sm:$0xf] %vm5839_vm14, %v11620_v48  ;;  %6097 = vst.msk [vmem:[#allocation2 + $0xa0] sm:$0xf] %vm5839_vm14, %v11640_v19  ;;  %v11623_v36 = vpack.c.bf16 %v12149_v5, %v12149_v5  ;;  %v11643_v31 = vpack.c.bf16 %v12179_v63, %v12179_v63 }
 0x61d   :  { %v5683_v30 = vpop.f32.mrf.mxu0  ;;  %v5941_v0 = vpop.f32.mrf.mxu1 }
 0x61e   :  { %5843 = vst.msk [vmem:[#allocation2 + $0x18] sm:$0xf] %vm5839_vm14, %v11623_v36  ;;  %6100 = vst.msk [vmem:[#allocation2 + $0xb8] sm:$0xf] %vm5839_vm14, %v11643_v31  ;;  %v11621_v3 = vpack.c.bf16 %v5683_v30, %v5683_v30  ;;  %v11641_v7 = vpack.c.bf16 %v5941_v0, %v5941_v0 }
 0x620   :  { %5841 = vst.msk [vmem:[#allocation2 + $0x8] sm:$0xf] %vm5839_vm14, %v11621_v3  ;;  %6098 = vst.msk [vmem:[#allocation2 + $0xa8] sm:$0xf] %vm5839_vm14, %v11641_v7 }
 0x627   :  { %v12152_v54 = vpop.f32.mrf.mxu0  ;;  %v12182_v37 = vpop.f32.mrf.mxu1 }
 0x628   :  { %v11626_v43 = vpack.c.bf16 %v12152_v54, %v12152_v54  ;;  %v11646_v14 = vpack.c.bf16 %v12182_v37, %v12182_v37 }
 0x629   :  { %v5696_v50 = vpop.f32.mrf.mxu0  ;;  %v5954_v42 = vpop.f32.mrf.mxu1 }
 0x62a   :  { %5846 = vst.msk [vmem:[#allocation2 + $0x30] sm:$0xf] %vm5839_vm14, %v11626_v43  ;;  %6103 = vst.msk [vmem:[#allocation2 + $0xd0] sm:$0xf] %vm5839_vm14, %v11646_v14  ;;  %v11624_v35 = vpack.c.bf16 %v5696_v50, %v5696_v50  ;;  %v11644_v61 = vpack.c.bf16 %v5954_v42, %v5954_v42 }
 0x62b   :  { %v12153_v20 = vpop.f32.mrf.mxu0  ;;  %v12183_v60 = vpop.f32.mrf.mxu1 }
 0x62c   :  { %5844 = vst.msk [vmem:[#allocation2 + $0x20] sm:$0xf] %vm5839_vm14, %v11624_v35  ;;  %6101 = vst.msk [vmem:[#allocation2 + $0xc0] sm:$0xf] %vm5839_vm14, %v11644_v61  ;;  %v11627_v23 = vpack.c.bf16 %v12153_v20, %v12153_v20  ;;  %v11647_v38 = vpack.c.bf16 %v12183_v60, %v12183_v60 }
 0x62d   :  { %v5699_v24 = vpop.f32.mrf.mxu0  ;;  %v5957_v51 = vpop.f32.mrf.mxu1 }
 0x62e   :  { %5847 = vst.msk [vmem:[#allocation2 + $0x38] sm:$0xf] %vm5839_vm14, %v11627_v23  ;;  %6104 = vst.msk [vmem:[#allocation2 + $0xd8] sm:$0xf] %vm5839_vm14, %v11647_v38  ;;  %v11625_v34 = vpack.c.bf16 %v5699_v24, %v5699_v24  ;;  %v11645_v22 = vpack.c.bf16 %v5957_v51, %v5957_v51  ;;  %v12977_v51 = vld [vmem:[#allocation2 + $0xb0] ss:$8 sps:$4 sm:$0xff]  }
 0x630   :  { %5845 = vst.msk [vmem:[#allocation2 + $0x28] sm:$0xf] %vm5839_vm14, %v11625_v34  ;;  %6102 = vst.msk [vmem:[#allocation2 + $0xc8] sm:$0xf] %vm5839_vm14, %v11645_v22 }
 0x635   :  { %v12973_v3 = vld [vmem:[#allocation2 + $0xd0] ss:$8 sps:$4 sm:$0xff]  }
 0x637   :  { %v12156_v46 = vpop.f32.mrf.mxu0  ;;  %v12186_v13 = vpop.f32.mrf.mxu1  ;;  %v12975_v20 = vld [vmem:[#allocation2 + $0xc0] ss:$8 sps:$4 sm:$0xff]  }
 0x638   :  { %v11630_v16 = vpack.c.bf16 %v12156_v46, %v12156_v46  ;;  %v11650_v57 = vpack.c.bf16 %v12186_v13, %v12186_v13  ;;  %v12978_v13 = vld [vmem:[#allocation2 + $0x30] ss:$8 sps:$4 sm:$0xff]  }
 0x639   :  { %v5712_v45 = vpop.f32.mrf.mxu0  ;;  %v5970_v27 = vpop.f32.mrf.mxu1 }
 0x63a   :  { %5850 = vst.msk [vmem:[#allocation2 + $0x50] sm:$0xf] %vm5839_vm14, %v11630_v16  ;;  %6107 = vst.msk [vmem:[#allocation2 + $0xf0] sm:$0xf] %vm5839_vm14, %v11650_v57  ;;  %v11628_v29 = vpack.c.bf16 %v5712_v45, %v5712_v45  ;;  %v11648_v49 = vpack.c.bf16 %v5970_v27, %v5970_v27  ;;  %v12979_v57 = vld [vmem:[#allocation2 + $0xa0] ss:$8 sps:$4 sm:$0xff]  }
 0x63b   :  { %v12157_v53 = vpop.f32.mrf.mxu0  ;;  %v12187_v26 = vpop.f32.mrf.mxu1 }
 0x63c   :  { %5848 = vst.msk [vmem:[#allocation2 + $0x40] sm:$0xf] %vm5839_vm14, %v11628_v29  ;;  %6105 = vst.msk [vmem:[#allocation2 + $0xe0] sm:$0xf] %vm5839_vm14, %v11648_v49  ;;  %v11631_v59 = vpack.c.bf16 %v12157_v53, %v12157_v53  ;;  %v11651_v32 = vpack.c.bf16 %v12187_v26, %v12187_v26  ;;  %v12980_v49 = vld [vmem:[#allocation2 + $0x20] ss:$8 sps:$4 sm:$0xff]  }
 0x63d   :  { %v5715_v12 = vpop.f32.mrf.mxu0  ;;  %v5973_v62 = vpop.f32.mrf.mxu1 }
 0x63e   :  { %5851 = vst.msk [vmem:[#allocation2 + $0x58] sm:$0xf] %vm5839_vm14, %v11631_v59  ;;  %6108 = vst.msk [vmem:[#allocation2 + $0xf8] sm:$0xf] %vm5839_vm14, %v11651_v32  ;;  %v11629_v28 = vpack.c.bf16 %v5715_v12, %v5715_v12  ;;  %v11649_v4 = vpack.c.bf16 %v5973_v62, %v5973_v62  ;;  %v12982_v62 = vld [vmem:[#allocation2 + $0x10] ss:$8 sps:$4 sm:$0xff]  }
 0x640   :  { %5849 = vst.msk [vmem:[#allocation2 + $0x48] sm:$0xf] %vm5839_vm14, %v11629_v28  ;;  %6106 = vst.msk [vmem:[#allocation2 + $0xe8] sm:$0xf] %vm5839_vm14, %v11649_v4 }
 0x645   :  { %v12969_v9 = vld [vmem:[#allocation2 + $0xf0] ss:$8 sps:$4 sm:$0xff]  }
 0x646   :  { %11927 = vmatprep.subr.bf16.mxu1 %v12969_v9  ;;  %v12974_v42 = vld [vmem:[#allocation2 + $0x50] ss:$8 sps:$4 sm:$0xff]  }
 0x647   :  { %v12160_v44 = vpop.f32.mrf.mxu0  ;;  %v12190_v39 = vpop.f32.mrf.mxu1  ;;  %v12971_v52 = vld [vmem:[#allocation2 + $0xe0] ss:$8 sps:$4 sm:$0xff]  }
 0x648   :  { %v11634_v33 = vpack.c.bf16 %v12160_v44, %v12160_v44  ;;  %v11654_v56 = vpack.c.bf16 %v12190_v39, %v12190_v39  ;;  %v12976_v11 = vld [vmem:[#allocation2 + $0x40] ss:$8 sps:$4 sm:$0xff]  }
 0x649   :  { %v5728_v17 = vpop.f32.mrf.mxu0  ;;  %v5986_v55 = vpop.f32.mrf.mxu1 }
 0x64a   :  { %5854 = vst.msk [vmem:[#allocation2 + $0x70] sm:$0xf] %vm5839_vm14, %v11634_v33  ;;  %6111 = vst.msk [vmem:[#allocation2 + $0x110] sm:$0xf] %vm5839_vm14, %v11654_v56  ;;  %v11632_v21 = vpack.c.bf16 %v5728_v17, %v5728_v17  ;;  %v11652_v10 = vpack.c.bf16 %v5986_v55, %v5986_v55  ;;  %v12984_v33 = vld [vmem:[#allocation2] ss:$8 sps:$4 sm:$0xff]  }
 0x64b   :  { %v12161_v25 = vpop.f32.mrf.mxu0  ;;  %v12191_v1 = vpop.f32.mrf.mxu1  ;;  %v12985_v17 = vld [vmem:[%s16580_s11] ss:$16 sps:$4 sm:$0xff]  }
 0x64c   :  { %5852 = vst.msk [vmem:[#allocation2 + $0x60] sm:$0xf] %vm5839_vm14, %v11632_v21  ;;  %6109 = vst.msk [vmem:[#allocation2 + $0x100] sm:$0xf] %vm5839_vm14, %v11652_v10  ;;  %v11635_v6 = vpack.c.bf16 %v12161_v25, %v12161_v25  ;;  %v11655_v18 = vpack.c.bf16 %v12191_v1, %v12191_v1  ;;  %v12992_v21 = vld [vmem:[%s16580_s11 + $0x24] ss:$16 sps:$4 sm:$0xff]  }
 0x64d   :  { %v5731_v58 = vpop.f32.mrf.mxu0  ;;  %v5989_v8 = vpop.f32.mrf.mxu1 }
 0x64e   :  { %5855 = vst.msk [vmem:[#allocation2 + $0x78] sm:$0xf] %vm5839_vm14, %v11635_v6  ;;  %6112 = vst.msk [vmem:[#allocation2 + $0x118] sm:$0xf] %vm5839_vm14, %v11655_v18  ;;  %v11633_v40 = vpack.c.bf16 %v5731_v58, %v5731_v58  ;;  %v11653_v47 = vpack.c.bf16 %v5989_v8, %v5989_v8 }
 0x650   :  { %5853 = vst.msk [vmem:[#allocation2 + $0x68] sm:$0xf] %vm5839_vm14, %v11633_v40  ;;  %6110 = vst.msk [vmem:[#allocation2 + $0x108] sm:$0xf] %vm5839_vm14, %v11653_v47 }
 0x655   :  { %v12970_v15 = vld [vmem:[#allocation2 + $0x70] ss:$8 sps:$4 sm:$0xff]  }
 0x656   :  { %11928 = vmatpush3.bf16.msra.mxu1 %v12970_v15  ;;  %v12990_v15 = vld [vmem:[%s16580_s11 + $0x20] ss:$16 sps:$4 sm:$0xff]  }
 0x657   :  { %v12164_v41 = vpop.f32.mrf.mxu0  ;;  %v12194_v48 = vpop.f32.mrf.mxu1  ;;  %11929 = vmatprep.subr.bf16.mxu1 %v12971_v52  ;;  %v12972_v31 = vld [vmem:[#allocation2 + $0x60] ss:$8 sps:$4 sm:$0xff]  }
 0x658   :  { %v11638_v19 = vpack.c.bf16 %v12164_v41, %v12164_v41  ;;  %v11658_v5 = vpack.c.bf16 %v12194_v48, %v12194_v48  ;;  %v12997_v41 = vld [vmem:[%s16580_s11 + $0x44] ss:$16 sps:$4 sm:$0xff]  }
 0x659   :  { %v5744_v63 = vpop.f32.mrf.mxu0  ;;  %v6002_v36 = vpop.f32.mrf.mxu1 }
 0x65a   :  { %5858 = vst.msk [vmem:[#allocation2 + $0x90] sm:$0xf] %vm5839_vm14, %v11638_v19  ;;  %6115 = vst.msk [vmem:[#allocation2 + $0x130] sm:$0xf] %vm5839_vm14, %v11658_v5  ;;  %v11636_v30 = vpack.c.bf16 %v5744_v63, %v5744_v63  ;;  %v11656_v0 = vpack.c.bf16 %v6002_v36, %v6002_v36  ;;  %11930 = vmatpush3.bf16.msra.mxu1 %v12972_v31 }
 0x65b   :  { %v12165_v7 = vpop.f32.mrf.mxu0  ;;  %v12195_v54 = vpop.f32.mrf.mxu1  ;;  %11931 = vmatprep.subr.bf16.mxu1 %v12973_v3 }
 0x65c   :  { %5856 = vst.msk [vmem:[#allocation2 + $0x80] sm:$0xf] %vm5839_vm14, %v11636_v30  ;;  %6113 = vst.msk [vmem:[#allocation2 + $0x120] sm:$0xf] %vm5839_vm14, %v11656_v0  ;;  %v11639_v37 = vpack.c.bf16 %v12165_v7, %v12165_v7  ;;  %v11659_v43 = vpack.c.bf16 %v12195_v54, %v12195_v54  ;;  %v12995_v7 = vld [vmem:[%s16580_s11 + $0x40] ss:$16 sps:$4 sm:$0xff]  }
 0x65d   :  { %v5747_v14 = vpop.f32.mrf.mxu0  ;;  %v6005_v50 = vpop.f32.mrf.mxu1 }
 0x65e   :  { %5860 = vst.msk [vmem:[#allocation2 + $0x98] sm:$0x3] %vm5859_vm15, %v11639_v37  ;;  %6116 = vst.msk [vmem:[#allocation2 + $0x138] sm:$0x3] %vm5859_vm15, %v11659_v43  ;;  %v11637_v35 = vpack.c.bf16 %v5747_v14, %v5747_v14  ;;  %v11657_v61 = vpack.c.bf16 %v6005_v50, %v6005_v50  ;;  %11932 = vmatpush3.bf16.msra.mxu1 %v12974_v42  ;;  %v13002_v37 = vld [vmem:[%s16580_s11 + $0x64] ss:$16 sps:$4 sm:$0xff]  }
 0x65f   :  { %v12208_v60 = vpop.f32.mrf.mxu0  ;;  %11933 = vmatprep.subr.bf16.mxu1 %v12975_v20  ;;  %v13007_v20 = vld [vmem:[%s16580_s11 + $0x84] ss:$16 sps:$4 sm:$0xff]  }
 0x660   :  { %5857 = vst.msk [vmem:[#allocation2 + $0x88] sm:$0xf] %vm5839_vm14, %v11637_v35  ;;  %6114 = vst.msk [vmem:[#allocation2 + $0x128] sm:$0xf] %vm5839_vm14, %v11657_v61  ;;  %v11662_v23 = vpack.c.bf16 %v12208_v60, %v12208_v60  ;;  %v13000_v61 = vld [vmem:[%s16580_s11 + $0x60] ss:$16 sps:$4 sm:$0xff]  }
 0x661   :  { %v6194_v38 = vpop.f32.mrf.mxu0  ;;  %v13003_v60 = vld [vmem:[#allocation2 + $0x110] ss:$8 sps:$4 sm:$0xff]  }
 0x662   :  { %6355 = vst.msk [vmem:[#allocation2 + $0x150] sm:$0xf] %vm5839_vm14, %v11662_v23  ;;  %v11660_v24 = vpack.c.bf16 %v6194_v38, %v6194_v38  ;;  %11934 = vmatpush3.bf16.msra.mxu1 %v12976_v11  ;;  %v13004_v23 = vld [vmem:[#allocation2 + $0x100] ss:$8 sps:$4 sm:$0xff]   ;;  %v13012_v11 = vld [vmem:[%s16580_s11 + $0xa4] ss:$16 sps:$4 sm:$0xff]  }
 0x663   :  { %v12209_v34 = vpop.f32.mrf.mxu0  ;;  %11935 = vmatprep.subr.bf16.mxu1 %v12977_v51  ;;  %v13005_v38 = vld [vmem:[%s16580_s11 + $0x80] ss:$16 sps:$4 sm:$0xff]  }
 0x664   :  { %6353 = vst.msk [vmem:[#allocation2 + $0x140] sm:$0xf] %vm5839_vm14, %v11660_v24  ;;  %v11663_v22 = vpack.c.bf16 %v12209_v34, %v12209_v34  ;;  %v13010_v34 = vld [vmem:[%s16580_s11 + $0xa0] ss:$16 sps:$4 sm:$0xff]  }
 0x665   :  { %v6197_v46 = vpop.f32.mrf.mxu0  ;;  %v12981_v26 = vld [vmem:[#allocation2 + $0x90] ss:$8 sps:$4 sm:$0xff]  }
 0x666   :  { %6356 = vst.msk [vmem:[#allocation2 + $0x158] sm:$0xf] %vm5839_vm14, %v11663_v22  ;;  %v11661_v16 = vpack.c.bf16 %v6197_v46, %v6197_v46  ;;  %11936 = vmatpush3.bf16.msra.mxu1 %v12978_v13  ;;  %v12998_v50 = vld [vmem:[#allocation2 + $0x130] ss:$8 sps:$4 sm:$0xff]   ;;  %v13017_v22 = vld [vmem:[%s16580_s11 + $0xc4] ss:$16 sps:$4 sm:$0xff]  }
 0x667   :  { %v12212_v45 = vpop.f32.mrf.mxu0  ;;  %11937 = vmatprep.subr.bf16.mxu1 %v12979_v57  ;;  %v12983_v4 = vld [vmem:[#allocation2 + $0x80] ss:$8 sps:$4 sm:$0xff]   ;;  %v13022_v57 = vld [vmem:[%s16580_s11 + $0xe4] ss:$16 sps:$4 sm:$0xff]  }
 0x668   :  { %6354 = vst.msk [vmem:[#allocation2 + $0x148] sm:$0xf] %vm5839_vm14, %v11661_v16  ;;  %v11666_v27 = vpack.c.bf16 %v12212_v45, %v12212_v45  ;;  %v12999_v35 = vld [vmem:[#allocation2 + $0x120] ss:$8 sps:$4 sm:$0xff]  }
 0x669   :  { %v6210_v29 = vpop.f32.mrf.mxu0  ;;  %v13015_v16 = vld [vmem:[%s16580_s11 + $0xc0] ss:$16 sps:$4 sm:$0xff]  }
 0x66a   :  { %6359 = vst.msk [vmem:[#allocation2 + $0x170] sm:$0xf] %vm5839_vm14, %v11666_v27  ;;  %v11664_v53 = vpack.c.bf16 %v6210_v29, %v6210_v29  ;;  %11938 = vmatpush3.bf16.msra.mxu1 %v12980_v49  ;;  %v13020_v29 = vld [vmem:[%s16580_s11 + $0xe0] ss:$16 sps:$4 sm:$0xff]   ;;  %v13023_v49 = vld [vmem:[%s16580_s11 + $0x8] ss:$16 sps:$4 sm:$0xff]  }
 0x66b   :  { %v12213_v59 = vpop.f32.mrf.mxu0  ;;  %11939 = vmatprep.subr.bf16.mxu1 %v12981_v26  ;;  %v13029_v26 = vld [vmem:[%s16580_s11 + $0x2c] ss:$16 sps:$4 sm:$0xff]  }
 0x66c   :  { %6357 = vst.msk [vmem:[#allocation2 + $0x160] sm:$0xf] %vm5839_vm14, %v11664_v53  ;;  %v11667_v32 = vpack.c.bf16 %v12213_v59, %v12213_v59  ;;  %v13028_v53 = vld [vmem:[%s16580_s11 + $0x104] ss:$16 sps:$4 sm:$0xff]  }
 0x66d   :  { %v6213_v12 = vpop.f32.mrf.mxu0  ;;  %v12993_v5 = vld [vmem:[#allocation2 + $0x150] ss:$8 sps:$4 sm:$0xff]   ;;  %v6469_v59 = vld [vmem:[%s16580_s11 + $0x120] sm:$0xff] }
 0x66e   :  { %6360 = vst.msk [vmem:[#allocation2 + $0x178] sm:$0xf] %vm5839_vm14, %v11667_v32  ;;  %v11665_v28 = vpack.c.bf16 %v6213_v12, %v6213_v12  ;;  %11940 = vmatpush3.bf16.msra.mxu1 %v12982_v62  ;;  %v13026_v32 = vld [vmem:[%s16580_s11 + $0x100] ss:$16 sps:$4 sm:$0xff]   ;;  %v13031_v12 = vld [vmem:[%s16580_s11 + $0x28] ss:$16 sps:$4 sm:$0xff]   ;;  %v11101_v62 = vcombine.high %v6469_v59, %v6469_v59 }
 0x66f   :  { %v12216_v9 = vpop.f32.mrf.mxu0  ;;  %11941 = vmatprep.subr.bf16.mxu1 %v12983_v4  ;;  %v12994_v0 = vld [vmem:[#allocation2 + $0x140] ss:$8 sps:$4 sm:$0xff]   ;;  %v11100_v4 = vcombine.low %v6469_v59, %v6469_v59 }
 0x670   :  { %6358 = vst.msk [vmem:[#allocation2 + $0x168] sm:$0xf] %vm5839_vm14, %v11665_v28  ;;  %v11670_v44 = vpack.c.bf16 %v12216_v9, %v12216_v9  ;;  %v13034_v28 = vld [vmem:[%s16580_s11 + $0x4c] ss:$16 sps:$4 sm:$0xff]   ;;  %v13036_v9 = vld [vmem:[%s16580_s11 + $0x48] ss:$16 sps:$4 sm:$0xff]  }
 0x671   :  { %v6226_v39 = vpop.f32.mrf.mxu0 }
 0x672   :  { %6363 = vst.msk [vmem:[#allocation2 + $0x190] sm:$0xf] %vm5839_vm14, %v11670_v44  ;;  %v11668_v56 = vpack.c.bf16 %v6226_v39, %v6226_v39  ;;  %11942 = vmatpush3.bf16.msra.mxu1 %v12984_v33  ;;  %v13037_v44 = vld [vmem:[%s16580_s11 + $0x6c] ss:$16 sps:$4 sm:$0xff]   ;;  %v13039_v39 = vld [vmem:[%s16580_s11 + $0x68] ss:$16 sps:$4 sm:$0xff]  }
 0x673   :  { %v12217_v55 = vpop.f32.mrf.mxu0  ;;  %v13040_v33 = vld [vmem:[%s16580_s11 + $0x8c] ss:$16 sps:$4 sm:$0xff]  }
 0x674   :  { %6361 = vst.msk [vmem:[#allocation2 + $0x180] sm:$0xf] %vm5839_vm14, %v11668_v56  ;;  %v11671_v10 = vpack.c.bf16 %v12217_v55, %v12217_v55  ;;  %v13042_v56 = vld [vmem:[%s16580_s11 + $0x88] ss:$16 sps:$4 sm:$0xff]  }
 0x675   :  { %v6229_v25 = vpop.f32.mrf.mxu0  ;;  %v12988_v1 = vld [vmem:[#allocation2 + $0x170] ss:$8 sps:$4 sm:$0xff]   ;;  %7012 = vmatmul.mubr.bf16.vlgmr.msra.gmra.mxu1 %v12985_v17  ;;  %v13043_v17 = vld [vmem:[%s16580_s11 + $0xac] ss:$16 sps:$4 sm:$0xff]  }
 0x676   :  { %6364 = vst.msk [vmem:[#allocation2 + $0x198] sm:$0xf] %vm5839_vm14, %v11671_v10  ;;  %v11669_v6 = vpack.c.bf16 %v6229_v25, %v6229_v25  ;;  %7092 = vmatpush1.bf16.msra.mxu0 %v12988_v1  ;;  %7019 = vmatprep.mubr.bf16.mxu1 %v12992_v21  ;;  %v13045_v55 = vld [vmem:[%s16580_s11 + $0xa8] ss:$16 sps:$4 sm:$0xff]   ;;  %v13046_v21 = vld [vmem:[%s16580_s11 + $0xcc] ss:$16 sps:$4 sm:$0xff]  }
 0x677   :  { %v12220_v18 = vpop.f32.mrf.mxu0  ;;  %7093 = vmatprep.subr.bf16.mxu0 %v13212_v2  ;;  %v12989_v40 = vld [vmem:[#allocation2 + $0x160] ss:$8 sps:$4 sm:$0xff]   ;;  %v13049_v25 = vld [vmem:[%s16580_s11 + $0xec] ss:$16 sps:$4 sm:$0xff]  }
 0x678   :  { %6362 = vst.msk [vmem:[#allocation2 + $0x188] sm:$0xf] %vm5839_vm14, %v11669_v6  ;;  %v11674_v58 = vpack.c.bf16 %v12220_v18, %v12220_v18  ;;  %v13048_v10 = vld [vmem:[%s16580_s11 + $0xc8] ss:$16 sps:$4 sm:$0xff]   ;;  %v13052_v18 = vld [vmem:[%s16580_s11 + $0x10c] ss:$16 sps:$4 sm:$0xff]  }
 0x679   :  { %v6242_v8 = vpop.f32.mrf.mxu0  ;;  %v13057_v1 = vld [vmem:[%s16581_s1 + $0x10] ss:$0 sps:$4 sm:$0x77]   ;;  %v13051_v6 = vld [vmem:[%s16580_s11 + $0xe8] ss:$16 sps:$4 sm:$0xff]  }
 0x67a   :  { %6367 = vst.msk [vmem:[#allocation2 + $0x1b0] sm:$0xf] %vm5839_vm14, %v11674_v58  ;;  %v11672_v47 = vpack.c.bf16 %v6242_v8, %v6242_v8  ;;  %7094 = vmatpush1.bf16.msra.mxu0 %v12989_v40  ;;  %12437 = vmatprep.subr.msk.bf16.mxu1 %vm3501_vm7, %v13057_v1  ;;  %v7437_v58 = vsel %vm3501_vm7, %v13057_v1, 0  ;;  %v6470_v8 = vld [vmem:[%s16580_s11 + $0x128] sm:$0xff] }
 0x67b   :  { %v12221_v52 = vpop.f32.mrf.mxu0  ;;  %7095 = vmatprep.subr.bf16.mxu0 %v13212_v2  ;;  %12227 = vmatpush3.bf16.msra.mxu1 %v7437_v58  ;;  %v13054_v40 = vld [vmem:[%s16580_s11 + $0x108] ss:$16 sps:$4 sm:$0xff]   ;;  %s13215_s11 = smov [#allocation9]  }
 0x67c   :  { %6365 = vst.msk [vmem:[#allocation2 + $0x1a0] sm:$0xf] %vm5839_vm14, %v11672_v47  ;;  %v11675_v48 = vpack.c.bf16 %v12221_v52, %v12221_v52  ;;  %v11103_v47 = vcombine.high %v6470_v8, %v6470_v8  ;;  %v13059_v52 = vld [vmem:[%s16581_s1 + $0x24] ss:$0 sps:$4 sm:$0x77]   ;;  %s10191_s7 = sshll.u32 %s13215_s11, 4  ;;  %s10192_s7 = int_to_ptr.vmem [resolvable:$true] %s10191_s7 }
 0x67d   :  { %v6245_v19 = vpop.f32.mrf.mxu0  ;;  %7020 = vmatmul.mubr.bf16.gmra.mxu1 %v12990_v15  ;;  %v13018_v45 = vld [vmem:[#allocation2 + $0x190] ss:$8 sps:$4 sm:$0xff]   ;;  %v11102_v15 = vcombine.low %v6470_v8, %v6470_v8  ;;  %p13195_p1 = scmp.lt.s32.totalorder %s10192_s7, %s10192_s7 }
 0x67e   :  { %6368 = vst.msk [vmem:[#allocation2 + $0x1b8] sm:$0xf] %vm5839_vm14, %v11675_v48  ;;  %v11673_v63 = vpack.c.bf16 %v6245_v19, %v6245_v19  ;;  %7096 = vmatpush1.bf16.msra.mxu0 %v12993_v5  ;;  %7027 = vmatprep.mubr.bf16.mxu1 %v12997_v41  ;;  %v7670_v41 = vsel %vm3501_vm7, %v13059_v52, 0  ;;  %v13058_v48 = vld [vmem:[%s16581_s1 + $0x8] sm:$0xff]   ;;  %v13061_v19 = vld [vmem:[%s16581_s1 + $0x1c] sm:$0xff]  }
 0x67f   :  { %v12224_v36 = vpop.f32.mrf.mxu0  ;;  %7097 = vmatprep.subr.bf16.mxu0 %v13212_v2  ;;  %v13019_v27 = vld [vmem:[#allocation2 + $0x180] ss:$8 sps:$4 sm:$0xff]   ;;  %12228 = vmatprep.subr.bf16.mxu1 %v13058_v48 }
 0x680   :  { %6366 = vst.msk [vmem:[#allocation2 + $0x1a8] sm:$0xf] %vm5839_vm14, %v11673_v63  ;;  %v11678_v31 = vpack.c.bf16 %v12224_v36, %v12224_v36  ;;  %12229 = vmatpush3.bf16.msra.mxu1 %v13058_v48  ;;  %v13062_v5 = vld [vmem:[%s16581_s1] sm:$0xff]   ;;  %v13063_v63 = vld [vmem:[%s16581_s1 + $0x14] sm:$0xff]  }
 0x681   :  { %v6258_v30 = vpop.f32.mrf.mxu0  ;;  %12230 = vmatprep.subr.bf16.mxu1 %v13062_v5  ;;  %v15984_v36 = vld [vmem:[%s16581_s1 + $0x38] ss:$0 sps:$4 sm:$0x77]  }
 0x682   :  { %6371 = vst.msk [vmem:[#allocation2 + $0x1d0] sm:$0xf] %vm5839_vm14, %v11678_v31  ;;  %v11676_v3 = vpack.c.bf16 %v6258_v30, %v6258_v30  ;;  %7098 = vmatpush1.bf16.msra.mxu0 %v12994_v0 }
 0x683   :  { %v12225_v54 = vpop.f32.mrf.mxu0  ;;  %7099 = vmatprep.subr.bf16.mxu0 %v13212_v2 }
 0x684   :  { %6369 = vst.msk [vmem:[#allocation2 + $0x1c0] sm:$0xf] %vm5839_vm14, %v11676_v3  ;;  %v11679_v43 = vpack.c.bf16 %v12225_v54, %v12225_v54  ;;  %12231 = vmatpush3.bf16.msra.mxu1 %v13062_v5 }
 0x685   :  { %v6261_v14 = vpop.f32.mrf.mxu0  ;;  %7028 = vmatmul.mubr.bf16.gmra.mxu1 %v12995_v7  ;;  %v13013_v46 = vld [vmem:[#allocation2 + $0x1b0] ss:$8 sps:$4 sm:$0xff]   ;;  %12439 = vmatprep.subr.msk.bf16.mxu1 %vm3501_vm7, %v15984_v36 }
 0x686   :  { %6372 = vst.msk [vmem:[#allocation2 + $0x1d8] sm:$0x3] %vm5859_vm15, %v11679_v43  ;;  %v11677_v42 = vpack.c.bf16 %v6261_v14, %v6261_v14  ;;  %7100 = vmatpush1.bf16.msra.mxu0 %v12998_v50  ;;  %7035 = vmatprep.mubr.bf16.mxu1 %v13002_v37 }
 0x687   :  { %7101 = vmatprep.subr.bf16.mxu0 %v13212_v2  ;;  %v13014_v13 = vld [vmem:[#allocation2 + $0x1a0] ss:$8 sps:$4 sm:$0xff]  }
 0x688   :  { %6370 = vst.msk [vmem:[#allocation2 + $0x1c8] sm:$0xf] %vm5839_vm14, %v11677_v42 }
 0x68a   :  { %7102 = vmatpush1.bf16.msra.mxu0 %v12999_v35 }
 0x68b   :  { %7103 = vmatprep.subr.bf16.mxu0 %v13212_v2 }
 0x68d   :  { %7036 = vmatmul.mubr.bf16.gmra.mxu1 %v13000_v61  ;;  %v13008_v24 = vld [vmem:[#allocation2 + $0x1d0] ss:$8 sps:$4 sm:$0xff]  }
 0x68e   :  { %7104 = vmatpush1.bf16.msra.mxu0 %v13003_v60  ;;  %7043 = vmatprep.mubr.bf16.mxu1 %v13007_v20 }
 0x68f   :  { %7105 = vmatprep.subr.bf16.mxu0 %v13212_v2  ;;  %v13009_v51 = vld [vmem:[#allocation2 + $0x1c0] ss:$8 sps:$4 sm:$0xff]  }
 0x692   :  { %7106 = vmatpush1.bf16.msra.mxu0 %v13004_v23 }
 0x693   :  { %7111 = vmatprep.subr.bf16.mxu0 %v13212_v2 }
 0x695   :  { %7044 = vmatmul.mubr.bf16.gmra.mxu1 %v13005_v38 }
 0x696   :  { %7112 = vmatpush2.bf16.msra.mxu0 %v13008_v24  ;;  %7051 = vmatprep.mubr.bf16.mxu1 %v13012_v11 }
 0x697   :  { %7113 = vmatprep.subr.bf16.mxu0 %v13212_v2 }
 0x69a   :  { %7114 = vmatpush2.bf16.msra.mxu0 %v13009_v51 }
 0x69b   :  { %7115 = vmatprep.subr.bf16.mxu0 %v13212_v2 }
 0x69d   :  { %7052 = vmatmul.mubr.bf16.gmra.mxu1 %v13010_v34 }
 0x69e   :  { %7116 = vmatpush2.bf16.msra.mxu0 %v13013_v46  ;;  %7059 = vmatprep.mubr.bf16.mxu1 %v13017_v22 }
 0x69f   :  { %7117 = vmatprep.subr.bf16.mxu0 %v13212_v2 }
 0x6a2   :  { %7118 = vmatpush2.bf16.msra.mxu0 %v13014_v13 }
 0x6a3   :  { %7119 = vmatprep.subr.bf16.mxu0 %v13212_v2 }
 0x6a5   :  { %7060 = vmatmul.mubr.bf16.gmra.mxu1 %v13015_v16 }
 0x6a6   :  { %7120 = vmatpush2.bf16.msra.mxu0 %v13018_v45  ;;  %7067 = vmatprep.mubr.bf16.mxu1 %v13022_v57 }
 0x6a7   :  { %7121 = vmatprep.subr.bf16.mxu0 %v13212_v2 }
 0x6aa   :  { %7122 = vmatpush2.bf16.msra.mxu0 %v13019_v27 }
 0x6ab   :  { %12438 = vmatprep.subr.msk.bf16.mxu0 %vm3501_vm7, %v13059_v52 }
 0x6ad   :  { %7068 = vmatmul.mubr.bf16.gmra.mxu1 %v13020_v29  ;;  %7124 = vmatmul.mubr.bf16.vlgmr.msra.gmra.mxu0 %v13023_v49  ;;  %v6493_v29 = vpop.permute.xlu0 %6492 }
 0x6ae   :  { %7075 = vmatprep.mubr.bf16.mxu1 %v13028_v53  ;;  %11135 = vmatprep.mubr.msk.bf16.mxu0 %vm3025_vm4, %v13029_v26 }
 0x6af   :  { %12253 = vmatpush3.bf16.msra.mxu0 %v7670_v41 }
 0x6b0   :  { %12254 = vmatprep.subr.bf16.mxu0 %v13061_v19 }
 0x6b3   :  { %12255 = vmatpush3.bf16.msra.mxu0 %v13061_v19 }
 0x6b4   :  { %12256 = vmatprep.subr.bf16.mxu0 %v13063_v63 }
 0x6b5   :  { %7076 = vmatmul.mubr.bf16.gmra.mxu1 %v13026_v32  ;;  %7132 = vmatmul.mubr.bf16.gmra.mxu0 %v13031_v12  ;;  %v6498_v12 = vpop.permute.xlu1 %6497 }
 0x6b6   :  { %7083 = vmatprep.mubr.bf16.mxu1 %v11101_v62  ;;  %11136 = vmatprep.mubr.msk.bf16.mxu0 %vm3025_vm4, %v13034_v28 }
 0x6b7   :  { %12257 = vmatpush3.bf16.msra.mxu0 %v13063_v63 }
 0x6bd   :  { %7084 = vmatmul.mubr.bf16.gmra.mxu1 %v11100_v4  ;;  %7140 = vmatmul.mubr.bf16.gmra.mxu0 %v13036_v9 }
 0x6be   :  { %11137 = vmatprep.mubr.msk.bf16.mxu0 %vm3025_vm4, %v13037_v44 }
 0x6c5   :  { %7148 = vmatmul.mubr.bf16.gmra.mxu0 %v13039_v39 }
 0x6c6   :  { %11138 = vmatprep.mubr.msk.bf16.mxu0 %vm3025_vm4, %v13040_v33 }
 0x6cd   :  { %7156 = vmatmul.mubr.bf16.gmra.mxu0 %v13042_v56 }
 0x6ce   :  { %11139 = vmatprep.mubr.msk.bf16.mxu0 %vm3025_vm4, %v13043_v17  ;;  %v6503_v17 = vpop.permute.xlu0 %6502 }
 0x6d5   :  { %7164 = vmatmul.mubr.bf16.gmra.mxu0 %v13045_v55 }
 0x6d6   :  { %11140 = vmatprep.mubr.msk.bf16.mxu0 %vm3025_vm4, %v13046_v21 }
 0x6dd   :  { %7172 = vmatmul.mubr.bf16.gmra.mxu0 %v13048_v10 }
 0x6de   :  { %11141 = vmatprep.mubr.msk.bf16.mxu0 %vm3025_vm4, %v13049_v25 }
 0x6e5   :  { %7180 = vmatmul.mubr.bf16.gmra.mxu0 %v13051_v6 }
 0x6e6   :  { %11142 = vmatprep.mubr.msk.bf16.mxu0 %vm3025_vm4, %v13052_v18 }
 0x6ed   :  { %7188 = vmatmul.mubr.bf16.gmra.mxu0 %v13054_v40  ;;  %v6508_v40 = vpop.permute.xlu1 %6507 }
 0x6ee   :  { %11143 = vmatprep.mubr.msk.bf16.mxu0 %vm3025_vm4, %v11103_v47 }
 0x6f5   :  { %7196 = vmatmul.mubr.bf16.gmra.mxu0 %v11102_v15 }
 0x735   :  { %v11943_v31 = vpop.f32.mrf.mxu1 }
 0x737   :  { %v11944_v30 = vpop.f32.mrf.mxu1 }
 0x738   :  { %v11945_v45 = vadd.f32 %v11944_v30, %v11943_v31  ;;  %v6513_v30 = vpop.permute.xlu0 %6512 }
 0x739   :  { %v11946_v0 = vpop.f32.mrf.mxu1 }
 0x73a   :  { %v7014_v26 = vadd.f32 %v11945_v45, %v6493_v29 }
 0x73b   :  { %v11947_v3 = vpop.f32.mrf.mxu1 }
 0x73c   :  { %v11948_v53 = vadd.f32 %v11947_v3, %v11946_v0 }
 0x73d   :  { %v11949_v7 = vpop.f32.mrf.mxu1 }
 0x73e   :  { %v7017_v39 = vadd.f32 %v11948_v53, %v6498_v12 }
 0x73f   :  { %v11950_v54 = vpop.f32.mrf.mxu1 }
 0x740   :  { %v11951_v9 = vadd.f32 %v11950_v54, %v11949_v7 }
 0x741   :  { %v11952_v37 = vpop.f32.mrf.mxu1 }
 0x742   :  { %v7022_v18 = vadd.f32 %v11951_v9, %v6503_v17 }
 0x743   :  { %v11953_v43 = vpop.f32.mrf.mxu1 }
 0x744   :  { %v11954_v1 = vadd.f32 %v11953_v43, %v11952_v37 }
 0x745   :  { %v11955_v14 = vpop.f32.mrf.mxu1 }
 0x746   :  { %v7025_v5 = vadd.f32 %v11954_v1, %v6508_v40 }
 0x747   :  { %v11956_v50 = vpop.f32.mrf.mxu1 }
 0x748   :  { %v11957_v48 = vadd.f32 %v11956_v50, %v11955_v14  ;;  %v6518_v50 = vpop.permute.xlu1 %6517 }
 0x749   :  { %v11958_v42 = vpop.f32.mrf.mxu1 }
 0x74a   :  { %v7030_v45 = vadd.f32 %v11957_v48, %v6513_v30 }
 0x74b   :  { %v11959_v35 = vpop.f32.mrf.mxu1 }
 0x74c   :  { %v11960_v37 = vadd.f32 %v11959_v35, %v11958_v42 }
 0x74d   :  { %v15988_v61 = vpop.f32.mrf.mxu1 }
 0x74e   :  { %v7033_v35 = vadd.f32 %v11960_v37, %v6518_v50 }
 0x74f   :  { %v15990_v20 = vpop.f32.mrf.mxu1 }
 0x751   :  { %v15992_v60 = vpop.f32.mrf.mxu1 }
 0x753   :  { %v15994_v23 = vpop.f32.mrf.mxu1 }
 0x755   :  { %v15996_v38 = vpop.f32.mrf.mxu1 }
 0x757   :  { %v15998_v11 = vpop.f32.mrf.mxu1 }
 0x759   :  { %v16000_v24 = vpop.f32.mrf.mxu1 }
 0x75b   :  { %v16002_v51 = vpop.f32.mrf.mxu1 }
 0x75d   :  { %v16004_v34 = vpop.f32.mrf.mxu1 }
 0x75f   :  { %v16006_v22 = vpop.f32.mrf.mxu1 }
 0x761   :  { %v16008_v46 = vpop.f32.mrf.mxu1 }
 0x763   :  { %v16010_v13 = vpop.f32.mrf.mxu1 }
 0x765   :  { %v16012_v16 = vpop.f32.mrf.mxu1 }
 0x767   :  { %v16014_v57 = vpop.f32.mrf.mxu1 }
 0x769   :  { %v16016_v27 = vpop.f32.mrf.mxu1 }
 0x76b   :  { %v16018_v49 = vpop.f32.mrf.mxu1 }
 0x76d   :  { %v16020_v59 = vpop.f32.mrf.mxu1  ;;  %v7125_v32 = vpop.f32.mrf.mxu0 }
 0x76e   :  { %v7126_v62 = vadd.f32 %v7125_v32, %v7014_v26 }
 0x76f   :  { %v16022_v28 = vpop.f32.mrf.mxu1  ;;  %v7127_v4 = vpop.f32.mrf.mxu0 }
 0x770   :  { %v7203_v44 = vmax.f32 %v7126_v62, 0.0  ;;  %v11963_v4 = vadd.f32 %v15990_v20, %v15988_v61  ;;  %v11966_v61 = vadd.f32 %v15994_v23, %v15992_v60  ;;  %v11969_v60 = vadd.f32 %v15998_v11, %v15996_v38  ;;  %v13075_v38 = vld [vmem:[%s16581_s1 + $0x28] sm:$0xff]  }
 0x771   :  { %v16024_v33 = vpop.f32.mrf.mxu1  ;;  %v7128_v56 = vpop.f32.mrf.mxu0  ;;  %v11972_v11 = vadd.f32 %v16002_v51, %v16000_v24 }
 0x772   :  { %v11680_v55 = vpack.c.bf16 %v7203_v44, %v7203_v44  ;;  %v7129_v21 = vadd.f32 %v7128_v56, %v7017_v39  ;;  %v6523_v39 = vpop.permute.xlu0 %6522 }
 0x773   :  { %v16026_v10 = vpop.f32.mrf.mxu1  ;;  %v7130_v25 = vpop.f32.mrf.mxu0 }
 0x774   :  { %7299 = vst.msk [vmem:[#allocation5] sm:$0xf] %vm5839_vm14, %v11680_v55  ;;  %v7204_v6 = vmax.f32 %v7129_v21, 0.0  ;;  %v7038_v25 = vadd.f32 %v11963_v4, %v6523_v39 }
 0x775   :  { %v16029_v58 = vpop.f32.mrf.mxu1  ;;  %v7133_v8 = vpop.f32.mrf.mxu0 }
 0x776   :  { %v11681_v47 = vpack.c.bf16 %v7204_v6, %v7204_v6  ;;  %v7134_v15 = vadd.f32 %v7133_v8, %v7022_v18  ;;  %v6528_v8 = vpop.permute.xlu1 %6527 }
 0x777   :  { %v16031_v52 = vpop.f32.mrf.mxu1  ;;  %v7135_v41 = vpop.f32.mrf.mxu0  ;;  %v7041_v48 = vadd.f32 %v11966_v61, %v6528_v8  ;;  %v11981_v61 = vadd.f32 %v16014_v57, %v16012_v16  ;;  %v11984_v8 = vadd.f32 %v16018_v49, %v16016_v27 }
 0x778   :  { %7300 = vst.msk [vmem:[#allocation5 + $0x4] sm:$0xf] %vm5839_vm14, %v11681_v47  ;;  %v7205_v19 = vmax.f32 %v7134_v15, 0.0  ;;  %v7902_v15 = vsel %vm3501_vm7, %v15984_v36, 0  ;;  %v13072_v41 = vld [vmem:[%s16581_s1 + $0x30] sm:$0xff]   ;;  %vm9344_vm7 = vcmask 916480  }
 0x779   :  { %v16034_v63 = vpop.f32.mrf.mxu1  ;;  %v7136_v31 = vpop.f32.mrf.mxu0 }
 0x77a   :  { %v11682_v0 = vpack.c.bf16 %v7205_v19, %v7205_v19  ;;  %v7137_v3 = vadd.f32 %v7136_v31, %v7025_v5  ;;  %v6533_v31 = vpop.permute.xlu0 %6532 }
 0x77b   :  { %v16036_v7 = vpop.f32.mrf.mxu1  ;;  %v7138_v54 = vpop.f32.mrf.mxu0 }
 0x77c   :  { %7301 = vst.msk [vmem:[#allocation5 + $0x8] sm:$0xf] %vm5839_vm14, %v11682_v0  ;;  %v7206_v43 = vmax.f32 %v7137_v3, 0.0  ;;  %v7046_v3 = vadd.f32 %v11969_v60, %v6533_v31 }
 0x77d   :  { %v16039_v29 = vpop.f32.mrf.mxu1  ;;  %v7141_v14 = vpop.f32.mrf.mxu0 }
 0x77e   :  { %v11683_v53 = vpack.c.bf16 %v7206_v43, %v7206_v43  ;;  %v7142_v26 = vadd.f32 %v7141_v14, %v7030_v45  ;;  %v6538_v45 = vpop.permute.xlu1 %6537 }
 0x77f   :  { %v16041_v32 = vpop.f32.mrf.mxu1  ;;  %v7143_v12 = vpop.f32.mrf.mxu0  ;;  %v16043_v62 = vld [vmem:[#allocation5] sm:$0xff]   ;;  %v7049_v24 = vadd.f32 %v11972_v11, %v6538_v45  ;;  %v11990_v11 = vadd.f32 %v16026_v10, %v16024_v33 }
 0x780   :  { %7302 = vst.msk [vmem:[#allocation5 + $0xc] sm:$0xf] %vm5839_vm14, %v11683_v53  ;;  %v7207_v42 = vmax.f32 %v7142_v26, 0.0  ;;  %12232 = vmatprep.mubr.msk.bf16.mxu1 %vm7405_vm2, %v16043_v62  ;;  %12258 = vmatprep.mubr.msk.bf16.mxu0 %vm7405_vm2, %v16043_v62  ;;  %v11975_v53 = vadd.f32 %v16006_v22, %v16004_v34  ;;  %v11978_v34 = vadd.f32 %v16010_v13, %v16008_v46 }
 0x781   :  { %v7144_v9 = vpop.f32.mrf.mxu0  ;;  %v12000_v44 = vpop.f32.mrf.mxu1 }
 0x782   :  { %v11684_v56 = vpack.c.bf16 %v7207_v42, %v7207_v42  ;;  %v7145_v17 = vadd.f32 %v7144_v9, %v7033_v35  ;;  %v6543_v42 = vpop.permute.xlu0 %6542 }
 0x783   :  { %v7146_v55 = vpop.f32.mrf.mxu0  ;;  %v12001_v21 = vpop.f32.mrf.mxu1  ;;  %v7054_v9 = vadd.f32 %v11975_v53, %v6543_v42 }
 0x784   :  { %7303 = vst.msk [vmem:[#allocation5 + $0x10] sm:$0xf] %vm5839_vm14, %v11684_v56  ;;  %v7208_v20 = vmax.f32 %v7145_v17, 0.0  ;;  %v6548_v17 = vpop.permute.xlu1 %6547 }
 0x785   :  { %v7149_v1 = vpop.f32.mrf.mxu0 }
 0x786   :  { %v11685_v6 = vpack.c.bf16 %v7208_v20, %v7208_v20  ;;  %v7150_v18 = vadd.f32 %v7149_v1, %v7038_v25  ;;  %v7057_v25 = vadd.f32 %v11978_v34, %v6548_v17 }
 0x787   :  { %v7151_v40 = vpop.f32.mrf.mxu0  ;;  %v16055_v47 = vld [vmem:[#allocation5 + $0x8] sm:$0xff]  }
 0x788   :  { %7304 = vst.msk [vmem:[#allocation5 + $0x14] sm:$0xf] %vm5839_vm14, %v11685_v6  ;;  %v7209_v23 = vmax.f32 %v7150_v18, 0.0  ;;  %12233 = vmatmul.mubr.msk.bf16.vlgmr.msra.gmra.mxu1 %vm7405_vm2, %v16055_v47  ;;  %12259 = vmatmul.mubr.msk.bf16.vlgmr.msra.gmra.mxu0 %vm7405_vm2, %v16055_v47  ;;  %v6553_v6 = vpop.permute.xlu0 %6552  ;;  %v6558_v60 = vpop.permute.xlu1 %6557 }
 0x789   :  { %v7152_v19 = vpop.f32.mrf.mxu0  ;;  %12279 = vmatpush3.bf16.msra.mxu1 %v7902_v15  ;;  %v7062_v57 = vadd.f32 %v11981_v61, %v6553_v6 }
 0x78a   :  { %v11686_v5 = vpack.c.bf16 %v7209_v23, %v7209_v23  ;;  %v7153_v36 = vadd.f32 %v7152_v19, %v7041_v48  ;;  %12280 = vmatprep.subr.bf16.mxu1 %v13072_v41  ;;  %v11987_v19 = vadd.f32 %v16022_v28, %v16020_v59 }
 0x78b   :  { %v7154_v30 = vpop.f32.mrf.mxu0 }
 0x78c   :  { %7305 = vst.msk [vmem:[#allocation5 + $0x18] sm:$0xf] %vm5839_vm14, %v11686_v5  ;;  %v7210_v0 = vmax.f32 %v7153_v36, 0.0  ;;  %v7065_v36 = vadd.f32 %v11984_v8, %v6558_v60  ;;  %v6563_v30 = vpop.permute.xlu0 %6562 }
 0x78d   :  { %v7157_v54 = vpop.f32.mrf.mxu0  ;;  %12281 = vmatpush3.bf16.msra.mxu1 %v13072_v41  ;;  %v7070_v28 = vadd.f32 %v11987_v19, %v6563_v30 }
 0x78e   :  { %v11687_v37 = vpack.c.bf16 %v7210_v0, %v7210_v0  ;;  %v7158_v43 = vadd.f32 %v7157_v54, %v7046_v3  ;;  %12282 = vmatprep.subr.bf16.mxu1 %v13075_v38 }
 0x78f   :  { %v7159_v14 = vpop.f32.mrf.mxu0  ;;  %v16075_v50 = vld [vmem:[#allocation5 + $0x10] sm:$0xff]  }
 0x790   :  { %7306 = vst.msk [vmem:[#allocation5 + $0x1c] sm:$0xf] %vm5839_vm14, %v11687_v37  ;;  %v7211_v26 = vmax.f32 %v7158_v43, 0.0  ;;  %12236 = vmatprep.mubr.msk.bf16.mxu1 %vm7405_vm2, %v16075_v50  ;;  %12262 = vmatprep.mubr.msk.bf16.mxu0 %vm7405_vm2, %v16075_v50  ;;  %v6568_v37 = vpop.permute.xlu1 %6567  ;;  %v11993_v14 = vadd.f32 %v16031_v52, %v16029_v58 }
 0x791   :  { %v7160_v51 = vpop.f32.mrf.mxu0  ;;  %12283 = vmatpush3.bf16.msra.mxu1 %v13075_v38 }
 0x792   :  { %v11688_v12 = vpack.c.bf16 %v7211_v26, %v7211_v26  ;;  %v7161_v4 = vadd.f32 %v7160_v51, %v7049_v24  ;;  %8600 = vmatprep.subr.bf16.mxu1 %v13212_v2  ;;  %v7073_v26 = vadd.f32 %v11990_v11, %v6568_v37  ;;  %v6573_v51 = vpop.permute.xlu0 %6572 }
 0x793   :  { %v7162_v35 = vpop.f32.mrf.mxu0  ;;  %v7078_v58 = vadd.f32 %v11993_v14, %v6573_v51 }
 0x794   :  { %7307 = vst.msk [vmem:[#allocation5 + $0x20] sm:$0xf] %vm5839_vm14, %v11688_v12  ;;  %v7212_v22 = vmax.f32 %v7161_v4, 0.0  ;;  %v11996_v4 = vadd.f32 %v16036_v7, %v16034_v63 }
 0x795   :  { %v7165_v44 = vpop.f32.mrf.mxu0 }
 0x796   :  { %v11689_v39 = vpack.c.bf16 %v7212_v22, %v7212_v22  ;;  %v7166_v56 = vadd.f32 %v7165_v44, %v7054_v9  ;;  %v6578_v22 = vpop.permute.xlu1 %6577  ;;  %v6583_v61 = vpop.permute.xlu0 %6582 }
 0x797   :  { %v7167_v55 = vpop.f32.mrf.mxu0  ;;  %v16088_v21 = vld [vmem:[#allocation5 + $0x18] sm:$0xff]   ;;  %v7081_v17 = vadd.f32 %v11996_v4, %v6578_v22 }
 0x798   :  { %7308 = vst.msk [vmem:[#allocation5 + $0x24] sm:$0xf] %vm5839_vm14, %v11689_v39  ;;  %v7213_v20 = vmax.f32 %v7166_v56, 0.0  ;;  %12237 = vmatmul.mubr.msk.bf16.gmra.mxu1 %vm7405_vm2, %v16088_v21  ;;  %12263 = vmatmul.mubr.msk.bf16.gmra.mxu0 %vm7405_vm2, %v16088_v21  ;;  %v11999_v39 = vadd.f32 %v16041_v32, %v16039_v29 }
 0x799   :  { %v7168_v1 = vpop.f32.mrf.mxu0 }
 0x79a   :  { %v11690_v46 = vpack.c.bf16 %v7213_v20, %v7213_v20  ;;  %v7169_v13 = vadd.f32 %v7168_v1, %v7057_v25  ;;  %v7086_v1 = vadd.f32 %v11999_v39, %v6583_v61 }
 0x79b   :  { %v7170_v18 = vpop.f32.mrf.mxu0 }
 0x79c   :  { %7309 = vst.msk [vmem:[#allocation5 + $0x28] sm:$0xf] %vm5839_vm14, %v11690_v46  ;;  %v7214_v16 = vmax.f32 %v7169_v13, 0.0 }
 0x79d   :  { %v7173_v40 = vpop.f32.mrf.mxu0 }
 0x79e   :  { %v11691_v15 = vpack.c.bf16 %v7214_v16, %v7214_v16  ;;  %v7174_v41 = vadd.f32 %v7173_v40, %v7062_v57 }
 0x79f   :  { %v7175_v23 = vpop.f32.mrf.mxu0  ;;  %v16100_v48 = vld [vmem:[#allocation5 + $0x20] sm:$0xff]  }
 0x7a0   :  { %7310 = vst.msk [vmem:[#allocation5 + $0x2c] sm:$0xf] %vm5839_vm14, %v11691_v15  ;;  %v7215_v5 = vmax.f32 %v7174_v41, 0.0  ;;  %12240 = vmatprep.mubr.msk.bf16.mxu1 %vm7405_vm2, %v16100_v48  ;;  %12266 = vmatprep.mubr.msk.bf16.mxu0 %vm7405_vm2, %v16100_v48 }
 0x7a1   :  { %v7176_v31 = vpop.f32.mrf.mxu0 }
 0x7a2   :  { %v11692_v27 = vpack.c.bf16 %v7215_v5, %v7215_v5  ;;  %v7177_v49 = vadd.f32 %v7176_v31, %v7065_v36 }
 0x7a3   :  { %v7178_v38 = vpop.f32.mrf.mxu0 }
 0x7a4   :  { %7311 = vst.msk [vmem:[#allocation5 + $0x30] sm:$0xf] %vm5839_vm14, %v11692_v27  ;;  %v7216_v59 = vmax.f32 %v7177_v49, 0.0 }
 0x7a5   :  { %v7181_v0 = vpop.f32.mrf.mxu0 }
 0x7a6   :  { %v11693_v3 = vpack.c.bf16 %v7216_v59, %v7216_v59  ;;  %v7182_v54 = vadd.f32 %v7181_v0, %v7070_v28 }
 0x7a7   :  { %v7183_v43 = vpop.f32.mrf.mxu0  ;;  %v13068_v45 = vld [vmem:[#allocation5 + $0x28] sm:$0xff]  }
 0x7a8   :  { %7312 = vst.msk [vmem:[#allocation5 + $0x34] sm:$0xf] %vm5839_vm14, %v11693_v3  ;;  %v7217_v53 = vmax.f32 %v7182_v54, 0.0  ;;  %12241 = vmatmul.mubr.msk.bf16.gmra.mxu1 %vm7405_vm2, %v13068_v45  ;;  %12267 = vmatmul.mubr.msk.bf16.gmra.mxu0 %vm7405_vm2, %v13068_v45  ;;  %v13122_v54 = vld [vmem:[%s16582_s30 + $0xc] ss:$16 sps:$4 sm:$0xff]  }
 0x7a9   :  { %v7184_v24 = vpop.f32.mrf.mxu0 }
 0x7aa   :  { %v11694_v33 = vpack.c.bf16 %v7217_v53, %v7217_v53  ;;  %v7185_v10 = vadd.f32 %v7184_v24, %v7073_v26 }
 0x7ab   :  { %v7186_v12 = vpop.f32.mrf.mxu0 }
 0x7ac   :  { %7313 = vst.msk [vmem:[#allocation5 + $0x38] sm:$0xf] %vm5839_vm14, %v11694_v33  ;;  %v7218_v42 = vmax.f32 %v7185_v10, 0.0 }
 0x7ad   :  { %v7189_v52 = vpop.f32.mrf.mxu0 }
 0x7ae   :  { %v11695_v35 = vpack.c.bf16 %v7218_v42, %v7218_v42  ;;  %v7190_v34 = vadd.f32 %v7189_v52, %v7078_v58 }
 0x7af   :  { %v7191_v9 = vpop.f32.mrf.mxu0  ;;  %v13070_v44 = vld [vmem:[#allocation5 + $0x30] sm:$0xff]  }
 0x7b0   :  { %7314 = vst.msk [vmem:[#allocation5 + $0x3c] sm:$0xf] %vm5839_vm14, %v11695_v35  ;;  %v7219_v56 = vmax.f32 %v7190_v34, 0.0  ;;  %12244 = vmatprep.mubr.msk.bf16.mxu1 %vm7405_vm2, %v13070_v44  ;;  %12270 = vmatprep.mubr.msk.bf16.mxu0 %vm7405_vm2, %v13070_v44 }
 0x7b1   :  { %v7192_v55 = vpop.f32.mrf.mxu0 }
 0x7b2   :  { %v11696_v63 = vpack.c.bf16 %v7219_v56, %v7219_v56  ;;  %v7193_v7 = vadd.f32 %v7192_v55, %v7081_v17 }
 0x7b3   :  { %v7194_v20 = vpop.f32.mrf.mxu0 }
 0x7b4   :  { %7315 = vst.msk [vmem:[#allocation5 + $0x40] sm:$0xf] %vm5839_vm14, %v11696_v63  ;;  %v7220_v25 = vmax.f32 %v7193_v7, 0.0 }
 0x7b5   :  { %v7197_v46 = vpop.f32.mrf.mxu0 }
 0x7b6   :  { %v11697_v13 = vpack.c.bf16 %v7220_v25, %v7220_v25  ;;  %v7198_v29 = vadd.f32 %v7197_v46, %v7086_v1 }
 0x7b7   :  { %v7199_v32 = vpop.f32.mrf.mxu0  ;;  %v13071_v6 = vld [vmem:[#allocation5 + $0x38] sm:$0xff]  }
 0x7b8   :  { %7316 = vst.msk [vmem:[#allocation5 + $0x44] sm:$0xf] %vm5839_vm14, %v11697_v13  ;;  %v7221_v18 = vmax.f32 %v7198_v29, 0.0  ;;  %12245 = vmatmul.mubr.msk.bf16.gmra.mxu1 %vm7405_vm2, %v13071_v6  ;;  %12271 = vmatmul.mubr.msk.bf16.gmra.mxu0 %vm7405_vm2, %v13071_v6 }
 0x7b9   :  { %v7200_v8 = vpop.f32.mrf.mxu0 }
 0x7ba   :  { %v11698_v16 = vpack.c.bf16 %v7221_v18, %v7221_v18 }
 0x7bb   :  { %v7201_v57 = vpop.f32.mrf.mxu0 }
 0x7bc   :  { %7317 = vst.msk [vmem:[#allocation5 + $0x48] sm:$0xf] %vm5839_vm14, %v11698_v16 }
 0x7bf   :  { %v13073_v40 = vld [vmem:[#allocation5 + $0x40] sm:$0xff]  }
 0x7c0   :  { %12248 = vmatprep.mubr.msk.bf16.mxu1 %vm7405_vm2, %v13073_v40  ;;  %12274 = vmatprep.mubr.msk.bf16.mxu0 %vm7405_vm2, %v13073_v40 }
 0x7c3   :  { %v13074_v15 = vld [vmem:[#allocation5 + $0x48] ss:$0 sps:$4 sm:$0xff]  }
 0x7c4   :  { %12249 = vmatmul.mubr.msk.bf16.gmra.mxu1 %vm7405_vm2, %v13074_v15  ;;  %12275 = vmatmul.mubr.msk.bf16.gmra.mxu0 %vm7405_vm2, %v13074_v15 }
 0x7c5   :  { %12284 = vmatprep.mubr.msk.bf16.mxu1 %vm7405_vm2, %v16043_v62  ;;  %v13095_v62 = vld [vmem:[%s16582_s30 + $0x4] ss:$16 sps:$4 sm:$0xff]  }
 0x7c6   :  { %8560 = vmatprep.mubr.bf16.mxu0 %v13095_v62 }
 0x7cc   :  { %12285 = vmatmul.mubr.msk.bf16.vlgmr.msra.gmra.mxu1 %vm7405_vm2, %v16055_v47 }
 0x7cd   :  { %12288 = vmatprep.mubr.msk.bf16.mxu1 %vm7405_vm2, %v16075_v50 }
 0x7d4   :  { %12289 = vmatmul.mubr.msk.bf16.gmra.mxu1 %vm7405_vm2, %v16088_v21 }
 0x7d5   :  { %12292 = vmatprep.mubr.msk.bf16.mxu1 %vm7405_vm2, %v16100_v48 }
 0x7dc   :  { %12293 = vmatmul.mubr.msk.bf16.gmra.mxu1 %vm7405_vm2, %v13068_v45 }
 0x7dd   :  { %12296 = vmatprep.mubr.msk.bf16.mxu1 %vm7405_vm2, %v13070_v44 }
 0x7e4   :  { %12297 = vmatmul.mubr.msk.bf16.gmra.mxu1 %vm7405_vm2, %v13071_v6 }
 0x7e5   :  { %12300 = vmatprep.mubr.msk.bf16.mxu1 %vm7405_vm2, %v13073_v40 }
 0x7ec   :  { %12301 = vmatmul.mubr.msk.bf16.gmra.mxu1 %vm7405_vm2, %v13074_v15 }
 0x7ed   :  { %11329 = vmatprep.mubr.msk.bf16.mxu1 %vm3025_vm4, %v13122_v54 }
 0x848   :  { %v12234_v47 = vpop.f32.mrf.mxu1  ;;  %v12260_v50 = vpop.f32.mrf.mxu0 }
 0x849   :  { %v11701_v21 = vpack.c.bf16 %v12234_v47, %v12234_v47  ;;  %v11720_v41 = vpack.c.bf16 %v12260_v50, %v12260_v50 }
 0x84a   :  { %v7473_v60 = vpop.f32.mrf.mxu1  ;;  %v7706_v23 = vpop.f32.mrf.mxu0 }
 0x84b   :  { %7631 = vst.msk [vmem:[#allocation2 + $0x10] sm:$0xf] %vm7628_vm3, %v11701_v21  ;;  %7863 = vst.msk [vmem:[#allocation2 + $0xb0] sm:$0xf] %vm7628_vm3, %v11720_v41  ;;  %v11699_v48 = vpack.c.bf16 %v7473_v60, %v7473_v60  ;;  %v11718_v19 = vpack.c.bf16 %v7706_v23, %v7706_v23 }
 0x84c   :  { %v12235_v5 = vpop.f32.mrf.mxu1  ;;  %v12261_v36 = vpop.f32.mrf.mxu0 }
 0x84d   :  { %7629 = vst.msk [vmem:[#allocation2] sm:$0xf] %vm7628_vm3, %v11699_v48  ;;  %7861 = vst.msk [vmem:[#allocation2 + $0xa0] sm:$0xf] %vm7628_vm3, %v11718_v19  ;;  %v11702_v31 = vpack.c.bf16 %v12235_v5, %v12235_v5  ;;  %v11721_v27 = vpack.c.bf16 %v12261_v36, %v12261_v36 }
 0x84e   :  { %v7476_v49 = vpop.f32.mrf.mxu1  ;;  %v7709_v30 = vpop.f32.mrf.mxu0 }
 0x84f   :  { %7632 = vst.msk [vmem:[#allocation2 + $0x18] sm:$0xf] %vm7628_vm3, %v11702_v31  ;;  %7864 = vst.msk [vmem:[#allocation2 + $0xb8] sm:$0xf] %vm7628_vm3, %v11721_v27  ;;  %v11700_v38 = vpack.c.bf16 %v7476_v49, %v7476_v49  ;;  %v11719_v11 = vpack.c.bf16 %v7709_v30, %v7709_v30 }
 0x851   :  { %7630 = vst.msk [vmem:[#allocation2 + $0x8] sm:$0xf] %vm7628_vm3, %v11700_v38  ;;  %7862 = vst.msk [vmem:[#allocation2 + $0xa8] sm:$0xf] %vm7628_vm3, %v11719_v11 }
 0x858   :  { %v12238_v59 = vpop.f32.mrf.mxu1  ;;  %v12264_v28 = vpop.f32.mrf.mxu0 }
 0x859   :  { %v11705_v0 = vpack.c.bf16 %v12238_v59, %v12238_v59  ;;  %v11724_v3 = vpack.c.bf16 %v12264_v28, %v12264_v28 }
 0x85a   :  { %v7489_v37 = vpop.f32.mrf.mxu1  ;;  %v7722_v43 = vpop.f32.mrf.mxu0 }
 0x85b   :  { %7635 = vst.msk [vmem:[#allocation2 + $0x30] sm:$0xf] %vm7628_vm3, %v11705_v0  ;;  %7867 = vst.msk [vmem:[#allocation2 + $0xd0] sm:$0xf] %vm7628_vm3, %v11724_v3  ;;  %v11703_v45 = vpack.c.bf16 %v7489_v37, %v7489_v37  ;;  %v11722_v14 = vpack.c.bf16 %v7722_v43, %v7722_v43 }
 0x85c   :  { %v12239_v53 = vpop.f32.mrf.mxu1  ;;  %v12265_v26 = vpop.f32.mrf.mxu0 }
 0x85d   :  { %7633 = vst.msk [vmem:[#allocation2 + $0x20] sm:$0xf] %vm7628_vm3, %v11703_v45  ;;  %7865 = vst.msk [vmem:[#allocation2 + $0xc0] sm:$0xf] %vm7628_vm3, %v11722_v14  ;;  %v11706_v24 = vpack.c.bf16 %v12239_v53, %v12239_v53  ;;  %v11725_v33 = vpack.c.bf16 %v12265_v26, %v12265_v26 }
 0x85e   :  { %v7492_v10 = vpop.f32.mrf.mxu1  ;;  %v7725_v51 = vpop.f32.mrf.mxu0 }
 0x85f   :  { %7636 = vst.msk [vmem:[#allocation2 + $0x38] sm:$0xf] %vm7628_vm3, %v11706_v24  ;;  %7868 = vst.msk [vmem:[#allocation2 + $0xd8] sm:$0xf] %vm7628_vm3, %v11725_v33  ;;  %v11704_v12 = vpack.c.bf16 %v7492_v10, %v7492_v10  ;;  %v11723_v4 = vpack.c.bf16 %v7725_v51, %v7725_v51 }
 0x861   :  { %7634 = vst.msk [vmem:[#allocation2 + $0x28] sm:$0xf] %vm7628_vm3, %v11704_v12  ;;  %7866 = vst.msk [vmem:[#allocation2 + $0xc8] sm:$0xf] %vm7628_vm3, %v11723_v4  ;;  %v13084_v4 = vld [vmem:[#allocation2 + $0xb0] ss:$8 sps:$4 sm:$0xff]  }
 0x866   :  { %v13080_v54 = vld [vmem:[#allocation2 + $0xd0] ss:$8 sps:$4 sm:$0xff]  }
 0x868   :  { %v12242_v42 = vpop.f32.mrf.mxu1  ;;  %v12268_v58 = vpop.f32.mrf.mxu0  ;;  %v13082_v26 = vld [vmem:[#allocation2 + $0xc0] ss:$8 sps:$4 sm:$0xff]  }
 0x869   :  { %v11709_v52 = vpack.c.bf16 %v12242_v42, %v12242_v42  ;;  %v11728_v35 = vpack.c.bf16 %v12268_v58, %v12268_v58 }
 0x86a   :  { %v7505_v34 = vpop.f32.mrf.mxu1  ;;  %v7738_v22 = vpop.f32.mrf.mxu0 }
 0x86b   :  { %7639 = vst.msk [vmem:[#allocation2 + $0x50] sm:$0xf] %vm7628_vm3, %v11709_v52  ;;  %7871 = vst.msk [vmem:[#allocation2 + $0xf0] sm:$0xf] %vm7628_vm3, %v11728_v35  ;;  %v11707_v9 = vpack.c.bf16 %v7505_v34, %v7505_v34  ;;  %v11726_v44 = vpack.c.bf16 %v7738_v22, %v7738_v22  ;;  %v13085_v35 = vld [vmem:[#allocation2 + $0x30] ss:$8 sps:$4 sm:$0xff]  }
 0x86c   :  { %v12243_v39 = vpop.f32.mrf.mxu1  ;;  %v12269_v56 = vpop.f32.mrf.mxu0  ;;  %v13086_v22 = vld [vmem:[#allocation2 + $0xa0] ss:$8 sps:$4 sm:$0xff]  }
 0x86d   :  { %7637 = vst.msk [vmem:[#allocation2 + $0x40] sm:$0xf] %vm7628_vm3, %v11707_v9  ;;  %7869 = vst.msk [vmem:[#allocation2 + $0xe0] sm:$0xf] %vm7628_vm3, %v11726_v44  ;;  %v11710_v17 = vpack.c.bf16 %v12243_v39, %v12243_v39  ;;  %v11729_v55 = vpack.c.bf16 %v12269_v56, %v12269_v56  ;;  %v13087_v56 = vld [vmem:[#allocation2 + $0x20] ss:$8 sps:$4 sm:$0xff]  }
 0x86e   :  { %v7508_v63 = vpop.f32.mrf.mxu1  ;;  %v7741_v7 = vpop.f32.mrf.mxu0 }
 0x86f   :  { %7640 = vst.msk [vmem:[#allocation2 + $0x58] sm:$0xf] %vm7628_vm3, %v11710_v17  ;;  %7872 = vst.msk [vmem:[#allocation2 + $0xf8] sm:$0xf] %vm7628_vm3, %v11729_v55  ;;  %v11708_v61 = vpack.c.bf16 %v7508_v63, %v7508_v63  ;;  %v11727_v20 = vpack.c.bf16 %v7741_v7, %v7741_v7 }
 0x871   :  { %7638 = vst.msk [vmem:[#allocation2 + $0x48] sm:$0xf] %vm7628_vm3, %v11708_v61  ;;  %7870 = vst.msk [vmem:[#allocation2 + $0xe8] sm:$0xf] %vm7628_vm3, %v11727_v20  ;;  %v13089_v20 = vld [vmem:[#allocation2 + $0x10] ss:$8 sps:$4 sm:$0xff]  }
 0x876   :  { %v13076_v25 = vld [vmem:[#allocation2 + $0xf0] ss:$8 sps:$4 sm:$0xff]  }
 0x877   :  { %12042 = vmatprep.subr.bf16.mxu0 %v13076_v25  ;;  %v13081_v14 = vld [vmem:[#allocation2 + $0x50] ss:$8 sps:$4 sm:$0xff]  }
 0x878   :  { %v12246_v1 = vpop.f32.mrf.mxu1  ;;  %v12272_v46 = vpop.f32.mrf.mxu0  ;;  %v13078_v49 = vld [vmem:[#allocation2 + $0xe0] ss:$8 sps:$4 sm:$0xff]  }
 0x879   :  { %v11713_v13 = vpack.c.bf16 %v12246_v1, %v12246_v1  ;;  %v11732_v29 = vpack.c.bf16 %v12272_v46, %v12272_v46  ;;  %v13083_v51 = vld [vmem:[#allocation2 + $0x40] ss:$8 sps:$4 sm:$0xff]  }
 0x87a   :  { %v7521_v32 = vpop.f32.mrf.mxu1  ;;  %v7754_v6 = vpop.f32.mrf.mxu0 }
 0x87b   :  { %7643 = vst.msk [vmem:[#allocation2 + $0x70] sm:$0xf] %vm7628_vm3, %v11713_v13  ;;  %7875 = vst.msk [vmem:[#allocation2 + $0x110] sm:$0xf] %vm7628_vm3, %v11732_v29  ;;  %v11711_v18 = vpack.c.bf16 %v7521_v32, %v7521_v32  ;;  %v11730_v8 = vpack.c.bf16 %v7754_v6, %v7754_v6  ;;  %v13091_v32 = vld [vmem:[#allocation2] ss:$8 sps:$4 sm:$0xff]  }
 0x87c   :  { %v12247_v16 = vpop.f32.mrf.mxu1  ;;  %v12273_v57 = vpop.f32.mrf.mxu0 }
 0x87d   :  { %7641 = vst.msk [vmem:[#allocation2 + $0x60] sm:$0xf] %vm7628_vm3, %v11711_v18  ;;  %7873 = vst.msk [vmem:[#allocation2 + $0x100] sm:$0xf] %vm7628_vm3, %v11730_v8  ;;  %v11714_v40 = vpack.c.bf16 %v12247_v16, %v12247_v16  ;;  %v11733_v15 = vpack.c.bf16 %v12273_v57, %v12273_v57  ;;  %v13093_v8 = vld [vmem:[%s16582_s30] ss:$16 sps:$4 sm:$0xff]  }
 0x87e   :  { %v7524_v62 = vpop.f32.mrf.mxu1  ;;  %v7757_v47 = vpop.f32.mrf.mxu0  ;;  %v13100_v57 = vld [vmem:[%s16582_s30 + $0x24] ss:$16 sps:$4 sm:$0xff]  }
 0x87f   :  { %7644 = vst.msk [vmem:[#allocation2 + $0x78] sm:$0xf] %vm7628_vm3, %v11714_v40  ;;  %7876 = vst.msk [vmem:[#allocation2 + $0x118] sm:$0xf] %vm7628_vm3, %v11733_v15  ;;  %v11712_v50 = vpack.c.bf16 %v7524_v62, %v7524_v62  ;;  %v11731_v21 = vpack.c.bf16 %v7757_v47, %v7757_v47 }
 0x881   :  { %7642 = vst.msk [vmem:[#allocation2 + $0x68] sm:$0xf] %vm7628_vm3, %v11712_v50  ;;  %7874 = vst.msk [vmem:[#allocation2 + $0x108] sm:$0xf] %vm7628_vm3, %v11731_v21 }
 0x884   :  { %v12250_v41 = vpop.f32.mrf.mxu1  ;;  %v12276_v60 = vpop.f32.mrf.mxu0 }
 0x885   :  { %v11717_v23 = vpack.c.bf16 %v12250_v41, %v12250_v41  ;;  %v11736_v48 = vpack.c.bf16 %v12276_v60, %v12276_v60 }
 0x886   :  { %v7537_v19 = vpop.f32.mrf.mxu1  ;;  %v7770_v5 = vpop.f32.mrf.mxu0  ;;  %v13077_v36 = vld [vmem:[#allocation2 + $0x70] ss:$8 sps:$4 sm:$0xff]  }
 0x887   :  { %7647 = vst.msk [vmem:[#allocation2 + $0x90] sm:$0xf] %vm7628_vm3, %v11717_v23  ;;  %7879 = vst.msk [vmem:[#allocation2 + $0x130] sm:$0xf] %vm7628_vm3, %v11736_v48  ;;  %v11715_v31 = vpack.c.bf16 %v7537_v19, %v7537_v19  ;;  %v11734_v27 = vpack.c.bf16 %v7770_v5, %v7770_v5  ;;  %12043 = vmatpush3.bf16.msra.mxu0 %v13077_v36  ;;  %v13098_v48 = vld [vmem:[%s16582_s30 + $0x20] ss:$16 sps:$4 sm:$0xff]  }
 0x888   :  { %v12251_v30 = vpop.f32.mrf.mxu1  ;;  %v12277_v38 = vpop.f32.mrf.mxu0  ;;  %12044 = vmatprep.subr.bf16.mxu0 %v13078_v49  ;;  %v13079_v28 = vld [vmem:[#allocation2 + $0x60] ss:$8 sps:$4 sm:$0xff]   ;;  %v13105_v5 = vld [vmem:[%s16582_s30 + $0x44] ss:$16 sps:$4 sm:$0xff]  }
 0x889   :  { %7645 = vst.msk [vmem:[#allocation2 + $0x80] sm:$0xf] %vm7628_vm3, %v11715_v31  ;;  %7877 = vst.msk [vmem:[#allocation2 + $0x120] sm:$0xf] %vm7628_vm3, %v11734_v27 }
 0x88a   :  { %v7540_v11 = vpop.f32.mrf.mxu1  ;;  %v7773_v59 = vpop.f32.mrf.mxu0 }
 0x88b   :  { %v11716_v0 = vpack.c.bf16 %v7540_v11, %v7540_v11  ;;  %v11735_v3 = vpack.c.bf16 %v7773_v59, %v7773_v59  ;;  %12045 = vmatpush3.bf16.msra.mxu0 %v13079_v28  ;;  %v13103_v28 = vld [vmem:[%s16582_s30 + $0x40] ss:$16 sps:$4 sm:$0xff]  }
 0x88c   :  { %v12286_v37 = vpop.f32.mrf.mxu1  ;;  %12046 = vmatprep.subr.bf16.mxu0 %v13080_v54  ;;  %v8188_v54 = vld [vmem:[%s16582_s30 + $0x80] sm:$0xff] }
 0x88d   :  { %7646 = vst.msk [vmem:[#allocation2 + $0x88] sm:$0xf] %vm7628_vm3, %v11716_v0  ;;  %7878 = vst.msk [vmem:[#allocation2 + $0x128] sm:$0xf] %vm7628_vm3, %v11735_v3  ;;  %v11739_v43 = vpack.c.bf16 %v12286_v37, %v12286_v37  ;;  %v13110_v0 = vld [vmem:[%s16582_s30 + $0x64] ss:$16 sps:$4 sm:$0xff]  }
 0x88e   :  { %v7938_v45 = vpop.f32.mrf.mxu1  ;;  %v13088_v55 = vld [vmem:[#allocation2 + $0x90] ss:$8 sps:$4 sm:$0xff]  }
 0x88f   :  { %8095 = vst.msk [vmem:[#allocation2 + $0x150] sm:$0xf] %vm7628_vm3, %v11739_v43  ;;  %v11737_v53 = vpack.c.bf16 %v7938_v45, %v7938_v45  ;;  %12047 = vmatpush3.bf16.msra.mxu0 %v13081_v14  ;;  %v13102_v11 = vld [vmem:[#allocation2 + $0x130] ss:$8 sps:$4 sm:$0xff]   ;;  %v11296_v45 = vcombine.high %v8188_v54, %v8188_v54  ;;  %v13111_v14 = vld [vmem:[#allocation2 + $0x100] ss:$8 sps:$4 sm:$0xff]  }
 0x890   :  { %v12287_v24 = vpop.f32.mrf.mxu1  ;;  %12048 = vmatprep.subr.bf16.mxu0 %v13082_v26  ;;  %v13107_v37 = vld [vmem:[#allocation2 + $0x110] ss:$8 sps:$4 sm:$0xff]   ;;  %v11295_v26 = vcombine.low %v8188_v54, %v8188_v54 }
 0x891   :  { %8093 = vst.msk [vmem:[#allocation2 + $0x140] sm:$0xf] %vm7628_vm3, %v11737_v53  ;;  %v11740_v33 = vpack.c.bf16 %v12287_v24, %v12287_v24  ;;  %v13108_v43 = vld [vmem:[%s16582_s30 + $0x60] ss:$16 sps:$4 sm:$0xff]  }
 0x892   :  { %v7941_v10 = vpop.f32.mrf.mxu1 }
 0x893   :  { %8096 = vst.msk [vmem:[#allocation2 + $0x158] sm:$0xf] %vm7628_vm3, %v11740_v33  ;;  %v11738_v12 = vpack.c.bf16 %v7941_v10, %v7941_v10  ;;  %12049 = vmatpush3.bf16.msra.mxu0 %v13083_v51 }
 0x894   :  { %v12290_v42 = vpop.f32.mrf.mxu1  ;;  %12050 = vmatprep.subr.bf16.mxu0 %v13084_v4  ;;  %v13090_v1 = vld [vmem:[#allocation2 + $0x80] ss:$8 sps:$4 sm:$0xff]  }
 0x895   :  { %8094 = vst.msk [vmem:[#allocation2 + $0x148] sm:$0xf] %vm7628_vm3, %v11738_v12  ;;  %v11743_v58 = vpack.c.bf16 %v12290_v42, %v12290_v42  ;;  %v13106_v3 = vld [vmem:[#allocation2 + $0x120] ss:$8 sps:$4 sm:$0xff]   ;;  %v13123_v42 = vld [vmem:[%s16582_s30 + $0x2c] ss:$16 sps:$4 sm:$0xff]  }
 0x896   :  { %v7954_v52 = vpop.f32.mrf.mxu1  ;;  %v13120_v4 = vld [vmem:[%s16582_s30 + $0x8] ss:$16 sps:$4 sm:$0xff]  }
 0x897   :  { %8099 = vst.msk [vmem:[#allocation2 + $0x170] sm:$0xf] %vm7628_vm3, %v11743_v58  ;;  %v11741_v34 = vpack.c.bf16 %v7954_v52, %v7954_v52  ;;  %12051 = vmatpush3.bf16.msra.mxu0 %v13085_v35  ;;  %v13125_v58 = vld [vmem:[%s16582_s30 + $0x28] ss:$16 sps:$4 sm:$0xff]   ;;  %v13126_v52 = vld [vmem:[%s16582_s30 + $0x4c] ss:$16 sps:$4 sm:$0xff]  }
 0x898   :  { %v12291_v9 = vpop.f32.mrf.mxu1  ;;  %12052 = vmatprep.subr.bf16.mxu0 %v13086_v22  ;;  %v13128_v35 = vld [vmem:[%s16582_s30 + $0x48] ss:$16 sps:$4 sm:$0xff]  }
 0x899   :  { %8097 = vst.msk [vmem:[#allocation2 + $0x160] sm:$0xf] %vm7628_vm3, %v11741_v34  ;;  %v11744_v44 = vpack.c.bf16 %v12291_v9, %v12291_v9  ;;  %v13129_v34 = vld [vmem:[%s16582_s30 + $0x6c] ss:$16 sps:$4 sm:$0xff]   ;;  %v13131_v9 = vld [vmem:[%s16582_s30 + $0x68] ss:$16 sps:$4 sm:$0xff]  }
 0x89a   :  { %v7957_v39 = vpop.f32.mrf.mxu1  ;;  %v13097_v60 = vld [vmem:[#allocation2 + $0x150] ss:$8 sps:$4 sm:$0xff]   ;;  %v8189_v22 = vld [vmem:[%s16582_s30 + $0x88] sm:$0xff] }
 0x89b   :  { %8100 = vst.msk [vmem:[#allocation2 + $0x178] sm:$0xf] %vm7628_vm3, %v11744_v44  ;;  %v11742_v17 = vpack.c.bf16 %v7957_v39, %v7957_v39  ;;  %12053 = vmatpush3.bf16.msra.mxu0 %v13087_v56  ;;  %v11298_v44 = vcombine.high %v8189_v22, %v8189_v22  ;;  %v11297_v39 = vcombine.low %v8189_v22, %v8189_v22  ;;  %v13134_v56 = vld [vmem:[%s16526_s13 + $0x8] ss:$0 sps:$4 sm:$0x11]  }
 0x89c   :  { %v12294_v63 = vpop.f32.mrf.mxu1  ;;  %12054 = vmatprep.subr.bf16.mxu0 %v13088_v55  ;;  %v13101_v27 = vld [vmem:[#allocation2 + $0x140] ss:$8 sps:$4 sm:$0xff]   ;;  %v8789_v55 = vsel %vm8787_vm5, %v13134_v56, 0 }
 0x89d   :  { %8098 = vst.msk [vmem:[#allocation2 + $0x168] sm:$0xf] %vm7628_vm3, %v11742_v17  ;;  %v11747_v7 = vpack.c.bf16 %v12294_v63, %v12294_v63  ;;  %v13213_v17 = vmov 0.0   ;;  %v13136_v63 = vld [vmem:[%s16526_s13 + $0x14] ss:$0 sps:$4 sm:$0x11]  }
 0x89e   :  { %v7970_v61 = vpop.f32.mrf.mxu1 }
 0x89f   :  { %8103 = vst.msk [vmem:[#allocation2 + $0x190] sm:$0xf] %vm7628_vm3, %v11747_v7  ;;  %v11745_v25 = vpack.c.bf16 %v7970_v61, %v7970_v61  ;;  %12055 = vmatpush3.bf16.msra.mxu0 %v13089_v20  ;;  %v8924_v7 = vsel %vm8787_vm5, %v13136_v63, 0  ;;  %v13135_v61 = vld [vmem:[%s16526_s13] sm:$0xff]   ;;  %v13137_v20 = vld [vmem:[%s16526_s13 + $0xc] sm:$0xff]  }
 0x8a0   :  { %v12295_v46 = vpop.f32.mrf.mxu1  ;;  %12056 = vmatprep.subr.bf16.mxu0 %v13090_v1 }
 0x8a1   :  { %8101 = vst.msk [vmem:[#allocation2 + $0x180] sm:$0xf] %vm7628_vm3, %v11745_v25  ;;  %v11748_v13 = vpack.c.bf16 %v12295_v46, %v12295_v46 }
 0x8a2   :  { %v7973_v29 = vpop.f32.mrf.mxu1  ;;  %v13092_v6 = vld [vmem:[#allocation2 + $0x170] ss:$8 sps:$4 sm:$0xff]  }
 0x8a3   :  { %8104 = vst.msk [vmem:[#allocation2 + $0x198] sm:$0xf] %vm7628_vm3, %v11748_v13  ;;  %v11746_v18 = vpack.c.bf16 %v7973_v29, %v7973_v29  ;;  %12057 = vmatpush3.bf16.msra.mxu0 %v13091_v32  ;;  %8601 = vmatpush1.bf16.msra.mxu1 %v13092_v6 }
 0x8a4   :  { %v12298_v16 = vpop.f32.mrf.mxu1  ;;  %8602 = vmatprep.subr.bf16.mxu1 %v13212_v2  ;;  %v13096_v62 = vld [vmem:[#allocation2 + $0x160] ss:$8 sps:$4 sm:$0xff]   ;;  %12304 = vmatprep.subr.bf16.mxu0 %v13213_v17 }
 0x8a5   :  { %8102 = vst.msk [vmem:[#allocation2 + $0x188] sm:$0xf] %vm7628_vm3, %v11746_v18  ;;  %v11751_v40 = vpack.c.bf16 %v12298_v16, %v12298_v16 }
 0x8a6   :  { %v7986_v15 = vpop.f32.mrf.mxu1  ;;  %8561 = vmatmul.mubr.bf16.vlgmr.msra.gmra.mxu0 %v13093_v8 }
 0x8a7   :  { %8107 = vst.msk [vmem:[#allocation2 + $0x1b0] sm:$0xf] %vm7628_vm3, %v11751_v40  ;;  %v11749_v47 = vpack.c.bf16 %v7986_v15, %v7986_v15  ;;  %8603 = vmatpush1.bf16.msra.mxu1 %v13096_v62  ;;  %8568 = vmatprep.mubr.bf16.mxu0 %v13100_v57 }
 0x8a8   :  { %v12299_v50 = vpop.f32.mrf.mxu1  ;;  %8604 = vmatprep.subr.bf16.mxu1 %v13212_v2  ;;  %12305 = vmatpush3.bf16.msra.mxu0 %v8789_v55 }
 0x8a9   :  { %8105 = vst.msk [vmem:[#allocation2 + $0x1a0] sm:$0xf] %vm7628_vm3, %v11749_v47  ;;  %v11752_v21 = vpack.c.bf16 %v12299_v50, %v12299_v50  ;;  %12306 = vmatprep.subr.bf16.mxu0 %v13213_v17 }
 0x8aa   :  { %v7989_v41 = vpop.f32.mrf.mxu1  ;;  %v13118_v51 = vld [vmem:[#allocation2 + $0x190] ss:$8 sps:$4 sm:$0xff]  }
 0x8ab   :  { %8108 = vst.msk [vmem:[#allocation2 + $0x1b8] sm:$0xf] %vm7628_vm3, %v11752_v21  ;;  %v11750_v23 = vpack.c.bf16 %v7989_v41, %v7989_v41  ;;  %8605 = vmatpush1.bf16.msra.mxu1 %v13097_v60 }
 0x8ac   :  { %v12302_v19 = vpop.f32.mrf.mxu1  ;;  %8606 = vmatprep.subr.bf16.mxu1 %v13212_v2  ;;  %v13119_v12 = vld [vmem:[#allocation2 + $0x180] ss:$8 sps:$4 sm:$0xff]   ;;  %12307 = vmatpush3.bf16.msra.mxu0 %v13135_v61 }
 0x8ad   :  { %8106 = vst.msk [vmem:[#allocation2 + $0x1a8] sm:$0xf] %vm7628_vm3, %v11750_v23  ;;  %v11755_v36 = vpack.c.bf16 %v12302_v19, %v12302_v19  ;;  %12352 = vmatprep.subr.bf16.mxu0 %v13213_v17  ;;  %v8202_v19 = vpop.permute.xlu1 %8201 }
 0x8ae   :  { %v8002_v31 = vpop.f32.mrf.mxu1  ;;  %8569 = vmatmul.mubr.bf16.gmra.mxu0 %v13098_v48 }
 0x8af   :  { %8111 = vst.msk [vmem:[#allocation2 + $0x1d0] sm:$0xf] %vm7628_vm3, %v11755_v36  ;;  %v11753_v49 = vpack.c.bf16 %v8002_v31, %v8002_v31  ;;  %8607 = vmatpush1.bf16.msra.mxu1 %v13101_v27  ;;  %8576 = vmatprep.mubr.bf16.mxu0 %v13105_v5 }
 0x8b0   :  { %v12303_v30 = vpop.f32.mrf.mxu1  ;;  %8608 = vmatprep.subr.bf16.mxu1 %v13212_v2 }
 0x8b1   :  { %8109 = vst.msk [vmem:[#allocation2 + $0x1c0] sm:$0xf] %vm7628_vm3, %v11753_v49  ;;  %v8207_v49 = vpop.permute.xlu0 %8206  ;;  %v8212_v54 = vpop.permute.xlu1 %8211 }
 0x8b2   :  { %v8005_v38 = vpop.f32.mrf.mxu1  ;;  %v13116_v33 = vld [vmem:[#allocation2 + $0x1b0] ss:$8 sps:$4 sm:$0xff]  }
 0x8b3   :  { %v11754_v59 = vpack.c.bf16 %v8005_v38, %v8005_v38  ;;  %8609 = vmatpush1.bf16.msra.mxu1 %v13102_v11 }
 0x8b4   :  { %8610 = vmatprep.subr.bf16.mxu1 %v13212_v2  ;;  %v13117_v10 = vld [vmem:[#allocation2 + $0x1a0] ss:$8 sps:$4 sm:$0xff]  }
 0x8b5   :  { %8110 = vst.msk [vmem:[#allocation2 + $0x1c8] sm:$0xf] %vm7628_vm3, %v11754_v59 }
 0x8b6   :  { %8577 = vmatmul.mubr.bf16.gmra.mxu0 %v13103_v28  ;;  %v13112_v53 = vld [vmem:[#allocation2 + $0x1d0] ss:$8 sps:$4 sm:$0xff]  }
 0x8b7   :  { %8611 = vmatpush1.bf16.msra.mxu1 %v13106_v3  ;;  %8584 = vmatprep.mubr.bf16.mxu0 %v13110_v0 }
 0x8b8   :  { %8612 = vmatprep.subr.bf16.mxu1 %v13212_v2 }
 0x8bb   :  { %8613 = vmatpush1.bf16.msra.mxu1 %v13107_v37 }
 0x8bc   :  { %8614 = vmatprep.subr.bf16.mxu1 %v13212_v2  ;;  %v13115_v24 = vld [vmem:[#allocation2 + $0x1c0] ss:$8 sps:$4 sm:$0xff]  }
 0x8be   :  { %8585 = vmatmul.mubr.bf16.gmra.mxu0 %v13108_v43 }
 0x8bf   :  { %8615 = vmatpush1.bf16.msra.mxu1 %v13111_v14  ;;  %8592 = vmatprep.mubr.bf16.mxu0 %v11296_v45 }
 0x8c0   :  { %8620 = vmatprep.subr.bf16.mxu1 %v13212_v2 }
 0x8c3   :  { %8621 = vmatpush2.bf16.msra.mxu1 %v13112_v53 }
 0x8c4   :  { %8622 = vmatprep.subr.bf16.mxu1 %v13212_v2 }
 0x8c6   :  { %8593 = vmatmul.mubr.bf16.gmra.mxu0 %v11295_v26 }
 0x8c7   :  { %8623 = vmatpush2.bf16.msra.mxu1 %v13115_v24 }
 0x8c8   :  { %8624 = vmatprep.subr.bf16.mxu1 %v13212_v2 }
 0x8cb   :  { %8625 = vmatpush2.bf16.msra.mxu1 %v13116_v33  ;;  %v8217_v33 = vpop.permute.xlu0 %8216 }
 0x8cc   :  { %8626 = vmatprep.subr.bf16.mxu1 %v13212_v2 }
 0x8cf   :  { %8627 = vmatpush2.bf16.msra.mxu1 %v13117_v10 }
 0x8d0   :  { %8628 = vmatprep.subr.bf16.mxu1 %v13212_v2 }
 0x8d3   :  { %8629 = vmatpush2.bf16.msra.mxu1 %v13118_v51 }
 0x8d4   :  { %8630 = vmatprep.subr.bf16.mxu1 %v13212_v2 }
 0x8d7   :  { %8631 = vmatpush2.bf16.msra.mxu1 %v13119_v12 }
 0x8d8   :  { %12328 = vmatprep.subr.bf16.mxu1 %v13213_v17 }
 0x8da   :  { %8633 = vmatmul.mubr.bf16.vlgmr.msra.gmra.mxu1 %v13120_v4 }
 0x8db   :  { %11330 = vmatprep.mubr.msk.bf16.mxu1 %vm3025_vm4, %v13123_v42  ;;  %12329 = vmatpush3.bf16.msra.mxu1 %v8924_v7  ;;  %v8227_v7 = vpop.permute.xlu0 %8226 }
 0x8dc   :  { %12330 = vmatprep.subr.bf16.mxu1 %v13213_v17 }
 0x8df   :  { %12331 = vmatpush3.bf16.msra.mxu1 %v13137_v20 }
 0x8e0   :  { %9351 = vmatprep.subr.bf16.mxu1 %v13212_v2 }
 0x8e2   :  { %8641 = vmatmul.mubr.bf16.gmra.mxu1 %v13125_v58 }
 0x8e3   :  { %11331 = vmatprep.mubr.msk.bf16.mxu1 %vm3025_vm4, %v13126_v52 }
 0x8ea   :  { %8649 = vmatmul.mubr.bf16.gmra.mxu1 %v13128_v35  ;;  %v8222_v35 = vpop.permute.xlu1 %8221 }
 0x8eb   :  { %11332 = vmatprep.mubr.msk.bf16.mxu1 %vm3025_vm4, %v13129_v34 }
 0x8f2   :  { %8657 = vmatmul.mubr.bf16.gmra.mxu1 %v13131_v9 }
 0x8f3   :  { %11333 = vmatprep.mubr.msk.bf16.mxu1 %vm3025_vm4, %v11298_v44  ;;  %vm13214_vm4 = vmmov 0  }
 0x8f4   :  { %12308 = vmatprep.mubr.msk.bf16.mxu0 %vm13214_vm4, %v13213_v17 }
 0x8fa   :  { %8665 = vmatmul.mubr.bf16.gmra.mxu1 %v11297_v39  ;;  %v13140_v39 = vld [vmem:[%s16526_s13 + $0x20] ss:$0 sps:$4 sm:$0x11]  }
 0x8fb   :  { %12332 = vmatprep.mubr.msk.bf16.mxu1 %vm13214_vm4, %v13213_v17 }
 0x966   :  { %v12058_v25 = vpop.f32.mrf.mxu0 }
 0x968   :  { %v12059_v1 = vpop.f32.mrf.mxu0 }
 0x969   :  { %v12060_v48 = vadd.f32 %v12059_v1, %v12058_v25 }
 0x96a   :  { %v12061_v46 = vpop.f32.mrf.mxu0 }
 0x96b   :  { %v8563_v36 = vadd.f32 %v12060_v48, %v8202_v19  ;;  %v8237_v48 = vpop.permute.xlu0 %8236 }
 0x96c   :  { %v12062_v13 = vpop.f32.mrf.mxu0 }
 0x96d   :  { %v12063_v5 = vadd.f32 %v12062_v13, %v12061_v46  ;;  %v9058_v13 = vsel %vm8787_vm5, %v13140_v39, 0 }
 0x96e   :  { %v12064_v29 = vpop.f32.mrf.mxu0 }
 0x96f   :  { %v8566_v59 = vadd.f32 %v12063_v5, %v8207_v49 }
 0x970   :  { %v12065_v32 = vpop.f32.mrf.mxu0 }
 0x971   :  { %v12066_v38 = vadd.f32 %v12065_v32, %v12064_v29 }
 0x972   :  { %v12067_v6 = vpop.f32.mrf.mxu0 }
 0x973   :  { %v8571_v14 = vadd.f32 %v12066_v38, %v8212_v54 }
 0x974   :  { %v12068_v18 = vpop.f32.mrf.mxu0 }
 0x975   :  { %v12069_v43 = vadd.f32 %v12068_v18, %v12067_v6  ;;  %v8232_v18 = vpop.permute.xlu1 %8231 }
 0x976   :  { %v12070_v8 = vpop.f32.mrf.mxu0 }
 0x977   :  { %v8574_v4 = vadd.f32 %v12069_v43, %v8217_v33 }
 0x978   :  { %v12071_v16 = vpop.f32.mrf.mxu0 }
 0x979   :  { %v12072_v51 = vadd.f32 %v12071_v16, %v12070_v8  ;;  %v13143_v16 = vld [vmem:[%s16526_s13 + $0x18] sm:$0xff]  }
 0x97a   :  { %v12073_v57 = vpop.f32.mrf.mxu0 }
 0x97b   :  { %v8579_v44 = vadd.f32 %v12072_v51, %v8222_v35 }
 0x97c   :  { %v12074_v40 = vpop.f32.mrf.mxu0 }
 0x97d   :  { %v12075_v22 = vadd.f32 %v12074_v40, %v12073_v57 }
 0x97e   :  { %v12076_v15 = vpop.f32.mrf.mxu0 }
 0x97f   :  { %v8582_v46 = vadd.f32 %v12075_v22, %v8227_v7 }
 0x980   :  { %v12077_v62 = vpop.f32.mrf.mxu0 }
 0x981   :  { %v12078_v25 = vadd.f32 %v12077_v62, %v12076_v15 }
 0x982   :  { %v16302_v47 = vpop.f32.mrf.mxu0 }
 0x983   :  { %v8587_v15 = vadd.f32 %v12078_v25, %v8232_v18 }
 0x984   :  { %v16304_v50 = vpop.f32.mrf.mxu0 }
 0x985   :  { %v12081_v57 = vadd.f32 %v16304_v50, %v16302_v47 }
 0x986   :  { %v16306_v21 = vpop.f32.mrf.mxu0 }
 0x987   :  { %v8590_v47 = vadd.f32 %v12081_v57, %v8237_v48 }
 0x988   :  { %v16308_v41 = vpop.f32.mrf.mxu0 }
 0x98a   :  { %v12085_v60 = vpop.f32.mrf.mxu0 }
 0x98c   :  { %v12086_v23 = vpop.f32.mrf.mxu0 }
 0x99a   :  { %v8634_v31 = vpop.f32.mrf.mxu1 }
 0x99b   :  { %v8635_v27 = vadd.f32 %v8634_v31, %v8563_v36  ;;  %v12084_v36 = vadd.f32 %v16308_v41, %v16306_v21 }
 0x99c   :  { %v8636_v30 = vpop.f32.mrf.mxu1 }
 0x99d   :  { %v8672_v11 = vmax.f32 %v8635_v27, 0.0  ;;  %v8242_v30 = vpop.permute.xlu1 %8241 }
 0x99e   :  { %v8637_v28 = vpop.f32.mrf.mxu1  ;;  %v8595_v41 = vadd.f32 %v12084_v36, %v8242_v30 }
 0x99f   :  { %v11756_v0 = vpack.c.bf16 %v8672_v11, %v8672_v11  ;;  %v8638_v3 = vadd.f32 %v8637_v28, %v8566_v59 }
 0x9a0   :  { %v8639_v37 = vpop.f32.mrf.mxu1 }
 0x9a1   :  { %8718 = vst.msk [vmem:[#allocation6] sm:$0xf] %vm7628_vm3, %v11756_v0  ;;  %v8673_v45 = vmax.f32 %v8638_v3, 0.0 }
 0x9a2   :  { %v8642_v53 = vpop.f32.mrf.mxu1 }
 0x9a3   :  { %v11757_v26 = vpack.c.bf16 %v8673_v45, %v8673_v45  ;;  %v8643_v24 = vadd.f32 %v8642_v53, %v8571_v14 }
 0x9a4   :  { %v8644_v10 = vpop.f32.mrf.mxu1 }
 0x9a5   :  { %8719 = vst.msk [vmem:[#allocation6 + $0x4] sm:$0xf] %vm7628_vm3, %v11757_v26  ;;  %v8674_v12 = vmax.f32 %v8643_v24, 0.0  ;;  %v13162_v26 = vld [vmem:[%s16527_s14 + $0x4] ss:$8 sps:$4 sm:$0xff]  }
 0x9a6   :  { %v8645_v42 = vpop.f32.mrf.mxu1  ;;  %v16384_v24 = vld [vmem:[%s16529_s16] sm:$0xf] }
 0x9a7   :  { %v11758_v58 = vpack.c.bf16 %v8674_v12, %v8674_v12  ;;  %v8646_v52 = vadd.f32 %v8645_v42, %v8574_v4 }
 0x9a8   :  { %v8647_v34 = vpop.f32.mrf.mxu1 }
 0x9a9   :  { %8720 = vst.msk [vmem:[#allocation6 + $0x8] sm:$0xf] %vm7628_vm3, %v11758_v58  ;;  %v8675_v9 = vmax.f32 %v8646_v52, 0.0 }
 0x9aa   :  { %v8650_v56 = vpop.f32.mrf.mxu1 }
 0x9ab   :  { %v11759_v55 = vpack.c.bf16 %v8675_v9, %v8675_v9  ;;  %v8651_v63 = vadd.f32 %v8650_v56, %v8579_v44 }
 0x9ac   :  { %v8652_v61 = vpop.f32.mrf.mxu1  ;;  %v16316_v20 = vld [vmem:[#allocation6] sm:$0xff]  }
 0x9ad   :  { %8721 = vst.msk [vmem:[#allocation6 + $0xc] sm:$0xf] %vm7628_vm3, %v11759_v55  ;;  %v8676_v1 = vmax.f32 %v8651_v63, 0.0  ;;  %12309 = vmatmul.mubr.msk.bf16.vlgmr.msra.gmra.mxu0 %vm8771_vm6, %v16316_v20  ;;  %12333 = vmatmul.mubr.msk.bf16.vlgmr.msra.gmra.mxu1 %vm8771_vm6, %v16316_v20 }
 0x9ae   :  { %v8653_v29 = vpop.f32.mrf.mxu1  ;;  %12312 = vmatprep.mubr.msk.bf16.mxu0 %vm13214_vm4, %v13213_v17  ;;  %12336 = vmatprep.mubr.msk.bf16.mxu1 %vm13214_vm4, %v13213_v17 }
 0x9af   :  { %v11760_v32 = vpack.c.bf16 %v8676_v1, %v8676_v1  ;;  %v8654_v6 = vadd.f32 %v8653_v29, %v8582_v46  ;;  %12353 = vmatpush3.bf16.msra.mxu0 %v9058_v13 }
 0x9b0   :  { %v8655_v8 = vpop.f32.mrf.mxu1  ;;  %12354 = vmatprep.subr.bf16.mxu0 %v13213_v17 }
 0x9b1   :  { %8722 = vst.msk [vmem:[#allocation6 + $0x10] sm:$0xf] %vm7628_vm3, %v11760_v32  ;;  %v8677_v40 = vmax.f32 %v8654_v6, 0.0 }
 0x9b2   :  { %v8658_v62 = vpop.f32.mrf.mxu1 }
 0x9b3   :  { %v11761_v60 = vpack.c.bf16 %v8677_v40, %v8677_v40  ;;  %v8659_v23 = vadd.f32 %v8658_v62, %v8587_v15  ;;  %12355 = vmatpush3.bf16.msra.mxu0 %v13143_v16 }
 0x9b4   :  { %v8660_v19 = vpop.f32.mrf.mxu1  ;;  %v13139_v5 = vld [vmem:[#allocation6 + $0x8] sm:$0xff]   ;;  %12440 = vmatprep.subr.msk.bf16.mxu0 %vm91_vm1, %v16384_v24 }
 0x9b5   :  { %8723 = vst.msk [vmem:[#allocation6 + $0x14] sm:$0xf] %vm7628_vm3, %v11761_v60  ;;  %v8678_v31 = vmax.f32 %v8659_v23, 0.0  ;;  %12313 = vmatmul.mubr.msk.bf16.gmra.mxu0 %vm8771_vm6, %v13139_v5  ;;  %12337 = vmatmul.mubr.msk.bf16.gmra.mxu1 %vm8771_vm6, %v13139_v5 }
 0x9b6   :  { %v8661_v50 = vpop.f32.mrf.mxu1  ;;  %12316 = vmatprep.mubr.msk.bf16.mxu0 %vm13214_vm4, %v13213_v17  ;;  %12340 = vmatprep.mubr.msk.bf16.mxu1 %vm13214_vm4, %v13213_v17 }
 0x9b7   :  { %v11762_v27 = vpack.c.bf16 %v8678_v31, %v8678_v31  ;;  %v8662_v49 = vadd.f32 %v8661_v50, %v8590_v47 }
 0x9b8   :  { %v8663_v38 = vpop.f32.mrf.mxu1 }
 0x9b9   :  { %8724 = vst.msk [vmem:[#allocation6 + $0x18] sm:$0xf] %vm7628_vm3, %v11762_v27  ;;  %v8679_v21 = vmax.f32 %v8662_v49, 0.0 }
 0x9ba   :  { %v8666_v11 = vpop.f32.mrf.mxu1 }
 0x9bb   :  { %v11763_v59 = vpack.c.bf16 %v8679_v21, %v8679_v21  ;;  %v8667_v28 = vadd.f32 %v8666_v11, %v8595_v41 }
 0x9bc   :  { %v13141_v0 = vld [vmem:[#allocation6 + $0x10] sm:$0xff]   ;;  %v8668_v3 = vpop.f32.mrf.mxu1 }
 0x9bd   :  { %8725 = vst.msk [vmem:[#allocation6 + $0x1c] sm:$0xf] %vm7628_vm3, %v11763_v59  ;;  %v8680_v54 = vmax.f32 %v8667_v28, 0.0  ;;  %12317 = vmatmul.mubr.msk.bf16.gmra.mxu0 %vm8771_vm6, %v13141_v0  ;;  %12341 = vmatmul.mubr.msk.bf16.gmra.mxu1 %vm8771_vm6, %v13141_v0 }
 0x9be   :  { %v8669_v37 = vpop.f32.mrf.mxu1  ;;  %12320 = vmatprep.mubr.msk.bf16.mxu0 %vm13214_vm4, %v13213_v17  ;;  %12344 = vmatprep.mubr.msk.bf16.mxu1 %vm13214_vm4, %v13213_v17 }
 0x9bf   :  { %v11764_v43 = vpack.c.bf16 %v8680_v54, %v8680_v54 }
 0x9c0   :  { %v8670_v45 = vpop.f32.mrf.mxu1 }
 0x9c1   :  { %8726 = vst.msk [vmem:[#allocation6 + $0x20] sm:$0xf] %vm7628_vm3, %v11764_v43 }
 0x9c4   :  { %v13142_v14 = vld [vmem:[#allocation6 + $0x18] sm:$0xff]  }
 0x9c5   :  { %12321 = vmatmul.mubr.msk.bf16.gmra.mxu0 %vm8771_vm6, %v13142_v14  ;;  %12345 = vmatmul.mubr.msk.bf16.gmra.mxu1 %vm8771_vm6, %v13142_v14 }
 0x9c6   :  { %12324 = vmatprep.mubr.msk.bf16.mxu0 %vm13214_vm4, %v13213_v17  ;;  %12348 = vmatprep.mubr.msk.bf16.mxu1 %vm13214_vm4, %v13213_v17 }
 0x9c8   :  { %v13144_v53 = vld [vmem:[#allocation6 + $0x20] ss:$0 sps:$4 sm:$0xff]  }
 0x9cd   :  { %12325 = vmatmul.mubr.msk.bf16.gmra.mxu0 %vm8771_vm6, %v13144_v53  ;;  %12349 = vmatmul.mubr.msk.bf16.gmra.mxu1 %vm8771_vm6, %v13144_v53 }
 0x9ce   :  { %12356 = vmatprep.mubr.msk.bf16.mxu0 %vm13214_vm4, %v13213_v17  ;;  %11421 = vmatprep.mubr.msk.bf16.mxu1 %vm9344_vm7, %v13162_v26 }
 0x9d5   :  { %12357 = vmatmul.mubr.msk.bf16.vlgmr.msra.gmra.mxu0 %vm8771_vm6, %v16316_v20 }
 0x9d6   :  { %12360 = vmatprep.mubr.msk.bf16.mxu0 %vm13214_vm4, %v13213_v17 }
 0x9dd   :  { %12361 = vmatmul.mubr.msk.bf16.gmra.mxu0 %vm8771_vm6, %v13139_v5 }
 0x9de   :  { %12364 = vmatprep.mubr.msk.bf16.mxu0 %vm13214_vm4, %v13213_v17 }
 0x9e5   :  { %12365 = vmatmul.mubr.msk.bf16.gmra.mxu0 %vm8771_vm6, %v13141_v0 }
 0x9e6   :  { %12368 = vmatprep.mubr.msk.bf16.mxu0 %vm13214_vm4, %v13213_v17 }
 0x9ed   :  { %12369 = vmatmul.mubr.msk.bf16.gmra.mxu0 %vm8771_vm6, %v13142_v14 }
 0x9ee   :  { %12372 = vmatprep.mubr.msk.bf16.mxu0 %vm13214_vm4, %v13213_v17 }
 0x9f5   :  { %12373 = vmatmul.mubr.msk.bf16.gmra.mxu0 %vm8771_vm6, %v13144_v53 }
 0xa6d   :  { %v8825_v33 = vpop.f32.mrf.mxu0  ;;  %v8960_v10 = vpop.f32.mrf.mxu1 }
 0xa6e   :  { %v11765_v51 = vpack.c.bf16 %v8825_v33, %v8825_v33  ;;  %v11774_v12 = vpack.c.bf16 %v8960_v10, %v8960_v10 }
 0xa6f   :  { %v12310_v4 = vpop.f32.mrf.mxu0  ;;  %v12334_v42 = vpop.f32.mrf.mxu1 }
 0xa70   :  { %8901 = vst.msk [vmem:[#allocation2] sm:$0xf] %vm8900_vm8, %v11765_v51  ;;  %9035 = vst.msk [vmem:[#allocation2 + $0x50] sm:$0xf] %vm8900_vm8, %v11774_v12 }
 0xa71   :  { %v8828_v58 = vpop.f32.mrf.mxu0  ;;  %v8963_v52 = vpop.f32.mrf.mxu1 }
 0xa72   :  { %v11766_v35 = vpack.c.bf16 %v8828_v58, %v8828_v58  ;;  %v11775_v34 = vpack.c.bf16 %v8963_v52, %v8963_v52 }
 0xa73   :  { %v12311_v22 = vpop.f32.mrf.mxu0  ;;  %v12335_v9 = vpop.f32.mrf.mxu1 }
 0xa74   :  { %8902 = vst.msk [vmem:[#allocation2 + $0x8] sm:$0xf] %vm8900_vm8, %v11766_v35  ;;  %9036 = vst.msk [vmem:[#allocation2 + $0x58] sm:$0xf] %vm8900_vm8, %v11775_v34 }
 0xa75   :  { %v8833_v44 = vpop.f32.mrf.mxu0  ;;  %v8968_v39 = vpop.f32.mrf.mxu1 }
 0xa76   :  { %v11767_v56 = vpack.c.bf16 %v8833_v44, %v8833_v44  ;;  %v11776_v55 = vpack.c.bf16 %v8968_v39, %v8968_v39 }
 0xa77   :  { %v12314_v63 = vpop.f32.mrf.mxu0  ;;  %v12338_v7 = vpop.f32.mrf.mxu1 }
 0xa78   :  { %8903 = vst.msk [vmem:[#allocation2 + $0x10] sm:$0xf] %vm8900_vm8, %v11767_v56  ;;  %9037 = vst.msk [vmem:[#allocation2 + $0x60] sm:$0xf] %vm8900_vm8, %v11776_v55 }
 0xa79   :  { %v8836_v61 = vpop.f32.mrf.mxu0  ;;  %v8971_v20 = vpop.f32.mrf.mxu1 }
 0xa7a   :  { %v11768_v25 = vpack.c.bf16 %v8836_v61, %v8836_v61  ;;  %v11777_v1 = vpack.c.bf16 %v8971_v20, %v8971_v20 }
 0xa7b   :  { %v12315_v46 = vpop.f32.mrf.mxu0  ;;  %v12339_v13 = vpop.f32.mrf.mxu1  ;;  %v13147_v26 = vld [vmem:[#allocation2 + $0x50] ss:$8 sps:$4 sm:$0xff]   ;;  %v13152_v20 = vld [vmem:[#allocation2] ss:$8 sps:$4 sm:$0xff]  }
 0xa7c   :  { %8904 = vst.msk [vmem:[#allocation2 + $0x18] sm:$0xf] %vm8900_vm8, %v11768_v25  ;;  %9038 = vst.msk [vmem:[#allocation2 + $0x68] sm:$0xf] %vm8900_vm8, %v11777_v1 }
 0xa7d   :  { %v8841_v29 = vpop.f32.mrf.mxu0  ;;  %v8976_v32 = vpop.f32.mrf.mxu1 }
 0xa7e   :  { %v11769_v6 = vpack.c.bf16 %v8841_v29, %v8841_v29  ;;  %v11778_v18 = vpack.c.bf16 %v8976_v32, %v8976_v32 }
 0xa7f   :  { %v12318_v8 = vpop.f32.mrf.mxu0  ;;  %v12342_v16 = vpop.f32.mrf.mxu1 }
 0xa80   :  { %8905 = vst.msk [vmem:[#allocation2 + $0x20] sm:$0xf] %vm8900_vm8, %v11769_v6  ;;  %9039 = vst.msk [vmem:[#allocation2 + $0x70] sm:$0xf] %vm8900_vm8, %v11778_v18 }
 0xa81   :  { %v8844_v57 = vpop.f32.mrf.mxu0  ;;  %v8979_v40 = vpop.f32.mrf.mxu1 }
 0xa82   :  { %v11770_v15 = vpack.c.bf16 %v8844_v57, %v8844_v57  ;;  %v11779_v62 = vpack.c.bf16 %v8979_v40, %v8979_v40 }
 0xa83   :  { %v12319_v60 = vpop.f32.mrf.mxu0  ;;  %v12343_v23 = vpop.f32.mrf.mxu1  ;;  %v13146_v37 = vld [vmem:[#allocation2 + $0x60] ss:$8 sps:$4 sm:$0xff]   ;;  %v13151_v55 = vld [vmem:[#allocation2 + $0x10] ss:$8 sps:$4 sm:$0xff]  }
 0xa84   :  { %8906 = vst.msk [vmem:[#allocation2 + $0x28] sm:$0xf] %vm8900_vm8, %v11770_v15  ;;  %9040 = vst.msk [vmem:[#allocation2 + $0x78] sm:$0xf] %vm8900_vm8, %v11779_v62 }
 0xa85   :  { %v8849_v48 = vpop.f32.mrf.mxu0  ;;  %v8984_v19 = vpop.f32.mrf.mxu1 }
 0xa86   :  { %v11771_v5 = vpack.c.bf16 %v8849_v48, %v8849_v48  ;;  %v11780_v36 = vpack.c.bf16 %v8984_v19, %v8984_v19 }
 0xa87   :  { %v12322_v31 = vpop.f32.mrf.mxu0  ;;  %v12346_v47 = vpop.f32.mrf.mxu1 }
 0xa88   :  { %8907 = vst.msk [vmem:[#allocation2 + $0x30] sm:$0xf] %vm8900_vm8, %v11771_v5  ;;  %9041 = vst.msk [vmem:[#allocation2 + $0x80] sm:$0xf] %vm8900_vm8, %v11780_v36  ;;  %v13160_v47 = vld [vmem:[%s16527_s14] ss:$8 sps:$4 sm:$0xff]  }
 0xa89   :  { %v8852_v50 = vpop.f32.mrf.mxu0  ;;  %v8987_v27 = vpop.f32.mrf.mxu1 }
 0xa8a   :  { %v11772_v49 = vpack.c.bf16 %v8852_v50, %v8852_v50  ;;  %v11781_v30 = vpack.c.bf16 %v8987_v27, %v8987_v27  ;;  %v13163_v50 = vld [vmem:[%s16527_s14 + $0x14] ss:$8 sps:$4 sm:$0xff]   ;;  %v13165_v27 = vld [vmem:[%s16527_s14 + $0x10] ss:$8 sps:$4 sm:$0xff]  }
 0xa8b   :  { %v12323_v38 = vpop.f32.mrf.mxu0  ;;  %v12347_v21 = vpop.f32.mrf.mxu1  ;;  %v13145_v41 = vld [vmem:[#allocation2 + $0x70] ss:$8 sps:$4 sm:$0xff]   ;;  %v13150_v9 = vld [vmem:[#allocation2 + $0x20] ss:$8 sps:$4 sm:$0xff]  }
 0xa8c   :  { %8908 = vst.msk [vmem:[#allocation2 + $0x38] sm:$0xf] %vm8900_vm8, %v11772_v49  ;;  %9042 = vst.msk [vmem:[#allocation2 + $0x88] sm:$0xf] %vm8900_vm8, %v11781_v30  ;;  %9352 = vmatpush1.bf16.msra.mxu1 %v13145_v41  ;;  %v11435_v49 = vld [vmem:[%s16529_s16 + $0x4] sm:$0xf]  ;;  %v9219_v30 = vpop.permute.xlu0 %9218 }
 0xa8d   :  { %v8857_v11 = vpop.f32.mrf.mxu0  ;;  %v8992_v59 = vpop.f32.mrf.mxu1  ;;  %9353 = vmatprep.subr.bf16.mxu1 %v13212_v2 }
 0xa8e   :  { %v11773_v28 = vpack.c.bf16 %v8857_v11, %v8857_v11  ;;  %v11782_v0 = vpack.c.bf16 %v8992_v59, %v8992_v59  ;;  %v9224_v59 = vpop.permute.xlu1 %9223 }
 0xa8f   :  { %v12326_v3 = vpop.f32.mrf.mxu0  ;;  %v12350_v54 = vpop.f32.mrf.mxu1 }
 0xa90   :  { %8909 = vst.msk [vmem:[#allocation2 + $0x40] sm:$0xf] %vm8900_vm8, %v11773_v28  ;;  %9043 = vst.msk [vmem:[#allocation2 + $0x90] sm:$0xf] %vm8900_vm8, %v11782_v0  ;;  %9354 = vmatpush1.bf16.msra.mxu1 %v13146_v37  ;;  %v9229_v37 = vpop.permute.xlu0 %9228 }
 0xa91   :  { %v8860_v43 = vpop.f32.mrf.mxu0  ;;  %v8995_v45 = vpop.f32.mrf.mxu1  ;;  %9355 = vmatprep.subr.bf16.mxu1 %v13212_v2 }
 0xa93   :  { %v12327_v14 = vpop.f32.mrf.mxu0  ;;  %v12351_v53 = vpop.f32.mrf.mxu1  ;;  %v13149_v52 = vld [vmem:[#allocation2 + $0x30] ss:$8 sps:$4 sm:$0xff]   ;;  %v13159_v31 = vld [vmem:[#allocation2 + $0x80] ss:$8 sps:$4 sm:$0xff]  }
 0xa94   :  { %9356 = vmatpush1.bf16.msra.mxu1 %v13147_v26 }
 0xa95   :  { %v9094_v33 = vpop.f32.mrf.mxu0  ;;  %9357 = vmatprep.subr.bf16.mxu1 %v13212_v2 }
 0xa96   :  { %v11783_v10 = vpack.c.bf16 %v9094_v33, %v9094_v33  ;;  %v9234_v33 = vpop.permute.xlu1 %9233 }
 0xa97   :  { %v12358_v51 = vpop.f32.mrf.mxu0  ;;  %v13148_v12 = vld [vmem:[#allocation2 + $0x40] ss:$8 sps:$4 sm:$0xff]   ;;  %v13158_v36 = vld [vmem:[#allocation2 + $0x90] ss:$8 sps:$4 sm:$0xff]  }
 0xa98   :  { %9169 = vst.msk [vmem:[#allocation2 + $0xa0] sm:$0xf] %vm8900_vm8, %v11783_v10  ;;  %9358 = vmatpush1.bf16.msra.mxu1 %v13148_v12 }
 0xa99   :  { %v9097_v4 = vpop.f32.mrf.mxu0  ;;  %9359 = vmatprep.subr.bf16.mxu1 %v13212_v2 }
 0xa9a   :  { %v11784_v42 = vpack.c.bf16 %v9097_v4, %v9097_v4 }
 0xa9b   :  { %v12359_v58 = vpop.f32.mrf.mxu0 }
 0xa9c   :  { %9170 = vst.msk [vmem:[#allocation2 + $0xa8] sm:$0xf] %vm8900_vm8, %v11784_v42  ;;  %9360 = vmatpush1.bf16.msra.mxu1 %v13149_v52 }
 0xa9d   :  { %v9102_v35 = vpop.f32.mrf.mxu0  ;;  %9361 = vmatprep.subr.bf16.mxu1 %v13212_v2 }
 0xa9e   :  { %v11785_v34 = vpack.c.bf16 %v9102_v35, %v9102_v35 }
 0xa9f   :  { %v12362_v22 = vpop.f32.mrf.mxu0 }
 0xaa0   :  { %9171 = vst.msk [vmem:[#allocation2 + $0xb0] sm:$0xf] %vm8900_vm8, %v11785_v34  ;;  %9362 = vmatpush1.bf16.msra.mxu1 %v13150_v9  ;;  %v9522_v34 = vsel %vm91_vm1, %v11435_v49, 0 }
 0xaa1   :  { %v9105_v44 = vpop.f32.mrf.mxu0  ;;  %9363 = vmatprep.subr.bf16.mxu1 %v13212_v2 }
 0xaa2   :  { %v11786_v39 = vpack.c.bf16 %v9105_v44, %v9105_v44 }
 0xaa3   :  { %v12363_v56 = vpop.f32.mrf.mxu0  ;;  %v13157_v5 = vld [vmem:[#allocation2 + $0xa0] ss:$8 sps:$4 sm:$0xff]  }
 0xaa4   :  { %9172 = vst.msk [vmem:[#allocation2 + $0xb8] sm:$0xf] %vm8900_vm8, %v11786_v39  ;;  %9364 = vmatpush1.bf16.msra.mxu1 %v13151_v55 }
 0xaa5   :  { %v9110_v63 = vpop.f32.mrf.mxu0  ;;  %9365 = vmatprep.subr.bf16.mxu1 %v13212_v2 }
 0xaa6   :  { %v11787_v7 = vpack.c.bf16 %v9110_v63, %v9110_v63 }
 0xaa7   :  { %v12366_v61 = vpop.f32.mrf.mxu0 }
 0xaa8   :  { %9173 = vst.msk [vmem:[#allocation2 + $0xc0] sm:$0xf] %vm8900_vm8, %v11787_v7  ;;  %9366 = vmatpush1.bf16.msra.mxu1 %v13152_v20 }
 0xaa9   :  { %v9113_v25 = vpop.f32.mrf.mxu0  ;;  %9369 = vmatprep.subr.bf16.mxu1 %v13212_v2 }
 0xaaa   :  { %v11788_v1 = vpack.c.bf16 %v9113_v25, %v9113_v25 }
 0xaab   :  { %v12367_v46 = vpop.f32.mrf.mxu0  ;;  %v13156_v19 = vld [vmem:[#allocation2 + $0xb0] ss:$8 sps:$4 sm:$0xff]  }
 0xaac   :  { %9174 = vst.msk [vmem:[#allocation2 + $0xc8] sm:$0xf] %vm8900_vm8, %v11788_v1 }
 0xaad   :  { %v9118_v13 = vpop.f32.mrf.mxu0 }
 0xaae   :  { %v11789_v29 = vpack.c.bf16 %v9118_v13, %v9118_v13 }
 0xaaf   :  { %v12370_v32 = vpop.f32.mrf.mxu0 }
 0xab0   :  { %9175 = vst.msk [vmem:[#allocation2 + $0xd0] sm:$0xf] %vm8900_vm8, %v11789_v29 }
 0xab1   :  { %v9121_v6 = vpop.f32.mrf.mxu0 }
 0xab2   :  { %v11790_v18 = vpack.c.bf16 %v9121_v6, %v9121_v6 }
 0xab3   :  { %v12371_v8 = vpop.f32.mrf.mxu0  ;;  %v13155_v48 = vld [vmem:[#allocation2 + $0xc0] ss:$8 sps:$4 sm:$0xff]  }
 0xab4   :  { %9176 = vst.msk [vmem:[#allocation2 + $0xd8] sm:$0xf] %vm8900_vm8, %v11790_v18 }
 0xab5   :  { %v9126_v16 = vpop.f32.mrf.mxu0 }
 0xab6   :  { %v11791_v57 = vpack.c.bf16 %v9126_v16, %v9126_v16 }
 0xab7   :  { %v12374_v40 = vpop.f32.mrf.mxu0 }
 0xab8   :  { %9177 = vst.msk [vmem:[#allocation2 + $0xe0] sm:$0xf] %vm8900_vm8, %v11791_v57  ;;  %v13172_v57 = vld [vmem:[%s16530_s17] sm:$0xff]  }
 0xab9   :  { %v9129_v15 = vpop.f32.mrf.mxu0  ;;  %v9700_v40 = vld [vmem:[%s16532_s19] sm:$0xf] }
 0xaba   :  { %v9786_v15 = vld [vmem:[%s16533_s20] sm:$0xf] }
 0xabb   :  { %v12375_v62 = vpop.f32.mrf.mxu0  ;;  %v13154_v23 = vld [vmem:[#allocation2 + $0xd0] ss:$8 sps:$4 sm:$0xff]  }
 0xabc   :  { %v9608_v62 = vpop.permute.xlu0 %9607 }
 0xabf   :  { %v13153_v60 = vld [vmem:[#allocation2 + $0xe0] ss:$8 sps:$4 sm:$0xff]  }
 0xac0   :  { %9370 = vmatpush2.bf16.msra.mxu1 %v13153_v60 }
 0xac1   :  { %9371 = vmatprep.subr.bf16.mxu1 %v13212_v2 }
 0xac4   :  { %9372 = vmatpush2.bf16.msra.mxu1 %v13154_v23 }
 0xac5   :  { %9373 = vmatprep.subr.bf16.mxu1 %v13212_v2 }
 0xac8   :  { %9374 = vmatpush2.bf16.msra.mxu1 %v13155_v48 }
 0xac9   :  { %9375 = vmatprep.subr.bf16.mxu1 %v13212_v2 }
 0xacc   :  { %9376 = vmatpush2.bf16.msra.mxu1 %v13156_v19 }
 0xacd   :  { %9377 = vmatprep.subr.bf16.mxu1 %v13212_v2 }
 0xad0   :  { %9378 = vmatpush2.bf16.msra.mxu1 %v13157_v5  ;;  %v9613_v5 = vpop.permute.xlu1 %9612 }
 0xad1   :  { %9379 = vmatprep.subr.bf16.mxu1 %v13212_v2 }
 0xad4   :  { %9380 = vmatpush2.bf16.msra.mxu1 %v13158_v36 }
 0xad5   :  { %9381 = vmatprep.subr.bf16.mxu1 %v13212_v2  ;;  %v9447_v2 = vsel %vm91_vm1, %v16384_v24, 0 }
 0xad6   :  { %12377 = vmatpush3.bf16.msra.mxu0 %v9447_v2 }
 0xad7   :  { %12441 = vmatprep.subr.msk.bf16.mxu0 %vm91_vm1, %v11435_v49  ;;  %v9866_v49 = vld [vmem:[%s16535_s22] sm:$0xff] }
 0xad8   :  { %9382 = vmatpush2.bf16.msra.mxu1 %v13159_v31 }
 0xad9   :  { %12400 = vmatprep.subr.msk.mxu1 %vm91_vm1, %v9700_v40 }
 0xadb   :  { %9384 = vmatmul.mubr.bf16.vlgmr.msra.gmra.mxu1 %v13160_v47 }
 0xadc   :  { %11422 = vmatprep.mubr.msk.bf16.mxu1 %vm9344_vm7, %v13163_v50  ;;  %12401 = vmatpush3.msk.msra.mxu1 %vm91_vm1, %v9700_v40 }
 0xadd   :  { %12410 = vmatprep.subr.mxu1 %v13213_v17 }
 0xae3   :  { %9392 = vmatmul.mubr.bf16.gmra.mxu1 %v13165_v27 }
 0xb9b   :  { %v9385_v38 = vpop.f32.mrf.mxu1 }
 0xb9c   :  { %v9386_v21 = vadd.f32 %v9385_v38, %v9219_v30  ;;  %v9865_v30 = vld [vmem:[%s16534_s21] sm:$0xff] }
 0xb9d   :  { %v9387_v41 = vpop.f32.mrf.mxu1 }
 0xb9e   :  { %v9400_v11 = vmax.f32 %v9386_v21, 0.0 }
 0xb9f   :  { %v9388_v28 = vpop.f32.mrf.mxu1 }
 0xba0   :  { %v11792_v0 = vpack.c.bf16 %v9400_v11, %v9400_v11  ;;  %v9389_v3 = vadd.f32 %v9388_v28, %v9224_v59  ;;  %v10018_v59 = vpop.permute.xlu0 %10017 }
 0xba1   :  { %v9390_v54 = vpop.f32.mrf.mxu1 }
 0xba2   :  { %9420 = vst.msk [vmem:[#allocation7] sm:$0xf] %vm8900_vm8, %v11792_v0  ;;  %v9401_v24 = vmax.f32 %v9389_v3, 0.0 }
 0xba3   :  { %v9393_v43 = vpop.f32.mrf.mxu1 }
 0xba4   :  { %v11793_v45 = vpack.c.bf16 %v9401_v24, %v9401_v24  ;;  %v9394_v14 = vadd.f32 %v9393_v43, %v9229_v37  ;;  %v10022_v37 = vld [vmem:[%s16537_s24] sm:$0xff]  ;;  %v10027_v43 = vpop.permute.xlu1 %10026  ;;  %s13190_s24 = scalar_lea.vmem %s10192_s7, 32 }
 0xba5   :  { %v9395_v53 = vpop.f32.mrf.mxu1  ;;  %p13191_p0 = scmp.ne.s32.totalorder %s10192_s7, %s13190_s24  ;;  %p13196_p2 = scmp.lt.s32.totalorder %s13190_s24, %s13190_s24 }
 0xba6   :  { %9421 = vst.msk [vmem:[#allocation7 + $0x4] sm:$0xf] %vm8900_vm8, %v11793_v45  ;;  %v9402_v26 = vmax.f32 %v9394_v14, 0.0 }
 0xba7   :  { %v9396_v10 = vpop.f32.mrf.mxu1  ;;  %p13197_p3 = por %p13196_p2, %p13195_p1 }
 0xba8   :  { %v11794_v51 = vpack.c.bf16 %v9402_v26, %v9402_v26  ;;  %v9397_v12 = vadd.f32 %v9396_v10, %v9234_v33  ;;  %v10103_v26 = vld [vmem:[%s16539_s26] sm:$0x3]  ;;  %v10108_v33 = vpop.permute.xlu0 %10107 }
 0xba9   :  { %v9398_v4 = vpop.f32.mrf.mxu1  ;;  %p13198_p4 = pnand %p13197_p3, %p13191_p0 }
 0xbaa   :  { %9422 = vst.msk [vmem:[#allocation7 + $0x8] sm:$0xf] %vm8900_vm8, %v11794_v51  ;;  %v9403_v42 = vmax.f32 %v9397_v12, 0.0 }
 0xbac   :  { %v11795_v58 = vpack.c.bf16 %v9403_v42, %v9403_v42 }
 0xbad   :  { %v13166_v52 = vld [vmem:[#allocation7] sm:$0xff]  }
 0xbae   :  { %9423 = vst.msk [vmem:[#allocation7 + $0xc] sm:$0xf] %vm8900_vm8, %v11795_v58  ;;  %12378 = vmatprep.mubr.msk.bf16.mxu0 %vm9439_vm9, %v13166_v52 }
 0xbb5   :  { %v13167_v35 = vld [vmem:[#allocation7 + $0x8] sm:$0xff]  }
 0xbb6   :  { %12379 = vmatmul.mubr.msk.bf16.vlgmr.msra.gmra.mxu0 %vm9439_vm9, %v13167_v35 }
 0xbb7   :  { %12384 = vmatprep.mubr.msk.bf16.mxu0 %vm9439_vm9, %v13166_v52  ;;  %12383 = vmatpush3.bf16.msra.mxu0 %v9522_v34 }
 0xbb8   :  { %12388 = vmatprep.subr.bf16.mxu0 %v13213_v17 }
 0xbbe   :  { %12385 = vmatmul.mubr.msk.bf16.vlgmr.msra.gmra.mxu0 %vm9439_vm9, %v13167_v35 }
 0xbbf   :  { %12396 = vmatprep.mubr.msk.bf16.mxu0 %vm13214_vm4, %v13213_v17 }
 0xc76   :  { %v12380_v22 = vpop.f32.mrf.mxu0 }
 0xc77   :  { %v11798_v9 = vpack.c.bf16 %v12380_v22, %v12380_v22 }
 0xc78   :  { %v9483_v44 = vpop.f32.mrf.mxu0 }
 0xc79   :  { %9517 = vst.msk [vmem:[#allocation2 + $0x10] sm:$0xf] %vm9514_vm10, %v11798_v9  ;;  %v11796_v39 = vpack.c.bf16 %v9483_v44, %v9483_v44 }
 0xc7a   :  { %v12381_v56 = vpop.f32.mrf.mxu0 }
 0xc7b   :  { %9515 = vst.msk [vmem:[#allocation2] sm:$0xf] %vm9514_vm10, %v11796_v39  ;;  %v11799_v55 = vpack.c.bf16 %v12381_v56, %v12381_v56 }
 0xc7c   :  { %v9486_v63 = vpop.f32.mrf.mxu0 }
 0xc7d   :  { %9518 = vst.msk [vmem:[#allocation2 + $0x18] sm:$0xf] %vm9514_vm10, %v11799_v55  ;;  %v11797_v7 = vpack.c.bf16 %v9486_v63, %v9486_v63 }
 0xc7e   :  { %v12386_v61 = vpop.f32.mrf.mxu0 }
 0xc7f   :  { %9516 = vst.msk [vmem:[#allocation2 + $0x8] sm:$0xf] %vm9514_vm10, %v11797_v7  ;;  %v11802_v20 = vpack.c.bf16 %v12386_v61, %v12386_v61 }
 0xc80   :  { %v9558_v25 = vpop.f32.mrf.mxu0 }
 0xc81   :  { %9591 = vst.msk [vmem:[#allocation2 + $0x30] sm:$0xf] %vm9514_vm10, %v11802_v20  ;;  %v11800_v1 = vpack.c.bf16 %v9558_v25, %v9558_v25 }
 0xc82   :  { %v12387_v46 = vpop.f32.mrf.mxu0 }
 0xc83   :  { %9589 = vst.msk [vmem:[#allocation2 + $0x20] sm:$0xf] %vm9514_vm10, %v11800_v1  ;;  %v11803_v13 = vpack.c.bf16 %v12387_v46, %v12387_v46 }
 0xc84   :  { %v9561_v29 = vpop.f32.mrf.mxu0  ;;  %v13170_v8 = vld [vmem:[#allocation2 + $0x10] ss:$8 sps:$4 sm:$0xff]  }
 0xc85   :  { %9592 = vst.msk [vmem:[#allocation2 + $0x38] sm:$0xf] %vm9514_vm10, %v11803_v13  ;;  %v11801_v32 = vpack.c.bf16 %v9561_v29, %v9561_v29 }
 0xc86   :  { %v13171_v16 = vld [vmem:[#allocation2] ss:$8 sps:$4 sm:$0xff]  }
 0xc87   :  { %9590 = vst.msk [vmem:[#allocation2 + $0x28] sm:$0xf] %vm9514_vm10, %v11801_v32 }
 0xc8c   :  { %v13168_v6 = vld [vmem:[#allocation2 + $0x30] ss:$8 sps:$4 sm:$0xff]  }
 0xc8d   :  { %12389 = vmatpush3.bf16.msra.mxu0 %v13168_v6 }
 0xc8e   :  { %12390 = vmatprep.subr.bf16.mxu0 %v13213_v17  ;;  %v13169_v18 = vld [vmem:[#allocation2 + $0x20] ss:$8 sps:$4 sm:$0xff]  }
 0xc91   :  { %12391 = vmatpush3.bf16.msra.mxu0 %v13169_v18 }
 0xc92   :  { %12392 = vmatprep.subr.bf16.mxu0 %v13213_v17 }
 0xc95   :  { %12393 = vmatpush3.bf16.msra.mxu0 %v13170_v8 }
 0xc96   :  { %12394 = vmatprep.subr.bf16.mxu0 %v13213_v17 }
 0xc99   :  { %12395 = vmatpush3.bf16.msra.mxu0 %v13171_v16 }
 0xc9a   :  { %12405 = vmatprep.subr.msk.mxu0 %vm91_vm1, %v9786_v15 }
 0xc9c   :  { %12397 = vmatmul.mubr.msk.bf16.vlgmr.msra.gmra.mxu0 %vm584_vm0, %v13172_v57  ;;  %vm9701_vm0 = vcmask 31744  }
 0xc9d   :  { %12406 = vmatpush3.msk.msra.mxu0 %vm91_vm1, %v9786_v15  ;;  %vm9867_vm1 = vcmask 130048  }
 0xc9e   :  { %12417 = vmatprep.subr.mxu0 %v13213_v17 }
 0xd5c   :  { %v9681_v60 = vpop.f32.mrf.mxu0 }
 0xd5d   :  { %v9682_v23 = vadd.f32 %v9681_v60, %v9608_v62 }
 0xd5e   :  { %v12398_v48 = vpop.f32.mrf.mxu0 }
 0xd5f   :  { %v9688_v19 = vmax.f32 %v9682_v23, 0.0 }
 0xd60   :  { %v9684_v36 = vpop.f32.mrf.mxu0 }
 0xd61   :  { %v9685_v31 = vadd.f32 %v9684_v36, %v9613_v5  ;;  %12402 = vmatprep.mubr.msk.f32.mxu1 %vm9701_vm0, %v9688_v19  ;;  %12407 = vmatprep.mubr.msk.f32.mxu0 %vm9701_vm0, %v9688_v19 }
 0xd62   :  { %v12399_v47 = vpop.f32.mrf.mxu0 }
 0xd63   :  { %v9689_v50 = vmax.f32 %v9685_v31, 0.0 }
 0xd65   :  { %12403 = vmatmul.mubr.msk.f32.vlgmr.msra.gmra.mxu1 %vm9701_vm0, %v9689_v50  ;;  %12408 = vmatmul.mubr.msk.f32.vlgmr.msra.gmra.mxu0 %vm9701_vm0, %v9689_v50 }
 0xd66   :  { %12414 = vmatprep.mubr.msk.f32.mxu1 %vm13214_vm4, %v13213_v17  ;;  %12421 = vmatprep.mubr.msk.f32.mxu0 %vm13214_vm4, %v13213_v17 }
 0xe25   :  { %v12404_v27 = vpop.f32.mrf.mxu1  ;;  %v12409_v2 = vpop.f32.mrf.mxu0 }
 0xe26   :  { %12411 = vmatpush3.msra.mxu1 %v12409_v2  ;;  %12418 = vmatpush3.msra.mxu0 %v12404_v27 }
 0xe27   :  { %v9777_v38 = vpop.f32.mrf.mxu1  ;;  %v9856_v21 = vpop.f32.mrf.mxu0  ;;  %12412 = vmatprep.subr.mxu1 %v13213_v17  ;;  %12419 = vmatprep.subr.mxu0 %v13213_v17 }
 0xe28   :  { %12413 = vmatpush3.msra.mxu1 %v9856_v21  ;;  %12420 = vmatpush3.msra.mxu0 %v9777_v38 }
 0xe29   :  { %12415 = vmatmul.mubr.msk.f32.vlgmr.msra.gmra.mxu1 %vm9867_vm1, %v9866_v49  ;;  %12422 = vmatmul.mubr.msk.f32.vlgmr.msra.gmra.mxu0 %vm9867_vm1, %v9865_v30 }
 0xe2a   :  { %12424 = vmatprep.subr.mxu1 %v13213_v17  ;;  %12426 = vmatprep.mubr.msk.f32.mxu1 %vm13214_vm4, %v13213_v17 }
 0xe2b   :  { %12429 = vmatprep.subr.mxu0 %v13213_v17  ;;  %12431 = vmatprep.mubr.msk.f32.mxu0 %vm13214_vm4, %v13213_v17 }
 0xee9   :  { %v9937_v41 = vpop.f32.mrf.mxu1  ;;  %v10010_v11 = vpop.f32.mrf.mxu0 }
 0xeea   :  { %v10011_v28 = vadd.f32 %v10010_v11, %v9937_v41 }
 0xeeb   :  { %v12416_v0 = vpop.f32.mrf.mxu1  ;;  %v12423_v3 = vpop.f32.mrf.mxu0 }
 0xeec   :  { %v10020_v54 = vadd.f32 %v10018_v59, %v10011_v28 }
 0xeee   :  { %v10021_v24 = vmax.f32 %v10020_v54, 0.0 }
 0xef0   :  { %12425 = vmatpush3.msra.mxu1 %v10021_v24 }
 0xef1   :  { %12427 = vmatmul.mubr.msk.f32.vlgmr.msra.gmra.mxu1 %vm9439_vm9, %v10022_v37 }
 0xfb1   :  { %v10098_v45 = vpop.f32.mrf.mxu1 }
 0xfb2   :  { %v10099_v14 = vadd.f32 %v10098_v45, %v10027_v43 }
 0xfb3   :  { %v12428_v53 = vpop.f32.mrf.mxu1 }
 0xfb4   :  { %v10102_v17 = vmax.f32 %v10099_v14, 0.0 }
 0xfb6   :  { %12430 = vmatpush3.msra.mxu0 %v10102_v17 }
 0xfb7   :  { %12432 = vmatmul.mubr.msk.f32.vlgmr.msra.gmra.mxu0 %vm9439_vm9, %v10103_v26 }
0x1077   :  { %v10179_v10 = vpop.f32.mrf.mxu0 }
0x1078   :  { %v10180_v51 = vadd.f32 %v10179_v10, %v10108_v33 }
0x1079   :  { %v12433_v12 = vpop.f32.mrf.mxu0 }
0x107a   :  { %10184 = vst.msk [vmem:[#allocation9] sm:$0x3] %vm10183_vm11, %v10180_v51 }
0x107b   :  { %13201 = shalt.err (!%p13198_p4)
}
0x107c   :  { %10194 = dma.vmem_to_hbm [thread:$0]  %s10192_s7, 32, %s16541_s28, [#allocation10]  }
0x107d   :  { %13210 = dma.done.wait [#allocation10], 32  }
0x107e   :  { %13211 = vsyncadd [#allocation10], 4294967264 }
0x107f   :  { %10198 = vsyncpa [#allocation10], 1 }

</bundles_post_ra>
